<compile_context>
chip_gen: v7x
topology: tpu7x:2x2x1
jax: 0.10.0
libtpu: 0.0.40
codegen_flags: <defaults>
</compile_context>

<pallas_src>
import functools
import math

import jax
import jax.numpy as jnp
from jax.experimental import pallas as pl
from jax.experimental.pallas import tpu as pltpu

# Hyperparameters implied by the PyTorch module.
INPUT_DIM = 289                 # fc1 in_features = 4592 = (289 - 2) * 16
SEQ = INPUT_DIM - 2             # 287 (Conv1d k=3, stride=1, no padding)
SEQ_PAD = 288                   # padded to a multiple of 8 (one masked key row)
EMBED = 16
NUM_HEADS = 2
HEAD_DIM = EMBED // NUM_HEADS   # 8
HIDDEN = 8
NEG_INF = -1e30


# ----------------------------------------------------------------------------
# One fused kernel: conv1d (im2col matmul) + ReLU + 2-head self-attention with
# Wo folded into V + fc1 (MXU) + ReLU + fc2.  One grid step = b_blk batches.
# ----------------------------------------------------------------------------
def _fused_kernel(xw_ref, cwt_ref, cb_ref, wqkvt_ref, bqkv_ref, bo_ref,
                  kbias_ref, w1_ref, b1_ref, w2_ref, b2_ref, o_ref,
                  qkv_scr, *, b_blk):
    # ---- conv1d(1->16, k=3) as an im2col matmul + ReLU on the merged slab ----
    xw = xw_ref[...].astype(jnp.bfloat16)                          # (b_blk*288, 3)
    h = jnp.dot(xw, cwt_ref[...], preferred_element_type=jnp.float32) + cb_ref[...]
    h = jnp.maximum(h, 0.0).astype(jnp.bfloat16)                   # (b_blk*288, 16)

    # ---- fused Q / K / (V@Wo) projection: one N=64 matmul on the slab ----
    # column layout: [ Wq^T*scale | Wk^T | Wvo_head0 | Wvo_head1 ]
    qkv = jnp.dot(h, wqkvt_ref[...], preferred_element_type=jnp.float32) + bqkv_ref[...]
    qkv_scr[...] = qkv.astype(jnp.bfloat16)                        # (b_blk*288, 64)

    # Tiny constants hoisted once per grid step.
    kbias = kbias_ref[...]            # (1, 288) 0 / -1e30 padded-key mask bias
    bo = bo_ref[...]                  # (1, 16)  out-proj bias
    b1c = b1_ref[...]                 # (8, 1)
    w2c = w2_ref[...]                 # (8, 1)
    b2 = b2_ref[...]                  # (1, 1)

    def batch_body(b, acc):
        off = pl.multiple_of(b * SEQ_PAD, 16)                      # bf16 sublane-aligned
        qkv_b = qkv_scr[pl.ds(off, SEQ_PAD), :]                    # (288, 64) bf16

        # ---- 2-head self-attention (deferred softmax normalization) ----
        ctx = bo                                                   # (1, 16) -> broadcast
        for hd in range(NUM_HEADS):                                # 2 heads, static
            qh = qkv_b[:, hd * HEAD_DIM:(hd + 1) * HEAD_DIM]                  # (288, 8)
            kh = qkv_b[:, EMBED + hd * HEAD_DIM:EMBED + (hd + 1) * HEAD_DIM]  # (288, 8)
            voh = qkv_b[:, 2 * EMBED + hd * EMBED:
                         2 * EMBED + (hd + 1) * EMBED]                        # (288, 16)
            s = jax.lax.dot_general(qh, kh, (((1,), (1,)), ((), ())),
                                    preferred_element_type=jnp.float32)       # (288, 288)
            s = s + kbias                                          # mask padded key col
            m = jnp.max(s, axis=-1, keepdims=True)
            # f32 exp (generation-agnostic; bf16 exp is a v6e/v7x-only micro-opt)
            p = jnp.exp(s - m)
            den = jnp.sum(p, axis=-1, keepdims=True)               # (288, 1)
            pv = jnp.dot(p.astype(jnp.bfloat16), voh,
                         preferred_element_type=jnp.float32)       # (288, 16)
            ctx = ctx + pv * pl.reciprocal(den, approx=True)       # normalize after PV
        ctx = ctx.astype(jnp.bfloat16)                             # (288, 16)

        # ---- fc1 (4592 -> 8) on the MXU ----
        # z[j*16+e, e'] = sum_t w1[j, t*16+e] * ctx[t, e']   (padded t rows are 0)
        z = jnp.dot(w1_ref[...], ctx, preferred_element_type=jnp.float32)   # (128, 16)
        r = jax.lax.broadcasted_iota(jnp.int32, (HIDDEN * EMBED, EMBED), 0)
        c = jax.lax.broadcasted_iota(jnp.int32, (HIDDEN * EMBED, EMBED), 1)
        dsel = (jnp.bitwise_and(r, EMBED - 1) == c).astype(jnp.float32)     # diag pick
        zd = jnp.sum(z * dsel, axis=-1, keepdims=True)                      # (128, 1)
        gr = jax.lax.broadcasted_iota(jnp.int32, (HIDDEN, HIDDEN * EMBED), 0)
        gc = jax.lax.broadcasted_iota(jnp.int32, (HIDDEN, HIDDEN * EMBED), 1)
        gsel = (gr == jnp.right_shift(gc, 4)).astype(jnp.float32)  # 2**4 == EMBED
        h1 = jnp.dot(gsel, zd, preferred_element_type=jnp.float32)          # (8, 1)
        h1 = jnp.maximum(h1 + b1c, 0.0)

        # ---- fc2 (8 -> 1) ----
        yb = jnp.sum(h1 * w2c, keepdims=True) + b2                          # (1, 1)

        onehot = (jax.lax.broadcasted_iota(jnp.int32, (b_blk, 1), 0) == b
                  ).astype(jnp.float32)
        return acc + onehot * yb

    acc0 = jnp.zeros((b_blk, 1), jnp.float32)
    acc = jax.lax.fori_loop(0, b_blk, batch_body, acc0)
    o_ref[0] = acc                                                  # (b_blk, 1)


# ----------------------------------------------------------------------------
# Wrapper: im2col + padding glue in plain JAX, everything else in the kernel.
# ----------------------------------------------------------------------------
def _full_spec(shape):
    zero = (0,) * len(shape)
    return pl.BlockSpec(shape, lambda i, _z=zero: _z)


def _pick_blocking(batch):
    # Keep the grid >= 2 steps when batch >= 2 (v7x has 2 TensorCores); the
    # in-kernel fori_loop bounds live ranges, so fat blocks only amortize the
    # per-grid-step overhead.
    if batch <= 1:
        return 1, 1
    b_blk = min(32, (batch + 1) // 2)
    b_pad = ((batch + b_blk - 1) // b_blk) * b_blk
    return b_blk, b_pad


def transformer_forward(x, kp):
    B, L = x.shape
    assert L == INPUT_DIM and B >= 1
    b_blk, b_pad = _pick_blocking(B)
    n_blk = b_pad // b_blk

    # im2col windows for Conv1d(k=3, stride=1): (B, 287, 3); pad batch & seq,
    # merge (batch, seq) so the shared-weight matmuls see a fat M dimension.
    xw = jnp.stack([x[:, 0:SEQ], x[:, 1:SEQ + 1], x[:, 2:SEQ + 2]], axis=-1)
    xw = jnp.pad(xw, ((0, b_pad - B), (0, SEQ_PAD - SEQ), (0, 0)))
    xw_m = xw.reshape(b_pad * SEQ_PAD, 3)

    y = pl.pallas_call(
        functools.partial(_fused_kernel, b_blk=b_blk),
        grid=(n_blk,),
        in_specs=[
            pl.BlockSpec((b_blk * SEQ_PAD, 3), lambda i: (i, 0)),  # im2col windows
            _full_spec((3, EMBED)),                 # conv weight^T         bf16
            _full_spec((1, EMBED)),                 # conv bias             f32
            _full_spec((EMBED, 4 * EMBED)),         # [Wq*s|Wk|Wvo0|Wvo1]^T bf16
            _full_spec((1, 4 * EMBED)),             # matching biases       f32
            _full_spec((1, EMBED)),                 # out-proj bias bo      f32
            _full_spec((1, SEQ_PAD)),               # padded-key mask bias  f32
            _full_spec((HIDDEN * EMBED, SEQ_PAD)),  # fc1 weight (128,288)  bf16
            _full_spec((HIDDEN, 1)),                # fc1 bias              f32
            _full_spec((HIDDEN, 1)),                # fc2 weight            f32
            _full_spec((1, 1)),                     # fc2 bias              f32
        ],
        out_specs=pl.BlockSpec((1, b_blk, 1), lambda i: (i, 0, 0)),
        out_shape=jax.ShapeDtypeStruct((n_blk, b_blk, 1), jnp.float32),
        scratch_shapes=[pltpu.VMEM((b_blk * SEQ_PAD, 4 * EMBED), jnp.bfloat16)],
        compiler_params=pltpu.CompilerParams(dimension_semantics=("parallel",)),
    )(xw_m, kp["cwT"], kp["cb"], kp["wqkvT"], kp["bqkv"], kp["bo"],
      kp["kbias"], kp["w1_2d"], kp["b1"], kp["w2"], kp["b2"])
    return y.reshape(b_pad, 1)[:B]


# ----------------------------------------------------------------------------
# Parameters: PyTorch-layout init + one-time static transform for the kernel
# (q-scale folded into Wq/bq, Wo folded into V per head, fc1 reordered+padded).
# ----------------------------------------------------------------------------
def init_params(key):
    ks = jax.random.split(key, 14)

    def nrm(k, shape, scale=0.05):
        return jax.random.normal(k, shape, dtype=jnp.float32) * scale

    return dict(
        cw=nrm(ks[0], (EMBED, 3)),           # conv1.weight (16,1,3) squeezed
        cb=nrm(ks[1], (EMBED,)),             # conv1.bias
        wq=nrm(ks[2], (EMBED, EMBED)),       # in_proj_weight[0:16]
        wk=nrm(ks[3], (EMBED, EMBED)),       # in_proj_weight[16:32]
        wv=nrm(ks[4], (EMBED, EMBED)),       # in_proj_weight[32:48]
        bq=nrm(ks[5], (EMBED,)),
        bk=nrm(ks[6], (EMBED,)),
        bv=nrm(ks[7], (EMBED,)),
        wo=nrm(ks[8], (EMBED, EMBED)),       # attn.out_proj.weight
        bo=nrm(ks[9], (EMBED,)),             # attn.out_proj.bias
        w1=nrm(ks[10], (HIDDEN, SEQ * EMBED)),  # fc1.weight (8, 4592)
        b1=nrm(ks[11], (HIDDEN,)),
        w2=nrm(ks[12], (1, HIDDEN)),         # fc2.weight (1, 8)
        b2=nrm(ks[13], (1,)),
    )


def prepare_params(params):
    scale = 1.0 / math.sqrt(HEAD_DIM)
    wq, wk, wv, wo = params["wq"], params["wk"], params["wv"], params["wo"]

    # Fold Wo into the V projection per head:
    #   ctx = sum_h p_h @ (h @ Wvo_h + bvo_h) + bo,
    #   Wvo_h = Wv_h^T @ Wo_h  (16,16),  bvo_h = bv_h @ Wo_h  (16,)
    vo_blocks, bvo = [], []
    for hd in range(NUM_HEADS):
        sl = slice(hd * HEAD_DIM, (hd + 1) * HEAD_DIM)
        wo_h = wo[:, sl].T                                  # (8, 16)
        vo_blocks.append(wv[sl, :].T @ wo_h)                # (16, 16)
        bvo.append(params["bv"][sl] @ wo_h)                 # (16,)

    wqkvT = jnp.concatenate([wq.T * scale, wk.T] + vo_blocks, axis=1)     # (16, 64)
    bqkv = jnp.concatenate([params["bq"] * scale, params["bk"]] + bvo)[None, :]
    kbias = jnp.where(jnp.arange(SEQ_PAD) < SEQ, 0.0,
                      NEG_INF).astype(jnp.float32)[None, :]               # (1, 288)

    # fc1 weight reordered to (HIDDEN*EMBED, SEQ_PAD):
    #   w1_2d[j*16+e, t] = w1[j, t*16+e]; zero for the padded t column.
    w1r = params["w1"].reshape(HIDDEN, SEQ, EMBED)                        # [j, t, e]
    w1r = jnp.transpose(w1r, (0, 2, 1)).reshape(HIDDEN * EMBED, SEQ)      # [j*16+e, t]
    w1_2d = jnp.pad(w1r, ((0, 0), (0, SEQ_PAD - SEQ)))

    return dict(
        cwT=params["cw"].T.astype(jnp.bfloat16),     # (3, 16)
        cb=params["cb"][None, :],                    # (1, 16)
        wqkvT=wqkvT.astype(jnp.bfloat16),            # (16, 64)
        bqkv=bqkv,                                   # (1, 64)
        bo=params["bo"][None, :],                    # (1, 16)
        kbias=kbias,                                 # (1, 288)
        w1_2d=w1_2d.astype(jnp.bfloat16),            # (128, 288)
        b1=params["b1"][:, None],                    # (8, 1)
        w2=params["w2"].reshape(HIDDEN, 1),          # (8, 1)
        b2=params["b2"][None, :],                    # (1, 1)
    )


# Pure-JAX f32 reference (same math as the PyTorch module) for a sanity check.
def reference_forward(x, params):
    B = x.shape[0]
    xw = jnp.stack([x[:, 0:SEQ], x[:, 1:SEQ + 1], x[:, 2:SEQ + 2]], axis=-1)
    h = jax.nn.relu(jnp.einsum("btk,ek->bte", xw, params["cw"]) + params["cb"])
    scale = 1.0 / math.sqrt(HEAD_DIM)
    q = (h @ params["wq"].T + params["bq"]) * scale
    k = h @ params["wk"].T + params["bk"]
    v = h @ params["wv"].T + params["bv"]
    heads = []
    for hd in range(NUM_HEADS):
        sl = slice(hd * HEAD_DIM, (hd + 1) * HEAD_DIM)
        s = jnp.einsum("bqd,bkd->bqk", q[..., sl], k[..., sl])
        p = jax.nn.softmax(s, axis=-1)
        heads.append(jnp.einsum("bqk,bkd->bqd", p, v[..., sl]))
    ctx = jnp.concatenate(heads, axis=-1) @ params["wo"].T + params["bo"]
    flat = ctx.reshape(B, -1)
    h1 = jax.nn.relu(flat @ params["w1"].T + params["b1"])
    return h1 @ params["w2"].T + params["b2"]


if __name__ == "__main__":
    key = jax.random.PRNGKey(0)
    pkey, xkey = jax.random.split(key)
    params = init_params(pkey)
    kparams = prepare_params(params)

    B = 2
    x = jax.random.normal(xkey, (B, INPUT_DIM), dtype=jnp.float32)

    y = transformer_forward(x, kparams)
    y = jax.block_until_ready(y)
    assert y.shape == (B, 1)

    y_ref = reference_forward(x, params)
    # bf16 MXU operands + approx reciprocal => slightly looser tolerance than f32.
    assert jnp.allclose(y, y_ref, atol=2e-2, rtol=2e-2), (y, y_ref)

    print("KERNEL_OK")
</pallas_src>

<mosaic_0001>
module attributes {stable_mosaic.version = 11 : i64} {
  func.func @_fused_kernel(%arg0: i32, %arg1: memref<288x3xf32, #tpu.memory_space<vmem>>, %arg2: memref<3x16xbf16, #tpu.memory_space<vmem>>, %arg3: memref<1x16xf32, #tpu.memory_space<vmem>>, %arg4: memref<16x64xbf16, #tpu.memory_space<vmem>>, %arg5: memref<1x64xf32, #tpu.memory_space<vmem>>, %arg6: memref<1x16xf32, #tpu.memory_space<vmem>>, %arg7: memref<1x288xf32, #tpu.memory_space<vmem>>, %arg8: memref<128x288xbf16, #tpu.memory_space<vmem>>, %arg9: memref<8x1xf32, #tpu.memory_space<vmem>>, %arg10: memref<8x1xf32, #tpu.memory_space<vmem>>, %arg11: memref<1x1xf32, #tpu.memory_space<vmem>>, %arg12: memref<1x1x1xf32, #tpu.memory_space<vmem>>, %arg13: memref<288x64xbf16, #tpu.memory_space<vmem>>) attributes {dimension_semantics = [#tpu.dimension_semantics<parallel>], iteration_bounds = array<i64: 2>, scalar_prefetch = 0 : i64, scratch_operands = 1 : i64, tpu.core_type = #tpu.core_type<tc>, window_params = [{transform_indices = @transform_0, window_bounds = array<i64: 288, 3>}, {pipeline_mode = #tpu.pipeline_mode<synchronous>, transform_indices = @transform_1, window_bounds = array<i64: 3, 16>}, {pipeline_mode = #tpu.pipeline_mode<synchronous>, transform_indices = @transform_2, window_bounds = array<i64: 1, 16>}, {pipeline_mode = #tpu.pipeline_mode<synchronous>, transform_indices = @transform_3, window_bounds = array<i64: 16, 64>}, {pipeline_mode = #tpu.pipeline_mode<synchronous>, transform_indices = @transform_4, window_bounds = array<i64: 1, 64>}, {pipeline_mode = #tpu.pipeline_mode<synchronous>, transform_indices = @transform_5, window_bounds = array<i64: 1, 16>}, {pipeline_mode = #tpu.pipeline_mode<synchronous>, transform_indices = @transform_6, window_bounds = array<i64: 1, 288>}, {pipeline_mode = #tpu.pipeline_mode<synchronous>, transform_indices = @transform_7, window_bounds = array<i64: 128, 288>}, {pipeline_mode = #tpu.pipeline_mode<synchronous>, transform_indices = @transform_8, window_bounds = array<i64: 8, 1>}, {pipeline_mode = #tpu.pipeline_mode<synchronous>, transform_indices = @transform_9, window_bounds = array<i64: 8, 1>}, {pipeline_mode = #tpu.pipeline_mode<synchronous>, transform_indices = @transform_10, window_bounds = array<i64: 1, 1>}, {transform_indices = @transform_11, window_bounds = array<i64: 1, 1, 1>}]} {
    %c0 = arith.constant 0 : index
    %c0_0 = arith.constant 0 : index
    %0 = vector.load %arg1[%c0, %c0_0] : memref<288x3xf32, #tpu.memory_space<vmem>>, vector<288x3xf32>
    %1 = arith.truncf %0 : vector<288x3xf32> to vector<288x3xbf16>
    %c0_1 = arith.constant 0 : index
    %c0_2 = arith.constant 0 : index
    %2 = vector.load %arg2[%c0_1, %c0_2] : memref<3x16xbf16, #tpu.memory_space<vmem>>, vector<3x16xbf16>
    %cst = arith.constant dense<0.000000e+00> : vector<288x16xf32>
    %3 = tpu.matmul %1, %2, %cst {dimension_numbers = #tpu.dot_dimension_numbers<[1], [0], [0], [1], [0, 0, 1, 1], [], []>} : vector<288x3xbf16>, vector<3x16xbf16>, vector<288x16xf32> -> vector<288x16xf32>
    %c0_3 = arith.constant 0 : index
    %c0_4 = arith.constant 0 : index
    %4 = vector.load %arg3[%c0_3, %c0_4] : memref<1x16xf32, #tpu.memory_space<vmem>>, vector<1x16xf32>
    %5 = vector.broadcast %4 : vector<1x16xf32> to vector<288x16xf32>
    %6 = arith.addf %3, %5 : vector<288x16xf32>
    %cst_5 = arith.constant 0.000000e+00 : f32
    %7 = vector.broadcast %cst_5 : f32 to vector<288x16xf32>
    %8 = arith.maximumf %6, %7 : vector<288x16xf32>
    %9 = arith.truncf %8 : vector<288x16xf32> to vector<288x16xbf16>
    %c0_6 = arith.constant 0 : index
    %c0_7 = arith.constant 0 : index
    %10 = vector.load %arg4[%c0_6, %c0_7] : memref<16x64xbf16, #tpu.memory_space<vmem>>, vector<16x64xbf16>
    %cst_8 = arith.constant dense<0.000000e+00> : vector<288x64xf32>
    %11 = tpu.matmul %9, %10, %cst_8 {dimension_numbers = #tpu.dot_dimension_numbers<[1], [0], [0], [1], [0, 0, 1, 1], [], []>} : vector<288x16xbf16>, vector<16x64xbf16>, vector<288x64xf32> -> vector<288x64xf32>
    %c0_9 = arith.constant 0 : index
    %c0_10 = arith.constant 0 : index
    %12 = vector.load %arg5[%c0_9, %c0_10] : memref<1x64xf32, #tpu.memory_space<vmem>>, vector<1x64xf32>
    %13 = vector.broadcast %12 : vector<1x64xf32> to vector<288x64xf32>
    %14 = arith.addf %11, %13 : vector<288x64xf32>
    %15 = arith.truncf %14 : vector<288x64xf32> to vector<288x64xbf16>
    %c0_11 = arith.constant 0 : index
    %c0_12 = arith.constant 0 : index
    %16 = vector.load %arg13[%c0_11, %c0_12] : memref<288x64xbf16, #tpu.memory_space<vmem>>, vector<288x64xbf16>
    tpu.vector_store %arg13[%c0_11, %c0_12], %15 {strides = array<i32>} : memref<288x64xbf16, #tpu.memory_space<vmem>>, vector<288x64xbf16>,
    %c0_13 = arith.constant 0 : index
    %c0_14 = arith.constant 0 : index
    %17 = vector.load %arg7[%c0_13, %c0_14] : memref<1x288xf32, #tpu.memory_space<vmem>>, vector<1x288xf32>
    %c0_15 = arith.constant 0 : index
    %c0_16 = arith.constant 0 : index
    %18 = vector.load %arg6[%c0_15, %c0_16] : memref<1x16xf32, #tpu.memory_space<vmem>>, vector<1x16xf32>
    %c0_17 = arith.constant 0 : index
    %c0_18 = arith.constant 0 : index
    %19 = vector.load %arg9[%c0_17, %c0_18] : memref<8x1xf32, #tpu.memory_space<vmem>>, vector<8x1xf32>
    %c0_19 = arith.constant 0 : index
    %c0_20 = arith.constant 0 : index
    %20 = vector.load %arg10[%c0_19, %c0_20] : memref<8x1xf32, #tpu.memory_space<vmem>>, vector<8x1xf32>
    %c0_21 = arith.constant 0 : index
    %c0_22 = arith.constant 0 : index
    %21 = vector.load %arg11[%c0_21, %c0_22] : memref<1x1xf32, #tpu.memory_space<vmem>>, vector<1x1xf32>
    %cst_23 = arith.constant 0.000000e+00 : f32
    %22 = vector.broadcast %cst_23 : f32 to vector<1x1xf32>
    %c0_i32 = arith.constant 0 : i32
    %c288_i32 = arith.constant 288 : i32
    %23 = arith.muli %c0_i32, %c288_i32 : i32
    %24 = tpu.assume_multiple %23, 16 : i32
    %25 = arith.index_cast %24 : i32 to index
    %c0_24 = arith.constant 0 : index
    %26 = vector.load %arg13[%25, %c0_24] : memref<288x64xbf16, #tpu.memory_space<vmem>>, vector<288x64xbf16>
    %27 = vector.extract_strided_slice %26 {offsets = [0, 0], sizes = [288, 8], strides = [1, 1]} : vector<288x64xbf16> to vector<288x8xbf16>
    %28 = vector.extract_strided_slice %26 {offsets = [0, 16], sizes = [288, 8], strides = [1, 1]} : vector<288x64xbf16> to vector<288x8xbf16>
    %29 = vector.extract_strided_slice %26 {offsets = [0, 32], sizes = [288, 16], strides = [1, 1]} : vector<288x64xbf16> to vector<288x16xbf16>
    %cst_25 = arith.constant dense<0.000000e+00> : vector<288x288xf32>
    %30 = tpu.matmul %27, %28, %cst_25 {dimension_numbers = #tpu.dot_dimension_numbers<[1], [1], [0], [0], [0, 0, 1, 0], [], []>} : vector<288x8xbf16>, vector<288x8xbf16>, vector<288x288xf32> -> vector<288x288xf32>
    %31 = vector.broadcast %17 : vector<1x288xf32> to vector<288x288xf32>
    %32 = arith.addf %30, %31 : vector<288x288xf32>
    %cst_26 = arith.constant dense<0xFF800000> : vector<288xf32>
    %33 = vector.multi_reduction <maximumf>, %32, %cst_26 [1] : vector<288x288xf32> to vector<288xf32>
    %34 = vector.shape_cast %33 : vector<288xf32> to vector<288x1xf32>
    %35 = vector.broadcast %34 : vector<288x1xf32> to vector<288x288xf32>
    %36 = arith.subf %32, %35 : vector<288x288xf32>
    %37 = math.exp %36 : vector<288x288xf32>
    %cst_27 = arith.constant dense<0.000000e+00> : vector<288xf32>
    %38 = vector.multi_reduction <add>, %37, %cst_27 [1] : vector<288x288xf32> to vector<288xf32>
    %39 = vector.shape_cast %38 : vector<288xf32> to vector<288x1xf32>
    %40 = arith.truncf %37 : vector<288x288xf32> to vector<288x288xbf16>
    %cst_28 = arith.constant dense<0.000000e+00> : vector<288x16xf32>
    %41 = tpu.matmul %40, %29, %cst_28 {dimension_numbers = #tpu.dot_dimension_numbers<[1], [0], [0], [1], [0, 0, 1, 1], [], []>} : vector<288x288xbf16>, vector<288x16xbf16>, vector<288x16xf32> -> vector<288x16xf32>
    %42 = tpu.reciprocal %39 {approx = true} : vector<288x1xf32> -> vector<288x1xf32>
    %43 = vector.broadcast %42 : vector<288x1xf32> to vector<288x16xf32>
    %44 = arith.mulf %41, %43 : vector<288x16xf32>
    %45 = vector.broadcast %18 : vector<1x16xf32> to vector<288x16xf32>
    %46 = arith.addf %45, %44 : vector<288x16xf32>
    %47 = vector.extract_strided_slice %26 {offsets = [0, 8], sizes = [288, 8], strides = [1, 1]} : vector<288x64xbf16> to vector<288x8xbf16>
    %48 = vector.extract_strided_slice %26 {offsets = [0, 24], sizes = [288, 8], strides = [1, 1]} : vector<288x64xbf16> to vector<288x8xbf16>
    %49 = vector.extract_strided_slice %26 {offsets = [0, 48], sizes = [288, 16], strides = [1, 1]} : vector<288x64xbf16> to vector<288x16xbf16>
    %cst_29 = arith.constant dense<0.000000e+00> : vector<288x288xf32>
    %50 = tpu.matmul %47, %48, %cst_29 {dimension_numbers = #tpu.dot_dimension_numbers<[1], [1], [0], [0], [0, 0, 1, 0], [], []>} : vector<288x8xbf16>, vector<288x8xbf16>, vector<288x288xf32> -> vector<288x288xf32>
    %51 = vector.broadcast %17 : vector<1x288xf32> to vector<288x288xf32>
    %52 = arith.addf %50, %51 : vector<288x288xf32>
    %cst_30 = arith.constant dense<0xFF800000> : vector<288xf32>
    %53 = vector.multi_reduction <maximumf>, %52, %cst_30 [1] : vector<288x288xf32> to vector<288xf32>
    %54 = vector.shape_cast %53 : vector<288xf32> to vector<288x1xf32>
    %55 = vector.broadcast %54 : vector<288x1xf32> to vector<288x288xf32>
    %56 = arith.subf %52, %55 : vector<288x288xf32>
    %57 = math.exp %56 : vector<288x288xf32>
    %cst_31 = arith.constant dense<0.000000e+00> : vector<288xf32>
    %58 = vector.multi_reduction <add>, %57, %cst_31 [1] : vector<288x288xf32> to vector<288xf32>
    %59 = vector.shape_cast %58 : vector<288xf32> to vector<288x1xf32>
    %60 = arith.truncf %57 : vector<288x288xf32> to vector<288x288xbf16>
    %cst_32 = arith.constant dense<0.000000e+00> : vector<288x16xf32>
    %61 = tpu.matmul %60, %49, %cst_32 {dimension_numbers = #tpu.dot_dimension_numbers<[1], [0], [0], [1], [0, 0, 1, 1], [], []>} : vector<288x288xbf16>, vector<288x16xbf16>, vector<288x16xf32> -> vector<288x16xf32>
    %62 = tpu.reciprocal %59 {approx = true} : vector<288x1xf32> -> vector<288x1xf32>
    %63 = vector.broadcast %62 : vector<288x1xf32> to vector<288x16xf32>
    %64 = arith.mulf %61, %63 : vector<288x16xf32>
    %65 = arith.addf %46, %64 : vector<288x16xf32>
    %66 = arith.truncf %65 : vector<288x16xf32> to vector<288x16xbf16>
    %c0_33 = arith.constant 0 : index
    %c0_34 = arith.constant 0 : index
    %67 = vector.load %arg8[%c0_33, %c0_34] : memref<128x288xbf16, #tpu.memory_space<vmem>>, vector<128x288xbf16>
    %cst_35 = arith.constant dense<0.000000e+00> : vector<128x16xf32>
    %68 = tpu.matmul %67, %66, %cst_35 {dimension_numbers = #tpu.dot_dimension_numbers<[1], [0], [0], [1], [0, 0, 1, 1], [], []>} : vector<128x288xbf16>, vector<288x16xbf16>, vector<128x16xf32> -> vector<128x16xf32>
    %69 = tpu.iota {dimensions = array<i32: 0>} : vector<128x16xi32>
    %70 = tpu.iota {dimensions = array<i32: 1>} : vector<128x16xi32>
    %c15_i32 = arith.constant 15 : i32
    %71 = vector.broadcast %c15_i32 : i32 to vector<128x16xi32>
    %72 = arith.andi %69, %71 : vector<128x16xi32>
    %73 = arith.cmpi eq, %72, %70 : vector<128x16xi32>
    %74 = arith.extui %73 : vector<128x16xi1> to vector<128x16xi32>
    %75 = arith.sitofp %74 : vector<128x16xi32> to vector<128x16xf32>
    %76 = arith.mulf %68, %75 : vector<128x16xf32>
    %cst_36 = arith.constant dense<0.000000e+00> : vector<128xf32>
    %77 = vector.multi_reduction <add>, %76, %cst_36 [1] : vector<128x16xf32> to vector<128xf32>
    %78 = vector.shape_cast %77 : vector<128xf32> to vector<128x1xf32>
    %79 = tpu.iota {dimensions = array<i32: 0>} : vector<8x128xi32>
    %80 = tpu.iota {dimensions = array<i32: 1>} : vector<8x128xi32>
    %c4_i32 = arith.constant 4 : i32
    %81 = vector.broadcast %c4_i32 : i32 to vector<8x128xi32>
    %82 = arith.shrsi %80, %81 : vector<8x128xi32>
    %83 = arith.cmpi eq, %79, %82 : vector<8x128xi32>
    %84 = arith.extui %83 : vector<8x128xi1> to vector<8x128xi32>
    %85 = arith.sitofp %84 : vector<8x128xi32> to vector<8x128xf32>
    %cst_37 = arith.constant dense<0.000000e+00> : vector<8x1xf32>
    %86 = tpu.matmul %85, %78, %cst_37 {dimension_numbers = #tpu.dot_dimension_numbers<[1], [0], [0], [1], [0, 0, 1, 1], [], []>} : vector<8x128xf32>, vector<128x1xf32>, vector<8x1xf32> -> vector<8x1xf32>
    %87 = arith.addf %86, %19 : vector<8x1xf32>
    %cst_38 = arith.constant 0.000000e+00 : f32
    %88 = vector.broadcast %cst_38 : f32 to vector<8x1xf32>
    %89 = arith.maximumf %87, %88 : vector<8x1xf32>
    %90 = arith.mulf %89, %20 : vector<8x1xf32>
    %91 = vector.shape_cast %90 : vector<8x1xf32> to vector<1x8x1xf32>
    %cst_39 = arith.constant dense<0.000000e+00> : vector<1xf32>
    %92 = vector.multi_reduction <add>, %91, %cst_39 [1, 2] : vector<1x8x1xf32> to vector<1xf32>
    %93 = vector.shape_cast %92 : vector<1xf32> to vector<1x1x1xf32>
    %94 = vector.extract %93[0, 0, 0] : f32 from vector<1x1x1xf32>
    %95 = vector.broadcast %94 : f32 to vector<1x1xf32>
    %96 = arith.addf %95, %21 : vector<1x1xf32>
    %97 = tpu.iota {dimensions = array<i32: 0>} : vector<1x1xi32>
    %98 = vector.broadcast %c0_i32 : i32 to vector<1x1xi32>
    %99 = arith.cmpi eq, %97, %98 : vector<1x1xi32>
    %100 = arith.extui %99 : vector<1x1xi1> to vector<1x1xi32>
    %101 = arith.sitofp %100 : vector<1x1xi32> to vector<1x1xf32>
    %102 = arith.mulf %101, %96 : vector<1x1xf32>
    %103 = arith.addf %22, %102 : vector<1x1xf32>
    %c1_i32 = arith.constant 1 : i32
    %c0_40 = arith.constant 0 : index
    %c0_41 = arith.constant 0 : index
    %c0_42 = arith.constant 0 : index
    %104 = vector.load %arg12[%c0_40, %c0_41, %c0_42] : memref<1x1x1xf32, #tpu.memory_space<vmem>>, vector<1x1x1xf32>
    %105 = vector.shape_cast %104 : vector<1x1x1xf32> to vector<1x1xf32>
    %106 = vector.shape_cast %103 : vector<1x1xf32> to vector<1x1x1xf32>
    tpu.vector_store %arg12[%c0_40, %c0_41, %c0_42], %106 {strides = array<i32>} : memref<1x1x1xf32, #tpu.memory_space<vmem>>, vector<1x1x1xf32>,
    return
  }
  func.func @transform_0(%arg0: i32) -> (i32, i32) {
    %c0_i32 = arith.constant 0 : i32
    %c0_i32_0 = arith.constant 0 : i32
    return %arg0, %c0_i32 : i32, i32
  }
  func.func @transform_1(%arg0: i32) -> (i32, i32) {
    %c0_i32 = arith.constant 0 : i32
    %c0_i32_0 = arith.constant 0 : i32
    %c0_i32_1 = arith.constant 0 : i32
    return %c0_i32, %c0_i32_0 : i32, i32
  }
  func.func @transform_2(%arg0: i32) -> (i32, i32) {
    %c0_i32 = arith.constant 0 : i32
    %c0_i32_0 = arith.constant 0 : i32
    %c0_i32_1 = arith.constant 0 : i32
    return %c0_i32, %c0_i32_0 : i32, i32
  }
  func.func @transform_3(%arg0: i32) -> (i32, i32) {
    %c0_i32 = arith.constant 0 : i32
    %c0_i32_0 = arith.constant 0 : i32
    %c0_i32_1 = arith.constant 0 : i32
    return %c0_i32, %c0_i32_0 : i32, i32
  }
  func.func @transform_4(%arg0: i32) -> (i32, i32) {
    %c0_i32 = arith.constant 0 : i32
    %c0_i32_0 = arith.constant 0 : i32
    %c0_i32_1 = arith.constant 0 : i32
    return %c0_i32, %c0_i32_0 : i32, i32
  }
  func.func @transform_5(%arg0: i32) -> (i32, i32) {
    %c0_i32 = arith.constant 0 : i32
    %c0_i32_0 = arith.constant 0 : i32
    %c0_i32_1 = arith.constant 0 : i32
    return %c0_i32, %c0_i32_0 : i32, i32
  }
  func.func @transform_6(%arg0: i32) -> (i32, i32) {
    %c0_i32 = arith.constant 0 : i32
    %c0_i32_0 = arith.constant 0 : i32
    %c0_i32_1 = arith.constant 0 : i32
    return %c0_i32, %c0_i32_0 : i32, i32
  }
  func.func @transform_7(%arg0: i32) -> (i32, i32) {
    %c0_i32 = arith.constant 0 : i32
    %c0_i32_0 = arith.constant 0 : i32
    %c0_i32_1 = arith.constant 0 : i32
    return %c0_i32, %c0_i32_0 : i32, i32
  }
  func.func @transform_8(%arg0: i32) -> (i32, i32) {
    %c0_i32 = arith.constant 0 : i32
    %c0_i32_0 = arith.constant 0 : i32
    %c0_i32_1 = arith.constant 0 : i32
    return %c0_i32, %c0_i32_0 : i32, i32
  }
  func.func @transform_9(%arg0: i32) -> (i32, i32) {
    %c0_i32 = arith.constant 0 : i32
    %c0_i32_0 = arith.constant 0 : i32
    %c0_i32_1 = arith.constant 0 : i32
    return %c0_i32, %c0_i32_0 : i32, i32
  }
  func.func @transform_10(%arg0: i32) -> (i32, i32) {
    %c0_i32 = arith.constant 0 : i32
    %c0_i32_0 = arith.constant 0 : i32
    %c0_i32_1 = arith.constant 0 : i32
    return %c0_i32, %c0_i32_0 : i32, i32
  }
  func.func @transform_11(%arg0: i32) -> (i32, i32, i32) {
    %c0_i32 = arith.constant 0 : i32
    %c0_i32_0 = arith.constant 0 : i32
    %c0_i32_1 = arith.constant 0 : i32
    return %arg0, %c0_i32, %c0_i32_0 : i32, i32, i32
  }
}

</mosaic_0001>

<bundles_post_ra>
// kernel: tpu_custom_call.1
= control target key start
LH: loop header
LB: loop body
LE: loop exit
PB: predicated region body
PF: predicated region fallthrough
CT: control target
= control target key end

     0   :  { %s7079_s19 = smov 0   ;;  %s10842_s0 = inlined_call_operand.vmem [shape: f32[576,3], index: 0, kind: input, shape index: {}]   ;;  %s10843_s1 = inlined_call_operand.vmem [shape: bf16[3,16], index: 1, kind: input, shape index: {}]   ;;  %s10844_s2 = inlined_call_operand.vmem [shape: f32[1,16], index: 2, kind: input, shape index: {}]   ;;  %s10845_s3 = inlined_call_operand.vmem [shape: bf16[16,64], index: 3, kind: input, shape index: {}]   ;;  %s10846_s4 = inlined_call_operand.vmem [shape: f32[1,64], index: 4, kind: input, shape index: {}]   ;;  %s10847_s5 = inlined_call_operand.vmem [shape: f32[1,16], index: 5, kind: input, shape index: {}]   ;;  %s10848_s6 = inlined_call_operand.vmem [shape: f32[1,288], index: 6, kind: input, shape index: {}]   ;;  %s10849_s7 = inlined_call_operand.vmem [shape: bf16[128,288], index: 7, kind: input, shape index: {}]   ;;  %s10850_s8 = inlined_call_operand.vmem [shape: f32[8,1], index: 8, kind: input, shape index: {}]   ;;  %s10851_s9 = inlined_call_operand.vmem [shape: f32[8,1], index: 9, kind: input, shape index: {}]   ;;  %s10852_s10 = inlined_call_operand.<no memory space> [shape: f32[1,1], index: 10, kind: input, shape index: {}]   ;;  %s10853_s11 = inlined_call_operand.vmem [shape: f32[2,1,1], index: 11, kind: output, shape index: {}]  }
   0x1   :  { %v16_v0 = vstv %s10852_s10 }
   0x2   :  { %17 = vst [vmem:[#allocation3] sm:$0x1] %v16_v0 }
   0x3 LB: > { %s7085_s20 = sadd.s32 4294967295, %s7003_s19   ;;  %p5494_p0 = scmp.ge.s32.totalorder %s7003_s19, 1  ;;  %s7003_s19 = sphi %s7079_s19, %s23_s19  }
   0x4   : > { %p340_p1 = scmp.lt.s32.totalorder %s7003_s19, 3 }
   0x6   : > { %p341_p2 = pnand %p5494_p0, %p340_p1 }
   0x8   : > { %344 = sbr.rel (%p341_p2) target bundleno = 2893 (0xb4d), region = 64 }
   0xf   : > { %v442_v1 = vld [vmem:[%s10843_s1] sm:$0x3]  ;;  %vm505_vm0 = vcmask 1040384   ;;  %vm506_vm1 = vcmask 1041408   ;;  %s378_s10 = smul.u32 36, %s7085_s20  ;;  %v7005_v2 = vmov 65535  }
  0x10   : > { %v507_v3 = vsel %vm505_vm0, 4294967295, %v7005_v2  ;;  %vm450_vm2 = vcmask 23552   ;;  %v6368_v60 = vld [vmem:[%s10845_s3] sm:$0xff]   ;;  %vm758_vm3 = vcmask 130048   ;;  %vm1008_vm4 = vcmask 523264   ;;  %s7006_s14 = smov 112  }
  0x11   : > { %v508_v4 = vsel %vm506_vm1, %v507_v3, 0  ;;  %p379_p3 = scmp.lt.s32.totalorder %s378_s10, 71  ;;  %v7158_v61 = vld [vmem:[%s10844_s2] ss:$0 sm:$0xff]  ;;  %vm1120_vm5 = vcmask 64512   ;;  %s7007_s15 = smov 96  }
  0x12   : > { %v510_v5 = vand.u32 %v508_v4, %v442_v1  ;;  %s7008_s16 = smov 104   ;;  %vm1620_vm6 = vcmask 261120   ;;  %s7010_s21 = smov 120  }
  0x13   : > { %s11633_s10 = smov (!%p379_p3, %s378_s10), 71  ;;  %s7011_s22 = smov 80  }
  0x14   : > { %6010 = vmatprep.subr.bf16.mxu0 %v510_v5  ;;  %6325 = vmatprep.subr.bf16.mxu1 %v510_v5  ;;  %s5495_s23 = sshll.u32 %s11633_s10, 3  ;;  %p384_p4 = scmp.lt.s32.totalorder %s7085_s20, 1 }
  0x15   : > { %6011 = vmatpush3.bf16.msra.mxu0 %v510_v5  ;;  %6326 = vmatpush3.bf16.msra.mxu1 %v510_v5  ;;  %s7096_s26 = scalar_lea.vmem %s10842_s0, %s5495_s23 }
  0x16   : > { %v388_v6 = vld [vmem:[%s7096_s26] sm:$0xff]  ;;  %v389_v7 = vld [vmem:[%s7096_s26 + $0x8] sm:$0xff]  ;;  %v390_v8 = vld [vmem:[%s7096_s26 + $0x10] sm:$0xff]  ;;  %6048 = vmatprep.subr.bf16.mxu1 %v6368_v60  ;;  %s11635_s20 = smov (!%p384_p4, %s7085_s20), 1 }
  0x17   : > { %v424_v9 = vpack.c.bf16 %v389_v7, %v388_v6  ;;  %v391_v10 = vld [vmem:[%s7096_s26 + $0x18] sm:$0xff]  ;;  %v392_v11 = vld [vmem:[%s7096_s26 + $0x20] sm:$0xff]  ;;  %v393_v12 = vld [vmem:[%s7096_s26 + $0x28] sm:$0xff]  ;;  %s386_s25 = scalar_lea.vmem %s10853_s11, %s11635_s20 }
  0x18   : > { %v425_v13 = vpack.c.bf16 %v391_v10, %v390_v8  ;;  %v426_v14 = vpack.c.bf16 %v393_v12, %v392_v11  ;;  %v394_v15 = vld [vmem:[%s7096_s26 + $0x30] sm:$0xff]  ;;  %v395_v16 = vld [vmem:[%s7096_s26 + $0x38] sm:$0xff]  ;;  %v396_v17 = vld [vmem:[%s7096_s26 + $0x40] sm:$0xff] }
  0x19   : > { %6012 = vmatprep.mubr.msk.bf16.mxu0 %vm450_vm2, %v424_v9  ;;  %v397_v18 = vld [vmem:[%s7096_s26 + $0x48] sm:$0xff]  ;;  %v427_v19 = vpack.c.bf16 %v395_v16, %v394_v15  ;;  %v420_v21 = vld [vmem:[%s7096_s26 + $0x100] sm:$0xff]  ;;  %v398_v22 = vld [vmem:[%s7096_s26 + $0x50] sm:$0xff] }
  0x1a   : > { %6013 = vmatmul.mubr.msk.bf16.vlgmr.msra.gmra.mrb[0].mxu0 %vm450_vm2, %v425_v13  ;;  %v428_v20 = vpack.c.bf16 %v397_v18, %v396_v17  ;;  %v399_v23 = vld [vmem:[%s7096_s26 + $0x58] sm:$0xff]  ;;  %v421_v24 = vld [vmem:[%s7096_s26 + $0x108] sm:$0xff]  ;;  %v422_v25 = vld [vmem:[%s7096_s26 + $0x110] sm:$0xff] }
  0x1b   : > { %6016 = vmatprep.mubr.msk.bf16.mxu0 %vm450_vm2, %v426_v14  ;;  %v423_v26 = vld [vmem:[%s7096_s26 + $0x118] sm:$0xff]  ;;  %v400_v27 = vld [vmem:[%s7096_s26 + $0x60] sm:$0xff]  ;;  %v401_v28 = vld [vmem:[%s7096_s26 + $0x68] sm:$0xff]  ;;  %v440_v29 = vpack.c.bf16 %v421_v24, %v420_v21  ;;  %v429_v31 = vpack.c.bf16 %v399_v23, %v398_v22 }
  0x1c   : > { %v441_v30 = vpack.c.bf16 %v423_v26, %v422_v25  ;;  %v430_v32 = vpack.c.bf16 %v401_v28, %v400_v27  ;;  %v402_v33 = vld [vmem:[%s7096_s26 + $0x70] sm:$0xff]  ;;  %v403_v34 = vld [vmem:[%s7096_s26 + $0x78] sm:$0xff]  ;;  %v404_v35 = vld [vmem:[%s7096_s26 + $0x80] sm:$0xff] }
  0x1d   : > { %6044 = vmatprep.mubr.msk.bf16.mxu1 %vm450_vm2, %v440_v29  ;;  %v405_v36 = vld [vmem:[%s7096_s26 + $0x88] sm:$0xff]  ;;  %v431_v37 = vpack.c.bf16 %v403_v34, %v402_v33  ;;  %v406_v39 = vld [vmem:[%s7096_s26 + $0x90] sm:$0xff]  ;;  %v407_v40 = vld [vmem:[%s7096_s26 + $0x98] sm:$0xff] }
  0x1e   : > { %6045 = vmatmul.mubr.msk.bf16.vlgmr.msra.gmra.mrb[0].mxu1 %vm450_vm2, %v441_v30  ;;  %v432_v38 = vpack.c.bf16 %v405_v36, %v404_v35  ;;  %v408_v41 = vld [vmem:[%s7096_s26 + $0xa0] sm:$0xff]  ;;  %v409_v42 = vld [vmem:[%s7096_s26 + $0xa8] sm:$0xff]  ;;  %v433_v43 = vpack.c.bf16 %v407_v40, %v406_v39  ;;  %v410_v45 = vld [vmem:[%s7096_s26 + $0xb0] sm:$0xff] }
  0x1f   : > { %v434_v44 = vpack.c.bf16 %v409_v42, %v408_v41  ;;  %v411_v46 = vld [vmem:[%s7096_s26 + $0xb8] sm:$0xff]  ;;  %v412_v47 = vld [vmem:[%s7096_s26 + $0xc0] sm:$0xff]  ;;  %v413_v48 = vld [vmem:[%s7096_s26 + $0xc8] sm:$0xff]  ;;  %6049 = vmatpush3.bf16.msra.mxu1 %v6368_v60 }
  0x20   : > { %v435_v49 = vpack.c.bf16 %v411_v46, %v410_v45  ;;  %v436_v50 = vpack.c.bf16 %v413_v48, %v412_v47  ;;  %v414_v51 = vld [vmem:[%s7096_s26 + $0xd0] sm:$0xff]  ;;  %v415_v52 = vld [vmem:[%s7096_s26 + $0xd8] sm:$0xff]  ;;  %v416_v53 = vld [vmem:[%s7096_s26 + $0xe0] sm:$0xff] }
  0x21   : > { %v417_v54 = vld [vmem:[%s7096_s26 + $0xe8] sm:$0xff]  ;;  %v437_v55 = vpack.c.bf16 %v415_v52, %v414_v51  ;;  %v418_v57 = vld [vmem:[%s7096_s26 + $0xf0] sm:$0xff]  ;;  %v419_v58 = vld [vmem:[%s7096_s26 + $0xf8] sm:$0xff] }
  0x22   : > { %6017 = vmatmul.mubr.msk.bf16.gmra.mrb[4].mxu0 %vm450_vm2, %v427_v19  ;;  %v438_v56 = vpack.c.bf16 %v417_v54, %v416_v53  ;;  %v439_v59 = vpack.c.bf16 %v419_v58, %v418_v57 }
  0x23   : > { %6020 = vmatprep.mubr.msk.bf16.mxu0 %vm450_vm2, %v428_v20 }
  0x2a   : > { %6021 = vmatmul.mubr.msk.bf16.gmra.mrb[8].mxu0 %vm450_vm2, %v429_v31 }
  0x2b   : > { %6024 = vmatprep.mubr.msk.bf16.mxu0 %vm450_vm2, %v430_v32 }
  0x32   : > { %6025 = vmatmul.mubr.msk.bf16.gmra.mrb[12].mxu0 %vm450_vm2, %v431_v37 }
  0x33   : > { %6028 = vmatprep.mubr.msk.bf16.mxu0 %vm450_vm2, %v432_v38 }
  0x3a   : > { %6029 = vmatmul.mubr.msk.bf16.gmra.mrb[16].mxu0 %vm450_vm2, %v433_v43 }
  0x3b   : > { %6032 = vmatprep.mubr.msk.bf16.mxu0 %vm450_vm2, %v434_v44 }
  0x42   : > { %6033 = vmatmul.mubr.msk.bf16.gmra.mrb[20].mxu0 %vm450_vm2, %v435_v49 }
  0x43   : > { %6036 = vmatprep.mubr.msk.bf16.mxu0 %vm450_vm2, %v436_v50 }
  0x4a   : > { %6037 = vmatmul.mubr.msk.bf16.gmra.mrb[24].mxu0 %vm450_vm2, %v437_v55 }
  0x4b   : > { %6040 = vmatprep.mubr.msk.bf16.mxu0 %vm450_vm2, %v438_v56 }
  0x52   : > { %6041 = vmatmul.mubr.msk.bf16.gmra.mrb[28].mxu0 %vm450_vm2, %v439_v59 }
  0xed   : > { %v6014_v62 = vpop.f32.mrb[0].mxu0 }
  0xee   : > { %v555_v63 = vadd.f32 %v6014_v62, %v7158_v61  ;;  %v546_v0 = vpop.f32.mrb[1].mxu0 }
  0xef   : > { %v547_v1 = vadd.f32 %v7158_v61, %v546_v0  ;;  %v6015_v2 = vpop.f32.mrb[2].mxu0 }
  0xf0   : > { %v558_v3 = vadd.f32 %v6015_v2, %v7158_v61  ;;  %v549_v4 = vpop.f32.mrb[3].mxu0  ;;  %v691_v6 = vmax.f32 %v555_v63, 0.0 }
  0xf1   : > { %v550_v5 = vadd.f32 %v7158_v61, %v549_v4  ;;  %v689_v8 = vmax.f32 %v547_v1, 0.0  ;;  %v6046_v19 = vpop.f32.mrb[0].mxu1 }
  0xf2   : > { %v692_v7 = vmax.f32 %v558_v3, 0.0  ;;  %v683_v21 = vadd.f32 %v6046_v19, %v7158_v61  ;;  %v674_v22 = vpop.f32.mrb[1].mxu1 }
  0xf3   : > { %v690_v9 = vmax.f32 %v550_v5, 0.0  ;;  %v675_v25 = vadd.f32 %v7158_v61, %v674_v22  ;;  %v6047_v26 = vpop.f32.mrb[2].mxu1 }
  0xf4   : > { %v726_v10 = vpack.c.bf16 %v692_v7, %v691_v6  ;;  %v723_v29 = vmax.f32 %v683_v21, 0.0  ;;  %v686_v30 = vadd.f32 %v6047_v26, %v7158_v61  ;;  %v677_v31 = vpop.f32.mrb[3].mxu1 }
  0xf5   : > { %v725_v11 = vpack.c.bf16 %v690_v9, %v689_v8  ;;  %v6018_v12 = vpop.f32.mrb[4].mxu0  ;;  %v721_v33 = vmax.f32 %v675_v25, 0.0  ;;  %v678_v34 = vadd.f32 %v7158_v61, %v677_v31 }
  0xf6   : > { %v571_v13 = vadd.f32 %v6018_v12, %v7158_v61  ;;  %v562_v14 = vpop.f32.mrb[5].mxu0  ;;  %v724_v37 = vmax.f32 %v686_v30, 0.0 }
  0xf7   : > { %v563_v15 = vadd.f32 %v7158_v61, %v562_v14  ;;  %v6019_v16 = vpop.f32.mrb[6].mxu0  ;;  %6050 = vmatprep.mubr.msk.bf16.mxu1 %vm758_vm3, %v725_v11  ;;  %v722_v40 = vmax.f32 %v678_v34, 0.0 }
  0xf8   : > { %v574_v17 = vadd.f32 %v6019_v16, %v7158_v61  ;;  %v565_v18 = vpop.f32.mrb[7].mxu0  ;;  %6051 = vmatmul.mubr.msk.bf16.vlgmr.msra.gmra.mrb[4].mxu1 %vm758_vm3, %v726_v10  ;;  %v695_v23 = vmax.f32 %v571_v13, 0.0  ;;  %v7177_v43 = vpack.c.bf16 %v724_v37, %v723_v29 }
  0xf9   : > { %v566_v20 = vadd.f32 %v7158_v61, %v565_v18  ;;  %v693_v27 = vmax.f32 %v563_v15, 0.0  ;;  %v7181_v46 = vpack.c.bf16 %v722_v40, %v721_v33 }
  0xfa   : > { %v696_v24 = vmax.f32 %v574_v17, 0.0 }
  0xfb   : > { %v694_v28 = vmax.f32 %v566_v20, 0.0 }
  0xfc   : > { %v728_v32 = vpack.c.bf16 %v696_v24, %v695_v23 }
  0xfd   : > { %v727_v35 = vpack.c.bf16 %v694_v28, %v693_v27  ;;  %v6022_v36 = vpop.f32.mrb[8].mxu0 }
  0xfe   : > { %v587_v38 = vadd.f32 %v6022_v36, %v7158_v61  ;;  %v578_v39 = vpop.f32.mrb[9].mxu0 }
  0xff   : > { %v579_v41 = vadd.f32 %v7158_v61, %v578_v39  ;;  %v6023_v42 = vpop.f32.mrb[10].mxu0  ;;  %6054 = vmatprep.mubr.msk.bf16.mxu1 %vm758_vm3, %v727_v35 }
 0x100   : > { %v590_v44 = vadd.f32 %v6023_v42, %v7158_v61  ;;  %v581_v45 = vpop.f32.mrb[11].mxu0  ;;  %6055 = vmatmul.mubr.msk.bf16.gmra.mrb[8].mxu1 %vm758_vm3, %v728_v32  ;;  %v699_v48 = vmax.f32 %v587_v38, 0.0 }
 0x101   : > { %v582_v47 = vadd.f32 %v7158_v61, %v581_v45  ;;  %v697_v50 = vmax.f32 %v579_v41, 0.0 }
 0x102   : > { %v700_v49 = vmax.f32 %v590_v44, 0.0 }
 0x103   : > { %v698_v51 = vmax.f32 %v582_v47, 0.0 }
 0x104   : > { %v730_v52 = vpack.c.bf16 %v700_v49, %v699_v48 }
 0x105   : > { %v729_v53 = vpack.c.bf16 %v698_v51, %v697_v50  ;;  %v6026_v54 = vpop.f32.mrb[12].mxu0 }
 0x106   : > { %v603_v55 = vadd.f32 %v6026_v54, %v7158_v61  ;;  %v594_v56 = vpop.f32.mrb[13].mxu0 }
 0x107   : > { %v595_v57 = vadd.f32 %v7158_v61, %v594_v56  ;;  %v6027_v58 = vpop.f32.mrb[14].mxu0  ;;  %6058 = vmatprep.mubr.msk.bf16.mxu1 %vm758_vm3, %v729_v53 }
 0x108   : > { %v606_v59 = vadd.f32 %v6027_v58, %v7158_v61  ;;  %v597_v60 = vpop.f32.mrb[15].mxu0  ;;  %6059 = vmatmul.mubr.msk.bf16.gmra.mrb[12].mxu1 %vm758_vm3, %v730_v52  ;;  %v703_v63 = vmax.f32 %v603_v55, 0.0 }
 0x109   : > { %v598_v62 = vadd.f32 %v7158_v61, %v597_v60  ;;  %v701_v1 = vmax.f32 %v595_v57, 0.0 }
 0x10a   : > { %v704_v0 = vmax.f32 %v606_v59, 0.0 }
 0x10b   : > { %v702_v2 = vmax.f32 %v598_v62, 0.0 }
 0x10c   : > { %v732_v3 = vpack.c.bf16 %v704_v0, %v703_v63 }
 0x10d   : > { %v731_v4 = vpack.c.bf16 %v702_v2, %v701_v1  ;;  %v6030_v5 = vpop.f32.mrb[16].mxu0  ;;  %v7223_v1 = vld [vmem:[%s10846_s4] ss:$0 sm:$0xff] }
 0x10e   : > { %v619_v6 = vadd.f32 %v6030_v5, %v7158_v61  ;;  %v610_v7 = vpop.f32.mrb[17].mxu0 }
 0x10f   : > { %v611_v8 = vadd.f32 %v7158_v61, %v610_v7  ;;  %v6031_v9 = vpop.f32.mrb[18].mxu0  ;;  %6062 = vmatprep.mubr.msk.bf16.mxu1 %vm758_vm3, %v731_v4 }
 0x110   : > { %v622_v10 = vadd.f32 %v6031_v9, %v7158_v61  ;;  %v613_v11 = vpop.f32.mrb[19].mxu0  ;;  %6063 = vmatmul.mubr.msk.bf16.gmra.mrb[16].mxu1 %vm758_vm3, %v732_v3  ;;  %v707_v13 = vmax.f32 %v619_v6, 0.0 }
 0x111   : > { %v614_v12 = vadd.f32 %v7158_v61, %v613_v11  ;;  %v705_v15 = vmax.f32 %v611_v8, 0.0 }
 0x112   : > { %v708_v14 = vmax.f32 %v622_v10, 0.0 }
 0x113   : > { %v706_v16 = vmax.f32 %v614_v12, 0.0 }
 0x114   : > { %v734_v17 = vpack.c.bf16 %v708_v14, %v707_v13 }
 0x115   : > { %v733_v18 = vpack.c.bf16 %v706_v16, %v705_v15  ;;  %v6034_v19 = vpop.f32.mrb[20].mxu0 }
 0x116   : > { %v635_v20 = vadd.f32 %v6034_v19, %v7158_v61  ;;  %v626_v21 = vpop.f32.mrb[21].mxu0 }
 0x117   : > { %v627_v22 = vadd.f32 %v7158_v61, %v626_v21  ;;  %v6035_v23 = vpop.f32.mrb[22].mxu0  ;;  %6066 = vmatprep.mubr.msk.bf16.mxu1 %vm758_vm3, %v733_v18 }
 0x118   : > { %v711_v24 = vmax.f32 %v635_v20, 0.0  ;;  %v638_v25 = vadd.f32 %v6035_v23, %v7158_v61  ;;  %v629_v26 = vpop.f32.mrb[23].mxu0  ;;  %6067 = vmatmul.mubr.msk.bf16.gmra.mrb[20].mxu1 %vm758_vm3, %v734_v17 }
 0x119   : > { %v709_v27 = vmax.f32 %v627_v22, 0.0  ;;  %v630_v28 = vadd.f32 %v7158_v61, %v629_v26 }
 0x11a   : > { %v712_v29 = vmax.f32 %v638_v25, 0.0 }
 0x11b   : > { %v710_v30 = vmax.f32 %v630_v28, 0.0 }
 0x11c   : > { %v736_v31 = vpack.c.bf16 %v712_v29, %v711_v24 }
 0x11d   : > { %v735_v32 = vpack.c.bf16 %v710_v30, %v709_v27  ;;  %v6038_v33 = vpop.f32.mrb[24].mxu0 }
 0x11e   : > { %v651_v34 = vadd.f32 %v6038_v33, %v7158_v61  ;;  %v642_v35 = vpop.f32.mrb[25].mxu0 }
 0x11f   : > { %v643_v36 = vadd.f32 %v7158_v61, %v642_v35  ;;  %v6039_v37 = vpop.f32.mrb[26].mxu0  ;;  %6070 = vmatprep.mubr.msk.bf16.mxu1 %vm758_vm3, %v735_v32 }
 0x120   : > { %v715_v38 = vmax.f32 %v651_v34, 0.0  ;;  %v654_v39 = vadd.f32 %v6039_v37, %v7158_v61  ;;  %v645_v40 = vpop.f32.mrb[27].mxu0  ;;  %6071 = vmatmul.mubr.msk.bf16.gmra.mrb[24].mxu1 %vm758_vm3, %v736_v31 }
 0x121   : > { %v713_v41 = vmax.f32 %v643_v36, 0.0  ;;  %v646_v42 = vadd.f32 %v7158_v61, %v645_v40 }
 0x122   : > { %v716_v44 = vmax.f32 %v654_v39, 0.0 }
 0x123   : > { %v714_v45 = vmax.f32 %v646_v42, 0.0 }
 0x124   : > { %v738_v47 = vpack.c.bf16 %v716_v44, %v715_v38 }
 0x125   : > { %v737_v48 = vpack.c.bf16 %v714_v45, %v713_v41  ;;  %v6042_v49 = vpop.f32.mrb[28].mxu0 }
 0x126   : > { %v667_v50 = vadd.f32 %v6042_v49, %v7158_v61  ;;  %v658_v51 = vpop.f32.mrb[29].mxu0 }
 0x127   : > { %v659_v52 = vadd.f32 %v7158_v61, %v658_v51  ;;  %v6043_v53 = vpop.f32.mrb[30].mxu0  ;;  %6074 = vmatprep.mubr.msk.bf16.mxu1 %vm758_vm3, %v737_v48 }
 0x128   : > { %v719_v54 = vmax.f32 %v667_v50, 0.0  ;;  %v670_v55 = vadd.f32 %v6043_v53, %v7158_v61  ;;  %v661_v56 = vpop.f32.mrb[31].mxu0  ;;  %6075 = vmatmul.mubr.msk.bf16.gmra.mrb[28].mxu1 %vm758_vm3, %v738_v47 }
 0x129   : > { %v717_v57 = vmax.f32 %v659_v52, 0.0  ;;  %v662_v58 = vadd.f32 %v7158_v61, %v661_v56 }
 0x12a   : > { %v720_v59 = vmax.f32 %v670_v55, 0.0 }
 0x12b   : > { %v718_v60 = vmax.f32 %v662_v58, 0.0 }
 0x12c   : > { %v740_v62 = vpack.c.bf16 %v720_v59, %v719_v54 }
 0x12d   : > { %v739_v63 = vpack.c.bf16 %v718_v60, %v717_v57 }
 0x12f   : > { %6078 = vmatprep.mubr.msk.bf16.mxu1 %vm758_vm3, %v739_v63 }
 0x130   : > { %6079 = vmatmul.mubr.msk.bf16.gmra.mrb[32].mxu1 %vm758_vm3, %v740_v62 }
 0x131   : > { %6082 = vmatprep.mubr.msk.bf16.mxu1 %vm758_vm3, %v7181_v46 }
 0x138   : > { %6083 = vmatmul.mubr.msk.bf16.gmra.mrb[36].mxu1 %vm758_vm3, %v7177_v43 }
 0x1cb   : > { %v6052_v0 = vpop.f32.mrb[4].mxu1 }
 0x1cc   : > { %v847_v61 = vpop.f32.mrb[5].mxu1  ;;  %v856_v3 = vadd.f32 %v6052_v0, %v7223_v1 }
 0x1cd   : > { %v6053_v2 = vpop.f32.mrb[6].mxu1  ;;  %v848_v6 = vadd.f32 %v7223_v1, %v847_v61 }
 0x1ce   : > { %v859_v4 = vadd.f32 %v6053_v2, %v7223_v1  ;;  %v850_v5 = vpop.f32.mrb[7].mxu1 }
 0x1cf   : > { %v851_v46 = vadd.f32 %v7223_v1, %v850_v5 }
 0x1d0   : > { %v991_v7 = vpack.c.bf16 %v859_v4, %v856_v3 }
 0x1d1   : > { %v990_v43 = vpack.c.bf16 %v851_v46, %v848_v6 }
 0x1d2   : > { %1010 = vst.msk [vmem:[#allocation2 + $0x8] sm:$0xff] %vm1008_vm4, %v991_v7 }
 0x1d3   : > { %1009 = vst.msk [vmem:[#allocation2] sm:$0xff] %vm1008_vm4, %v990_v43  ;;  %v6056_v8 = vpop.f32.mrb[8].mxu1 }
 0x1d4   : > { %v863_v9 = vpop.f32.mrb[9].mxu1  ;;  %v872_v11 = vadd.f32 %v6056_v8, %v7223_v1 }
 0x1d5   : > { %v6057_v10 = vpop.f32.mrb[10].mxu1  ;;  %v864_v14 = vadd.f32 %v7223_v1, %v863_v9 }
 0x1d6   : > { %v875_v12 = vadd.f32 %v6057_v10, %v7223_v1  ;;  %v866_v13 = vpop.f32.mrb[11].mxu1 }
 0x1d7   : > { %v867_v15 = vadd.f32 %v7223_v1, %v866_v13 }
 0x1d8   : > { %v993_v16 = vpack.c.bf16 %v875_v12, %v872_v11 }
 0x1d9   : > { %v992_v17 = vpack.c.bf16 %v867_v15, %v864_v14  ;;  %v7235_v18 = vld [vmem:[#allocation2 + $0x8] sm:$0xff] }
 0x1da   : > { %1012 = vst.msk [vmem:[#allocation2 + $0x18] sm:$0xff] %vm1008_vm4, %v993_v16  ;;  %1086 = vrot.lane.b32.xlu1 %v7235_v18, %s7006_s14  ;;  %v7240_v19 = vld [vmem:[#allocation2] sm:$0xff] }
 0x1db   : > { %1011 = vst.msk [vmem:[#allocation2 + $0x10] sm:$0xff] %vm1008_vm4, %v992_v17  ;;  %v6060_v20 = vpop.f32.mrb[12].mxu1  ;;  %1084 = vrot.lane.b32.xlu0 %v7240_v19, %s7006_s14  ;;  %5751 = vmatprep.mubr.msk.bf16.mxu0 %vm1120_vm5, %v7240_v19 }
 0x1dc   : > { %6090 = vmatprep.mubr.msk.bf16.mxu1 %vm1120_vm5, %v7240_v19  ;;  %v879_v21 = vpop.f32.mrb[13].mxu1  ;;  %v888_v23 = vadd.f32 %v6060_v20, %v7223_v1 }
 0x1dd   : > { %v6061_v22 = vpop.f32.mrb[14].mxu1  ;;  %v880_v26 = vadd.f32 %v7223_v1, %v879_v21 }
 0x1de   : > { %v891_v24 = vadd.f32 %v6061_v22, %v7223_v1  ;;  %v882_v25 = vpop.f32.mrb[15].mxu1 }
 0x1df   : > { %v883_v27 = vadd.f32 %v7223_v1, %v882_v25 }
 0x1e0   : > { %v995_v28 = vpack.c.bf16 %v891_v24, %v888_v23 }
 0x1e1   : > { %v994_v29 = vpack.c.bf16 %v883_v27, %v880_v26  ;;  %v7292_v11 = vld [vmem:[#allocation2 + $0x18] sm:$0xff] }
 0x1e2   : > { %1014 = vst.msk [vmem:[#allocation2 + $0x28] sm:$0xff] %vm1008_vm4, %v995_v28  ;;  %v7284_v7 = vld [vmem:[#allocation2 + $0x10] sm:$0xff] }
 0x1e3   : > { %1013 = vst.msk [vmem:[#allocation2 + $0x20] sm:$0xff] %vm1008_vm4, %v994_v29  ;;  %v6064_v30 = vpop.f32.mrb[16].mxu1 }
 0x1e4   : > { %v895_v31 = vpop.f32.mrb[17].mxu1  ;;  %v904_v33 = vadd.f32 %v6064_v30, %v7223_v1 }
 0x1e5   : > { %v6065_v32 = vpop.f32.mrb[18].mxu1  ;;  %v896_v36 = vadd.f32 %v7223_v1, %v895_v31 }
 0x1e6   : > { %v907_v34 = vadd.f32 %v6065_v32, %v7223_v1  ;;  %v898_v35 = vpop.f32.mrb[19].mxu1 }
 0x1e7   : > { %v899_v37 = vadd.f32 %v7223_v1, %v898_v35 }
 0x1e8   : > { %v997_v38 = vpack.c.bf16 %v907_v34, %v904_v33 }
 0x1e9   : > { %v996_v39 = vpack.c.bf16 %v899_v37, %v896_v36  ;;  %v7314_v27 = vld [vmem:[#allocation2 + $0x28] sm:$0xff] }
 0x1ea   : > { %1016 = vst.msk [vmem:[#allocation2 + $0x38] sm:$0xff] %vm1008_vm4, %v997_v38  ;;  %v7304_v22 = vld [vmem:[#allocation2 + $0x20] sm:$0xff] }
 0x1eb   : > { %1015 = vst.msk [vmem:[#allocation2 + $0x30] sm:$0xff] %vm1008_vm4, %v996_v39  ;;  %v6068_v40 = vpop.f32.mrb[20].mxu1 }
 0x1ec   : > { %v911_v41 = vpop.f32.mrb[21].mxu1  ;;  %v920_v44 = vadd.f32 %v6068_v40, %v7223_v1 }
 0x1ed   : > { %v6069_v42 = vpop.f32.mrb[22].mxu1  ;;  %v912_v48 = vadd.f32 %v7223_v1, %v911_v41 }
 0x1ee   : > { %v923_v45 = vadd.f32 %v6069_v42, %v7223_v1  ;;  %v914_v47 = vpop.f32.mrb[23].mxu1 }
 0x1ef   : > { %v915_v49 = vadd.f32 %v7223_v1, %v914_v47 }
 0x1f0   : > { %v999_v50 = vpack.c.bf16 %v923_v45, %v920_v44 }
 0x1f1   : > { %v998_v51 = vpack.c.bf16 %v915_v49, %v912_v48  ;;  %v7339_v41 = vld [vmem:[#allocation2 + $0x38] sm:$0xff] }
 0x1f2   : > { %1018 = vst.msk [vmem:[#allocation2 + $0x48] sm:$0xff] %vm1008_vm4, %v999_v50  ;;  %v7326_v36 = vld [vmem:[#allocation2 + $0x30] sm:$0xff] }
 0x1f3   : > { %1017 = vst.msk [vmem:[#allocation2 + $0x40] sm:$0xff] %vm1008_vm4, %v998_v51  ;;  %v6072_v52 = vpop.f32.mrb[24].mxu1 }
 0x1f4   : > { %v936_v53 = vadd.f32 %v6072_v52, %v7223_v1  ;;  %v927_v54 = vpop.f32.mrb[25].mxu1 }
 0x1f5   : > { %v928_v55 = vadd.f32 %v7223_v1, %v927_v54  ;;  %v6073_v56 = vpop.f32.mrb[26].mxu1 }
 0x1f6   : > { %v939_v57 = vadd.f32 %v6073_v56, %v7223_v1  ;;  %v930_v58 = vpop.f32.mrb[27].mxu1 }
 0x1f7   : > { %v931_v59 = vadd.f32 %v7223_v1, %v930_v58 }
 0x1f8   : > { %v1001_v60 = vpack.c.bf16 %v939_v57, %v936_v53 }
 0x1f9   : > { %v1000_v62 = vpack.c.bf16 %v931_v59, %v928_v55  ;;  %v7271_v63 = vld [vmem:[#allocation2 + $0x48] sm:$0xff] }
 0x1fa   : > { %1020 = vst.msk [vmem:[#allocation2 + $0x58] sm:$0xff] %vm1008_vm4, %v1001_v60  ;;  %1102 = vrot.lane.b32.xlu1 %v7271_v63, %s7006_s14  ;;  %v7276_v0 = vld [vmem:[#allocation2 + $0x40] sm:$0xff] }
 0x1fb   : > { %1019 = vst.msk [vmem:[#allocation2 + $0x50] sm:$0xff] %vm1008_vm4, %v1000_v62  ;;  %v6076_v61 = vpop.f32.mrb[28].mxu1  ;;  %1100 = vrot.lane.b32.xlu0 %v7276_v0, %s7006_s14 }
 0x1fc   : > { %v952_v2 = vadd.f32 %v6076_v61, %v7223_v1  ;;  %v943_v3 = vpop.f32.mrb[29].mxu1 }
 0x1fd   : > { %v944_v4 = vadd.f32 %v7223_v1, %v943_v3  ;;  %v6077_v5 = vpop.f32.mrb[30].mxu1 }
 0x1fe   : > { %v955_v6 = vadd.f32 %v6077_v5, %v7223_v1  ;;  %v946_v46 = vpop.f32.mrb[31].mxu1 }
 0x1ff   : > { %v947_v43 = vadd.f32 %v7223_v1, %v946_v46  ;;  %1088 = vrot.lane.b32.xlu0 %v7284_v7, %s7006_s14 }
 0x200   : > { %v1003_v8 = vpack.c.bf16 %v955_v6, %v952_v2 }
 0x201   : > { %v1002_v9 = vpack.c.bf16 %v947_v43, %v944_v4  ;;  %v7302_v21 = vld [vmem:[#allocation2 + $0x58] sm:$0xff] }
 0x202   : > { %1022 = vst.msk [vmem:[#allocation2 + $0x68] sm:$0xff] %vm1008_vm4, %v1003_v8  ;;  %v7290_v10 = vld [vmem:[#allocation2 + $0x50] sm:$0xff] }
 0x203   : > { %1021 = vst.msk [vmem:[#allocation2 + $0x60] sm:$0xff] %vm1008_vm4, %v1002_v9  ;;  %v6080_v12 = vpop.f32.mrb[32].mxu1  ;;  %1104 = vrot.lane.b32.xlu1 %v7290_v10, %s7006_s14  ;;  %1090 = vrot.lane.b32.xlu0 %v7292_v11, %s7006_s14 }
 0x204   : > { %v968_v13 = vadd.f32 %v6080_v12, %v7223_v1  ;;  %v959_v14 = vpop.f32.mrb[33].mxu1 }
 0x205   : > { %v960_v15 = vadd.f32 %v7223_v1, %v959_v14  ;;  %v6081_v16 = vpop.f32.mrb[34].mxu1 }
 0x206   : > { %v971_v17 = vadd.f32 %v6081_v16, %v7223_v1  ;;  %v962_v20 = vpop.f32.mrb[35].mxu1 }
 0x207   : > { %v963_v23 = vadd.f32 %v7223_v1, %v962_v20  ;;  %1106 = vrot.lane.b32.xlu1 %v7302_v21, %s7006_s14  ;;  %1092 = vrot.lane.b32.xlu0 %v7304_v22, %s7006_s14 }
 0x208   : > { %v1005_v24 = vpack.c.bf16 %v971_v17, %v968_v13  ;;  %v10855_v13 = vmov 0  }
 0x209   : > { %v1004_v25 = vpack.c.bf16 %v963_v23, %v960_v15  ;;  %v7322_v31 = vld [vmem:[#allocation2 + $0x68] sm:$0xff] }
 0x20a   : > { %1024 = vst.msk [vmem:[#allocation2 + $0x78] sm:$0xff] %vm1008_vm4, %v1005_v24  ;;  %v7312_v26 = vld [vmem:[#allocation2 + $0x60] sm:$0xff] }
 0x20b   : > { %1023 = vst.msk [vmem:[#allocation2 + $0x70] sm:$0xff] %vm1008_vm4, %v1004_v25  ;;  %v6084_v28 = vpop.f32.mrb[36].mxu1  ;;  %1108 = vrot.lane.b32.xlu1 %v7312_v26, %s7006_s14  ;;  %1094 = vrot.lane.b32.xlu0 %v7314_v27, %s7006_s14 }
 0x20c   : > { %v984_v29 = vadd.f32 %v6084_v28, %v7223_v1  ;;  %v975_v30 = vpop.f32.mrb[37].mxu1 }
 0x20d   : > { %v976_v32 = vadd.f32 %v7223_v1, %v975_v30  ;;  %v6085_v33 = vpop.f32.mrb[38].mxu1 }
 0x20e   : > { %v987_v34 = vadd.f32 %v6085_v33, %v7223_v1  ;;  %v978_v35 = vpop.f32.mrb[39].mxu1 }
 0x20f   : > { %v979_v37 = vadd.f32 %v7223_v1, %v978_v35  ;;  %1110 = vrot.lane.b32.xlu1 %v7322_v31, %s7006_s14  ;;  %1096 = vrot.lane.b32.xlu0 %v7326_v36, %s7006_s14 }
 0x210   : > { %v1007_v38 = vpack.c.bf16 %v987_v34, %v984_v29 }
 0x211   : > { %v1006_v39 = vpack.c.bf16 %v979_v37, %v976_v32  ;;  %v7351_v44 = vld [vmem:[#allocation2 + $0x78] sm:$0xff] }
 0x212   : > { %1026 = vst.msk [vmem:[#allocation2 + $0x88] sm:$0xff] %vm1008_vm4, %v1007_v38  ;;  %v7334_v40 = vld [vmem:[#allocation2 + $0x70] sm:$0xff] }
 0x213   : > { %1025 = vst.msk [vmem:[#allocation2 + $0x80] sm:$0xff] %vm1008_vm4, %v1006_v39  ;;  %1112 = vrot.lane.b32.xlu1 %v7334_v40, %s7006_s14 }
 0x217   : > { %1098 = vrot.lane.b32.xlu1 %v7339_v41, %s7006_s14 }
 0x219   : > { %v7343_v1 = vld [vmem:[#allocation2 + $0x88] sm:$0xff] }
 0x21a   : > { %v7345_v42 = vld [vmem:[#allocation2 + $0x80] sm:$0xff] }
 0x21b   : > { %1118 = vrot.lane.b32.xlu1 %v7343_v1, %s7006_s14  ;;  %1116 = vrot.lane.b32.xlu0 %v7345_v42, %s7006_s14 }
 0x21f   : > { %2360 = vrot.lane.b32.xlu1 %v7235_v18, %s7007_s15  ;;  %1114 = vrot.lane.b32.xlu0 %v7351_v44, %s7006_s14 }
 0x223   : > { %2364 = vrot.lane.b32.xlu1 %v7292_v11, %s7007_s15  ;;  %2358 = vrot.lane.b32.xlu0 %v7240_v19, %s7007_s15 }
 0x227   : > { %2368 = vrot.lane.b32.xlu1 %v7314_v27, %s7007_s15  ;;  %2362 = vrot.lane.b32.xlu0 %v7284_v7, %s7007_s15 }
 0x22b   : > { %2372 = vrot.lane.b32.xlu1 %v7339_v41, %s7007_s15  ;;  %2366 = vrot.lane.b32.xlu0 %v7304_v22, %s7007_s15 }
 0x22f   : > { %2376 = vrot.lane.b32.xlu1 %v7271_v63, %s7007_s15  ;;  %2370 = vrot.lane.b32.xlu0 %v7326_v36, %s7007_s15 }
 0x233   : > { %2380 = vrot.lane.b32.xlu1 %v7302_v21, %s7007_s15  ;;  %2374 = vrot.lane.b32.xlu0 %v7276_v0, %s7007_s15 }
 0x237   : > { %2384 = vrot.lane.b32.xlu1 %v7322_v31, %s7007_s15  ;;  %2378 = vrot.lane.b32.xlu0 %v7290_v10, %s7007_s15 }
 0x23b   : > { %2388 = vrot.lane.b32.xlu1 %v7351_v44, %s7007_s15  ;;  %2382 = vrot.lane.b32.xlu0 %v7312_v26, %s7007_s15 }
 0x23f   : > { %2970 = vrot.lane.b32.xlu1 %v7240_v19, %s7008_s16  ;;  %2386 = vrot.lane.b32.xlu0 %v7334_v40, %s7007_s15 }
 0x243   : > { %2972 = vrot.lane.b32.xlu1 %v7235_v18, %s7008_s16  ;;  %2392 = vrot.lane.b32.xlu0 %v7343_v1, %s7007_s15 }
 0x247   : > { %2974 = vrot.lane.b32.xlu1 %v7284_v7, %s7008_s16  ;;  %2986 = vrot.lane.b32.xlu0 %v7276_v0, %s7008_s16 }
 0x24b   : > { %2976 = vrot.lane.b32.xlu1 %v7292_v11, %s7008_s16  ;;  %2988 = vrot.lane.b32.xlu0 %v7271_v63, %s7008_s16 }
 0x24c   : > { %v1087_v47 = vpop.permute.xlu1 %1086 }
 0x24d   : > { %v1085_v45 = vpop.permute.xlu0 %1084  ;;  %v1179_v53 = vsel %vm1120_vm5, %v1087_v47, 0 }
 0x24e   : > { %v1176_v49 = vsel %vm1120_vm5, %v1085_v45, 0 }
 0x24f   : > { %2978 = vrot.lane.b32.xlu1 %v7304_v22, %s7008_s16  ;;  %2990 = vrot.lane.b32.xlu0 %v7290_v10, %s7008_s16 }
 0x253   : > { %2980 = vrot.lane.b32.xlu1 %v7314_v27, %s7008_s16  ;;  %2992 = vrot.lane.b32.xlu0 %v7302_v21, %s7008_s16 }
 0x257   : > { %2996 = vrot.lane.b32.xlu1 %v7322_v31, %s7008_s16  ;;  %2994 = vrot.lane.b32.xlu0 %v7312_v26, %s7008_s16 }
 0x25b   : > { %2390 = vrot.lane.b32.xlu1 %v7345_v42, %s7007_s15 }
 0x26c   : > { %v1103_v50 = vpop.permute.xlu1 %1102 }
 0x26d   : > { %v1101_v48 = vpop.permute.xlu0 %1100 }
 0x26e   : > { %6327 = vmatprep.subr.msk.bf16.mxu0 %vm1120_vm5, %v1101_v48 }
 0x26f   : > { %5736 = vmatpush3.bf16.xpose.msra.mxu0 %v1176_v49 }
 0x270   : > { %6328 = vmatprep.subr.msk.bf16.mxu0 %vm1120_vm5, %v1103_v50 }
 0x271   : > { %v1089_v51 = vpop.permute.xlu0 %1088 }
 0x272   : > { %v1182_v58 = vsel %vm1120_vm5, %v1089_v51, 0 }
 0x275   : > { %v1105_v52 = vpop.permute.xlu1 %1104  ;;  %v1091_v54 = vpop.permute.xlu0 %1090 }
 0x276   : > { %v1185_v61 = vsel %vm1120_vm5, %v1091_v54, 0 }
 0x277   : > { %5738 = vmatpush3.bf16.xpose.msra.mxu0 %v1179_v53 }
 0x278   : > { %6329 = vmatprep.subr.msk.bf16.mxu0 %vm1120_vm5, %v1105_v52 }
 0x279   : > { %v1107_v55 = vpop.permute.xlu1 %1106  ;;  %v1093_v56 = vpop.permute.xlu0 %1092 }
 0x27a   : > { %v1188_v6 = vsel %vm1120_vm5, %v1093_v56, 0 }
 0x27d   : > { %v1109_v57 = vpop.permute.xlu1 %1108  ;;  %v1095_v60 = vpop.permute.xlu0 %1094 }
 0x27e   : > { %v1191_v12 = vsel %vm1120_vm5, %v1095_v60, 0 }
 0x27f   : > { %5740 = vmatpush3.bf16.xpose.msra.mxu0 %v1182_v58 }
 0x280   : > { %6330 = vmatprep.subr.msk.bf16.mxu0 %vm1120_vm5, %v1107_v55 }
 0x281   : > { %v1111_v59 = vpop.permute.xlu1 %1110  ;;  %v1097_v2 = vpop.permute.xlu0 %1096 }
 0x282   : > { %v1194_v17 = vsel %vm1120_vm5, %v1097_v2, 0 }
 0x285   : > { %v1113_v62 = vpop.permute.xlu1 %1112 }
 0x287   : > { %5742 = vmatpush3.bf16.xpose.msra.mxu0 %v1185_v61 }
 0x288   : > { %6331 = vmatprep.subr.msk.bf16.mxu0 %vm1120_vm5, %v1109_v57 }
 0x289   : > { %v1099_v3 = vpop.permute.xlu1 %1098 }
 0x28a   : > { %v1197_v28 = vsel %vm1120_vm5, %v1099_v3, 0 }
 0x28d   : > { %v1119_v4 = vpop.permute.xlu1 %1118  ;;  %v1117_v5 = vpop.permute.xlu0 %1116 }
 0x28e   : > { %6335 = vmatprep.subr.msk.bf16.mxu1 %vm1120_vm5, %v1117_v5  ;;  %v1224_v46 = vsel %vm1120_vm5, %v1117_v5, 0  ;;  %v1227_v8 = vsel %vm1120_vm5, %v1119_v4, 0 }
 0x28f   : > { %5744 = vmatpush3.bf16.xpose.msra.mxu0 %v1188_v6  ;;  %6087 = vmatpush3.bf16.xpose.msra.mxu1 %v1224_v46 }
 0x290   : > { %6332 = vmatprep.subr.msk.bf16.mxu0 %vm1120_vm5, %v1111_v59  ;;  %6336 = vmatprep.subr.msk.bf16.mxu1 %vm1120_vm5, %v1119_v4 }
 0x291   : > { %v2361_v43 = vpop.permute.xlu1 %2360  ;;  %v1115_v14 = vpop.permute.xlu0 %1114 }
 0x295   : > { %v2365_v9 = vpop.permute.xlu1 %2364  ;;  %v2359_v20 = vpop.permute.xlu0 %2358 }
 0x297   : > { %5746 = vmatpush3.bf16.xpose.msra.mxu0 %v1191_v12  ;;  %6089 = vmatpush3.bf16.xpose.msra.mxu1 %v1227_v8 }
 0x298   : > { %6333 = vmatprep.subr.msk.bf16.mxu0 %vm1120_vm5, %v1113_v62  ;;  %2466 = vmatprep.subr.bf16.mxu1 %v10855_v13 }
 0x299   : > { %v2369_v15 = vpop.permute.xlu1 %2368  ;;  %v2363_v24 = vpop.permute.xlu0 %2362 }
 0x29d   : > { %v2373_v16 = vpop.permute.xlu1 %2372  ;;  %v2367_v30 = vpop.permute.xlu0 %2366 }
 0x29e   : > { %6091 = vmatmul.mubr.msk.bf16.vlgmr.msra.gmra.mrb[40].mxu1 %vm1120_vm5, %v7235_v18 }
 0x29f   : > { %5748 = vmatpush3.bf16.xpose.msra.mxu0 %v1194_v17  ;;  %6094 = vmatprep.mubr.msk.bf16.mxu1 %vm1120_vm5, %v7284_v7 }
 0x2a0   : > { %2467 = vmatpush1.bf16.msra.mxu1 %v2359_v20  ;;  %6334 = vmatprep.subr.msk.bf16.mxu0 %vm1120_vm5, %v1115_v14 }
 0x2a1   : > { %v2377_v23 = vpop.permute.xlu1 %2376  ;;  %2468 = vmatprep.subr.bf16.mxu1 %v10855_v13  ;;  %v2371_v33 = vpop.permute.xlu0 %2370 }
 0x2a4   : > { %2469 = vmatpush1.bf16.msra.mxu1 %v2361_v43 }
 0x2a5   : > { %v2381_v25 = vpop.permute.xlu1 %2380  ;;  %2470 = vmatprep.subr.bf16.mxu1 %v10855_v13 }
 0x2a6   : > { %6095 = vmatmul.mubr.msk.bf16.gmra.mrb[44].mxu1 %vm1120_vm5, %v7292_v11 }
 0x2a7   : > { %5750 = vmatpush3.bf16.xpose.msra.mxu0 %v1197_v28  ;;  %6098 = vmatprep.mubr.msk.bf16.mxu1 %vm1120_vm5, %v7304_v22 }
 0x2a8   : > { %2471 = vmatpush1.bf16.msra.mxu1 %v2363_v24 }
 0x2a9   : > { %v2385_v29 = vpop.permute.xlu1 %2384  ;;  %2472 = vmatprep.subr.bf16.mxu1 %v10855_v13 }
 0x2ac   : > { %2473 = vmatpush1.bf16.msra.mxu1 %v2365_v9 }
 0x2ad   : > { %v7447_v32 = vpop.permute.xlu1 %2388  ;;  %2474 = vmatprep.subr.bf16.mxu1 %v10855_v13 }
 0x2ae   : > { %5752 = vmatmul.mubr.msk.bf16.vlgmr.msra.gmra.mrb[32].mxu0 %vm1120_vm5, %v7240_v19  ;;  %6099 = vmatmul.mubr.msk.bf16.gmra.mrb[48].mxu1 %vm1120_vm5, %v7314_v27  ;;  %v2375_v19 = vpop.permute.xlu0 %2374 }
 0x2af   : > { %5753 = vmatprep.mubr.msk.bf16.mxu0 %vm1120_vm5, %v7235_v18  ;;  %6102 = vmatprep.mubr.msk.bf16.mxu1 %vm1120_vm5, %v7326_v36 }
 0x2b0   : > { %2475 = vmatpush1.bf16.msra.mxu1 %v2367_v30 }
 0x2b1   : > { %v7458_v34 = vpop.permute.xlu1 %2970  ;;  %2476 = vmatprep.subr.bf16.mxu1 %v10855_v13 }
 0x2b2   : > { %11048 = vst [vmem:[#allocation4_spill] sm:$0xff] %v7458_v34  ;;  %v2379_v38 = vpop.permute.xlu0 %2378 }
 0x2b4   : > { %2477 = vmatpush1.bf16.msra.mxu1 %v2369_v15 }
 0x2b5   : > { %v7461_v35 = vpop.permute.xlu1 %2972  ;;  %2478 = vmatprep.subr.bf16.mxu1 %v10855_v13 }
 0x2b6   : > { %11049 = vst [vmem:[#allocation5_spill] sm:$0xff] %v7461_v35  ;;  %5754 = vmatmul.mubr.msk.bf16.gmra.mrb[36].mxu0 %vm1120_vm5, %v7235_v18  ;;  %6103 = vmatmul.mubr.msk.bf16.gmra.mrb[52].mxu1 %vm1120_vm5, %v7339_v41  ;;  %v2383_v45 = vpop.permute.xlu0 %2382 }
 0x2b7   : > { %5755 = vmatprep.mubr.msk.bf16.mxu0 %vm1120_vm5, %v7284_v7  ;;  %6106 = vmatprep.mubr.msk.bf16.mxu1 %vm1120_vm5, %v7276_v0 }
 0x2b8   : > { %2479 = vmatpush1.bf16.msra.mxu1 %v2371_v33 }
 0x2b9   : > { %v7472_v37 = vpop.permute.xlu1 %2974  ;;  %2480 = vmatprep.subr.bf16.mxu1 %v10855_v13 }
 0x2ba   : > { %11050 = vst [vmem:[#allocation6_spill] sm:$0xff] %v7472_v37 }
 0x2bc   : > { %2481 = vmatpush1.bf16.msra.mxu1 %v2373_v16 }
 0x2bd   : > { %v7475_v39 = vpop.permute.xlu1 %2976  ;;  %2482 = vmatprep.subr.bf16.mxu1 %v10855_v13 }
 0x2be   : > { %11051 = vst [vmem:[#allocation7_spill] sm:$0xff] %v7475_v39  ;;  %5756 = vmatmul.mubr.msk.bf16.gmra.mrb[40].mxu0 %vm1120_vm5, %v7284_v7  ;;  %6107 = vmatmul.mubr.msk.bf16.gmra.mrb[56].mxu1 %vm1120_vm5, %v7271_v63  ;;  %v2387_v7 = vpop.permute.xlu0 %2386 }
 0x2bf   : > { %5757 = vmatprep.mubr.msk.bf16.mxu0 %vm1120_vm5, %v7292_v11  ;;  %6110 = vmatprep.mubr.msk.bf16.mxu1 %vm1120_vm5, %v7290_v10 }
 0x2c0   : > { %2483 = vmatpush1.bf16.msra.mxu1 %v2375_v19 }
 0x2c1   : > { %v7486_v18 = vpop.permute.xlu1 %2978  ;;  %2484 = vmatprep.subr.bf16.mxu1 %v10855_v13 }
 0x2c2   : > { %11052 = vst [vmem:[#allocation8_spill] sm:$0xff] %v7486_v18 }
 0x2c4   : > { %2485 = vmatpush1.bf16.msra.mxu1 %v2377_v23 }
 0x2c5   : > { %v7489_v47 = vpop.permute.xlu1 %2980  ;;  %2486 = vmatprep.subr.bf16.mxu1 %v10855_v13 }
 0x2c6   : > { %11053 = vst [vmem:[#allocation9_spill] sm:$0xff] %v7489_v47  ;;  %5758 = vmatmul.mubr.msk.bf16.gmra.mrb[44].mxu0 %vm1120_vm5, %v7292_v11  ;;  %6111 = vmatmul.mubr.msk.bf16.gmra.mrb[60].mxu1 %vm1120_vm5, %v7302_v21  ;;  %v2393_v11 = vpop.permute.xlu0 %2392 }
 0x2c7   : > { %5759 = vmatprep.mubr.msk.bf16.mxu0 %vm1120_vm5, %v7304_v22  ;;  %6114 = vmatprep.mubr.msk.bf16.mxu1 %vm1120_vm5, %v7312_v26 }
 0x2c8   : > { %2487 = vmatpush1.bf16.msra.mxu1 %v2379_v38 }
 0x2c9   : > { %v7500_v48 = vpop.permute.xlu1 %2996  ;;  %2488 = vmatprep.subr.bf16.mxu1 %v10855_v13 }
 0x2ca   : > { %11054 = vst [vmem:[#allocation10_spill] sm:$0xff] %v7500_v48  ;;  %v2987_v50 = vpop.permute.xlu0 %2986 }
 0x2cc   : > { %2489 = vmatpush1.bf16.msra.mxu1 %v2381_v25 }
 0x2cd   : > { %v2391_v49 = vpop.permute.xlu1 %2390  ;;  %2490 = vmatprep.subr.bf16.mxu1 %v10855_v13 }
 0x2ce   : > { %5760 = vmatmul.mubr.msk.bf16.gmra.mrb[48].mxu0 %vm1120_vm5, %v7304_v22  ;;  %6115 = vmatmul.mubr.msk.bf16.gmra.mrb[64].mxu1 %vm1120_vm5, %v7322_v31 }
 0x2cf   : > { %6126 = vmatprep.subr.bf16.mxu0 %v2391_v49  ;;  %5761 = vmatprep.mubr.msk.bf16.mxu0 %vm1120_vm5, %v7314_v27 }
 0x2d0   : > { %6118 = vmatprep.mubr.msk.bf16.mxu1 %vm1120_vm5, %v7334_v40  ;;  %2491 = vmatpush1.bf16.msra.mxu1 %v2383_v45 }
 0x2d1   : > { %6127 = vmatpush3.bf16.msra.mxu0 %v2391_v49  ;;  %2492 = vmatprep.subr.bf16.mxu1 %v10855_v13 }
 0x2d2   : > { %6128 = vmatprep.subr.bf16.mxu0 %v2393_v11 }
 0x2d4   : > { %2493 = vmatpush1.bf16.msra.mxu1 %v2385_v29 }
 0x2d5   : > { %6129 = vmatpush3.bf16.msra.mxu0 %v2393_v11  ;;  %2494 = vmatprep.subr.bf16.mxu1 %v10855_v13 }
 0x2d6   : > { %6337 = vmatprep.subr.msk.bf16.mxu0 %vm1120_vm5, %v2987_v50  ;;  %5762 = vmatmul.mubr.msk.bf16.gmra.mrb[52].mxu0 %vm1120_vm5, %v7314_v27 }
 0x2d7   : > { %6119 = vmatmul.mubr.msk.bf16.gmra.mrb[68].mxu1 %vm1120_vm5, %v7351_v44  ;;  %5763 = vmatprep.mubr.msk.bf16.mxu0 %vm1120_vm5, %v7326_v36 }
 0x2d8   : > { %6122 = vmatprep.mubr.msk.bf16.mxu1 %vm1120_vm5, %v7345_v42  ;;  %2495 = vmatpush1.bf16.msra.mxu1 %v2387_v7 }
 0x2d9   : > { %2496 = vmatprep.subr.bf16.mxu1 %v10855_v13 }
 0x2dc   : > { %2497 = vmatpush1.bf16.msra.mxu1 %v7447_v32 }
 0x2de   : > { %5764 = vmatmul.mubr.msk.bf16.gmra.mrb[56].mxu0 %vm1120_vm5, %v7326_v36 }
 0x2df   : > { %6123 = vmatmul.mubr.msk.bf16.gmra.mrb[72].mxu1 %vm1120_vm5, %v7343_v1  ;;  %5765 = vmatprep.mubr.msk.bf16.mxu0 %vm1120_vm5, %v7339_v41 }
 0x2e6   : > { %5766 = vmatmul.mubr.msk.bf16.gmra.mrb[60].mxu0 %vm1120_vm5, %v7339_v41 }
 0x2e7   : > { %5767 = vmatprep.mubr.msk.bf16.mxu0 %vm1120_vm5, %v7276_v0 }
 0x2ee   : > { %5768 = vmatmul.mubr.msk.bf16.gmra.mrb[64].mxu0 %vm1120_vm5, %v7276_v0  ;;  %v10854_v0 = vlaneseq }
 0x2ef   : > { %5769 = vmatprep.mubr.msk.bf16.mxu0 %vm1120_vm5, %v7271_v63 }
 0x2f6   : > { %5770 = vmatmul.mubr.msk.bf16.gmra.mrb[68].mxu0 %vm1120_vm5, %v7271_v63 }
 0x2f7   : > { %5771 = vmatprep.mubr.msk.bf16.mxu0 %vm1120_vm5, %v7290_v10 }
 0x2fe   : > { %5772 = vmatmul.mubr.msk.bf16.gmra.mrb[72].mxu0 %vm1120_vm5, %v7290_v10 }
 0x2ff   : > { %5773 = vmatprep.mubr.msk.bf16.mxu0 %vm1120_vm5, %v7302_v21 }
 0x306   : > { %5774 = vmatmul.mubr.msk.bf16.gmra.mrb[76].mxu0 %vm1120_vm5, %v7302_v21 }
 0x307   : > { %5775 = vmatprep.mubr.msk.bf16.mxu0 %vm1120_vm5, %v7312_v26 }
 0x30e   : > { %5776 = vmatmul.mubr.msk.bf16.gmra.mrb[80].mxu0 %vm1120_vm5, %v7312_v26  ;;  %v7574_v26 = vshrl.u32 %v10854_v0, 7 }
 0x30f   : > { %5777 = vmatprep.mubr.msk.bf16.mxu0 %vm1120_vm5, %v7322_v31 }
 0x310   : > { %11055 = vst [vmem:[#allocation11_spill] sm:$0xff] %v7574_v26  ;;  %v1057_v51 = vsub.s32 1, %v7574_v26 }
 0x316   : > { %5778 = vmatmul.mubr.msk.bf16.gmra.mrb[84].mxu0 %vm1120_vm5, %v7322_v31  ;;  %v1061_v31 = vsub.s32 2, %v7574_v26 }
 0x317   : > { %5779 = vmatprep.mubr.msk.bf16.mxu0 %vm1120_vm5, %v7334_v40 }
 0x31e   : > { %5780 = vmatmul.mubr.msk.bf16.gmra.mrb[88].mxu0 %vm1120_vm5, %v7334_v40 }
 0x31f   : > { %5781 = vmatprep.mubr.msk.bf16.mxu0 %vm1120_vm5, %v7351_v44 }
 0x326   : > { %5782 = vmatmul.mubr.msk.bf16.gmra.mrb[92].mxu0 %vm1120_vm5, %v7351_v44  ;;  %v1027_v44 = vld [vmem:[%s10848_s6] sm:$0x7] }
 0x327   : > { %5783 = vmatprep.mubr.msk.bf16.mxu0 %vm1120_vm5, %v7345_v42  ;;  %v7586_v53 = vrot.slane %v1027_v44, %v1061_v31  ;;  %v7590_v55 = vrot.slane %v1027_v44, %v1057_v51 }
 0x329   : > { %11056 = vst [vmem:[#allocation12_spill] sm:$0xff] %v7586_v53  ;;  %11058 = vst [vmem:[#allocation14_spill] sm:$0xff] %v7590_v55 }
 0x32e   : > { %5784 = vmatmul.mubr.msk.bf16.gmra.mrb[96].mxu0 %vm1120_vm5, %v7345_v42  ;;  %v1053_v42 = vsub.s32 0, %v7574_v26 }
 0x32f   : > { %5785 = vmatprep.mubr.msk.bf16.mxu0 %vm1120_vm5, %v7343_v1 }
 0x330   : > { %v7588_v54 = vrot.slane %v1027_v44, %v1053_v42 }
 0x332   : > { %11057 = vst [vmem:[#allocation13_spill] sm:$0xff] %v7588_v54 }
 0x336   : > { %5786 = vmatmul.mubr.msk.bf16.gmra.mrb[100].mxu0 %vm1120_vm5, %v7343_v1 }
 0x371   : > { %v6092_v63 = vpop.f32.mrb[40].mxu1 }
 0x372   : > { %v1476_v10 = vpop.f32.mrb[41].mxu1  ;;  %v7629_v23 = vadd.f32 %v6092_v63, %v7586_v53 }
 0x373   : > { %v6093_v21 = vpop.f32.mrb[42].mxu1  ;;  %v7595_v58 = vadd.f32 %v1476_v10, %v7586_v53 }
 0x374   : > { %v1479_v22 = vpop.f32.mrb[43].mxu1  ;;  %11059 = vst [vmem:[#allocation15_spill] sm:$0xff] %v7629_v23  ;;  %v7642_v33 = vadd.f32 %v6093_v21, %v7586_v53  ;;  %v1631_v11 = vsel %vm1620_vm6, %v7629_v23, -inf }
 0x375   : > { %v7608_v4 = vadd.f32 %v1479_v22, %v7586_v53  ;;  %v1621_v9 = vsel %vm1620_vm6, %v7595_v58, -inf }
 0x376   : > { %11061 = vst [vmem:[#allocation17_spill] sm:$0xff] %v7642_v33  ;;  %v1636_v10 = vsel %vm1620_vm6, %v7642_v33, -inf }
 0x377   : > { %v1626_v15 = vsel %vm1620_vm6, %v7608_v4, -inf }
 0x379   : > { %v7576_v27 = vpop.f32.mrb[44].mxu1 }
 0x37a   : > { %v1492_v41 = vpop.f32.mrb[45].mxu1 }
 0x37b   : > { %v7583_v1 = vpop.f32.mrb[46].mxu1  ;;  %v7663_v42 = vadd.f32 %v1492_v41, %v7586_v53 }
 0x37c   : > { %v1495_v52 = vpop.f32.mrb[47].mxu1 }
 0x37d   : > { %11064 = vst [vmem:[#allocation20_spill] sm:$0xff] %v7663_v42 }
 0x381   : > { %v1263_v56 = vpop.f32.mrb[32].mxu0  ;;  %v7592_v57 = vpop.f32.mrb[48].mxu1 }
 0x382   : > { %v7598_v59 = vadd.f32 %v1263_v56, %v7588_v54  ;;  %v1265_v60 = vpop.f32.mrb[33].mxu0  ;;  %v7600_v62 = vpop.f32.mrb[49].mxu1 }
 0x383   : > { %v7603_v61 = vadd.f32 %v1265_v60, %v7590_v55  ;;  %v1267_v2 = vpop.f32.mrb[34].mxu0  ;;  %v7605_v3 = vpop.f32.mrb[50].mxu1 }
 0x384   : > { %v7611_v5 = vadd.f32 %v1267_v2, %v7588_v54  ;;  %v1269_v6 = vpop.f32.mrb[35].mxu0  ;;  %v7613_v46 = vpop.f32.mrb[51].mxu1 }
 0x385   : > { %v1619_v43 = vmax.f32 %v7598_v59, %v7603_v61  ;;  %v7618_v8 = vadd.f32 %v1269_v6, %v7590_v55 }
 0x387   : > { %v1625_v12 = vmax.f32 %v7611_v5, %v7618_v8  ;;  %v1622_v14 = vmax.f32 %v1619_v43, %v1621_v9  ;;  %v7676_v43 = vadd.f32 %v1495_v52, %v7586_v53 }
 0x389   : > { %v1273_v16 = vpop.f32.mrb[36].mxu0  ;;  %v7626_v17 = vpop.f32.mrb[52].mxu1  ;;  %1623 = vmax.xlane.f32.xlu0 %v1622_v14  ;;  %v1627_v20 = vmax.f32 %v1625_v12, %v1626_v15  ;;  %11067 = vst [vmem:[#allocation23_spill] sm:$0xff] %v7676_v43 }
 0x38a   : > { %v7632_v24 = vadd.f32 %v1273_v16, %v7588_v54  ;;  %v1275_v25 = vpop.f32.mrb[37].mxu0  ;;  %v7634_v28 = vpop.f32.mrb[53].mxu1  ;;  %v1641_v16 = vsel %vm1620_vm6, %v7663_v42, -inf }
 0x38b   : > { %v7637_v29 = vadd.f32 %v1275_v25, %v7590_v55  ;;  %v1277_v30 = vpop.f32.mrb[38].mxu0  ;;  %v7639_v32 = vpop.f32.mrb[54].mxu1  ;;  %1628 = vmax.xlane.f32.xlu1 %v1627_v20  ;;  %v1646_v25 = vsel %vm1620_vm6, %v7676_v43, -inf }
 0x38c   : > { %v7645_v19 = vadd.f32 %v1277_v30, %v7588_v54  ;;  %v1279_v38 = vpop.f32.mrb[39].mxu0  ;;  %v7647_v45 = vpop.f32.mrb[55].mxu1 }
 0x38d   : > { %11060 = vst [vmem:[#allocation16_spill] sm:$0xff] %v7637_v29  ;;  %v1630_v7 = vmax.f32 %v7632_v24, %v7637_v29  ;;  %v7652_v49 = vadd.f32 %v1279_v38, %v7590_v55 }
 0x38e   : > { %11062 = vst [vmem:[#allocation18_spill] sm:$0xff] %v7645_v19 }
 0x38f   : > { %11063 = vst [vmem:[#allocation19_spill] sm:$0xff] %v7652_v49  ;;  %v1635_v50 = vmax.f32 %v7645_v19, %v7652_v49  ;;  %v1632_v63 = vmax.f32 %v1630_v7, %v1631_v11 }
 0x391   : > { %v1283_v21 = vpop.f32.mrb[40].mxu0  ;;  %v7660_v22 = vpop.f32.mrb[56].mxu1  ;;  %1633 = vmax.xlane.f32.xlu0 %v1632_v63  ;;  %v1637_v31 = vmax.f32 %v1635_v50, %v1636_v10 }
 0x392   : > { %v7666_v44 = vadd.f32 %v1283_v21, %v7588_v54  ;;  %v1285_v51 = vpop.f32.mrb[41].mxu0  ;;  %v7668_v56 = vpop.f32.mrb[57].mxu1  ;;  %v7702_v21 = vadd.f32 %v7583_v1, %v7586_v53 }
 0x393   : > { %v7671_v60 = vadd.f32 %v1285_v51, %v7590_v55  ;;  %v1287_v2 = vpop.f32.mrb[42].mxu0  ;;  %v7673_v6 = vpop.f32.mrb[58].mxu1  ;;  %1638 = vmax.xlane.f32.xlu1 %v1637_v31 }
 0x394   : > { %11065 = vst [vmem:[#allocation21_spill] sm:$0xff] %v7666_v44  ;;  %v7679_v9 = vadd.f32 %v1287_v2, %v7588_v54  ;;  %v1289_v41 = vpop.f32.mrb[43].mxu0  ;;  %v7681_v12 = vpop.f32.mrb[59].mxu1  ;;  %11070 = vst [vmem:[#allocation26_spill] sm:$0xff] %v7702_v21 }
 0x395   : > { %11066 = vst [vmem:[#allocation22_spill] sm:$0xff] %v7671_v60  ;;  %v1640_v14 = vmax.f32 %v7666_v44, %v7671_v60  ;;  %v7686_v15 = vadd.f32 %v1289_v41, %v7590_v55 }
 0x396   : > { %11068 = vst [vmem:[#allocation24_spill] sm:$0xff] %v7679_v9 }
 0x397   : > { %11069 = vst [vmem:[#allocation25_spill] sm:$0xff] %v7686_v15  ;;  %v1645_v20 = vmax.f32 %v7679_v9, %v7686_v15  ;;  %v1642_v52 = vmax.f32 %v1640_v14, %v1641_v16  ;;  %v1656_v16 = vsel %vm1620_vm6, %v7702_v21, -inf }
 0x399   : > { %v1293_v30 = vpop.f32.mrb[44].mxu0  ;;  %v7694_v38 = vpop.f32.mrb[60].mxu1  ;;  %1643 = vmax.xlane.f32.xlu0 %v1642_v52  ;;  %v1647_v7 = vmax.f32 %v1645_v20, %v1646_v25 }
 0x39a   : > { %v1295_v11 = vpop.f32.mrb[45].mxu0  ;;  %v7696_v50 = vpop.f32.mrb[61].mxu1 }
 0x39b   : > { %v1297_v63 = vpop.f32.mrb[46].mxu0  ;;  %v7698_v10 = vpop.f32.mrb[62].mxu1  ;;  %1648 = vmax.xlane.f32.xlu1 %v1647_v7 }
 0x39c   : > { %v7705_v31 = vadd.f32 %v1297_v63, %v7588_v54  ;;  %v1299_v51 = vpop.f32.mrb[47].mxu0  ;;  %v7707_v2 = vpop.f32.mrb[63].mxu1 }
 0x39d   : > { %v7710_v41 = vadd.f32 %v1299_v51, %v7590_v55  ;;  %v7724_v51 = vadd.f32 %v7613_v46, %v7586_v53 }
 0x39e   : > { %11071 = vst [vmem:[#allocation27_spill] sm:$0xff] %v7705_v31 }
 0x39f   : > { %11072 = vst [vmem:[#allocation28_spill] sm:$0xff] %v7710_v41  ;;  %v1655_v14 = vmax.f32 %v7705_v31, %v7710_v41  ;;  %11073 = vst [vmem:[#allocation29_spill] sm:$0xff] %v7724_v51 }
 0x3a1   : > { %v1303_v20 = vpop.f32.mrb[48].mxu0  ;;  %v7716_v52 = vpop.f32.mrb[64].mxu1  ;;  %v1657_v1 = vmax.f32 %v1655_v14, %v1656_v16  ;;  %v1666_v16 = vsel %vm1620_vm6, %v7724_v51, -inf }
 0x3a2   : > { %v1305_v25 = vpop.f32.mrb[49].mxu0  ;;  %v7718_v7 = vpop.f32.mrb[65].mxu1 }
 0x3a3   : > { %v1307_v63 = vpop.f32.mrb[50].mxu0  ;;  %v7720_v0 = vpop.f32.mrb[66].mxu1  ;;  %1658 = vmax.xlane.f32.xlu1 %v1657_v1  ;;  %v7778_v33 = vadd.f32 %v1305_v25, %v7590_v55 }
 0x3a4   : > { %v7727_v13 = vadd.f32 %v1307_v63, %v7588_v54  ;;  %v1309_v26 = vpop.f32.mrb[51].mxu0  ;;  %v7729_v47 = vpop.f32.mrb[67].mxu1 }
 0x3a5   : > { %v7732_v48 = vadd.f32 %v1309_v26, %v7590_v55  ;;  %11084 = vst [vmem:[#allocation40_spill] sm:$0xff] %v7778_v33 }
 0x3a6   : > { %11074 = vst [vmem:[#allocation30_spill] sm:$0xff] %v7727_v13 }
 0x3a7   : > { %11075 = vst [vmem:[#allocation31_spill] sm:$0xff] %v7732_v48  ;;  %v1665_v14 = vmax.f32 %v7727_v13, %v7732_v48 }
 0x3a9   : > { %v1313_v1 = vpop.f32.mrb[52].mxu0  ;;  %v1667_v18 = vmax.f32 %v1665_v14, %v1666_v16 }
 0x3aa   : > { %v7738_v39 = vpop.f32.mrb[68].mxu1  ;;  %v1315_v46 = vpop.f32.mrb[53].mxu0 }
 0x3ab   : > { %v7740_v37 = vpop.f32.mrb[69].mxu1  ;;  %v1317_v63 = vpop.f32.mrb[54].mxu0  ;;  %1668 = vmax.xlane.f32.xlu1 %v1667_v18  ;;  %v7796_v25 = vadd.f32 %v1315_v46, %v7590_v55 }
 0x3ac   : > { %v7742_v35 = vpop.f32.mrb[70].mxu1  ;;  %v1319_v34 = vpop.f32.mrb[55].mxu0 }
 0x3ad   : > { %v7744_v26 = vpop.f32.mrb[71].mxu1  ;;  %11085 = vst [vmem:[#allocation41_spill] sm:$0xff] %v7796_v25 }
 0x3af   : > { %2982 = vrot.lane.b32.xlu0 %v7326_v36, %s7008_s16 }
 0x3b1   : > { %v1323_v48 = vpop.f32.mrb[56].mxu0 }
 0x3b2   : > { %v7748_v13 = vpop.f32.mrb[72].mxu1  ;;  %v1325_v51 = vpop.f32.mrb[57].mxu0 }
 0x3b3   : > { %11076 = vst [vmem:[#allocation32_spill] sm:$0xff] %v7748_v13  ;;  %v7750_v14 = vpop.f32.mrb[73].mxu1  ;;  %v1327_v16 = vpop.f32.mrb[58].mxu0 }
 0x3b4   : > { %11077 = vst [vmem:[#allocation33_spill] sm:$0xff] %v7750_v14  ;;  %v7752_v21 = vpop.f32.mrb[74].mxu1  ;;  %v1329_v41 = vpop.f32.mrb[59].mxu0  ;;  %v7763_v14 = vadd.f32 %v1293_v30, %v7588_v54 }
 0x3b5   : > { %11078 = vst [vmem:[#allocation34_spill] sm:$0xff] %v7752_v21  ;;  %v7754_v31 = vpop.f32.mrb[75].mxu1  ;;  %v7766_v21 = vadd.f32 %v1295_v11, %v7590_v55  ;;  %v7786_v11 = vadd.f32 %v7600_v62, %v7586_v53  ;;  %v7800_v62 = vadd.f32 %v7592_v57, %v7586_v53  ;;  %v7818_v57 = vadd.f32 %v7605_v3, %v7586_v53 }
 0x3b6   : > { %11079 = vst [vmem:[#allocation35_spill] sm:$0xff] %v7754_v31  ;;  %11080 = vst [vmem:[#allocation36_spill] sm:$0xff] %v7763_v14  ;;  %v7770_v31 = vadd.f32 %v7576_v27, %v7586_v53  ;;  %v7834_v3 = vadd.f32 %v1325_v51, %v7590_v55  ;;  %v7852_v51 = vadd.f32 %v7634_v28, %v7586_v53 }
 0x3b7   : > { %11081 = vst [vmem:[#allocation37_spill] sm:$0xff] %v7766_v21  ;;  %v1650_v44 = vmax.f32 %v7763_v14, %v7766_v21  ;;  %11086 = vst [vmem:[#allocation42_spill] sm:$0xff] %v7800_v62  ;;  %v1661_v29 = vsel %vm1620_vm6, %v7786_v11, -inf }
 0x3b8   : > { %11082 = vst [vmem:[#allocation38_spill] sm:$0xff] %v7770_v31  ;;  %v1651_v27 = vsel %vm1620_vm6, %v7770_v31, -inf  ;;  %11090 = vst [vmem:[#allocation46_spill] sm:$0xff] %v7834_v3 }
 0x3b9   : > { %v1333_v18 = vpop.f32.mrb[60].mxu0  ;;  %v1652_v23 = vmax.f32 %v1650_v44, %v1651_v27  ;;  %v1671_v27 = vsel %vm1620_vm6, %v7800_v62, -inf  ;;  %v7838_v62 = vadd.f32 %v7647_v45, %v7586_v53 }
 0x3ba   : > { %v1335_v43 = vpop.f32.mrb[61].mxu0 }
 0x3bb   : > { %v1337_v15 = vpop.f32.mrb[62].mxu0  ;;  %11091 = vst [vmem:[#allocation47_spill] sm:$0xff] %v7838_v62  ;;  %v1686_v28 = vsel %vm1620_vm6, %v7838_v62, -inf }
 0x3bc   : > { %v1339_v9 = vpop.f32.mrb[63].mxu0  ;;  %2998 = vrot.lane.b32.xlu1 %v7334_v40, %s7008_s16  ;;  %v7775_v40 = vadd.f32 %v1303_v20, %v7588_v54  ;;  %v7793_v20 = vadd.f32 %v1313_v1, %v7588_v54  ;;  %v7810_v1 = vadd.f32 %v1319_v34, %v7590_v55  ;;  %v7825_v34 = vadd.f32 %v1327_v16, %v7588_v54 }
 0x3bd   : > { %v1676_v16 = vsel %vm1620_vm6, %v7818_v57, -inf }
 0x3be   : > { %11083 = vst [vmem:[#allocation39_spill] sm:$0xff] %v7775_v40  ;;  %v1660_v21 = vmax.f32 %v7775_v40, %v7778_v33  ;;  %v1670_v31 = vmax.f32 %v7793_v20, %v7796_v25  ;;  %v7807_v33 = vadd.f32 %v1317_v63, %v7588_v54  ;;  %11087 = vst [vmem:[#allocation43_spill] sm:$0xff] %v7810_v1 }
 0x3c0   : > { %v1662_v46 = vmax.f32 %v1660_v21, %v1661_v29  ;;  %v1675_v63 = vmax.f32 %v7807_v33, %v7810_v1  ;;  %v7828_v29 = vadd.f32 %v1329_v41, %v7590_v55  ;;  %v1672_v25 = vmax.f32 %v1670_v31, %v1671_v27 }
 0x3c1   : > { %v7758_v36 = vpop.f32.mrb[64].mxu0  ;;  %v7845_v1 = vadd.f32 %v1337_v15, %v7588_v54  ;;  %v7859_v27 = vadd.f32 %v1333_v18, %v7588_v54 }
 0x3c2   : > { %v7760_v42 = vpop.f32.mrb[65].mxu0  ;;  %11088 = vst [vmem:[#allocation44_spill] sm:$0xff] %v7828_v29  ;;  %v1685_v41 = vmax.f32 %v7825_v34, %v7828_v29  ;;  %v1677_v31 = vmax.f32 %v1675_v63, %v1676_v16  ;;  %v7862_v29 = vadd.f32 %v1335_v43, %v7590_v55 }
 0x3c3   : > { %v1347_v13 = vpop.f32.mrb[66].mxu0 }
 0x3c4   : > { %v1349_v60 = vpop.f32.mrb[67].mxu0  ;;  %11093 = vst [vmem:[#allocation49_spill] sm:$0xff] %v7862_v29  ;;  %v1690_v62 = vmax.f32 %v7859_v27, %v7862_v29 }
 0x3c5   : > { %v7876_v18 = vadd.f32 %v1349_v60, %v7590_v55 }
 0x3c7   : > { %11094 = vst [vmem:[#allocation50_spill] sm:$0xff] %v7876_v18 }
 0x3c9   : > { %v7780_v49 = vpop.f32.mrb[68].mxu0 }
 0x3ca   : > { %v7782_v30 = vpop.f32.mrb[69].mxu0 }
 0x3cb   : > { %v1357_v19 = vpop.f32.mrb[70].mxu0 }
 0x3cc   : > { %v1359_v14 = vpop.f32.mrb[71].mxu0  ;;  %v7903_v29 = vadd.f32 %v1357_v19, %v7588_v54  ;;  %v7918_v19 = vadd.f32 %v7780_v49, %v7588_v54 }
 0x3ce   : > { %1653 = vmax.xlane.f32.xlu0 %v1652_v23 }
 0x3d1   : > { %v7812_v40 = vpop.f32.mrb[72].mxu0 }
 0x3d2   : > { %v7814_v23 = vpop.f32.mrb[73].mxu0  ;;  %1663 = vmax.xlane.f32.xlu0 %v1662_v46  ;;  %v7831_v46 = vadd.f32 %v1323_v48, %v7588_v54  ;;  %v7848_v48 = vadd.f32 %v1339_v9, %v7590_v55  ;;  %v7866_v9 = vadd.f32 %v7639_v32, %v7586_v53  ;;  %v1681_v32 = vsel %vm1620_vm6, %v7852_v51, -inf }
 0x3d3   : > { %v1367_v44 = vpop.f32.mrb[74].mxu0 }
 0x3d4   : > { %v1369_v21 = vpop.f32.mrb[75].mxu0  ;;  %11089 = vst [vmem:[#allocation45_spill] sm:$0xff] %v7831_v46  ;;  %11092 = vst [vmem:[#allocation48_spill] sm:$0xff] %v7848_v48  ;;  %v1680_v45 = vmax.f32 %v7831_v46, %v7834_v3  ;;  %v1695_v16 = vmax.f32 %v7845_v1, %v7848_v48  ;;  %v7873_v3 = vadd.f32 %v1347_v13, %v7588_v54 }
 0x3d5   : > { %v1687_v46 = vmax.f32 %v1685_v41, %v1686_v28  ;;  %v7888_v48 = vadd.f32 %v7758_v36, %v7588_v54  ;;  %v7892_v13 = vadd.f32 %v7760_v42, %v7590_v55  ;;  %v1696_v41 = vsel %vm1620_vm6, %v7866_v9, -inf }
 0x3d6   : > { %1673 = vmax.xlane.f32.xlu0 %v1672_v25  ;;  %v1682_v60 = vmax.f32 %v1680_v45, %v1681_v32  ;;  %v1705_v28 = vmax.f32 %v7873_v3, %v7876_v18  ;;  %v7906_v36 = vadd.f32 %v1359_v14, %v7590_v55  ;;  %v1697_v42 = vmax.f32 %v1695_v16, %v1696_v41 }
 0x3d7   : > { %11095 = vst [vmem:[#allocation51_spill] sm:$0xff] %v7888_v48  ;;  %11096 = vst [vmem:[#allocation52_spill] sm:$0xff] %v7892_v13  ;;  %v1700_v32 = vmax.f32 %v7888_v48, %v7892_v13  ;;  %v7922_v14 = vadd.f32 %v7782_v30, %v7590_v55  ;;  %v7933_v49 = vadd.f32 %v1367_v44, %v7588_v54 }
 0x3d8   : > { %v1715_v13 = vmax.f32 %v7903_v29, %v7906_v36  ;;  %v7936_v30 = vadd.f32 %v1369_v21, %v7590_v55  ;;  %v7948_v44 = vadd.f32 %v7812_v40, %v7588_v54  ;;  %v7952_v21 = vadd.f32 %v7814_v23, %v7590_v55 }
 0x3d9   : > { %v7854_v25 = vpop.f32.mrb[76].mxu0  ;;  %11097 = vst [vmem:[#allocation53_spill] sm:$0xff] %v7922_v14 }
 0x3da   : > { %v1375_v15 = vpop.f32.mrb[77].mxu0  ;;  %1678 = vmax.xlane.f32.xlu0 %v1677_v31  ;;  %v7880_v31 = vadd.f32 %v7626_v17, %v7586_v53  ;;  %v7896_v17 = vadd.f32 %v7681_v12, %v7586_v53  ;;  %11098 = vst [vmem:[#allocation54_spill] sm:$0xff] %v7936_v30  ;;  %11099 = vst [vmem:[#allocation55_spill] sm:$0xff] %v7948_v44 }
 0x3db   : > { %v1377_v63 = vpop.f32.mrb[78].mxu0  ;;  %11100 = vst [vmem:[#allocation56_spill] sm:$0xff] %v7952_v21 }
 0x3dc   : > { %v1379_v43 = vpop.f32.mrb[79].mxu0  ;;  %v1691_v45 = vsel %vm1620_vm6, %v7880_v31, -inf  ;;  %v1706_v18 = vsel %vm1620_vm6, %v7896_v17, -inf }
 0x3dd   : > { %v7966_v40 = vadd.f32 %v1379_v43, %v7590_v55  ;;  %v7981_v43 = vadd.f32 %v1375_v15, %v7590_v55 }
 0x3de   : > { %1688 = vmax.xlane.f32.xlu0 %v1687_v46  ;;  %v7910_v46 = vadd.f32 %v7668_v56, %v7586_v53  ;;  %v7926_v56 = vadd.f32 %v7673_v6, %v7586_v53  ;;  %v7940_v6 = vadd.f32 %v7660_v22, %v7586_v53  ;;  %v7956_v22 = vadd.f32 %v7707_v2, %v7586_v53 }
 0x3df   : > { %11102 = vst [vmem:[#allocation58_spill] sm:$0xff] %v7966_v40  ;;  %11104 = vst [vmem:[#allocation60_spill] sm:$0xff] %v7981_v43 }
 0x3e0   : > { %1683 = vmax.xlane.f32.xlu1 %v1682_v60  ;;  %v1692_v60 = vmax.f32 %v1690_v62, %v1691_v45  ;;  %v1707_v62 = vmax.f32 %v1705_v28, %v1706_v18  ;;  %v1710_v45 = vmax.f32 %v7918_v19, %v7922_v14  ;;  %v1716_v28 = vsel %vm1620_vm6, %v7926_v56, -inf }
 0x3e1   : > { %v1383_v12 = vpop.f32.mrb[80].mxu0  ;;  %v7963_v14 = vadd.f32 %v1377_v63, %v7588_v54  ;;  %v1717_v23 = vmax.f32 %v1715_v13, %v1716_v28  ;;  %v7978_v63 = vadd.f32 %v7854_v25, %v7588_v54 }
 0x3e2   : > { %v1385_v16 = vpop.f32.mrb[81].mxu0  ;;  %1698 = vmax.xlane.f32.xlu0 %v1697_v42  ;;  %v1701_v42 = vsel %vm1620_vm6, %v7910_v46, -inf }
 0x3e3   : > { %v1387_v41 = vpop.f32.mrb[82].mxu0  ;;  %v1702_v18 = vmax.f32 %v1700_v32, %v1701_v42  ;;  %11101 = vst [vmem:[#allocation57_spill] sm:$0xff] %v7963_v14  ;;  %v7970_v32 = vadd.f32 %v7696_v50, %v7586_v53  ;;  %v1720_v42 = vmax.f32 %v7948_v44, %v7952_v21  ;;  %11103 = vst [vmem:[#allocation59_spill] sm:$0xff] %v7978_v63 }
 0x3e4   : > { %v1389_v48 = vpop.f32.mrb[83].mxu0  ;;  %1693 = vmax.xlane.f32.xlu1 %v1692_v60  ;;  %v1725_v60 = vmax.f32 %v7933_v49, %v7936_v30  ;;  %v7985_v50 = vadd.f32 %v7698_v10, %v7586_v53  ;;  %v1726_v30 = vsel %vm1620_vm6, %v7956_v22, -inf  ;;  %v1735_v21 = vmax.f32 %v7963_v14, %v7966_v40 }
 0x3e5   : > { %v7992_v25 = vadd.f32 %v1387_v41, %v7588_v54  ;;  %v7995_v15 = vadd.f32 %v1389_v48, %v7590_v55  ;;  %v7999_v10 = vadd.f32 %v7694_v38, %v7586_v53  ;;  %v8006_v40 = vadd.f32 %v1383_v12, %v7588_v54 }
 0x3e6   : > { %1708 = vmax.xlane.f32.xlu0 %v1707_v62  ;;  %v1711_v62 = vsel %vm1620_vm6, %v7940_v6, -inf  ;;  %11105 = vst [vmem:[#allocation61_spill] sm:$0xff] %v7985_v50  ;;  %v8009_v41 = vadd.f32 %v1385_v16, %v7590_v55  ;;  %v1736_v38 = vsel %vm1620_vm6, %v7985_v50, -inf }
 0x3e7   : > { %v1712_v13 = vmax.f32 %v1710_v45, %v1711_v62  ;;  %11106 = vst [vmem:[#allocation62_spill] sm:$0xff] %v7992_v25  ;;  %11107 = vst [vmem:[#allocation63_spill] sm:$0xff] %v7995_v15  ;;  %v1727_v45 = vmax.f32 %v1725_v60, %v1726_v30  ;;  %v1730_v62 = vmax.f32 %v7978_v63, %v7981_v43 }
 0x3e8   : > { %1703 = vmax.xlane.f32.xlu1 %v1702_v18  ;;  %11108 = vst [vmem:[#allocation64_spill] sm:$0xff] %v7999_v10  ;;  %11109 = vst [vmem:[#allocation65_spill] sm:$0xff] %v8006_v40  ;;  %v8013_v30 = vadd.f32 %v7729_v47, %v7586_v53  ;;  %v1745_v60 = vmax.f32 %v7992_v25, %v7995_v15  ;;  %v1737_v16 = vmax.f32 %v1735_v21, %v1736_v38 }
 0x3e9   : > { %v1393_v2 = vpop.f32.mrb[84].mxu0  ;;  %11110 = vst [vmem:[#allocation66_spill] sm:$0xff] %v8009_v41 }
 0x3ea   : > { %v1395_v18 = vpop.f32.mrb[85].mxu0  ;;  %1718 = vmax.xlane.f32.xlu0 %v1717_v23  ;;  %v1721_v23 = vsel %vm1620_vm6, %v7970_v32, -inf  ;;  %11111 = vst [vmem:[#allocation67_spill] sm:$0xff] %v8013_v30  ;;  %v8034_v15 = vadd.f32 %v1393_v2, %v7588_v54  ;;  %v1746_v38 = vsel %vm1620_vm6, %v8013_v30, -inf }
 0x3eb   : > { %v1397_v28 = vpop.f32.mrb[86].mxu0  ;;  %v1722_v48 = vmax.f32 %v1720_v42, %v1721_v23  ;;  %v8027_v42 = vadd.f32 %v7718_v7, %v7586_v53  ;;  %v1740_v23 = vmax.f32 %v8006_v40, %v8009_v41  ;;  %v8041_v7 = vadd.f32 %v7720_v0, %v7586_v53 }
 0x3ec   : > { %v1399_v44 = vpop.f32.mrb[87].mxu0  ;;  %1713 = vmax.xlane.f32.xlu1 %v1712_v13  ;;  %v8020_v13 = vadd.f32 %v1397_v28, %v7588_v54  ;;  %11115 = vst [vmem:[#allocation71_spill] sm:$0xff] %v8034_v15  ;;  %v8037_v28 = vadd.f32 %v1395_v18, %v7590_v55  ;;  %v1747_v18 = vmax.f32 %v1745_v60, %v1746_v38 }
 0x3ed   : > { %v8023_v12 = vadd.f32 %v1399_v44, %v7590_v55  ;;  %11114 = vst [vmem:[#allocation70_spill] sm:$0xff] %v8027_v42  ;;  %11117 = vst [vmem:[#allocation73_spill] sm:$0xff] %v8041_v7 }
 0x3ee   : > { %1728 = vmax.xlane.f32.xlu0 %v1727_v45  ;;  %11112 = vst [vmem:[#allocation68_spill] sm:$0xff] %v8020_v13  ;;  %v1731_v45 = vsel %vm1620_vm6, %v7999_v10, -inf  ;;  %11116 = vst [vmem:[#allocation72_spill] sm:$0xff] %v8037_v28 }
 0x3ef   : > { %11113 = vst [vmem:[#allocation69_spill] sm:$0xff] %v8023_v12  ;;  %v1732_v21 = vmax.f32 %v1730_v62, %v1731_v45  ;;  %v1755_v41 = vmax.f32 %v8020_v13, %v8023_v12  ;;  %v8052_v62 = vadd.f32 %v7716_v52, %v7586_v53  ;;  %v1750_v45 = vmax.f32 %v8034_v15, %v8037_v28  ;;  %v8143_v15 = vld [vmem:[#allocation2 + $0x80] sm:$0xff] }
 0x3f0   : > { %1723 = vmax.xlane.f32.xlu1 %v1722_v48  ;;  %v8069_v52 = vadd.f32 %v7744_v26, %v7586_v53 }
 0x3f1   : > { %v1403_v47 = vpop.f32.mrb[88].mxu0  ;;  %11119 = vst [vmem:[#allocation75_spill] sm:$0xff] %v8052_v62 }
 0x3f2   : > { %v1405_v44 = vpop.f32.mrb[89].mxu0  ;;  %1738 = vmax.xlane.f32.xlu0 %v1737_v16  ;;  %v1741_v16 = vsel %vm1620_vm6, %v8027_v42, -inf  ;;  %v8062_v12 = vadd.f32 %v1403_v47, %v7588_v54  ;;  %11123 = vst [vmem:[#allocation79_spill] sm:$0xff] %v8069_v52  ;;  %v8077_v47 = vadd.f32 %v7740_v37, %v7586_v53  ;;  %v1766_v37 = vsel %vm1620_vm6, %v8069_v52, -inf }
 0x3f3   : > { %v1407_v48 = vpop.f32.mrb[90].mxu0  ;;  %v1742_v60 = vmax.f32 %v1740_v23, %v1741_v16  ;;  %v1751_v23 = vsel %vm1620_vm6, %v8052_v62, -inf }
 0x3f4   : > { %v8048_v2 = vadd.f32 %v1407_v48, %v7588_v54  ;;  %v1409_v40 = vpop.f32.mrb[91].mxu0  ;;  %1733 = vmax.xlane.f32.xlu1 %v1732_v21  ;;  %11121 = vst [vmem:[#allocation77_spill] sm:$0xff] %v8062_v12  ;;  %v8065_v48 = vadd.f32 %v1405_v44, %v7590_v55  ;;  %11124 = vst [vmem:[#allocation80_spill] sm:$0xff] %v8077_v47  ;;  %v1752_v28 = vmax.f32 %v1750_v45, %v1751_v23 }
 0x3f5   : > { %v8055_v0 = vadd.f32 %v1409_v40, %v7590_v55  ;;  %v1756_v40 = vsel %vm1620_vm6, %v8041_v7, -inf  ;;  %v8100_v45 = vadd.f32 %v7738_v39, %v7586_v53  ;;  %v1761_v23 = vsel %vm1620_vm6, %v8077_v47, -inf }
 0x3f6   : > { %11118 = vst [vmem:[#allocation74_spill] sm:$0xff] %v8048_v2  ;;  %11122 = vst [vmem:[#allocation78_spill] sm:$0xff] %v8065_v48  ;;  %1748 = vmax.xlane.f32.xlu0 %v1747_v18  ;;  %v1757_v38 = vmax.f32 %v1755_v41, %v1756_v40  ;;  %v1760_v26 = vmax.f32 %v8062_v12, %v8065_v48  ;;  %v8093_v40 = vadd.f32 %v7742_v35, %v7586_v53 }
 0x3f7   : > { %11120 = vst [vmem:[#allocation76_spill] sm:$0xff] %v8055_v0  ;;  %v1765_v21 = vmax.f32 %v8048_v2, %v8055_v0  ;;  %11129 = vst [vmem:[#allocation85_spill] sm:$0xff] %v8100_v45 }
 0x3f8   : > { %1743 = vmax.xlane.f32.xlu1 %v1742_v60  ;;  %11127 = vst [vmem:[#allocation83_spill] sm:$0xff] %v8093_v40  ;;  %v1776_v39 = vsel %vm1620_vm6, %v8093_v40, -inf }
 0x3f9   : > { %v1413_v44 = vpop.f32.mrb[92].mxu0 }
 0x3fa   : > { %v8084_v18 = vadd.f32 %v1413_v44, %v7588_v54  ;;  %v1415_v16 = vpop.f32.mrb[93].mxu0  ;;  %1758 = vmax.xlane.f32.xlu0 %v1757_v38  ;;  %v1767_v44 = vmax.f32 %v1765_v21, %v1766_v37  ;;  %v1771_v37 = vsel %vm1620_vm6, %v8100_v45, -inf }
 0x3fb   : > { %v8087_v60 = vadd.f32 %v1415_v16, %v7590_v55  ;;  %v1417_v41 = vpop.f32.mrb[94].mxu0  ;;  %v1762_v16 = vmax.f32 %v1760_v26, %v1761_v23 }
 0x3fc   : > { %11125 = vst [vmem:[#allocation81_spill] sm:$0xff] %v8084_v18  ;;  %v8096_v0 = vadd.f32 %v1417_v41, %v7588_v54  ;;  %v1419_v48 = vpop.f32.mrb[95].mxu0  ;;  %1753 = vmax.xlane.f32.xlu1 %v1752_v28  ;;  %v8111_v28 = vpop.permute.xlu0 %2988 }
 0x3fd   : > { %11126 = vst [vmem:[#allocation82_spill] sm:$0xff] %v8087_v60  ;;  %v8103_v38 = vadd.f32 %v1419_v48, %v7590_v55  ;;  %v1770_v35 = vmax.f32 %v8084_v18, %v8087_v60 }
 0x3fe   : > { %11128 = vst [vmem:[#allocation84_spill] sm:$0xff] %v8096_v0  ;;  %1768 = vmax.xlane.f32.xlu0 %v1767_v44 }
 0x3ff   : > { %11130 = vst [vmem:[#allocation86_spill] sm:$0xff] %v8103_v38  ;;  %v1775_v41 = vmax.f32 %v8096_v0, %v8103_v38  ;;  %v1772_v12 = vmax.f32 %v1770_v35, %v1771_v37  ;;  %v8135_v35 = vld [vmem:[#allocation2 + $0x38] sm:$0xff] }
 0x400   : > { %1763 = vmax.xlane.f32.xlu1 %v1762_v16  ;;  %v8121_v44 = vpop.permute.xlu0 %2990 }
 0x401   : > { %v1423_v21 = vpop.f32.mrb[96].mxu0  ;;  %v1777_v48 = vmax.f32 %v1775_v41, %v1776_v39 }
 0x402   : > { %v1425_v47 = vpop.f32.mrb[97].mxu0 }
 0x403   : > { %v8117_v52 = vpop.f32.mrb[98].mxu0  ;;  %1778 = vmax.xlane.f32.xlu0 %v1777_v48 }
 0x404   : > { %v8119_v26 = vpop.f32.mrb[99].mxu0  ;;  %1773 = vmax.xlane.f32.xlu1 %v1772_v12  ;;  %v8129_v41 = vpop.permute.xlu0 %2992 }
 0x408   : > { %v8133_v45 = vpop.permute.xlu0 %2994 }
 0x409   : > { %v8123_v23 = vpop.f32.mrb[100].mxu0 }
 0x40a   : > { %v8125_v16 = vpop.f32.mrb[101].mxu0 }
 0x40b   : > { %v8127_v60 = vpop.f32.mrb[102].mxu0 }
 0x40c   : > { %v8131_v39 = vpop.f32.mrb[103].mxu0 }
 0x415   : > { %2984 = vrot.lane.b32.xlu1 %v8135_v35, %s7008_s16 }
 0x416   : > { %v1624_v12 = vpop.xlane.xlu0 %1623 }
 0x417   : > { %v1800_v48 = vsub.f32 %v7598_v59, %v1624_v12  ;;  %v1801_v37 = vsub.f32 %v7603_v61, %v1624_v12  ;;  %v1802_v18 = vsub.f32 %v7595_v58, %v1624_v12 }
 0x418   : > { %v1629_v40 = vpop.xlane.xlu1 %1628 }
 0x419   : > { %v1908_v38 = vmul.f32 1.442695, %v1800_v48  ;;  %v1910_v0 = vmul.f32 1.442695, %v1801_v37  ;;  %v1912_v2 = vmul.f32 1.442695, %v1802_v18  ;;  %v1803_v62 = vsub.f32 %v7611_v5, %v1629_v40  ;;  %3002 = vrot.lane.b32.xlu0 %v8143_v15, %s7008_s16 }
 0x41a   : > { %v1804_v7 = vsub.f32 %v7618_v8, %v1629_v40  ;;  %v1805_v13 = vsub.f32 %v7608_v4, %v1629_v40  ;;  %v11131_v18 = vld [vmem:[#allocation16_spill] sm:$0xff]  ;;  %v11132_v37 = vld [vmem:[#allocation15_spill] sm:$0xff]  ;;  %v11133_v40 = vld [vmem:[#allocation18_spill] sm:$0xff] }
 0x41b   : > { %6401 = vpow2.f32 %v1908_v38  ;;  %v1914_v59 = vmul.f32 1.442695, %v1803_v62 }
 0x41c   : > { %6403 = vpow2.f32 %v1910_v0  ;;  %v1916_v61 = vmul.f32 1.442695, %v1804_v7  ;;  %v1918_v58 = vmul.f32 1.442695, %v1805_v13  ;;  %v11134_v0 = vld [vmem:[#allocation19_spill] sm:$0xff]  ;;  %v11135_v13 = vld [vmem:[#allocation17_spill] sm:$0xff] }
 0x41d   : > { %6405 = vpow2.f32 %v1912_v2 }
 0x41e   : > { %6407 = vpow2.f32 %v1914_v59  ;;  %v1634_v12 = vpop.xlane.xlu0 %1633 }
 0x41f   : > { %6409 = vpow2.f32 %v1916_v61  ;;  %v1806_v5 = vsub.f32 %v7632_v24, %v1634_v12  ;;  %v1807_v48 = vsub.f32 %v11131_v18, %v1634_v12  ;;  %v1808_v42 = vsub.f32 %v11132_v37, %v1634_v12  ;;  %v11139_v37 = vld [vmem:[#allocation22_spill] sm:$0xff] }
 0x420   : > { %6411 = vpow2.f32 %v1918_v58  ;;  %v1639_v30 = vpop.xlane.xlu1 %1638  ;;  %v8156_v58 = vadd.f32 %v1423_v21, %v7588_v54  ;;  %v8159_v12 = vadd.f32 %v1425_v47, %v7590_v55 }
 0x421   : > { %v1920_v8 = vmul.f32 1.442695, %v1806_v5  ;;  %v1922_v25 = vmul.f32 1.442695, %v1807_v48  ;;  %v1924_v4 = vmul.f32 1.442695, %v1808_v42  ;;  %v1809_v62 = vsub.f32 %v11133_v40, %v1639_v30 }
 0x422   : > { %v1810_v7 = vsub.f32 %v11134_v0, %v1639_v30  ;;  %v1811_v2 = vsub.f32 %v11135_v13, %v1639_v30  ;;  %11136 = vst [vmem:[#allocation16_spill] sm:$0xff] %v8156_v58  ;;  %11137 = vst [vmem:[#allocation15_spill] sm:$0xff] %v8159_v12  ;;  %v11138_v48 = vld [vmem:[#allocation21_spill] sm:$0xff] }
 0x423   : > { %6413 = vpow2.f32 %v1920_v8  ;;  %v1926_v38 = vmul.f32 1.442695, %v1809_v62 }
 0x424   : > { %6415 = vpow2.f32 %v1922_v25  ;;  %v1928_v59 = vmul.f32 1.442695, %v1810_v7  ;;  %v1930_v24 = vmul.f32 1.442695, %v1811_v2  ;;  %v11140_v25 = vld [vmem:[#allocation20_spill] sm:$0xff] }
 0x425   : > { %v6402_v61 = vpop.eup %6401  ;;  %6417 = vpow2.f32 %v1924_v4  ;;  %v8166_v4 = vadd.f32 %v8117_v52, %v7588_v54  ;;  %v8174_v52 = vadd.f32 %v8119_v26, %v7590_v55  ;;  %v11147_v26 = vld [vmem:[#allocation32_spill] sm:$0xff] }
 0x426   : > { %v6404_v18 = vpop.eup %6403  ;;  %6419 = vpow2.f32 %v1926_v38  ;;  %v1644_v42 = vpop.xlane.xlu0 %1643 }
 0x427   : > { %v6406_v5 = vpop.eup %6405  ;;  %6421 = vpow2.f32 %v1928_v59  ;;  %v1812_v30 = vsub.f32 %v11138_v48, %v1644_v42  ;;  %v1813_v8 = vsub.f32 %v11139_v37, %v1644_v42  ;;  %v1814_v40 = vsub.f32 %v11140_v25, %v1644_v42  ;;  %11141 = vst [vmem:[#allocation18_spill] sm:$0xff] %v8166_v4  ;;  %v11142_v59 = vld [vmem:[#allocation24_spill] sm:$0xff]  ;;  %v11143_v37 = vld [vmem:[#allocation25_spill] sm:$0xff]  ;;  %v11144_v42 = vld [vmem:[#allocation23_spill] sm:$0xff] }
 0x428   : > { %v6408_v62 = vpop.eup %6407  ;;  %6423 = vpow2.f32 %v1930_v24  ;;  %v1649_v21 = vpop.xlane.xlu1 %1648  ;;  %v2124_v0 = vadd.f32 %v6404_v18, %v6402_v61  ;;  %v2125_v47 = vsel %vm1620_vm6, %v6406_v5, 0.0  ;;  %11145 = vst [vmem:[#allocation19_spill] sm:$0xff] %v8174_v52 }
 0x429   : > { %v6410_v7 = vpop.eup %6409  ;;  %v1932_v13 = vmul.f32 1.442695, %v1812_v30  ;;  %v1934_v2 = vmul.f32 1.442695, %v1813_v8  ;;  %v1936_v38 = vmul.f32 1.442695, %v1814_v40  ;;  %v1815_v48 = vsub.f32 %v11142_v59, %v1649_v21 }
 0x42a   : > { %v6412_v10 = vpop.eup %6411  ;;  %v1816_v43 = vsub.f32 %v11143_v37, %v1649_v21  ;;  %v1817_v25 = vsub.f32 %v11144_v42, %v1649_v21  ;;  %v2305_v63 = vpack.c.bf16 %v6410_v7, %v6404_v18  ;;  %v2304_v50 = vpack.c.bf16 %v6408_v62, %v6402_v61  ;;  %v11155_v42 = vld [vmem:[#allocation27_spill] sm:$0xff] }
 0x42b   : > { %6425 = vpow2.f32 %v1932_v13  ;;  %v1938_v24 = vmul.f32 1.442695, %v1815_v48  ;;  %v2306_v14 = vpack.c.bf16 %v6412_v10, %v6406_v5  ;;  %v8176_v40 = vadd.f32 %v2125_v47, %v2124_v0  ;;  %v11149_v5 = vld [vmem:[#allocation33_spill] sm:$0xff] }
 0x42c   : > { %6427 = vpow2.f32 %v1934_v2  ;;  %v1940_v30 = vmul.f32 1.442695, %v1816_v43  ;;  %v1942_v8 = vmul.f32 1.442695, %v1817_v25  ;;  %2498 = vmatprep.mubr.bf16.mxu1 %v2305_v63  ;;  %v2129_v18 = vadd.f32 %v6410_v7, %v6408_v62  ;;  %v11151_v63 = vld [vmem:[#allocation35_spill] sm:$0xff] }
 0x42d   : > { %11146 = vst [vmem:[#allocation17_spill] sm:$0xff] %v8176_v40  ;;  %v6414_v59 = vpop.eup %6413  ;;  %6429 = vpow2.f32 %v1936_v38  ;;  %6130 = vmatprep.mubr.msk.bf16.mxu0 %vm1620_vm6, %v2306_v14  ;;  %2499 = vmatmul.mubr.bf16.vlgmr.msra.gmra.mrb[76].mxu1 %v2304_v50  ;;  %v2130_v61 = vsel %vm1620_vm6, %v6412_v10, 0.0  ;;  %v8182_v13 = vadd.f32 %v11147_v26, %v7586_v53  ;;  %v8186_v43 = vadd.f32 %v11149_v5, %v7586_v53 }
 0x42e   : > { %v6416_v21 = vpop.eup %6415  ;;  %v8190_v0 = vadd.f32 %v11151_v63, %v7586_v53  ;;  %6431 = vpow2.f32 %v1938_v24  ;;  %v1780_v14 = vmax.f32 %v8156_v58, %v8159_v12  ;;  %v8194_v50 = vadd.f32 %v2130_v61, %v2129_v18  ;;  %v11156_v24 = vld [vmem:[#allocation28_spill] sm:$0xff]  ;;  %v11157_v18 = vld [vmem:[#allocation26_spill] sm:$0xff] }
 0x42f   : > { %11148 = vst [vmem:[#allocation21_spill] sm:$0xff] %v8182_v13  ;;  %11150 = vst [vmem:[#allocation22_spill] sm:$0xff] %v8186_v43  ;;  %v6418_v47 = vpop.eup %6417  ;;  %6433 = vpow2.f32 %v1940_v30  ;;  %v2134_v10 = vadd.f32 %v6416_v21, %v6414_v59  ;;  %v1785_v7 = vmax.f32 %v8166_v4, %v8174_v52  ;;  %v8200_v2 = vadd.f32 %v8127_v60, %v7588_v54 }
 0x430   : > { %11152 = vst [vmem:[#allocation20_spill] sm:$0xff] %v8190_v0  ;;  %11153 = vst [vmem:[#allocation24_spill] sm:$0xff] %v8194_v50  ;;  %v6420_v62 = vpop.eup %6419  ;;  %6435 = vpow2.f32 %v1942_v8  ;;  %v1659_v38 = vpop.xlane.xlu1 %1658  ;;  %v2135_v48 = vsel %vm1620_vm6, %v6418_v47, 0.0  ;;  %v8208_v63 = vadd.f32 %v8131_v39, %v7590_v55  ;;  %v8222_v39 = vadd.f32 %v8125_v16, %v7590_v55 }
 0x431   : > { %11154 = vst [vmem:[#allocation25_spill] sm:$0xff] %v8200_v2  ;;  %v6422_v37 = vpop.eup %6421  ;;  %v1821_v25 = vsub.f32 %v11155_v42, %v1659_v38  ;;  %v1822_v30 = vsub.f32 %v11156_v24, %v1659_v38  ;;  %v1823_v61 = vsub.f32 %v11157_v18, %v1659_v38  ;;  %v2307_v26 = vpack.c.bf16 %v6420_v62, %v6414_v59  ;;  %v11160_v42 = vld [vmem:[#allocation34_spill] sm:$0xff] }
 0x432   : > { %v6424_v5 = vpop.eup %6423  ;;  %11158 = vst [vmem:[#allocation23_spill] sm:$0xff] %v8208_v63  ;;  %v2308_v50 = vpack.c.bf16 %v6422_v37, %v6416_v21  ;;  %v8210_v60 = vadd.f32 %v2135_v48, %v2134_v10  ;;  %v2139_v8 = vadd.f32 %v6422_v37, %v6420_v62  ;;  %v8214_v4 = vadd.f32 %v11160_v42, %v7586_v53  ;;  %v11164_v62 = vld [vmem:[#allocation4_spill] sm:$0xff] }
 0x433   : > { %v1950_v40 = vmul.f32 1.442695, %v1821_v25  ;;  %v1952_v12 = vmul.f32 1.442695, %v1822_v30  ;;  %v1954_v58 = vmul.f32 1.442695, %v1823_v61  ;;  %v2309_v52 = vpack.c.bf16 %v6424_v5, %v6418_v47 }
 0x434   : > { %11159 = vst [vmem:[#allocation32_spill] sm:$0xff] %v8210_v60  ;;  %11161 = vst [vmem:[#allocation33_spill] sm:$0xff] %v8214_v4  ;;  %v8218_v59 = vadd.f32 %v8123_v23, %v7588_v54  ;;  %2506 = vmatprep.mubr.bf16.mxu1 %v2308_v50  ;;  %v2140_v21 = vsel %vm1620_vm6, %v6424_v5, 0.0  ;;  %v3061_v38 = vsel %vm1120_vm5, %v11164_v62, 0  ;;  %v1786_v47 = vsel %vm1620_vm6, %v8190_v0, -inf  ;;  %v11225_v0 = vld [vmem:[#allocation73_spill] sm:$0xff] }
 0x435   : > { %11163 = vst [vmem:[#allocation27_spill] sm:$0xff] %v8222_v39  ;;  %v6426_v10 = vpop.eup %6425  ;;  %6437 = vpow2.f32 %v1950_v40  ;;  %6131 = vmatmul.mubr.msk.bf16.vlgmr.msra.gmra.mrb[104].mxu0 %vm1620_vm6, %v2309_v52  ;;  %2507 = vmatmul.mubr.bf16.gmra.mrb[80].mxu1 %v2307_v26  ;;  %v8230_v23 = vadd.f32 %v2140_v21, %v2139_v8  ;;  %v1795_v16 = vmax.f32 %v8200_v2, %v8208_v63  ;;  %v1781_v37 = vsel %vm1620_vm6, %v8186_v43, -inf  ;;  %v11166_v26 = vld [vmem:[#allocation30_spill] sm:$0xff]  ;;  %v11168_v8 = vld [vmem:[#allocation29_spill] sm:$0xff] }
 0x436   : > { %11162 = vst [vmem:[#allocation35_spill] sm:$0xff] %v8218_v59  ;;  %v6428_v48 = vpop.eup %6427  ;;  %6439 = vpow2.f32 %v1952_v12  ;;  %5828 = vmatpush3.bf16.xpose.msra.mxu0 %v3061_v38  ;;  %v1787_v50 = vmax.f32 %v1785_v7, %v1786_v47  ;;  %v1782_v52 = vmax.f32 %v1780_v14, %v1781_v37  ;;  %v1790_v30 = vmax.f32 %v8218_v59, %v8222_v39 }
 0x437   : > { %11165 = vst [vmem:[#allocation28_spill] sm:$0xff] %v8230_v23  ;;  %v6430_v25 = vpop.eup %6429  ;;  %6441 = vpow2.f32 %v1954_v58  ;;  %6338 = vmatprep.subr.msk.bf16.mxu0 %vm1120_vm5, %v8111_v28  ;;  %v2144_v40 = vadd.f32 %v6428_v48, %v6426_v10  ;;  %v1796_v12 = vsel %vm1620_vm6, %v8214_v4, -inf  ;;  %v1791_v7 = vsel %vm1620_vm6, %v8182_v13, -inf  ;;  %v11167_v28 = vld [vmem:[#allocation31_spill] sm:$0xff] }
 0x438   : > { %v6432_v24 = vpop.eup %6431  ;;  %v1669_v18 = vpop.xlane.xlu1 %1668  ;;  %1788 = vmax.xlane.f32.xlu0 %v1787_v50  ;;  %v2145_v61 = vsel %vm1620_vm6, %v6430_v25, 0.0  ;;  %v1797_v47 = vmax.f32 %v1795_v16, %v1796_v12  ;;  %v1792_v54 = vmax.f32 %v1790_v30, %v1791_v7  ;;  %v11175_v7 = vld [vmem:[#allocation7_spill] sm:$0xff] }
 0x439   : > { %v6434_v58 = vpop.eup %6433  ;;  %v1827_v5 = vsub.f32 %v11166_v26, %v1669_v18  ;;  %v1828_v14 = vsub.f32 %v11167_v28, %v1669_v18  ;;  %v1829_v42 = vsub.f32 %v11168_v8, %v1669_v18  ;;  %1783 = vmax.xlane.f32.xlu1 %v1782_v52  ;;  %v2310_v21 = vpack.c.bf16 %v6432_v24, %v6426_v10  ;;  %v11170_v28 = vld [vmem:[#allocation5_spill] sm:$0xff] }
 0x43a   : > { %v6436_v62 = vpop.eup %6435  ;;  %v2311_v38 = vpack.c.bf16 %v6434_v58, %v6428_v48  ;;  %v8248_v50 = vadd.f32 %v2145_v61, %v2144_v40  ;;  %v2149_v37 = vadd.f32 %v6434_v58, %v6432_v24  ;;  %v3064_v18 = vsel %vm1120_vm5, %v11170_v28, 0  ;;  %v8294_v58 = vld [vmem:[#allocation2 + $0x78] sm:$0xff] }
 0x43b   : > { %v1962_v23 = vmul.f32 1.442695, %v1827_v5  ;;  %v1964_v60 = vmul.f32 1.442695, %v1828_v14  ;;  %v1966_v53 = vmul.f32 1.442695, %v1829_v42  ;;  %v2312_v55 = vpack.c.bf16 %v6436_v62, %v6430_v25  ;;  %v2983_v42 = vpop.permute.xlu0 %2982 }
 0x43c   : > { %11169 = vst [vmem:[#allocation26_spill] sm:$0xff] %v8248_v50  ;;  %2514 = vmatprep.mubr.bf16.mxu1 %v2311_v38  ;;  %1798 = vmax.xlane.f32.xlu0 %v1797_v47  ;;  %v2150_v26 = vsel %vm1620_vm6, %v6436_v62, 0.0  ;;  %v3070_v61 = vsel %vm1120_vm5, %v11175_v7, 0  ;;  %v8298_v5 = vld [vmem:[#allocation2 + $0x8] sm:$0xff]  ;;  %v11176_v14 = vld [vmem:[#allocation8_spill] sm:$0xff] }
 0x43d   : > { %6443 = vpow2.f32 %v1962_v23  ;;  %6134 = vmatprep.mubr.msk.bf16.mxu0 %vm1620_vm6, %v2312_v55  ;;  %2515 = vmatmul.mubr.bf16.gmra.mrb[84].mxu1 %v2310_v21  ;;  %v8254_v10 = vadd.f32 %v2150_v26, %v2149_v37  ;;  %v3073_v8 = vsel %vm1120_vm5, %v11176_v14, 0  ;;  %v11177_v21 = vld [vmem:[#allocation10_spill] sm:$0xff]  ;;  %v8310_v62 = vld [vmem:[#allocation2 + $0x18] sm:$0xff]  ;;  %v8314_v38 = vld [vmem:[#allocation2 + $0x10] sm:$0xff] }
 0x43e   : > { %6445 = vpow2.f32 %v1964_v60  ;;  %5830 = vmatpush3.bf16.xpose.msra.mxu0 %v3064_v18  ;;  %1793 = vmax.xlane.f32.xlu1 %v1792_v54  ;;  %v11173_v60 = vld [vmem:[#allocation6_spill] sm:$0xff]  ;;  %v11178_v26 = vld [vmem:[#allocation36_spill] sm:$0xff]  ;;  %v11179_v18 = vld [vmem:[#allocation37_spill] sm:$0xff] }
 0x43f   : > { %11171 = vst [vmem:[#allocation34_spill] sm:$0xff] %v8254_v10  ;;  %v8256_v48 = vpop.eup %6437  ;;  %6447 = vpow2.f32 %v1966_v53  ;;  %6339 = vmatprep.subr.msk.bf16.mxu0 %vm1120_vm5, %v8121_v44  ;;  %v3067_v54 = vsel %vm1120_vm5, %v11173_v60, 0  ;;  %v8318_v47 = vld [vmem:[#allocation2 + $0x28] sm:$0xff] }
 0x440   : > { %v8260_v16 = vpop.eup %6439 }
 0x441   : > { %v8262_v25 = vpop.eup %6441  ;;  %v2159_v23 = vadd.f32 %v8260_v16, %v8256_v48 }
 0x442   : > { %v2160_v55 = vsel %vm1620_vm6, %v8262_v25, 0.0 }
 0x443   : > { %v8268_v52 = vadd.f32 %v2160_v55, %v2159_v23  ;;  %v11180_v55 = vld [vmem:[#allocation38_spill] sm:$0xff] }
 0x445   : > { %11172 = vst [vmem:[#allocation4_spill] sm:$0xff] %v8268_v52 }
 0x446   : > { %5832 = vmatpush3.bf16.xpose.msra.mxu0 %v3067_v54  ;;  %v11181_v54 = vld [vmem:[#allocation9_spill] sm:$0xff] }
 0x447   : > { %v8272_v53 = vpop.eup %6443  ;;  %6340 = vmatprep.subr.msk.bf16.mxu0 %vm1120_vm5, %v8129_v41  ;;  %v8290_v41 = vld [vmem:[#allocation2 + $0x88] sm:$0xff] }
 0x448   : > { %v8276_v44 = vpop.eup %6445 }
 0x449   : > { %v8278_v40 = vpop.eup %6447  ;;  %v2169_v24 = vadd.f32 %v8276_v44, %v8272_v53 }
 0x44a   : > { %v2170_v30 = vsel %vm1620_vm6, %v8278_v40, 0.0 }
 0x44b   : > { %v8284_v12 = vadd.f32 %v2170_v30, %v2169_v24  ;;  %v3076_v24 = vsel %vm1120_vm5, %v11181_v54, 0  ;;  %v2999_v30 = vpop.permute.xlu1 %2998 }
 0x44d   : > { %11174 = vst [vmem:[#allocation30_spill] sm:$0xff] %v8284_v12 }
 0x44e   : > { %5834 = vmatpush3.bf16.xpose.msra.mxu0 %v3070_v61 }
 0x44f   : > { %6341 = vmatprep.subr.msk.bf16.mxu0 %vm1120_vm5, %v8133_v45  ;;  %3004 = vrot.lane.b32.xlu1 %v8290_v41, %s7008_s16  ;;  %v8304_v45 = vld [vmem:[#allocation2] sm:$0xff] }
 0x452   : > { %3000 = vrot.lane.b32.xlu0 %v8294_v58, %s7008_s16 }
 0x453   : > { %2936 = vrot.lane.b32.xlu1 %v8298_v5, %s7010_s21 }
 0x456   : > { %5836 = vmatpush3.bf16.xpose.msra.mxu0 %v3073_v8  ;;  %2934 = vrot.lane.b32.xlu0 %v8304_v45, %s7010_s21  ;;  %v8327_v8 = vld [vmem:[#allocation2 + $0x20] sm:$0xff] }
 0x457   : > { %6342 = vmatprep.subr.msk.bf16.mxu0 %vm1120_vm5, %v11177_v21  ;;  %2940 = vrot.lane.b32.xlu1 %v8310_v62, %s7010_s21 }
 0x45a   : > { %2938 = vrot.lane.b32.xlu0 %v8314_v38, %s7010_s21 }
 0x45b   : > { %2944 = vrot.lane.b32.xlu1 %v8318_v47, %s7010_s21  ;;  %v1654_v37 = vpop.xlane.xlu0 %1653 }
 0x45c   : > { %v1818_v28 = vsub.f32 %v11178_v26, %v1654_v37  ;;  %v1819_v23 = vsub.f32 %v11179_v18, %v1654_v37  ;;  %v1820_v60 = vsub.f32 %v11180_v55, %v1654_v37  ;;  %v11182_v37 = vld [vmem:[#allocation39_spill] sm:$0xff]  ;;  %v11183_v18 = vld [vmem:[#allocation40_spill] sm:$0xff] }
 0x45e   : > { %5838 = vmatpush3.bf16.xpose.msra.mxu0 %v3076_v24  ;;  %v1944_v7 = vmul.f32 1.442695, %v1818_v28  ;;  %v1946_v61 = vmul.f32 1.442695, %v1819_v23  ;;  %v1948_v14 = vmul.f32 1.442695, %v1820_v60  ;;  %2942 = vrot.lane.b32.xlu0 %v8327_v8, %s7010_s21 }
 0x45f   : > { %6343 = vmatprep.subr.msk.bf16.mxu0 %vm1120_vm5, %v2999_v30  ;;  %2948 = vrot.lane.b32.xlu1 %v8135_v35, %s7010_s21  ;;  %v1664_v21 = vpop.xlane.xlu0 %1663  ;;  %v8337_v60 = vld [vmem:[#allocation2 + $0x30] sm:$0xff]  ;;  %v8341_v24 = vld [vmem:[#allocation2 + $0x48] sm:$0xff] }
 0x460   : > { %6449 = vpow2.f32 %v1944_v7  ;;  %v1824_v26 = vsub.f32 %v11182_v37, %v1664_v21  ;;  %v1825_v55 = vsub.f32 %v11183_v18, %v1664_v21  ;;  %v1826_v28 = vsub.f32 %v7786_v11, %v1664_v21  ;;  %v11184_v18 = vld [vmem:[#allocation41_spill] sm:$0xff] }
 0x461   : > { %6451 = vpow2.f32 %v1946_v61  ;;  %v11185_v61 = vld [vmem:[#allocation42_spill] sm:$0xff]  ;;  %v3079_v21 = vsel %vm1120_vm5, %v2983_v42, 0 }
 0x462   : > { %6453 = vpow2.f32 %v1948_v14  ;;  %v1958_v23 = vmul.f32 1.442695, %v1825_v55  ;;  %2946 = vrot.lane.b32.xlu0 %v8337_v60, %s7010_s21  ;;  %v1960_v54 = vmul.f32 1.442695, %v1826_v28  ;;  %v1956_v7 = vmul.f32 1.442695, %v1824_v26 }
 0x463   : > { %2952 = vrot.lane.b32.xlu1 %v8341_v24, %s7010_s21  ;;  %v1674_v30 = vpop.xlane.xlu0 %1673  ;;  %v8349_v28 = vld [vmem:[#allocation2 + $0x40] sm:$0xff]  ;;  %v8353_v26 = vld [vmem:[#allocation2 + $0x58] sm:$0xff] }
 0x464   : > { %v1830_v37 = vsub.f32 %v7793_v20, %v1674_v30  ;;  %v1831_v11 = vsub.f32 %v11184_v18, %v1674_v30  ;;  %v1832_v14 = vsub.f32 %v11185_v61, %v1674_v30  ;;  %6455 = vpow2.f32 %v1958_v23  ;;  %v11186_v23 = vld [vmem:[#allocation43_spill] sm:$0xff] }
 0x465   : > { %6457 = vpow2.f32 %v1960_v54  ;;  %v8360_v54 = vld [vmem:[#allocation2 + $0x50] sm:$0xff] }
 0x466   : > { %5840 = vmatpush3.bf16.xpose.msra.mxu0 %v3079_v21  ;;  %v1968_v55 = vmul.f32 1.442695, %v1830_v37  ;;  %v1970_v12 = vmul.f32 1.442695, %v1831_v11  ;;  %2950 = vrot.lane.b32.xlu0 %v8349_v28, %s7010_s21  ;;  %v1972_v52 = vmul.f32 1.442695, %v1832_v14  ;;  %6459 = vpow2.f32 %v1956_v7 }
 0x467   : > { %2956 = vrot.lane.b32.xlu1 %v8353_v26, %s7010_s21  ;;  %v1679_v20 = vpop.xlane.xlu0 %1678  ;;  %v8364_v7 = vld [vmem:[#allocation2 + $0x68] sm:$0xff] }
 0x468   : > { %v1833_v42 = vsub.f32 %v7807_v33, %v1679_v20  ;;  %v1834_v30 = vsub.f32 %v11186_v23, %v1679_v20  ;;  %v1835_v37 = vsub.f32 %v7818_v57, %v1679_v20  ;;  %6461 = vpow2.f32 %v1968_v55  ;;  %v11187_v55 = vld [vmem:[#allocation44_spill] sm:$0xff] }
 0x469   : > { %6463 = vpow2.f32 %v1970_v12 }
 0x46a   : > { %v6450_v18 = vpop.eup %6449  ;;  %v1974_v11 = vmul.f32 1.442695, %v1833_v42  ;;  %v1976_v61 = vmul.f32 1.442695, %v1834_v30  ;;  %2954 = vrot.lane.b32.xlu0 %v8360_v54, %s7010_s21  ;;  %6465 = vpow2.f32 %v1972_v52  ;;  %v1978_v21 = vmul.f32 1.442695, %v1835_v37 }
 0x46b   : > { %v6452_v14 = vpop.eup %6451  ;;  %2960 = vrot.lane.b32.xlu1 %v8364_v7, %s7010_s21  ;;  %v1689_v33 = vpop.xlane.xlu0 %1688  ;;  %v11188_v42 = vld [vmem:[#allocation47_spill] sm:$0xff]  ;;  %v2313_v30 = vpack.c.bf16 %v8256_v48, %v6450_v18  ;;  %v11189_v48 = vld [vmem:[#allocation45_spill] sm:$0xff] }
 0x46c   : > { %v8368_v57 = vpop.eup %6453  ;;  %v1839_v12 = vsub.f32 %v7825_v34, %v1689_v33  ;;  %v1840_v20 = vsub.f32 %v11187_v55, %v1689_v33  ;;  %v1841_v23 = vsub.f32 %v11188_v42, %v1689_v33  ;;  %6467 = vpow2.f32 %v1974_v11  ;;  %v8379_v34 = vld [vmem:[#allocation2 + $0x60] sm:$0xff] }
 0x46d   : > { %v1684_v10 = vpop.xlane.xlu1 %1683  ;;  %v2314_v52 = vpack.c.bf16 %v8260_v16, %v6452_v14  ;;  %v2315_v37 = vpack.c.bf16 %v8262_v25, %v8368_v57  ;;  %v8377_v50 = vadd.f32 %v6452_v14, %v6450_v18  ;;  %6469 = vpow2.f32 %v1976_v61  ;;  %v11190_v33 = vld [vmem:[#allocation46_spill] sm:$0xff]  ;;  %v11191_v14 = vld [vmem:[#allocation48_spill] sm:$0xff] }
 0x46e   : > { %v1986_v13 = vmul.f32 1.442695, %v1839_v12  ;;  %v1988_v39 = vmul.f32 1.442695, %v1840_v20  ;;  %v1990_v59 = vmul.f32 1.442695, %v1841_v23  ;;  %2958 = vrot.lane.b32.xlu0 %v8379_v34, %s7010_s21  ;;  %6471 = vpow2.f32 %v1978_v21  ;;  %v8387_v18 = vpop.eup %6455 }
 0x46f   : > { %v1836_v11 = vsub.f32 %v11189_v48, %v1684_v10  ;;  %v1837_v55 = vsub.f32 %v11190_v33, %v1684_v10  ;;  %v1838_v16 = vsub.f32 %v7852_v51, %v1684_v10  ;;  %2522 = vmatprep.mubr.bf16.mxu1 %v2314_v52  ;;  %6135 = vmatmul.mubr.msk.bf16.gmra.mrb[108].mxu0 %vm1620_vm6, %v2315_v37  ;;  %v1699_v25 = vpop.xlane.xlu0 %1698  ;;  %v8394_v20 = vpop.eup %6457 }
 0x470   : > { %6473 = vpow2.f32 %v1986_v13  ;;  %2964 = vrot.lane.b32.xlu1 %v8294_v58, %s7010_s21  ;;  %2523 = vmatmul.mubr.bf16.gmra.mrb[88].mxu1 %v2313_v30  ;;  %v1845_v61 = vsub.f32 %v7845_v1, %v1699_v25  ;;  %v1846_v21 = vsub.f32 %v11191_v14, %v1699_v25  ;;  %v1847_v12 = vsub.f32 %v7866_v9, %v1699_v25  ;;  %v8396_v52 = vpop.eup %6459  ;;  %v8398_v30 = vld [vmem:[#allocation2 + $0x70] sm:$0xff] }
 0x471   : > { %6475 = vpow2.f32 %v1988_v39  ;;  %v1980_v51 = vmul.f32 1.442695, %v1836_v11  ;;  %v1982_v10 = vmul.f32 1.442695, %v1837_v55  ;;  %v1984_v42 = vmul.f32 1.442695, %v1838_v16  ;;  %v1694_v23 = vpop.xlane.xlu1 %1693 }
 0x472   : > { %6477 = vpow2.f32 %v1990_v59  ;;  %v1998_v13 = vmul.f32 1.442695, %v1845_v61  ;;  %v2000_v37 = vmul.f32 1.442695, %v1846_v21  ;;  %v2002_v48 = vmul.f32 1.442695, %v1847_v12  ;;  %2962 = vrot.lane.b32.xlu0 %v8398_v30, %s7010_s21  ;;  %v8402_v1 = vpop.eup %6461 }
 0x473   : > { %6479 = vpow2.f32 %v1980_v51  ;;  %v1842_v9 = vsub.f32 %v7859_v27, %v1694_v23  ;;  %v11192_v39 = vld [vmem:[#allocation49_spill] sm:$0xff]  ;;  %v1844_v33 = vsub.f32 %v7880_v31, %v1694_v23  ;;  %v1709_v55 = vpop.xlane.xlu0 %1708  ;;  %v8407_v16 = vpop.eup %6463  ;;  %v2317_v59 = vpack.c.bf16 %v8276_v44, %v8387_v18  ;;  %v11193_v12 = vld [vmem:[#allocation50_spill] sm:$0xff] }
 0x474   : > { %v1843_v11 = vsub.f32 %v11192_v39, %v1694_v23  ;;  %6481 = vpow2.f32 %v1982_v10  ;;  %v2318_v25 = vpack.c.bf16 %v8278_v40, %v8394_v20  ;;  %2968 = vrot.lane.b32.xlu1 %v8290_v41, %s7010_s21  ;;  %v1851_v61 = vsub.f32 %v7873_v3, %v1709_v55  ;;  %v8416_v27 = vpop.eup %6465  ;;  %v11194_v10 = vld [vmem:[#allocation51_spill] sm:$0xff] }
 0x475   : > { %6483 = vpow2.f32 %v1984_v42  ;;  %v1992_v14 = vmul.f32 1.442695, %v1842_v9  ;;  %v1704_v31 = vpop.xlane.xlu1 %1703  ;;  %2530 = vmatprep.mubr.bf16.mxu1 %v2317_v59  ;;  %v1852_v44 = vsub.f32 %v11193_v12, %v1709_v55  ;;  %v1853_v51 = vsub.f32 %v7896_v17, %v1709_v55  ;;  %v11195_v9 = vld [vmem:[#allocation52_spill] sm:$0xff]  ;;  %v11199_v12 = vld [vmem:[#allocation53_spill] sm:$0xff] }
 0x476   : > { %6485 = vpow2.f32 %v1998_v13  ;;  %v1994_v21 = vmul.f32 1.442695, %v1843_v11  ;;  %6138 = vmatprep.mubr.msk.bf16.mxu0 %vm1620_vm6, %v2318_v25  ;;  %v8421_v40 = vpop.eup %6467  ;;  %v1996_v41 = vmul.f32 1.442695, %v1844_v33  ;;  %v1848_v3 = vsub.f32 %v11194_v10, %v1704_v31  ;;  %2966 = vrot.lane.b32.xlu0 %v8143_v15, %s7010_s21 }
 0x477   : > { %6487 = vpow2.f32 %v2000_v37  ;;  %v1719_v42 = vpop.xlane.xlu0 %1718  ;;  %v8426_v23 = vpop.eup %6469  ;;  %v2010_v13 = vmul.f32 1.442695, %v1851_v61  ;;  %v1849_v39 = vsub.f32 %v11195_v9, %v1704_v31  ;;  %v2316_v17 = vpack.c.bf16 %v8272_v53, %v8396_v52 }
 0x478   : > { %6489 = vpow2.f32 %v2002_v48  ;;  %4244 = vrot.lane.b32.xlu1 %v8298_v5, %s7011_s22  ;;  %v8433_v37 = vpop.eup %6471  ;;  %v2012_v11 = vmul.f32 1.442695, %v1852_v44  ;;  %v1850_v15 = vsub.f32 %v7910_v46, %v1704_v31  ;;  %v2014_v48 = vmul.f32 1.442695, %v1853_v51 }
 0x479   : > { %6491 = vpow2.f32 %v1992_v14  ;;  %v1714_v33 = vpop.xlane.xlu1 %1713  ;;  %2531 = vmatmul.mubr.bf16.gmra.mrb[92].mxu1 %v2316_v17  ;;  %v1857_v59 = vsub.f32 %v7903_v29, %v1719_v42  ;;  %v2004_v5 = vmul.f32 1.442695, %v1848_v3  ;;  %v1858_v53 = vsub.f32 %v7906_v36, %v1719_v42 }
 0x47a   : > { %v8436_v55 = vpop.eup %6473  ;;  %6493 = vpow2.f32 %v1994_v21  ;;  %v1859_v61 = vsub.f32 %v7926_v56, %v1719_v42  ;;  %4242 = vrot.lane.b32.xlu0 %v8304_v45, %s7011_s22  ;;  %v2006_v31 = vmul.f32 1.442695, %v1849_v39  ;;  %v1854_v21 = vsub.f32 %v7918_v19, %v1714_v33 }
 0x47b   : > { %11196 = vst [vmem:[#allocation31_spill] sm:$0xff] %v8436_v55  ;;  %v8439_v25 = vpop.eup %6475  ;;  %6495 = vpow2.f32 %v1996_v41  ;;  %v1729_v46 = vpop.xlane.xlu0 %1728  ;;  %v1855_v29 = vsub.f32 %v11199_v12, %v1714_v33  ;;  %v2008_v36 = vmul.f32 1.442695, %v1850_v15  ;;  %v2022_v56 = vmul.f32 1.442695, %v1857_v59  ;;  %v11205_v59 = vld [vmem:[#allocation55_spill] sm:$0xff] }
 0x47c   : > { %11197 = vst [vmem:[#allocation29_spill] sm:$0xff] %v8439_v25  ;;  %v8445_v14 = vpop.eup %6477  ;;  %6497 = vpow2.f32 %v2010_v13  ;;  %4248 = vrot.lane.b32.xlu1 %v8310_v62, %s7011_s22  ;;  %v1856_v51 = vsub.f32 %v7940_v6, %v1714_v33  ;;  %v2320_v10 = vpack.c.bf16 %v8426_v23, %v8407_v16  ;;  %v2321_v19 = vpack.c.bf16 %v8433_v37, %v8416_v27 }
 0x47d   : > { %11198 = vst [vmem:[#allocation5_spill] sm:$0xff] %v8445_v14  ;;  %v8451_v44 = vpop.eup %6479  ;;  %6499 = vpow2.f32 %v2012_v11  ;;  %v1724_v45 = vpop.xlane.xlu1 %1723  ;;  %v1863_v3 = vsub.f32 %v7933_v49, %v1729_v46  ;;  %v2024_v42 = vmul.f32 1.442695, %v1858_v53  ;;  %v2026_v13 = vmul.f32 1.442695, %v1859_v61  ;;  %v11203_v49 = vld [vmem:[#allocation54_spill] sm:$0xff] }
 0x47e   : > { %v8454_v41 = vpop.eup %6481  ;;  %6501 = vpow2.f32 %v2014_v48  ;;  %4246 = vrot.lane.b32.xlu0 %v8314_v38, %s7011_s22  ;;  %v8467_v9 = vsel %vm1620_vm6, %v8368_v57, 0.0  ;;  %v2016_v17 = vmul.f32 1.442695, %v1854_v21  ;;  %v2018_v11 = vmul.f32 1.442695, %v1855_v29  ;;  %2538 = vmatprep.mubr.bf16.mxu1 %v2320_v10  ;;  %v11210_v10 = vld [vmem:[#allocation57_spill] sm:$0xff] }
 0x47f   : > { %11200 = vst [vmem:[#allocation6_spill] sm:$0xff] %v8454_v41  ;;  %v8461_v62 = vpop.eup %6483  ;;  %6503 = vpow2.f32 %v2004_v5  ;;  %v1739_v6 = vpop.xlane.xlu0 %1738  ;;  %6139 = vmatmul.mubr.msk.bf16.gmra.mrb[112].mxu0 %vm1620_vm6, %v2321_v19  ;;  %v1864_v15 = vsub.f32 %v11203_v49, %v1729_v46  ;;  %v2020_v48 = vmul.f32 1.442695, %v1856_v51  ;;  %v1865_v38 = vsub.f32 %v7956_v22, %v1729_v46  ;;  %v11213_v49 = vld [vmem:[#allocation61_spill] sm:$0xff] }
 0x480   : > { %11201 = vst [vmem:[#allocation7_spill] sm:$0xff] %v8461_v62  ;;  %v8469_v39 = vpop.eup %6485  ;;  %6505 = vpow2.f32 %v2006_v31  ;;  %v1860_v5 = vsub.f32 %v11205_v59, %v1724_v45  ;;  %4252 = vrot.lane.b32.xlu1 %v8318_v47, %s7011_s22  ;;  %v2034_v61 = vmul.f32 1.442695, %v1863_v3  ;;  %v11207_v31 = vld [vmem:[#allocation56_spill] sm:$0xff]  ;;  %v2319_v12 = vpack.c.bf16 %v8421_v40, %v8402_v1  ;;  %v11211_v3 = vld [vmem:[#allocation58_spill] sm:$0xff]  ;;  %v11214_v59 = vld [vmem:[#allocation59_spill] sm:$0xff] }
 0x481   : > { %11202 = vst [vmem:[#allocation8_spill] sm:$0xff] %v8469_v39  ;;  %v8473_v33 = vpop.eup %6487  ;;  %6507 = vpow2.f32 %v2008_v36  ;;  %v1734_v57 = vpop.xlane.xlu1 %1733  ;;  %v1861_v21 = vsub.f32 %v11207_v31, %v1724_v45  ;;  %v1862_v22 = vsub.f32 %v7970_v32, %v1724_v45  ;;  %v2323_v46 = vpack.c.bf16 %v8439_v25, %v8454_v41 }
 0x482   : > { %11204 = vst [vmem:[#allocation10_spill] sm:$0xff] %v8473_v33  ;;  %v8479_v53 = vpop.eup %6489  ;;  %6509 = vpow2.f32 %v2022_v56  ;;  %v2324_v47 = vpack.c.bf16 %v8445_v14, %v8461_v62  ;;  %4250 = vrot.lane.b32.xlu0 %v8327_v8, %s7011_s22  ;;  %v2036_v51 = vmul.f32 1.442695, %v1864_v15  ;;  %2539 = vmatmul.mubr.bf16.gmra.mrb[96].mxu1 %v2319_v12  ;;  %v1869_v19 = vsub.f32 %v11210_v10, %v1739_v6  ;;  %v11215_v12 = vld [vmem:[#allocation60_spill] sm:$0xff] }
 0x483   : > { %11206 = vst [vmem:[#allocation36_spill] sm:$0xff] %v8479_v53  ;;  %v8484_v29 = vpop.eup %6491  ;;  %6511 = vpow2.f32 %v2024_v42  ;;  %v8493_v36 = vpop.xlane.xlu0 %1748  ;;  %v1870_v32 = vsub.f32 %v11211_v3, %v1739_v6  ;;  %v2038_v42 = vmul.f32 1.442695, %v1865_v38  ;;  %2546 = vmatprep.mubr.bf16.mxu1 %v2323_v46  ;;  %v1871_v8 = vsub.f32 %v11213_v49, %v1739_v6  ;;  %v11216_v3 = vld [vmem:[#allocation64_spill] sm:$0xff] }
 0x484   : > { %11208 = vst [vmem:[#allocation37_spill] sm:$0xff] %v8484_v29  ;;  %v8495_v56 = vpop.eup %6493  ;;  %6513 = vpow2.f32 %v2026_v13  ;;  %6142 = vmatprep.mubr.msk.bf16.mxu0 %vm1620_vm6, %v2324_v47  ;;  %v1866_v31 = vsub.f32 %v11214_v59, %v1734_v57  ;;  %v2028_v15 = vmul.f32 1.442695, %v1860_v5  ;;  %v1867_v10 = vsub.f32 %v11215_v12, %v1734_v57  ;;  %4256 = vrot.lane.b32.xlu1 %v8135_v35, %s7011_s22  ;;  %v11217_v35 = vld [vmem:[#allocation62_spill] sm:$0xff] }
 0x485   : > { %11209 = vst [vmem:[#allocation38_spill] sm:$0xff] %v8495_v56  ;;  %v8499_v45 = vpop.eup %6495  ;;  %6515 = vpow2.f32 %v2016_v17  ;;  %v8504_v4 = vpop.xlane.xlu1 %1743  ;;  %v1868_v63 = vsub.f32 %v11216_v3, %v1734_v57  ;;  %v2030_v38 = vmul.f32 1.442695, %v1861_v21  ;;  %v2032_v6 = vmul.f32 1.442695, %v1862_v22  ;;  %v11218_v22 = vld [vmem:[#allocation63_spill] sm:$0xff] }
 0x486   : > { %11212 = vst [vmem:[#allocation9_spill] sm:$0xff] %v8499_v45  ;;  %v8506_v13 = vpop.eup %6497  ;;  %6517 = vpow2.f32 %v2018_v11  ;;  %v2327_v46 = vpack.c.bf16 %v8479_v53, %v8499_v45  ;;  %4254 = vrot.lane.b32.xlu0 %v8337_v60, %s7011_s22  ;;  %v2046_v57 = vmul.f32 1.442695, %v1869_v19  ;;  %v2048_v47 = vmul.f32 1.442695, %v1870_v32  ;;  %v11219_v32 = vld [vmem:[#allocation67_spill] sm:$0xff] }
 0x487   : > { %v8512_v17 = vpop.eup %6499  ;;  %6519 = vpow2.f32 %v2020_v48  ;;  %v8518_v11 = vpop.xlane.xlu0 %1758  ;;  %v1875_v49 = vsub.f32 %v11217_v35, %v8493_v36  ;;  %v2050_v48 = vmul.f32 1.442695, %v1871_v8  ;;  %v2040_v21 = vmul.f32 1.442695, %v1866_v31  ;;  %v11220_v8 = vld [vmem:[#allocation65_spill] sm:$0xff]  ;;  %v11227_v45 = vld [vmem:[#allocation72_spill] sm:$0xff] }
 0x488   : > { %v8520_v5 = vpop.eup %6501  ;;  %6521 = vpow2.f32 %v2034_v61  ;;  %6143 = vmatmul.mubr.msk.bf16.gmra.mrb[116].mxu0 %vm1620_vm6, %v2327_v46  ;;  %v1876_v60 = vsub.f32 %v11218_v22, %v8493_v36  ;;  %v2042_v61 = vmul.f32 1.442695, %v1867_v10  ;;  %v2044_v19 = vmul.f32 1.442695, %v1868_v63  ;;  %4260 = vrot.lane.b32.xlu1 %v8341_v24, %s7011_s22  ;;  %v11221_v46 = vld [vmem:[#allocation66_spill] sm:$0xff] }
 0x489   : > { %v8524_v59 = vpop.eup %6503  ;;  %6523 = vpow2.f32 %v2036_v51  ;;  %v1754_v12 = vpop.xlane.xlu1 %1753  ;;  %v1877_v2 = vsub.f32 %v11219_v32, %v8493_v36  ;;  %v1872_v31 = vsub.f32 %v11220_v8, %v8504_v4  ;;  %v1873_v35 = vsub.f32 %v11221_v46, %v8504_v4  ;;  %v11222_v22 = vld [vmem:[#allocation70_spill] sm:$0xff] }
 0x48a   : > { %v8529_v3 = vpop.eup %6505  ;;  %6525 = vpow2.f32 %v2038_v42  ;;  %v1874_v42 = vsub.f32 %v11222_v22, %v8504_v4  ;;  %4258 = vrot.lane.b32.xlu0 %v8349_v28, %s7011_s22  ;;  %v2058_v24 = vmul.f32 1.442695, %v1875_v49  ;;  %v2060_v8 = vmul.f32 1.442695, %v1876_v60  ;;  %v11223_v28 = vld [vmem:[#allocation68_spill] sm:$0xff]  ;;  %v11224_v49 = vld [vmem:[#allocation69_spill] sm:$0xff] }
 0x48b   : > { %v8535_v51 = vpop.eup %6507  ;;  %6527 = vpow2.f32 %v2028_v15  ;;  %v8545_v63 = vpop.xlane.xlu0 %1768  ;;  %v2322_v15 = vpack.c.bf16 %v8436_v55, %v8451_v44  ;;  %v2326_v4 = vpack.c.bf16 %v8473_v33, %v8495_v56  ;;  %v1881_v46 = vsub.f32 %v11223_v28, %v8518_v11  ;;  %v11226_v28 = vld [vmem:[#allocation71_spill] sm:$0xff] }
 0x48c   : > { %v8547_v36 = vpop.eup %6509  ;;  %6529 = vpow2.f32 %v2030_v38  ;;  %v2330_v10 = vpack.c.bf16 %v8520_v5, %v8535_v51  ;;  %v2062_v38 = vmul.f32 1.442695, %v1877_v2  ;;  %v1882_v43 = vsub.f32 %v11224_v49, %v8518_v11  ;;  %v11228_v2 = vld [vmem:[#allocation75_spill] sm:$0xff]  ;;  %4264 = vrot.lane.b32.xlu1 %v8353_v26, %s7011_s22  ;;  %v11230_v26 = vld [vmem:[#allocation76_spill] sm:$0xff] }
 0x48d   : > { %v8553_v32 = vpop.eup %6511  ;;  %6531 = vpow2.f32 %v2032_v6  ;;  %2547 = vmatmul.mubr.bf16.gmra.mrb[100].mxu1 %v2322_v15  ;;  %v1883_v6 = vsub.f32 %v11225_v0, %v8518_v11  ;;  %v8566_v60 = vpop.xlane.xlu1 %1763  ;;  %v1878_v33 = vsub.f32 %v11226_v28, %v1754_v12  ;;  %v1880_v15 = vsub.f32 %v11228_v2, %v1754_v12 }
 0x48e   : > { %v8559_v22 = vpop.eup %6513  ;;  %6533 = vpow2.f32 %v2046_v57  ;;  %6146 = vmatprep.mubr.msk.bf16.mxu0 %vm1620_vm6, %v2330_v10  ;;  %2554 = vmatprep.mubr.bf16.mxu1 %v2326_v4  ;;  %v1879_v57 = vsub.f32 %v11227_v45, %v1754_v12  ;;  %v2052_v49 = vmul.f32 1.442695, %v1872_v31  ;;  %v2054_v0 = vmul.f32 1.442695, %v1873_v35  ;;  %v11229_v12 = vld [vmem:[#allocation74_spill] sm:$0xff] }
 0x48f   : > { %v8568_v53 = vpop.eup %6515  ;;  %6535 = vpow2.f32 %v2048_v47  ;;  %v2056_v11 = vmul.f32 1.442695, %v1874_v42  ;;  %4262 = vrot.lane.b32.xlu0 %v8360_v54, %s7011_s22  ;;  %v2070_v45 = vmul.f32 1.442695, %v1881_v46  ;;  %v1887_v28 = vsub.f32 %v11229_v12, %v8545_v63 }
 0x490   : > { %v8575_v10 = vpop.eup %6517  ;;  %6537 = vpow2.f32 %v2050_v48  ;;  %v8579_v47 = vpop.xlane.xlu0 %1778  ;;  %v1888_v2 = vsub.f32 %v11230_v26, %v8545_v63  ;;  %v2072_v48 = vmul.f32 1.442695, %v1882_v43  ;;  %v2074_v31 = vmul.f32 1.442695, %v1883_v6  ;;  %4268 = vrot.lane.b32.xlu1 %v8364_v7, %s7011_s22  ;;  %v11231_v43 = vld [vmem:[#allocation79_spill] sm:$0xff]  ;;  %v11232_v6 = vld [vmem:[#allocation77_spill] sm:$0xff] }
 0x491   : > { %v8581_v4 = vpop.eup %6519  ;;  %6539 = vpow2.f32 %v2040_v21  ;;  %v2064_v42 = vmul.f32 1.442695, %v1878_v33  ;;  %v8593_v21 = vmul.f32 1.442695, %v1879_v57  ;;  %v8595_v46 = vmul.f32 1.442695, %v1880_v15  ;;  %v1774_v57 = vpop.xlane.xlu1 %1773 }
 0x492   : > { %v8587_v56 = vpop.eup %6521  ;;  %6541 = vpow2.f32 %v2042_v61  ;;  %v2333_v54 = vpack.c.bf16 %v8559_v22, %v8581_v4  ;;  %v1889_v61 = vsub.f32 %v11231_v43, %v8545_v63  ;;  %v1884_v26 = vsub.f32 %v11232_v6, %v8566_v60  ;;  %v11233_v33 = vld [vmem:[#allocation78_spill] sm:$0xff]  ;;  %v11234_v43 = vld [vmem:[#allocation80_spill] sm:$0xff] }
 0x493   : > { %v8591_v35 = vpop.eup %6523  ;;  %6543 = vpow2.f32 %v2044_v19  ;;  %v1885_v19 = vsub.f32 %v11233_v33, %v8566_v60  ;;  %4266 = vrot.lane.b32.xlu0 %v8379_v34, %s7011_s22  ;;  %v8612_v14 = vmul.f32 1.442695, %v1888_v2  ;;  %v2325_v63 = vpack.c.bf16 %v8469_v39, %v8484_v29  ;;  %v11235_v33 = vld [vmem:[#allocation84_spill] sm:$0xff]  ;;  %v11236_v2 = vld [vmem:[#allocation86_spill] sm:$0xff]  ;;  %v11237_v29 = vld [vmem:[#allocation83_spill] sm:$0xff] }
 0x494   : > { %v8599_v12 = vpop.eup %6525  ;;  %6545 = vpow2.f32 %v2058_v24  ;;  %6147 = vmatmul.mubr.msk.bf16.gmra.mrb[120].mxu0 %vm1620_vm6, %v2333_v54  ;;  %v3003_v15 = vpop.permute.xlu0 %3002  ;;  %v2082_v24 = vmul.f32 1.442695, %v1887_v28  ;;  %v1886_v6 = vsub.f32 %v11234_v43, %v8566_v60  ;;  %v2329_v34 = vpack.c.bf16 %v8512_v17, %v8529_v3  ;;  %4272 = vrot.lane.b32.xlu1 %v8294_v58, %s7011_s22 }
 0x495   : > { %v8610_v7 = vpop.eup %6527  ;;  %6547 = vpow2.f32 %v2060_v8  ;;  %6345 = vmatprep.subr.msk.bf16.mxu1 %vm1120_vm5, %v3003_v15  ;;  %v1893_v8 = vsub.f32 %v11235_v33, %v8579_v47  ;;  %2555 = vmatmul.mubr.bf16.gmra.mrb[104].mxu1 %v2325_v63  ;;  %v1894_v39 = vsub.f32 %v11236_v2, %v8579_v47  ;;  %v1895_v25 = vsub.f32 %v11237_v29, %v8579_v47  ;;  %v11239_v63 = vld [vmem:[#allocation82_spill] sm:$0xff] }
 0x496   : > { %v8617_v54 = vpop.eup %6529  ;;  %6549 = vpow2.f32 %v2062_v38  ;;  %v11238_v38 = vld [vmem:[#allocation81_spill] sm:$0xff]  ;;  %v2086_v43 = vmul.f32 1.442695, %v1889_v61  ;;  %2562 = vmatprep.mubr.bf16.mxu1 %v2329_v34  ;;  %v1891_v33 = vsub.f32 %v11239_v63, %v1774_v57  ;;  %v2076_v29 = vmul.f32 1.442695, %v1884_v26 }
 0x497   : > { %v8625_v28 = vpop.eup %6531  ;;  %6551 = vpow2.f32 %v2052_v49  ;;  %v1890_v55 = vsub.f32 %v11238_v38, %v1774_v57  ;;  %4270 = vrot.lane.b32.xlu0 %v8398_v30, %s7011_s22  ;;  %v2078_v47 = vmul.f32 1.442695, %v1885_v19  ;;  %v11240_v38 = vld [vmem:[#allocation85_spill] sm:$0xff]  ;;  %v2094_v61 = vmul.f32 1.442695, %v1893_v8 }
 0x498   : > { %v8634_v60 = vpop.eup %6533  ;;  %6553 = vpow2.f32 %v2054_v0  ;;  %v2336_v49 = vpack.c.bf16 %v8599_v12, %v8625_v28  ;;  %v1892_v58 = vsub.f32 %v11240_v38, %v1774_v57  ;;  %v2080_v0 = vmul.f32 1.442695, %v1886_v6 }
 0x499   : > { %v8641_v2 = vpop.eup %6535  ;;  %6555 = vpow2.f32 %v2056_v11  ;;  %v3109_v34 = vsel %vm1120_vm5, %v3003_v15, 0  ;;  %v8650_v30 = vmul.f32 1.442695, %v1894_v39  ;;  %v8652_v41 = vmul.f32 1.442695, %v1895_v25 }
 0x49a   : > { %v8644_v62 = vpop.eup %6537  ;;  %6557 = vpow2.f32 %v2070_v45  ;;  %6150 = vmatprep.mubr.msk.bf16.mxu0 %vm1620_vm6, %v2336_v49  ;;  %v8654_v11 = vmul.f32 1.442695, %v1890_v55  ;;  %6167 = vmatpush3.bf16.xpose.msra.mxu1 %v3109_v34  ;;  %v8658_v45 = vmul.f32 1.442695, %v1891_v33  ;;  %v8660_v19 = vmul.f32 1.442695, %v1892_v58 }
 0x49b   : > { %v8648_v63 = vpop.eup %6539  ;;  %6559 = vpow2.f32 %v2072_v48  ;;  %v2328_v57 = vpack.c.bf16 %v8506_v13, %v8524_v59  ;;  %v2332_v39 = vpack.c.bf16 %v8553_v32, %v8575_v10  ;;  %v2204_v55 = vadd.f32 %v8529_v3, %v8524_v59 }
 0x49c   : > { %v8656_v26 = vpop.eup %6541  ;;  %6561 = vpow2.f32 %v2074_v31  ;;  %v2205_v25 = vsel %vm1620_vm6, %v8535_v51, 0.0  ;;  %v2209_v6 = vadd.f32 %v8512_v17, %v8506_v13  ;;  %v2214_v3 = vadd.f32 %v8575_v10, %v8568_v53 }
 0x49d   : > { %v6544_v15 = vpop.eup %6543  ;;  %6563 = vpow2.f32 %v2064_v42  ;;  %v2210_v42 = vsel %vm1620_vm6, %v8520_v5, 0.0  ;;  %2563 = vmatmul.mubr.bf16.gmra.mrb[108].mxu1 %v2328_v57  ;;  %v8681_v59 = vadd.f32 %v2205_v25, %v2204_v55  ;;  %v2215_v51 = vsel %vm1620_vm6, %v8581_v4, 0.0 }
 0x49e   : > { %v8670_v48 = vpop.eup %6545  ;;  %6565 = vpow2.f32 %v8593_v21  ;;  %v2339_v31 = vpack.c.bf16 %v8644_v62, %v6544_v15  ;;  %2570 = vmatprep.mubr.bf16.mxu1 %v2332_v39  ;;  %v8688_v13 = vadd.f32 %v2210_v42, %v2209_v6  ;;  %v2219_v17 = vadd.f32 %v8553_v32, %v8547_v36 }
 0x49f   : > { %v8678_v8 = vpop.eup %6547  ;;  %6567 = vpow2.f32 %v8595_v46  ;;  %v2220_v5 = vsel %vm1620_vm6, %v8559_v22, 0.0  ;;  %v8697_v10 = vadd.f32 %v2215_v51, %v2214_v3  ;;  %v2224_v4 = vadd.f32 %v8617_v54, %v8610_v7 }
 0x4a0   : > { %v6550_v21 = vpop.eup %6549  ;;  %6569 = vpow2.f32 %v2082_v24  ;;  %6151 = vmatmul.mubr.msk.bf16.gmra.mrb[124].mxu0 %vm1620_vm6, %v2339_v31  ;;  %11241 = vst [vmem:[#allocation39_spill] sm:$0xff] %v8688_v13  ;;  %v2225_v24 = vsel %vm1620_vm6, %v8625_v28, 0.0  ;;  %v2331_v32 = vpack.c.bf16 %v8547_v36, %v8568_v53  ;;  %v8707_v33 = vadd.f32 %v2220_v5, %v2219_v17 }
 0x4a1   : > { %v8694_v46 = vpop.eup %6551  ;;  %6571 = vpow2.f32 %v8612_v14  ;;  %11242 = vst [vmem:[#allocation40_spill] sm:$0xff] %v8697_v10  ;;  %v2229_v22 = vadd.f32 %v8591_v35, %v8587_v56  ;;  %v2335_v38 = vpack.c.bf16 %v8591_v35, %v8617_v54  ;;  %v8713_v58 = vadd.f32 %v2225_v24, %v2224_v4 }
 0x4a2   : > { %v8703_v49 = vpop.eup %6553  ;;  %6573 = vpow2.f32 %v2086_v43  ;;  %11243 = vst [vmem:[#allocation41_spill] sm:$0xff] %v8707_v33  ;;  %v2230_v28 = vsel %vm1620_vm6, %v8599_v12, 0.0  ;;  %v2234_v36 = vadd.f32 %v8656_v26, %v8648_v63  ;;  %v2239_v35 = vadd.f32 %v8641_v2, %v8634_v60 }
 0x4a3   : > { %v6556_v14 = vpop.eup %6555  ;;  %6575 = vpow2.f32 %v2076_v29  ;;  %11244 = vst [vmem:[#allocation42_spill] sm:$0xff] %v8713_v58  ;;  %v8719_v53 = vadd.f32 %v2230_v28, %v2229_v22  ;;  %v2235_v29 = vsel %vm1620_vm6, %v6544_v15, 0.0  ;;  %v2240_v12 = vsel %vm1620_vm6, %v8644_v62, 0.0 }
 0x4a4   : > { %v8717_v34 = vpop.eup %6557  ;;  %6577 = vpow2.f32 %v2078_v47  ;;  %v2342_v43 = vpack.c.bf16 %v6550_v21, %v6556_v14  ;;  %v8731_v47 = vadd.f32 %v2235_v29, %v2234_v36  ;;  %v8735_v39 = vadd.f32 %v8467_v9, %v8377_v50 }
 0x4a5   : > { %11245 = vst [vmem:[#allocation43_spill] sm:$0xff] %v8719_v53  ;;  %v8723_v57 = vpop.eup %6559  ;;  %6579 = vpow2.f32 %v2080_v0  ;;  %v2244_v0 = vadd.f32 %v8703_v49, %v8694_v46  ;;  %2571 = vmatmul.mubr.bf16.gmra.mrb[112].mxu1 %v2331_v32  ;;  %v8742_v55 = vadd.f32 %v2240_v12, %v2239_v35  ;;  %v2245_v62 = vsel %vm1620_vm6, %v6556_v14, 0.0  ;;  %v11259_v12 = vld [vmem:[#allocation31_spill] sm:$0xff] }
 0x4a6   : > { %v6562_v54 = vpop.eup %6561  ;;  %6581 = vpow2.f32 %v2094_v61  ;;  %6154 = vmatprep.mubr.msk.bf16.mxu0 %vm1620_vm6, %v2342_v43  ;;  %11246 = vst [vmem:[#allocation44_spill] sm:$0xff] %v8731_v47  ;;  %11247 = vst [vmem:[#allocation47_spill] sm:$0xff] %v8735_v39  ;;  %v2249_v61 = vadd.f32 %v8678_v8, %v8670_v48  ;;  %2578 = vmatprep.mubr.bf16.mxu1 %v2335_v38  ;;  %v2250_v9 = vsel %vm1620_vm6, %v6550_v21, 0.0  ;;  %v2165_v51 = vsel %vm1620_vm6, %v8394_v20, 0.0  ;;  %v11255_v38 = vld [vmem:[#allocation6_spill] sm:$0xff] }
 0x4a7   : > { %v8739_v15 = vpop.eup %6563  ;;  %6583 = vpow2.f32 %v8650_v30  ;;  %11248 = vst [vmem:[#allocation45_spill] sm:$0xff] %v8742_v55  ;;  %v8750_v50 = vadd.f32 %v2245_v62, %v2244_v0  ;;  %v2334_v30 = vpack.c.bf16 %v8587_v56, %v8610_v7  ;;  %v2164_v42 = vadd.f32 %v8396_v52, %v8387_v18 }
 0x4a8   : > { %v8747_v25 = vpop.eup %6565  ;;  %6585 = vpow2.f32 %v8652_v41  ;;  %v8756_v6 = vadd.f32 %v2250_v9, %v2249_v61  ;;  %v2259_v18 = vadd.f32 %v8723_v57, %v8717_v34  ;;  %v2260_v20 = vsel %vm1620_vm6, %v6562_v54, 0.0  ;;  %v11263_v9 = vld [vmem:[#allocation5_spill] sm:$0xff] }
 0x4a9   : > { %11249 = vst [vmem:[#allocation46_spill] sm:$0xff] %v8750_v50  ;;  %v6568_v31 = vpop.eup %6567  ;;  %6587 = vpow2.f32 %v8654_v11  ;;  %v2254_v21 = vadd.f32 %v8747_v25, %v8739_v15  ;;  %v8770_v56 = vadd.f32 %v2165_v51, %v2164_v42  ;;  %v2174_v17 = vadd.f32 %v8407_v16, %v8402_v1  ;;  %v11265_v42 = vld [vmem:[#allocation38_spill] sm:$0xff] }
 0x4aa   : > { %11250 = vst [vmem:[#allocation48_spill] sm:$0xff] %v8756_v6  ;;  %v8760_v3 = vpop.eup %6569  ;;  %6589 = vpow2.f32 %v8658_v45  ;;  %v2345_v41 = vpack.c.bf16 %v6562_v54, %v6568_v31  ;;  %v2255_v7 = vsel %vm1620_vm6, %v6568_v31, 0.0  ;;  %v8785_v4 = vadd.f32 %v2260_v20, %v2259_v18  ;;  %v11260_v54 = vld [vmem:[#allocation29_spill] sm:$0xff]  ;;  %v11268_v20 = vld [vmem:[#allocation8_spill] sm:$0xff] }
 0x4ab   : > { %v8767_v11 = vpop.eup %6571  ;;  %6591 = vpow2.f32 %v8660_v19  ;;  %11251 = vst [vmem:[#allocation49_spill] sm:$0xff] %v8770_v56  ;;  %v8776_v45 = vadd.f32 %v2255_v7, %v2254_v21  ;;  %v2175_v19 = vsel %vm1620_vm6, %v8416_v27, 0.0  ;;  %v2179_v24 = vadd.f32 %v8426_v23, %v8421_v40  ;;  %v11267_v18 = vld [vmem:[#allocation9_spill] sm:$0xff] }
 0x4ac   : > { %v6574_v52 = vpop.eup %6573  ;;  %6155 = vmatmul.mubr.msk.bf16.gmra.mrb[128].mxu0 %vm1620_vm6, %v2345_v41  ;;  %11253 = vst [vmem:[#allocation51_spill] sm:$0xff] %v8785_v4  ;;  %v2180_v32 = vsel %vm1620_vm6, %v8433_v37, 0.0  ;;  %v2269_v22 = vadd.f32 %v8767_v11, %v8760_v3  ;;  %v2338_v1 = vpack.c.bf16 %v8641_v2, %v8656_v26  ;;  %v8795_v16 = vadd.f32 %v2175_v19, %v2174_v17  ;;  %v11258_v26 = vld [vmem:[#allocation7_spill] sm:$0xff]  ;;  %v11269_v17 = vld [vmem:[#allocation10_spill] sm:$0xff] }
 0x4ad   : > { %11252 = vst [vmem:[#allocation50_spill] sm:$0xff] %v8776_v45  ;;  %v8783_v5 = vpop.eup %6575  ;;  %v2270_v27 = vsel %vm1620_vm6, %v6574_v52, 0.0  ;;  %v2184_v28 = vadd.f32 %v11255_v38, %v8451_v44  ;;  %2579 = vmatmul.mubr.bf16.gmra.mrb[116].mxu1 %v2334_v30  ;;  %v8800_v40 = vadd.f32 %v2180_v32, %v2179_v24  ;;  %v2185_v35 = vsel %vm1620_vm6, %v11258_v26, 0.0  ;;  %v11264_v30 = vld [vmem:[#allocation37_spill] sm:$0xff] }
 0x4ae   : > { %v6578_v14 = vpop.eup %6577  ;;  %11254 = vst [vmem:[#allocation52_spill] sm:$0xff] %v8795_v16  ;;  %v8803_v37 = vadd.f32 %v2270_v27, %v2269_v22  ;;  %2586 = vmatprep.mubr.bf16.mxu1 %v2338_v1  ;;  %v2189_v44 = vadd.f32 %v11260_v54, %v11259_v12  ;;  %v2190_v31 = vsel %vm1620_vm6, %v11263_v9, 0.0  ;;  %v2194_v41 = vadd.f32 %v11265_v42, %v11264_v30  ;;  %v11271_v1 = vld [vmem:[#allocation36_spill] sm:$0xff]  ;;  %v11276_v42 = vld [vmem:[#allocation19_spill] sm:$0xff] }
 0x4af   : > { %v6580_v43 = vpop.eup %6579  ;;  %11256 = vst [vmem:[#allocation53_spill] sm:$0xff] %v8800_v40  ;;  %v2264_v23 = vadd.f32 %v6578_v14, %v8783_v5  ;;  %v8816_v61 = vadd.f32 %v2185_v35, %v2184_v28  ;;  %v2199_v19 = vadd.f32 %v11269_v17, %v11268_v20  ;;  %v2200_v27 = vsel %vm1620_vm6, %v11271_v1, 0.0 }
 0x4b0   : > { %11257 = vst [vmem:[#allocation54_spill] sm:$0xff] %v8803_v37  ;;  %v8805_v36 = vpop.eup %6581  ;;  %v2348_v29 = vpack.c.bf16 %v6574_v52, %v6580_v43  ;;  %v2265_v2 = vsel %vm1620_vm6, %v6580_v43, 0.0  ;;  %v8823_v21 = vadd.f32 %v2190_v31, %v2189_v44  ;;  %v2195_v52 = vsel %vm1620_vm6, %v11267_v18, 0.0  ;;  %v11275_v31 = vld [vmem:[#allocation18_spill] sm:$0xff] }
 0x4b1   : > { %v8812_v0 = vpop.eup %6583  ;;  %v8814_v62 = vadd.f32 %v2265_v2, %v2264_v23  ;;  %11262 = vst [vmem:[#allocation56_spill] sm:$0xff] %v8816_v61  ;;  %v8834_v22 = vadd.f32 %v2195_v52, %v2194_v41  ;;  %v8840_v43 = vadd.f32 %v2200_v27, %v2199_v19  ;;  %v2341_v35 = vpack.c.bf16 %v8678_v8, %v8703_v49  ;;  %v11280_v52 = vld [vmem:[#allocation22_spill] sm:$0xff]  ;;  %v11282_v27 = vld [vmem:[#allocation23_spill] sm:$0xff] }
 0x4b2   : > { %v6586_v51 = vpop.eup %6585  ;;  %6158 = vmatprep.mubr.msk.bf16.mxu0 %vm1620_vm6, %v2348_v29  ;;  %11266 = vst [vmem:[#allocation57_spill] sm:$0xff] %v8823_v21  ;;  %v2279_v7 = vadd.f32 %v8812_v0, %v8805_v36  ;;  %v2337_v29 = vpack.c.bf16 %v8634_v60, %v8648_v63  ;;  %v2340_v44 = vpack.c.bf16 %v8670_v48, %v8694_v46  ;;  %v2985_v63 = vpop.permute.xlu1 %2984  ;;  %v11278_v48 = vld [vmem:[#allocation16_spill] sm:$0xff] }
 0x4b3   : > { %11261 = vst [vmem:[#allocation55_spill] sm:$0xff] %v8814_v62  ;;  %v8831_v24 = vpop.eup %6587  ;;  %v2280_v32 = vsel %vm1620_vm6, %v6586_v51, 0.0  ;;  %11270 = vst [vmem:[#allocation58_spill] sm:$0xff] %v8834_v22  ;;  %v2344_v60 = vpack.c.bf16 %v8723_v57, %v8747_v25  ;;  %v2343_v8 = vpack.c.bf16 %v8717_v34, %v8739_v15  ;;  %v2347_v9 = vpack.c.bf16 %v8767_v11, %v6578_v14  ;;  %v11279_v57 = vld [vmem:[#allocation15_spill] sm:$0xff] }
 0x4b4   : > { %v6590_v38 = vpop.eup %6589  ;;  %v8838_v28 = vadd.f32 %v2280_v32, %v2279_v7  ;;  %11273 = vst [vmem:[#allocation59_spill] sm:$0xff] %v8840_v43  ;;  %v11281_v32 = vld [vmem:[#allocation25_spill] sm:$0xff] }
 0x4b5   : > { %v6592_v23 = vpop.eup %6591  ;;  %v2274_v2 = vadd.f32 %v6590_v38, %v8831_v24  ;;  %2587 = vmatmul.mubr.bf16.gmra.mrb[120].mxu1 %v2337_v29  ;;  %v11283_v29 = vld [vmem:[#allocation33_spill] sm:$0xff] }
 0x4b6   : > { %11272 = vst [vmem:[#allocation61_spill] sm:$0xff] %v8838_v28  ;;  %v2351_v26 = vpack.c.bf16 %v6586_v51, %v6592_v23  ;;  %v2275_v12 = vsel %vm1620_vm6, %v6592_v23, 0.0  ;;  %2594 = vmatprep.mubr.bf16.mxu1 %v2341_v35  ;;  %v11277_v51 = vld [vmem:[#allocation20_spill] sm:$0xff] }
 0x4b7   : > { %v8848_v54 = vadd.f32 %v2275_v12, %v2274_v2  ;;  %v2346_v12 = vpack.c.bf16 %v8760_v3, %v8783_v5 }
 0x4b8   : > { %6159 = vmatmul.mubr.msk.bf16.gmra.mrb[132].mxu0 %vm1620_vm6, %v2351_v26 }
 0x4b9   : > { %11274 = vst [vmem:[#allocation60_spill] sm:$0xff] %v8848_v54 }
 0x4bd   : > { %2595 = vmatmul.mubr.bf16.gmra.mrb[124].mxu1 %v2340_v44 }
 0x4be   : > { %2602 = vmatprep.mubr.bf16.mxu1 %v2344_v60 }
 0x4c5   : > { %v1789_v49 = vpop.xlane.xlu0 %1788  ;;  %2603 = vmatmul.mubr.bf16.gmra.mrb[128].mxu1 %v2343_v8  ;;  %v11284_v8 = vld [vmem:[#allocation35_spill] sm:$0xff] }
 0x4c6   : > { %v1899_v30 = vsub.f32 %v11275_v31, %v1789_v49  ;;  %v1900_v41 = vsub.f32 %v11276_v42, %v1789_v49  ;;  %v1901_v7 = vsub.f32 %v11277_v51, %v1789_v49  ;;  %v1784_v18 = vpop.xlane.xlu1 %1783  ;;  %2610 = vmatprep.mubr.bf16.mxu1 %v2347_v9  ;;  %v11285_v9 = vld [vmem:[#allocation27_spill] sm:$0xff]  ;;  %v3082_v51 = vsel %vm1120_vm5, %v2985_v63, 0 }
 0x4c7   : > { %v1896_v46 = vsub.f32 %v11278_v48, %v1784_v18  ;;  %v1897_v25 = vsub.f32 %v11279_v57, %v1784_v18  ;;  %v1898_v20 = vsub.f32 %v11280_v52, %v1784_v18 }
 0x4c8   : > { %v2106_v17 = vmul.f32 1.442695, %v1899_v30  ;;  %v2108_v34 = vmul.f32 1.442695, %v1900_v41  ;;  %v2110_v15 = vmul.f32 1.442695, %v1901_v7  ;;  %v2350_v7 = vpack.c.bf16 %v8812_v0, %v6590_v38 }
 0x4c9   : > { %v2100_v19 = vmul.f32 1.442695, %v1896_v46  ;;  %v2102_v11 = vmul.f32 1.442695, %v1897_v25  ;;  %v1799_v14 = vpop.xlane.xlu0 %1798  ;;  %v2104_v26 = vmul.f32 1.442695, %v1898_v20  ;;  %v2349_v20 = vpack.c.bf16 %v8805_v36, %v8831_v24 }
 0x4ca   : > { %6593 = vpow2.f32 %v2106_v17  ;;  %v1905_v1 = vsub.f32 %v11281_v32, %v1799_v14  ;;  %v1906_v23 = vsub.f32 %v11282_v27, %v1799_v14  ;;  %v1907_v2 = vsub.f32 %v11283_v29, %v1799_v14  ;;  %v11286_v30 = vld [vmem:[#allocation21_spill] sm:$0xff] }
 0x4cb   : > { %6595 = vpow2.f32 %v2108_v34  ;;  %v1794_v35 = vpop.xlane.xlu1 %1793  ;;  %v11287_v0 = vmov 0  }
 0x4cc   : > { %6597 = vpow2.f32 %v2110_v15  ;;  %v2118_v44 = vmul.f32 1.442695, %v1905_v1  ;;  %v2120_v60 = vmul.f32 1.442695, %v1906_v23  ;;  %v1902_v49 = vsub.f32 %v11284_v8, %v1794_v35 }
 0x4cd   : > { %6599 = vpow2.f32 %v2100_v19  ;;  %v1903_v31 = vsub.f32 %v11285_v9, %v1794_v35  ;;  %v1904_v42 = vsub.f32 %v11286_v30, %v1794_v35  ;;  %v3001_v41 = vpop.permute.xlu0 %3000  ;;  %v2122_v18 = vmul.f32 1.442695, %v1907_v2  ;;  %2611 = vmatmul.mubr.bf16.gmra.mrb[132].mxu1 %v2346_v12 }
 0x4ce   : > { %6601 = vpow2.f32 %v2102_v11  ;;  %6344 = vmatprep.subr.msk.bf16.mxu0 %vm1120_vm5, %v3001_v41  ;;  %v2112_v3 = vmul.f32 1.442695, %v1902_v49  ;;  %2618 = vmatprep.mubr.bf16.mxu1 %v2350_v7 }
 0x4cf   : > { %6603 = vpow2.f32 %v2104_v26  ;;  %v3005_v5 = vpop.permute.xlu1 %3004  ;;  %5842 = vmatpush3.bf16.xpose.msra.mxu0 %v3082_v51  ;;  %v2114_v48 = vmul.f32 1.442695, %v1903_v31  ;;  %v2116_v63 = vmul.f32 1.442695, %v1904_v42 }
 0x4d0   : > { %6605 = vpow2.f32 %v2118_v44  ;;  %6346 = vmatprep.subr.msk.bf16.mxu1 %vm1120_vm5, %v3005_v5  ;;  %v3112_v46 = vsel %vm1120_vm5, %v3005_v5, 0 }
 0x4d1   : > { %6607 = vpow2.f32 %v2120_v60  ;;  %6169 = vmatpush3.bf16.xpose.msra.mxu1 %v3112_v46  ;;  %v2935_v57 = vpop.permute.xlu0 %2934 }
 0x4d2   : > { %6609 = vpow2.f32 %v2122_v18  ;;  %4350 = vmatprep.subr.bf16.mxu1 %v11287_v0 }
 0x4d3   : > { %6611 = vpow2.f32 %v2112_v3  ;;  %v2937_v38 = vpop.permute.xlu1 %2936 }
 0x4d4   : > { %v6594_v25 = vpop.eup %6593  ;;  %6613 = vpow2.f32 %v2114_v48 }
 0x4d5   : > { %v6596_v52 = vpop.eup %6595  ;;  %6615 = vpow2.f32 %v2116_v63  ;;  %v8880_v17 = vpop.permute.xlu0 %2938  ;;  %2619 = vmatmul.mubr.bf16.gmra.mrb[136].mxu1 %v2349_v20 }
 0x4d6   : > { %v6598_v34 = vpop.eup %6597  ;;  %v2289_v15 = vadd.f32 %v6596_v52, %v6594_v25 }
 0x4d7   : > { %v6600_v19 = vpop.eup %6599  ;;  %v8882_v11 = vpop.permute.xlu1 %2940  ;;  %v2290_v14 = vsel %vm1620_vm6, %v6598_v34, 0.0 }
 0x4d8   : > { %v6602_v32 = vpop.eup %6601  ;;  %v8885_v1 = vadd.f32 %v2290_v14, %v2289_v15  ;;  %v2352_v12 = vpack.c.bf16 %v6594_v25, %v6600_v19 }
 0x4d9   : > { %v6604_v27 = vpop.eup %6603  ;;  %v2353_v23 = vpack.c.bf16 %v6596_v52, %v6602_v32  ;;  %v8887_v29 = vpop.permute.xlu0 %2942  ;;  %v2284_v2 = vadd.f32 %v6602_v32, %v6600_v19 }
 0x4da   : > { %11288 = vst [vmem:[#allocation64_spill] sm:$0xff] %v8885_v1  ;;  %v6606_v26 = vpop.eup %6605  ;;  %v2354_v36 = vpack.c.bf16 %v6598_v34, %v6604_v27  ;;  %v2285_v24 = vsel %vm1620_vm6, %v6604_v27, 0.0 }
 0x4db   : > { %v6608_v35 = vpop.eup %6607  ;;  %2626 = vmatprep.mubr.bf16.mxu1 %v2353_v23  ;;  %v8890_v44 = vpop.permute.xlu1 %2944  ;;  %v8892_v60 = vadd.f32 %v2285_v24, %v2284_v2 }
 0x4dc   : > { %v6610_v8 = vpop.eup %6609  ;;  %6162 = vmatprep.mubr.msk.bf16.mxu0 %vm1620_vm6, %v2354_v36  ;;  %v2299_v49 = vadd.f32 %v6608_v35, %v6606_v26 }
 0x4dd   : > { %11289 = vst [vmem:[#allocation62_spill] sm:$0xff] %v8892_v60  ;;  %v6612_v9 = vpop.eup %6611  ;;  %v8895_v31 = vpop.permute.xlu0 %2946  ;;  %v2300_v30 = vsel %vm1620_vm6, %v6610_v8, 0.0  ;;  %2627 = vmatmul.mubr.bf16.gmra.mrb[140].mxu1 %v2352_v12 }
 0x4de   : > { %v6614_v42 = vpop.eup %6613  ;;  %v8898_v41 = vadd.f32 %v2300_v30, %v2299_v49  ;;  %v2355_v52 = vpack.c.bf16 %v6606_v26, %v6612_v9 }
 0x4df   : > { %v6616_v51 = vpop.eup %6615  ;;  %v2356_v7 = vpack.c.bf16 %v6608_v35, %v6614_v42  ;;  %v8900_v18 = vpop.permute.xlu1 %2948  ;;  %v2294_v3 = vadd.f32 %v6614_v42, %v6612_v9 }
 0x4e0   : > { %11290 = vst [vmem:[#allocation63_spill] sm:$0xff] %v8898_v41  ;;  %v2357_v5 = vpack.c.bf16 %v6610_v8, %v6616_v51  ;;  %v2295_v48 = vsel %vm1620_vm6, %v6616_v51, 0.0 }
 0x4e1   : > { %2634 = vmatprep.mubr.bf16.mxu1 %v2356_v7  ;;  %v8903_v46 = vpop.permute.xlu0 %2950  ;;  %v8905_v63 = vadd.f32 %v2295_v48, %v2294_v3 }
 0x4e2   : > { %6163 = vmatmul.mubr.msk.bf16.gmra.mrb[136].mxu0 %vm1620_vm6, %v2357_v5 }
 0x4e3   : > { %11291 = vst [vmem:[#allocation67_spill] sm:$0xff] %v8905_v63  ;;  %5843 = vmatprep.mubr.msk.bf16.mxu0 %vm1120_vm5, %v2935_v57  ;;  %v8909_v25 = vpop.permute.xlu1 %2952 }
 0x4e5   : > { %v8911_v20 = vpop.permute.xlu0 %2954  ;;  %2635 = vmatmul.mubr.bf16.gmra.mrb[144].mxu1 %v2355_v52 }
 0x4e6   : > { %6170 = vmatprep.mubr.msk.bf16.mxu1 %vm1120_vm5, %v2935_v57 }
 0x4e7   : > { %v8913_v34 = vpop.permute.xlu1 %2956 }
 0x4e9   : > { %v8916_v15 = vpop.permute.xlu0 %2958 }
 0x4ea   : > { %5844 = vmatmul.mubr.msk.bf16.vlgmr.msra.gmra.mrb[140].mxu0 %vm1120_vm5, %v2935_v57 }
 0x4eb   : > { %5845 = vmatprep.mubr.msk.bf16.mxu0 %vm1120_vm5, %v2937_v38  ;;  %v8920_v19 = vpop.permute.xlu1 %2960 }
 0x4ed   : > { %v8922_v14 = vpop.permute.xlu0 %2962  ;;  %6171 = vmatmul.mubr.msk.bf16.vlgmr.msra.gmra.mrb[148].mxu1 %vm1120_vm5, %v2937_v38 }
 0x4ee   : > { %6174 = vmatprep.mubr.msk.bf16.mxu1 %vm1120_vm5, %v8880_v17 }
 0x4ef   : > { %v8925_v32 = vpop.permute.xlu1 %2964 }
 0x4f1   : > { %v8929_v27 = vpop.permute.xlu0 %2966 }
 0x4f2   : > { %5846 = vmatmul.mubr.msk.bf16.gmra.mrb[144].mxu0 %vm1120_vm5, %v2937_v38 }
 0x4f3   : > { %5847 = vmatprep.mubr.msk.bf16.mxu0 %vm1120_vm5, %v8880_v17  ;;  %v8934_v57 = vpop.permute.xlu1 %2968 }
 0x4f5   : > { %v4243_v23 = vpop.permute.xlu0 %4242  ;;  %6175 = vmatmul.mubr.msk.bf16.gmra.mrb[152].mxu1 %vm1120_vm5, %v8882_v11 }
 0x4f6   : > { %4351 = vmatpush1.bf16.msra.mxu1 %v4243_v23  ;;  %6178 = vmatprep.mubr.msk.bf16.mxu1 %vm1120_vm5, %v8887_v29 }
 0x4f7   : > { %4352 = vmatprep.subr.bf16.mxu1 %v11287_v0  ;;  %v4245_v2 = vpop.permute.xlu1 %4244 }
 0x4f9   : > { %v4247_v38 = vpop.permute.xlu0 %4246 }
 0x4fa   : > { %5848 = vmatmul.mubr.msk.bf16.gmra.mrb[148].mxu0 %vm1120_vm5, %v8880_v17  ;;  %4353 = vmatpush1.bf16.msra.mxu1 %v4245_v2 }
 0x4fb   : > { %5849 = vmatprep.mubr.msk.bf16.mxu0 %vm1120_vm5, %v8882_v11  ;;  %4354 = vmatprep.subr.bf16.mxu1 %v11287_v0  ;;  %v4249_v36 = vpop.permute.xlu1 %4248 }
 0x4fd   : > { %6179 = vmatmul.mubr.msk.bf16.gmra.mrb[156].mxu1 %vm1120_vm5, %v8890_v44  ;;  %v4251_v12 = vpop.permute.xlu0 %4250 }
 0x4fe   : > { %4355 = vmatpush1.bf16.msra.mxu1 %v4247_v38  ;;  %6182 = vmatprep.mubr.msk.bf16.mxu1 %vm1120_vm5, %v8895_v31 }
 0x4ff   : > { %4356 = vmatprep.subr.bf16.mxu1 %v11287_v0  ;;  %v4253_v8 = vpop.permute.xlu1 %4252 }
 0x500   : > { %v2500_v26 = vpop.f32.mrb[76].mxu1 }
 0x501   : > { %v2502_v24 = vpop.f32.mrb[77].mxu1  ;;  %v4255_v2 = vpop.permute.xlu0 %4254 }
 0x502   : > { %5850 = vmatmul.mubr.msk.bf16.gmra.mrb[152].mxu0 %vm1120_vm5, %v8882_v11  ;;  %v2503_v17 = vpop.f32.mrb[78].mxu1  ;;  %4357 = vmatpush1.bf16.msra.mxu1 %v4249_v36 }
 0x503   : > { %5851 = vmatprep.mubr.msk.bf16.mxu0 %vm1120_vm5, %v8887_v29  ;;  %v2505_v35 = vpop.f32.mrb[79].mxu1  ;;  %4358 = vmatprep.subr.bf16.mxu1 %v11287_v0 }
 0x505   : > { %6183 = vmatmul.mubr.msk.bf16.gmra.mrb[160].mxu1 %vm1120_vm5, %v8900_v18 }
 0x506   : > { %4359 = vmatpush1.bf16.msra.mxu1 %v4251_v12  ;;  %6186 = vmatprep.mubr.msk.bf16.mxu1 %vm1120_vm5, %v8903_v46 }
 0x507   : > { %4360 = vmatprep.subr.bf16.mxu1 %v11287_v0 }
 0x508   : > { %v6132_v11 = vpop.f32.mrb[104].mxu0  ;;  %v2508_v49 = vpop.f32.mrb[80].mxu1 }
 0x509   : > { %v8961_v9 = vadd.f32 %v6132_v11, %v2508_v49  ;;  %v2677_v30 = vpop.f32.mrb[105].mxu0  ;;  %v2510_v42 = vpop.f32.mrb[81].mxu1 }
 0x50a   : > { %5852 = vmatmul.mubr.msk.bf16.gmra.mrb[156].mxu0 %vm1120_vm5, %v8887_v29  ;;  %v8965_v51 = vadd.f32 %v2677_v30, %v2500_v26  ;;  %v6133_v7 = vpop.f32.mrb[106].mxu0  ;;  %v2511_v3 = vpop.f32.mrb[82].mxu1  ;;  %4361 = vmatpush1.bf16.msra.mxu1 %v4253_v8 }
 0x50b   : > { %11292 = vst [vmem:[#allocation65_spill] sm:$0xff] %v8961_v9  ;;  %5853 = vmatprep.mubr.msk.bf16.mxu0 %vm1120_vm5, %v8890_v44  ;;  %v8969_v5 = vadd.f32 %v6133_v7, %v2511_v3  ;;  %v2680_v48 = vpop.f32.mrb[107].mxu0  ;;  %v2513_v52 = vpop.f32.mrb[83].mxu1  ;;  %4362 = vmatprep.subr.bf16.mxu1 %v11287_v0 }
 0x50c   : > { %11293 = vst [vmem:[#allocation66_spill] sm:$0xff] %v8965_v51  ;;  %v8972_v23 = vadd.f32 %v2680_v48, %v2503_v17  ;;  %v4257_v29 = vpop.permute.xlu1 %4256  ;;  %v4259_v17 = vpop.permute.xlu0 %4258 }
 0x50d   : > { %11294 = vst [vmem:[#allocation70_spill] sm:$0xff] %v8969_v5  ;;  %6187 = vmatmul.mubr.msk.bf16.gmra.mrb[164].mxu1 %vm1120_vm5, %v8909_v25 }
 0x50e   : > { %11295 = vst [vmem:[#allocation68_spill] sm:$0xff] %v8972_v23  ;;  %4363 = vmatpush1.bf16.msra.mxu1 %v4255_v2  ;;  %6190 = vmatprep.mubr.msk.bf16.mxu1 %vm1120_vm5, %v8911_v20 }
 0x50f   : > { %4364 = vmatprep.subr.bf16.mxu1 %v11287_v0 }
 0x510   : > { %v2516_v38 = vpop.f32.mrb[84].mxu1  ;;  %v4263_v35 = vpop.permute.xlu0 %4262 }
 0x511   : > { %v2518_v26 = vpop.f32.mrb[85].mxu1 }
 0x512   : > { %5854 = vmatmul.mubr.msk.bf16.gmra.mrb[160].mxu0 %vm1120_vm5, %v8890_v44  ;;  %4365 = vmatpush1.bf16.msra.mxu1 %v4257_v29  ;;  %v2519_v36 = vpop.f32.mrb[86].mxu1  ;;  %v4261_v44 = vpop.permute.xlu1 %4260 }
 0x513   : > { %5855 = vmatprep.mubr.msk.bf16.mxu0 %vm1120_vm5, %v8895_v31  ;;  %4366 = vmatprep.subr.bf16.mxu1 %v11287_v0  ;;  %v2521_v24 = vpop.f32.mrb[87].mxu1 }
 0x515   : > { %6191 = vmatmul.mubr.msk.bf16.gmra.mrb[168].mxu1 %vm1120_vm5, %v8913_v34 }
 0x516   : > { %4367 = vmatpush1.bf16.msra.mxu1 %v4259_v17  ;;  %6194 = vmatprep.mubr.msk.bf16.mxu1 %vm1120_vm5, %v8916_v15  ;;  %v4265_v12 = vpop.permute.xlu1 %4264 }
 0x517   : > { %4368 = vmatprep.subr.bf16.mxu1 %v11287_v0 }
 0x51a   : > { %5856 = vmatmul.mubr.msk.bf16.gmra.mrb[164].mxu0 %vm1120_vm5, %v8895_v31  ;;  %4369 = vmatpush1.bf16.msra.mxu1 %v4261_v44  ;;  %v4267_v31 = vpop.permute.xlu0 %4266  ;;  %v4269_v8 = vpop.permute.xlu1 %4268 }
 0x51b   : > { %5857 = vmatprep.mubr.msk.bf16.mxu0 %vm1120_vm5, %v8900_v18  ;;  %4370 = vmatprep.subr.bf16.mxu1 %v11287_v0 }
 0x51d   : > { %6195 = vmatmul.mubr.msk.bf16.gmra.mrb[172].mxu1 %vm1120_vm5, %v8920_v19 }
 0x51e   : > { %4371 = vmatpush1.bf16.msra.mxu1 %v4263_v35  ;;  %6198 = vmatprep.mubr.msk.bf16.mxu1 %vm1120_vm5, %v8922_v14  ;;  %v4273_v11 = vpop.permute.xlu1 %4272 }
 0x51f   : > { %4372 = vmatprep.subr.bf16.mxu1 %v11287_v0 }
 0x522   : > { %5858 = vmatmul.mubr.msk.bf16.gmra.mrb[168].mxu0 %vm1120_vm5, %v8900_v18  ;;  %4373 = vmatpush1.bf16.msra.mxu1 %v4265_v12  ;;  %v4271_v18 = vpop.permute.xlu0 %4270 }
 0x523   : > { %5859 = vmatprep.mubr.msk.bf16.mxu0 %vm1120_vm5, %v8903_v46  ;;  %4374 = vmatprep.subr.bf16.mxu1 %v11287_v0 }
 0x525   : > { %6199 = vmatmul.mubr.msk.bf16.gmra.mrb[176].mxu1 %vm1120_vm5, %v8925_v32 }
 0x526   : > { %4375 = vmatpush1.bf16.msra.mxu1 %v4267_v31  ;;  %6202 = vmatprep.mubr.msk.bf16.mxu1 %vm1120_vm5, %v8929_v27 }
 0x527   : > { %4376 = vmatprep.subr.bf16.mxu1 %v11287_v0 }
 0x52a   : > { %5860 = vmatmul.mubr.msk.bf16.gmra.mrb[172].mxu0 %vm1120_vm5, %v8903_v46  ;;  %4377 = vmatpush1.bf16.msra.mxu1 %v4269_v8 }
 0x52b   : > { %5861 = vmatprep.mubr.msk.bf16.mxu0 %vm1120_vm5, %v8909_v25  ;;  %4378 = vmatprep.subr.bf16.mxu1 %v11287_v0 }
 0x52d   : > { %6203 = vmatmul.mubr.msk.bf16.gmra.mrb[180].mxu1 %vm1120_vm5, %v8934_v57 }
 0x52e   : > { %4379 = vmatpush1.bf16.msra.mxu1 %v4271_v18 }
 0x52f   : > { %4380 = vmatprep.subr.bf16.mxu1 %v11287_v0 }
 0x532   : > { %5862 = vmatmul.mubr.msk.bf16.gmra.mrb[176].mxu0 %vm1120_vm5, %v8909_v25  ;;  %4381 = vmatpush1.bf16.msra.mxu1 %v4273_v11 }
 0x533   : > { %5863 = vmatprep.mubr.msk.bf16.mxu0 %vm1120_vm5, %v8911_v20 }
 0x53a   : > { %5864 = vmatmul.mubr.msk.bf16.gmra.mrb[180].mxu0 %vm1120_vm5, %v8911_v20 }
 0x53b   : > { %5865 = vmatprep.mubr.msk.bf16.mxu0 %vm1120_vm5, %v8913_v34 }
 0x542   : > { %5866 = vmatmul.mubr.msk.bf16.gmra.mrb[184].mxu0 %vm1120_vm5, %v8913_v34  ;;  %v6136_v46 = vpop.f32.mrb[108].mxu0 }
 0x543   : > { %5867 = vmatprep.mubr.msk.bf16.mxu0 %vm1120_vm5, %v8916_v15  ;;  %v2524_v0 = vpop.f32.mrb[88].mxu1  ;;  %v2693_v49 = vpop.f32.mrb[109].mxu0 }
 0x544   : > { %v9029_v25 = vadd.f32 %v6136_v46, %v2524_v0  ;;  %v9031_v30 = vadd.f32 %v2693_v49, %v2516_v38  ;;  %v2526_v42 = vpop.f32.mrb[89].mxu1  ;;  %v6137_v7 = vpop.f32.mrb[110].mxu0 }
 0x545   : > { %v2527_v3 = vpop.f32.mrb[90].mxu1  ;;  %v2696_v20 = vpop.f32.mrb[111].mxu0 }
 0x546   : > { %11296 = vst [vmem:[#allocation69_spill] sm:$0xff] %v9029_v25  ;;  %11297 = vst [vmem:[#allocation73_spill] sm:$0xff] %v9031_v30  ;;  %v9033_v48 = vadd.f32 %v6137_v7, %v2527_v3  ;;  %v9035_v52 = vadd.f32 %v2696_v20, %v2519_v36  ;;  %v2529_v2 = vpop.f32.mrb[91].mxu1 }
 0x548   : > { %11298 = vst [vmem:[#allocation71_spill] sm:$0xff] %v9033_v48  ;;  %11299 = vst [vmem:[#allocation72_spill] sm:$0xff] %v9035_v52 }
 0x54a   : > { %5868 = vmatmul.mubr.msk.bf16.gmra.mrb[188].mxu0 %vm1120_vm5, %v8916_v15 }
 0x54b   : > { %5869 = vmatprep.mubr.msk.bf16.mxu0 %vm1120_vm5, %v8920_v19 }
 0x54c   : > { %v2532_v34 = vpop.f32.mrb[92].mxu1 }
 0x54d   : > { %v2534_v29 = vpop.f32.mrb[93].mxu1 }
 0x54e   : > { %v2535_v26 = vpop.f32.mrb[94].mxu1 }
 0x54f   : > { %v2537_v38 = vpop.f32.mrb[95].mxu1 }
 0x552   : > { %5870 = vmatmul.mubr.msk.bf16.gmra.mrb[192].mxu0 %vm1120_vm5, %v8920_v19  ;;  %v6140_v24 = vpop.f32.mrb[112].mxu0 }
 0x553   : > { %5871 = vmatprep.mubr.msk.bf16.mxu0 %vm1120_vm5, %v8922_v14  ;;  %v2709_v36 = vpop.f32.mrb[113].mxu0 }
 0x554   : > { %v9045_v17 = vadd.f32 %v2709_v36, %v2532_v34  ;;  %v6141_v44 = vpop.f32.mrb[114].mxu0 }
 0x555   : > { %v2712_v35 = vpop.f32.mrb[115].mxu0  ;;  %v2540_v12 = vpop.f32.mrb[96].mxu1 }
 0x556   : > { %11300 = vst [vmem:[#allocation75_spill] sm:$0xff] %v9045_v17  ;;  %v9047_v15 = vadd.f32 %v2712_v35, %v2535_v26  ;;  %v9049_v31 = vadd.f32 %v6140_v24, %v2540_v12  ;;  %v2542_v8 = vpop.f32.mrb[97].mxu1 }
 0x557   : > { %v2543_v18 = vpop.f32.mrb[98].mxu1 }
 0x558   : > { %11301 = vst [vmem:[#allocation74_spill] sm:$0xff] %v9047_v15  ;;  %11302 = vst [vmem:[#allocation76_spill] sm:$0xff] %v9049_v31  ;;  %v9051_v11 = vadd.f32 %v6141_v44, %v2543_v18  ;;  %v2545_v46 = vpop.f32.mrb[99].mxu1 }
 0x55a   : > { %11303 = vst [vmem:[#allocation79_spill] sm:$0xff] %v9051_v11  ;;  %5872 = vmatmul.mubr.msk.bf16.gmra.mrb[196].mxu0 %vm1120_vm5, %v8922_v14 }
 0x55b   : > { %5873 = vmatprep.mubr.msk.bf16.mxu0 %vm1120_vm5, %v8925_v32  ;;  %v6144_v19 = vpop.f32.mrb[116].mxu0 }
 0x55c   : > { %v2725_v0 = vpop.f32.mrb[117].mxu0 }
 0x55d   : > { %v6145_v49 = vpop.f32.mrb[118].mxu0 }
 0x55e   : > { %v2728_v42 = vpop.f32.mrb[119].mxu0 }
 0x560   : > { %v2548_v7 = vpop.f32.mrb[100].mxu1 }
 0x561   : > { %v9057_v3 = vadd.f32 %v2725_v0, %v2548_v7  ;;  %v2550_v20 = vpop.f32.mrb[101].mxu1 }
 0x562   : > { %5874 = vmatmul.mubr.msk.bf16.gmra.mrb[200].mxu0 %vm1120_vm5, %v8925_v32  ;;  %v2551_v2 = vpop.f32.mrb[102].mxu1 }
 0x563   : > { %11304 = vst [vmem:[#allocation77_spill] sm:$0xff] %v9057_v3  ;;  %5875 = vmatprep.mubr.msk.bf16.mxu0 %vm1120_vm5, %v8929_v27  ;;  %v9063_v34 = vadd.f32 %v2728_v42, %v2551_v2  ;;  %v2553_v14 = vpop.f32.mrb[103].mxu1 }
 0x565   : > { %11305 = vst [vmem:[#allocation78_spill] sm:$0xff] %v9063_v34 }
 0x567   : > { %v6148_v29 = vpop.f32.mrb[120].mxu0 }
 0x568   : > { %v2741_v26 = vpop.f32.mrb[121].mxu0  ;;  %v2556_v24 = vpop.f32.mrb[104].mxu1 }
 0x569   : > { %v6149_v38 = vpop.f32.mrb[122].mxu0  ;;  %v9067_v44 = vadd.f32 %v6144_v19, %v2556_v24  ;;  %v2558_v35 = vpop.f32.mrb[105].mxu1 }
 0x56a   : > { %v2744_v36 = vpop.f32.mrb[123].mxu0  ;;  %5876 = vmatmul.mubr.msk.bf16.gmra.mrb[204].mxu0 %vm1120_vm5, %v8929_v27  ;;  %v2559_v32 = vpop.f32.mrb[106].mxu1 }
 0x56b   : > { %11306 = vst [vmem:[#allocation80_spill] sm:$0xff] %v9067_v44  ;;  %5877 = vmatprep.mubr.msk.bf16.mxu0 %vm1120_vm5, %v8934_v57  ;;  %v9071_v12 = vadd.f32 %v6145_v49, %v2559_v32  ;;  %v2561_v8 = vpop.f32.mrb[107].mxu1 }
 0x56d   : > { %11307 = vst [vmem:[#allocation84_spill] sm:$0xff] %v9071_v12 }
 0x570   : > { %v2564_v18 = vpop.f32.mrb[108].mxu1 }
 0x571   : > { %v9075_v0 = vadd.f32 %v2741_v26, %v2564_v18  ;;  %v2566_v42 = vpop.f32.mrb[109].mxu1 }
 0x572   : > { %5878 = vmatmul.mubr.msk.bf16.gmra.mrb[208].mxu0 %vm1120_vm5, %v8934_v57  ;;  %v2567_v27 = vpop.f32.mrb[110].mxu1 }
 0x573   : > { %v6152_v46 = vpop.f32.mrb[124].mxu0  ;;  %11308 = vst [vmem:[#allocation86_spill] sm:$0xff] %v9075_v0  ;;  %v9077_v20 = vadd.f32 %v2744_v36, %v2567_v27  ;;  %v2569_v2 = vpop.f32.mrb[111].mxu1 }
 0x574   : > { %v2757_v7 = vpop.f32.mrb[125].mxu0 }
 0x575   : > { %v6153_v19 = vpop.f32.mrb[126].mxu0  ;;  %11309 = vst [vmem:[#allocation83_spill] sm:$0xff] %v9077_v20 }
 0x576   : > { %v2760_v14 = vpop.f32.mrb[127].mxu0 }
 0x578   : > { %v2572_v24 = vpop.f32.mrb[112].mxu1 }
 0x579   : > { %v9079_v35 = vadd.f32 %v6148_v29, %v2572_v24  ;;  %v2574_v49 = vpop.f32.mrb[113].mxu1 }
 0x57a   : > { %v2575_v32 = vpop.f32.mrb[114].mxu1 }
 0x57b   : > { %11310 = vst [vmem:[#allocation81_spill] sm:$0xff] %v9079_v35  ;;  %v9081_v8 = vadd.f32 %v6149_v38, %v2575_v32  ;;  %v2577_v12 = vpop.f32.mrb[115].mxu1 }
 0x57d   : > { %11311 = vst [vmem:[#allocation82_spill] sm:$0xff] %v9081_v8 }
 0x57f   : > { %v6156_v57 = vpop.f32.mrb[128].mxu0 }
 0x580   : > { %v2773_v44 = vpop.f32.mrb[129].mxu0  ;;  %v2580_v42 = vpop.f32.mrb[116].mxu1 }
 0x581   : > { %v6157_v26 = vpop.f32.mrb[130].mxu0  ;;  %v9083_v34 = vadd.f32 %v2757_v7, %v2580_v42  ;;  %v2582_v3 = vpop.f32.mrb[117].mxu1 }
 0x582   : > { %v2776_v18 = vpop.f32.mrb[131].mxu0  ;;  %v2583_v36 = vpop.f32.mrb[118].mxu1 }
 0x583   : > { %11312 = vst [vmem:[#allocation85_spill] sm:$0xff] %v9083_v34  ;;  %v9085_v27 = vadd.f32 %v2760_v14, %v2583_v36  ;;  %v2585_v2 = vpop.f32.mrb[119].mxu1 }
 0x585   : > { %11313 = vst [vmem:[#allocation6_spill] sm:$0xff] %v9085_v27 }
 0x588   : > { %v2588_v11 = vpop.f32.mrb[120].mxu1 }
 0x589   : > { %v9087_v24 = vadd.f32 %v6152_v46, %v2588_v11  ;;  %v2590_v49 = vpop.f32.mrb[121].mxu1 }
 0x58a   : > { %v2591_v32 = vpop.f32.mrb[122].mxu1 }
 0x58b   : > { %v6160_v29 = vpop.f32.mrb[132].mxu0  ;;  %11314 = vst [vmem:[#allocation7_spill] sm:$0xff] %v9087_v24  ;;  %v9089_v31 = vadd.f32 %v6153_v19, %v2591_v32  ;;  %v2593_v15 = vpop.f32.mrb[123].mxu1 }
 0x58c   : > { %v2789_v38 = vpop.f32.mrb[133].mxu0 }
 0x58d   : > { %v6161_v12 = vpop.f32.mrb[134].mxu0  ;;  %11315 = vst [vmem:[#allocation31_spill] sm:$0xff] %v9089_v31 }
 0x58e   : > { %v2792_v17 = vpop.f32.mrb[135].mxu0 }
 0x590   : > { %v2596_v48 = vpop.f32.mrb[124].mxu1 }
 0x591   : > { %v9091_v7 = vadd.f32 %v2773_v44, %v2596_v48  ;;  %v2598_v3 = vpop.f32.mrb[125].mxu1 }
 0x592   : > { %v2599_v42 = vpop.f32.mrb[126].mxu1 }
 0x593   : > { %11316 = vst [vmem:[#allocation29_spill] sm:$0xff] %v9091_v7  ;;  %v9093_v14 = vadd.f32 %v2776_v18, %v2599_v42  ;;  %v2601_v36 = vpop.f32.mrb[127].mxu1 }
 0x595   : > { %11317 = vst [vmem:[#allocation5_spill] sm:$0xff] %v9093_v14 }
 0x598   : > { %v2604_v2 = vpop.f32.mrb[128].mxu1 }
 0x599   : > { %v9095_v25 = vadd.f32 %v6156_v57, %v2604_v2  ;;  %v2606_v11 = vpop.f32.mrb[129].mxu1 }
 0x59a   : > { %v2607_v46 = vpop.f32.mrb[130].mxu1 }
 0x59b   : > { %11318 = vst [vmem:[#allocation37_spill] sm:$0xff] %v9095_v25  ;;  %v9097_v49 = vadd.f32 %v6157_v26, %v2607_v46  ;;  %v2609_v24 = vpop.f32.mrb[131].mxu1 }
 0x59d   : > { %11319 = vst [vmem:[#allocation38_spill] sm:$0xff] %v9097_v49 }
 0x5a0   : > { %v2612_v19 = vpop.f32.mrb[132].mxu1 }
 0x5a1   : > { %v9099_v32 = vadd.f32 %v2789_v38, %v2612_v19  ;;  %v2614_v15 = vpop.f32.mrb[133].mxu1 }
 0x5a2   : > { %v2615_v31 = vpop.f32.mrb[134].mxu1 }
 0x5a3   : > { %11320 = vst [vmem:[#allocation9_spill] sm:$0xff] %v9099_v32  ;;  %v9101_v48 = vadd.f32 %v2792_v17, %v2615_v31  ;;  %v2617_v44 = vpop.f32.mrb[135].mxu1 }
 0x5a5   : > { %11321 = vst [vmem:[#allocation8_spill] sm:$0xff] %v9101_v48 }
 0x5a8   : > { %v2620_v3 = vpop.f32.mrb[136].mxu1 }
 0x5a9   : > { %v9103_v18 = vadd.f32 %v6160_v29, %v2620_v3  ;;  %v2622_v42 = vpop.f32.mrb[137].mxu1 }
 0x5aa   : > { %v2623_v36 = vpop.f32.mrb[138].mxu1 }
 0x5ab   : > { %11322 = vst [vmem:[#allocation10_spill] sm:$0xff] %v9103_v18  ;;  %v9105_v57 = vadd.f32 %v6161_v12, %v2623_v36  ;;  %v2625_v2 = vpop.f32.mrb[139].mxu1  ;;  %v11328_v18 = vld [vmem:[#allocation13_spill] sm:$0xff] }
 0x5ad   : > { %11323 = vst [vmem:[#allocation36_spill] sm:$0xff] %v9105_v57 }
 0x5b0   : > { %v2628_v11 = vpop.f32.mrb[140].mxu1 }
 0x5b1   : > { %v2630_v26 = vpop.f32.mrb[141].mxu1 }
 0x5b2   : > { %v2631_v46 = vpop.f32.mrb[142].mxu1 }
 0x5b3   : > { %v2633_v24 = vpop.f32.mrb[143].mxu1 }
 0x5b5   : > { %v6164_v49 = vpop.f32.mrb[136].mxu0 }
 0x5b6   : > { %v2805_v38 = vpop.f32.mrb[137].mxu0 }
 0x5b7   : > { %v9107_v19 = vadd.f32 %v2805_v38, %v2628_v11  ;;  %v6165_v15 = vpop.f32.mrb[138].mxu0  ;;  %v11329_v11 = vld [vmem:[#allocation14_spill] sm:$0xff] }
 0x5b8   : > { %v2808_v17 = vpop.f32.mrb[139].mxu0  ;;  %v2636_v44 = vpop.f32.mrb[144].mxu1 }
 0x5b9   : > { %11324 = vst [vmem:[#allocation18_spill] sm:$0xff] %v9107_v19  ;;  %v9109_v31 = vadd.f32 %v2808_v17, %v2631_v46  ;;  %v9111_v29 = vadd.f32 %v6164_v49, %v2636_v44  ;;  %v2638_v3 = vpop.f32.mrb[145].mxu1  ;;  %v11330_v44 = vld [vmem:[#allocation12_spill] sm:$0xff] }
 0x5ba   : > { %v2639_v42 = vpop.f32.mrb[146].mxu1 }
 0x5bb   : > { %11325 = vst [vmem:[#allocation19_spill] sm:$0xff] %v9109_v31  ;;  %11326 = vst [vmem:[#allocation20_spill] sm:$0xff] %v9111_v29  ;;  %v9113_v12 = vadd.f32 %v6165_v15, %v2639_v42  ;;  %v2641_v36 = vpop.f32.mrb[147].mxu1 }
 0x5bd   : > { %11327 = vst [vmem:[#allocation16_spill] sm:$0xff] %v9113_v12  ;;  %v3148_v2 = vpop.f32.mrb[140].mxu0 }
 0x5be   : > { %v3150_v26 = vpop.f32.mrb[141].mxu0  ;;  %v9116_v48 = vadd.f32 %v3148_v2, %v11328_v18 }
 0x5bf   : > { %v3152_v57 = vpop.f32.mrb[142].mxu0  ;;  %v9119_v38 = vadd.f32 %v3150_v26, %v11329_v11 }
 0x5c0   : > { %v3154_v24 = vpop.f32.mrb[143].mxu0  ;;  %v6172_v46 = vpop.f32.mrb[148].mxu1  ;;  %v9122_v17 = vadd.f32 %v3152_v57, %v11328_v18 }
 0x5c1   : > { %v9125_v49 = vadd.f32 %v3154_v24, %v11329_v11  ;;  %v3361_v15 = vpop.f32.mrb[149].mxu1  ;;  %v3504_v36 = vmax.f32 %v9116_v48, %v9119_v38  ;;  %v9133_v26 = vadd.f32 %v6172_v46, %v11330_v44 }
 0x5c2   : > { %v9128_v3 = vadd.f32 %v3361_v15, %v11330_v44  ;;  %v6173_v42 = vpop.f32.mrb[150].mxu1 }
 0x5c3   : > { %v3364_v12 = vpop.f32.mrb[151].mxu1  ;;  %11331 = vst [vmem:[#allocation15_spill] sm:$0xff] %v9133_v26  ;;  %v3509_v31 = vmax.f32 %v9122_v17, %v9125_v49  ;;  %v9149_v46 = vadd.f32 %v6173_v42, %v11330_v44 }
 0x5c4   : > { %v3505_v57 = vsel %vm1620_vm6, %v9128_v3, -inf  ;;  %v9141_v24 = vadd.f32 %v3364_v12, %v11330_v44 }
 0x5c5   : > { %v3158_v2 = vpop.f32.mrb[144].mxu0  ;;  %v3506_v19 = vmax.f32 %v3504_v36, %v3505_v57  ;;  %11332 = vst [vmem:[#allocation22_spill] sm:$0xff] %v9149_v46  ;;  %v3515_v57 = vsel %vm1620_vm6, %v9133_v26, -inf }
 0x5c6   : > { %v9138_v29 = vadd.f32 %v3158_v2, %v11328_v18  ;;  %v3160_v15 = vpop.f32.mrb[145].mxu0  ;;  %v3510_v14 = vsel %vm1620_vm6, %v9141_v24, -inf }
 0x5c7   : > { %v9146_v32 = vadd.f32 %v3160_v15, %v11329_v11  ;;  %v3162_v25 = vpop.f32.mrb[146].mxu0  ;;  %v3511_v7 = vmax.f32 %v3509_v31, %v3510_v14  ;;  %3507 = vmax.xlane.f32.xlu0 %v3506_v19  ;;  %v3520_v14 = vsel %vm1620_vm6, %v9149_v46, -inf }
 0x5c8   : > { %v9154_v2 = vadd.f32 %v3162_v25, %v11328_v18  ;;  %v3164_v12 = vpop.f32.mrb[147].mxu0  ;;  %v6176_v42 = vpop.f32.mrb[152].mxu1 }
 0x5c9   : > { %v3514_v52 = vmax.f32 %v9138_v29, %v9146_v32  ;;  %v9159_v36 = vadd.f32 %v3164_v12, %v11329_v11  ;;  %3512 = vmax.xlane.f32.xlu1 %v3511_v7  ;;  %v3377_v30 = vpop.f32.mrb[153].mxu1 }
 0x5ca   : > { %v6177_v31 = vpop.f32.mrb[154].mxu1  ;;  %v9168_v19 = vadd.f32 %v3377_v30, %v11330_v44 }
 0x5cb   : > { %v3519_v15 = vmax.f32 %v9154_v2, %v9159_v36  ;;  %v3516_v25 = vmax.f32 %v3514_v52, %v3515_v57  ;;  %v3380_v34 = vpop.f32.mrb[155].mxu1 }
 0x5cc   : > { %11333 = vst [vmem:[#allocation25_spill] sm:$0xff] %v9168_v19  ;;  %v9177_v7 = vadd.f32 %v3380_v34, %v11330_v44 }
 0x5cd   : > { %3517 = vmax.xlane.f32.xlu0 %v3516_v25  ;;  %v3168_v27 = vpop.f32.mrb[148].mxu0  ;;  %v3521_v12 = vmax.f32 %v3519_v15, %v3520_v14 }
 0x5ce   : > { %v9171_v5 = vadd.f32 %v3168_v27, %v11328_v18  ;;  %v3170_v9 = vpop.f32.mrb[149].mxu0  ;;  %11335 = vst [vmem:[#allocation33_spill] sm:$0xff] %v9177_v7  ;;  %v3525_v27 = vsel %vm1620_vm6, %v9168_v19, -inf }
 0x5cf   : > { %v9174_v8 = vadd.f32 %v3170_v9, %v11329_v11  ;;  %3522 = vmax.xlane.f32.xlu1 %v3521_v12  ;;  %v3172_v52 = vpop.f32.mrb[150].mxu0 }
 0x5d0   : > { %11334 = vst [vmem:[#allocation23_spill] sm:$0xff] %v9171_v5  ;;  %v9180_v57 = vadd.f32 %v3172_v52, %v11328_v18  ;;  %v3174_v25 = vpop.f32.mrb[151].mxu0  ;;  %v6180_v9 = vpop.f32.mrb[156].mxu1  ;;  %v3530_v52 = vsel %vm1620_vm6, %v9177_v7, -inf }
 0x5d1   : > { %v3524_v30 = vmax.f32 %v9171_v5, %v9174_v8  ;;  %v9185_v15 = vadd.f32 %v3174_v25, %v11329_v11  ;;  %v3393_v12 = vpop.f32.mrb[157].mxu1  ;;  %v9194_v25 = vadd.f32 %v6176_v42, %v11330_v44 }
 0x5d2   : > { %v6181_v35 = vpop.f32.mrb[158].mxu1  ;;  %v9224_v28 = vadd.f32 %v3393_v12, %v11330_v44 }
 0x5d3   : > { %v3529_v14 = vmax.f32 %v9180_v57, %v9185_v15  ;;  %v3526_v34 = vmax.f32 %v3524_v30, %v3525_v27  ;;  %v3396_v41 = vpop.f32.mrb[159].mxu1  ;;  %11336 = vst [vmem:[#allocation35_spill] sm:$0xff] %v9194_v25  ;;  %v9203_v30 = vadd.f32 %v6177_v31, %v11330_v44 }
 0x5d4   : > { %11342 = vst [vmem:[#allocation87_spill] sm:$0xff] %v9224_v28 }
 0x5d5   : > { %v3178_v23 = vpop.f32.mrb[152].mxu0  ;;  %3527 = vmax.xlane.f32.xlu0 %v3526_v34  ;;  %v3531_v51 = vmax.f32 %v3529_v14, %v3530_v52  ;;  %11339 = vst [vmem:[#allocation13_spill] sm:$0xff] %v9203_v30 }
 0x5d6   : > { %v9197_v20 = vadd.f32 %v3178_v23, %v11328_v18  ;;  %v3180_v0 = vpop.f32.mrb[153].mxu0  ;;  %v3535_v23 = vsel %vm1620_vm6, %v9194_v25, -inf }
 0x5d7   : > { %v9200_v63 = vadd.f32 %v3180_v0, %v11329_v11  ;;  %v3182_v1 = vpop.f32.mrb[154].mxu0  ;;  %3532 = vmax.xlane.f32.xlu1 %v3531_v51 }
 0x5d8   : > { %11337 = vst [vmem:[#allocation27_spill] sm:$0xff] %v9197_v20  ;;  %v9206_v27 = vadd.f32 %v3182_v1, %v11328_v18  ;;  %v3184_v34 = vpop.f32.mrb[155].mxu0  ;;  %v9215_v0 = vpop.f32.mrb[160].mxu1  ;;  %v3540_v1 = vsel %vm1620_vm6, %v9203_v30, -inf }
 0x5d9   : > { %11338 = vst [vmem:[#allocation21_spill] sm:$0xff] %v9200_v63  ;;  %v3534_v42 = vmax.f32 %v9197_v20, %v9200_v63  ;;  %v9211_v14 = vadd.f32 %v3184_v34, %v11329_v11  ;;  %v3409_v31 = vpop.f32.mrb[161].mxu1 }
 0x5da   : > { %11340 = vst [vmem:[#allocation14_spill] sm:$0xff] %v9206_v27  ;;  %v9221_v60 = vpop.f32.mrb[162].mxu1 }
 0x5db   : > { %11341 = vst [vmem:[#allocation12_spill] sm:$0xff] %v9211_v14  ;;  %v3539_v51 = vmax.f32 %v9206_v27, %v9211_v14  ;;  %v3536_v52 = vmax.f32 %v3534_v42, %v3535_v23  ;;  %v3412_v22 = vpop.f32.mrb[163].mxu1  ;;  %v9233_v23 = vadd.f32 %v3396_v41, %v11330_v44 }
 0x5dd   : > { %3537 = vmax.xlane.f32.xlu0 %v3536_v52  ;;  %v3188_v43 = vpop.f32.mrb[156].mxu0  ;;  %v3541_v34 = vmax.f32 %v3539_v51, %v3540_v1  ;;  %11345 = vst [vmem:[#allocation90_spill] sm:$0xff] %v9233_v23 }
 0x5de   : > { %v9227_v54 = vadd.f32 %v3188_v43, %v11328_v18  ;;  %v3190_v21 = vpop.f32.mrb[157].mxu0  ;;  %v3545_v43 = vsel %vm1620_vm6, %v9224_v28, -inf  ;;  %v9258_v28 = vadd.f32 %v6180_v9, %v11330_v44 }
 0x5df   : > { %v9230_v61 = vadd.f32 %v3190_v21, %v11329_v11  ;;  %3542 = vmax.xlane.f32.xlu1 %v3541_v34  ;;  %v3192_v42 = vpop.f32.mrb[158].mxu0 }
 0x5e0   : > { %11343 = vst [vmem:[#allocation88_spill] sm:$0xff] %v9227_v54  ;;  %v9236_v52 = vadd.f32 %v3192_v42, %v11328_v18  ;;  %v3194_v37 = vpop.f32.mrb[159].mxu0  ;;  %v9245_v21 = vpop.f32.mrb[164].mxu1  ;;  %v3550_v42 = vsel %vm1620_vm6, %v9233_v23, -inf  ;;  %11348 = vst [vmem:[#allocation93_spill] sm:$0xff] %v9258_v28  ;;  %v3555_v9 = vsel %vm1620_vm6, %v9258_v28, -inf }
 0x5e1   : > { %11344 = vst [vmem:[#allocation89_spill] sm:$0xff] %v9230_v61  ;;  %v3544_v12 = vmax.f32 %v9227_v54, %v9230_v61  ;;  %v9241_v51 = vadd.f32 %v3194_v37, %v11329_v11  ;;  %v9249_v41 = vpop.f32.mrb[165].mxu1 }
 0x5e2   : > { %11346 = vst [vmem:[#allocation91_spill] sm:$0xff] %v9236_v52  ;;  %v9253_v62 = vpop.f32.mrb[166].mxu1 }
 0x5e3   : > { %11347 = vst [vmem:[#allocation92_spill] sm:$0xff] %v9241_v51  ;;  %v3549_v1 = vmax.f32 %v9236_v52, %v9241_v51  ;;  %v3546_v34 = vmax.f32 %v3544_v12, %v3545_v43  ;;  %v9255_v37 = vpop.f32.mrb[167].mxu1 }
 0x5e5   : > { %v3198_v30 = vpop.f32.mrb[160].mxu0  ;;  %3547 = vmax.xlane.f32.xlu0 %v3546_v34  ;;  %v3551_v25 = vmax.f32 %v3549_v1, %v3550_v42 }
 0x5e6   : > { %v9261_v40 = vadd.f32 %v3198_v30, %v11328_v18  ;;  %v3200_v16 = vpop.f32.mrb[161].mxu0  ;;  %v9277_v30 = vadd.f32 %v6181_v35, %v11330_v44  ;;  %v9292_v35 = vadd.f32 %v3409_v31, %v11330_v44 }
 0x5e7   : > { %v9264_v7 = vadd.f32 %v3200_v16, %v11329_v11  ;;  %v3202_v12 = vpop.f32.mrb[162].mxu0  ;;  %3552 = vmax.xlane.f32.xlu1 %v3551_v25 }
 0x5e8   : > { %11349 = vst [vmem:[#allocation94_spill] sm:$0xff] %v9261_v40  ;;  %v9267_v43 = vadd.f32 %v3202_v12, %v11328_v18  ;;  %v3204_v23 = vpop.f32.mrb[163].mxu0  ;;  %11353 = vst [vmem:[#allocation98_spill] sm:$0xff] %v9277_v30  ;;  %v9279_v16 = vpop.f32.mrb[168].mxu1  ;;  %v3560_v28 = vsel %vm1620_vm6, %v9277_v30, -inf }
 0x5e9   : > { %11350 = vst [vmem:[#allocation95_spill] sm:$0xff] %v9264_v7  ;;  %v3554_v34 = vmax.f32 %v9261_v40, %v9264_v7  ;;  %v9272_v1 = vadd.f32 %v3204_v23, %v11329_v11  ;;  %v9283_v42 = vpop.f32.mrb[169].mxu1  ;;  %11354 = vst [vmem:[#allocation99_spill] sm:$0xff] %v9292_v35  ;;  %v9477_v27 = vadd.f32 %v9279_v16, %v11330_v44 }
 0x5ea   : > { %11351 = vst [vmem:[#allocation96_spill] sm:$0xff] %v9267_v43  ;;  %v9285_v4 = vpop.f32.mrb[170].mxu1 }
 0x5eb   : > { %11352 = vst [vmem:[#allocation97_spill] sm:$0xff] %v9272_v1  ;;  %v3559_v25 = vmax.f32 %v9267_v43, %v9272_v1  ;;  %v3556_v12 = vmax.f32 %v3554_v34, %v3555_v9  ;;  %v9287_v23 = vpop.f32.mrb[171].mxu1  ;;  %v9427_v43 = vadd.f32 %v9283_v42, %v11330_v44  ;;  %11388 = vst [vmem:[#allocation133_spill] sm:$0xff] %v9477_v27 }
 0x5ed   : > { %3557 = vmax.xlane.f32.xlu0 %v3556_v12  ;;  %v3208_v19 = vpop.f32.mrb[164].mxu0  ;;  %v3561_v9 = vmax.f32 %v3559_v25, %v3560_v28  ;;  %v9301_v12 = vadd.f32 %v3412_v22, %v11330_v44  ;;  %11378 = vst [vmem:[#allocation123_spill] sm:$0xff] %v9427_v43 }
 0x5ee   : > { %v9295_v45 = vadd.f32 %v3208_v19, %v11328_v18  ;;  %v3210_v46 = vpop.f32.mrb[165].mxu0 }
 0x5ef   : > { %v9298_v56 = vadd.f32 %v3210_v46, %v11329_v11  ;;  %v3212_v34 = vpop.f32.mrb[166].mxu0  ;;  %11357 = vst [vmem:[#allocation102_spill] sm:$0xff] %v9301_v12  ;;  %v3565_v46 = vsel %vm1620_vm6, %v9292_v35, -inf  ;;  %v9327_v35 = vadd.f32 %v9215_v0, %v11330_v44 }
 0x5f0   : > { %11355 = vst [vmem:[#allocation100_spill] sm:$0xff] %v9295_v45  ;;  %v9304_v6 = vadd.f32 %v3212_v34, %v11328_v18  ;;  %v3214_v50 = vpop.f32.mrb[167].mxu0  ;;  %v9313_v19 = vpop.f32.mrb[172].mxu1  ;;  %v3570_v34 = vsel %vm1620_vm6, %v9301_v12, -inf  ;;  %v9337_v12 = vadd.f32 %v9221_v60, %v11330_v44 }
 0x5f1   : > { %11356 = vst [vmem:[#allocation101_spill] sm:$0xff] %v9298_v56  ;;  %v3564_v31 = vmax.f32 %v9295_v45, %v9298_v56  ;;  %v9309_v30 = vadd.f32 %v3214_v50, %v11329_v11  ;;  %3562 = vmax.xlane.f32.xlu0 %v3561_v9  ;;  %v9317_v28 = vpop.f32.mrb[173].mxu1  ;;  %11360 = vst [vmem:[#allocation105_spill] sm:$0xff] %v9327_v35 }
 0x5f2   : > { %11358 = vst [vmem:[#allocation103_spill] sm:$0xff] %v9304_v6  ;;  %v9321_v39 = vpop.f32.mrb[174].mxu1  ;;  %11363 = vst [vmem:[#allocation108_spill] sm:$0xff] %v9337_v12 }
 0x5f3   : > { %11359 = vst [vmem:[#allocation104_spill] sm:$0xff] %v9309_v30  ;;  %v3569_v22 = vmax.f32 %v9304_v6, %v9309_v30  ;;  %v3566_v25 = vmax.f32 %v3564_v31, %v3565_v46  ;;  %v9323_v50 = vpop.f32.mrb[175].mxu1 }
 0x5f5   : > { %v3218_v45 = vpop.f32.mrb[168].mxu0  ;;  %3567 = vmax.xlane.f32.xlu1 %v3566_v25  ;;  %v3571_v9 = vmax.f32 %v3569_v22, %v3570_v34 }
 0x5f6   : > { %v9330_v56 = vadd.f32 %v3218_v45, %v11328_v18  ;;  %v3220_v30 = vpop.f32.mrb[169].mxu0 }
 0x5f7   : > { %v9333_v31 = vadd.f32 %v3220_v30, %v11329_v11  ;;  %v3222_v46 = vpop.f32.mrb[170].mxu0  ;;  %3572 = vmax.xlane.f32.xlu0 %v3571_v9  ;;  %v3575_v30 = vsel %vm1620_vm6, %v9327_v35, -inf  ;;  %v9363_v35 = vadd.f32 %v9249_v41, %v11330_v44 }
 0x5f8   : > { %11361 = vst [vmem:[#allocation106_spill] sm:$0xff] %v9330_v56  ;;  %v9340_v25 = vadd.f32 %v3222_v46, %v11328_v18  ;;  %v3224_v22 = vpop.f32.mrb[171].mxu0  ;;  %v9349_v34 = vpop.f32.mrb[176].mxu1  ;;  %v3580_v46 = vsel %vm1620_vm6, %v9337_v12, -inf }
 0x5f9   : > { %11362 = vst [vmem:[#allocation107_spill] sm:$0xff] %v9333_v31  ;;  %v3574_v0 = vmax.f32 %v9330_v56, %v9333_v31  ;;  %v9345_v45 = vadd.f32 %v3224_v22, %v11329_v11  ;;  %v9353_v60 = vpop.f32.mrb[177].mxu1  ;;  %11366 = vst [vmem:[#allocation111_spill] sm:$0xff] %v9363_v35 }
 0x5fa   : > { %11364 = vst [vmem:[#allocation109_spill] sm:$0xff] %v9340_v25  ;;  %v9357_v26 = vpop.f32.mrb[178].mxu1 }
 0x5fb   : > { %11365 = vst [vmem:[#allocation110_spill] sm:$0xff] %v9345_v45  ;;  %v3579_v9 = vmax.f32 %v9340_v25, %v9345_v45  ;;  %v3576_v6 = vmax.f32 %v3574_v0, %v3575_v30  ;;  %v9359_v22 = vpop.f32.mrb[179].mxu1 }
 0x5fd   : > { %3577 = vmax.xlane.f32.xlu1 %v3576_v6  ;;  %v3228_v31 = vpop.f32.mrb[172].mxu0  ;;  %v3581_v56 = vmax.f32 %v3579_v9, %v3580_v46  ;;  %v9373_v6 = vadd.f32 %v9255_v37, %v11330_v44 }
 0x5fe   : > { %v9366_v55 = vadd.f32 %v3228_v31, %v11328_v18  ;;  %v3230_v45 = vpop.f32.mrb[173].mxu0 }
 0x5ff   : > { %v9369_v0 = vadd.f32 %v3230_v45, %v11329_v11  ;;  %3582 = vmax.xlane.f32.xlu0 %v3581_v56  ;;  %v3232_v30 = vpop.f32.mrb[174].mxu0  ;;  %11369 = vst [vmem:[#allocation114_spill] sm:$0xff] %v9373_v6  ;;  %v3585_v45 = vsel %vm1620_vm6, %v9363_v35, -inf  ;;  %v9399_v35 = vadd.f32 %v9245_v21, %v11330_v44 }
 0x600   : > { %11367 = vst [vmem:[#allocation112_spill] sm:$0xff] %v9366_v55  ;;  %v9376_v12 = vadd.f32 %v3232_v30, %v11328_v18  ;;  %v3234_v9 = vpop.f32.mrb[175].mxu0  ;;  %v9385_v46 = vpop.f32.mrb[180].mxu1  ;;  %v3590_v30 = vsel %vm1620_vm6, %v9373_v6, -inf  ;;  %v9409_v6 = vadd.f32 %v9253_v62, %v11330_v44 }
 0x601   : > { %11368 = vst [vmem:[#allocation113_spill] sm:$0xff] %v9369_v0  ;;  %v3584_v41 = vmax.f32 %v9366_v55, %v9369_v0  ;;  %v9381_v31 = vadd.f32 %v3234_v9, %v11329_v11  ;;  %v9389_v37 = vpop.f32.mrb[181].mxu1  ;;  %11372 = vst [vmem:[#allocation117_spill] sm:$0xff] %v9399_v35 }
 0x602   : > { %11370 = vst [vmem:[#allocation115_spill] sm:$0xff] %v9376_v12  ;;  %v9393_v40 = vpop.f32.mrb[182].mxu1  ;;  %11375 = vst [vmem:[#allocation120_spill] sm:$0xff] %v9409_v6  ;;  %v3600_v62 = vsel %vm1620_vm6, %v9409_v6, -inf }
 0x603   : > { %11371 = vst [vmem:[#allocation116_spill] sm:$0xff] %v9381_v31  ;;  %v3589_v56 = vmax.f32 %v9376_v12, %v9381_v31  ;;  %v3586_v25 = vmax.f32 %v3584_v41, %v3585_v45  ;;  %v9395_v9 = vpop.f32.mrb[183].mxu1 }
 0x605   : > { %v3238_v55 = vpop.f32.mrb[176].mxu0  ;;  %3587 = vmax.xlane.f32.xlu1 %v3586_v25  ;;  %v3591_v0 = vmax.f32 %v3589_v56, %v3590_v30 }
 0x606   : > { %v9402_v1 = vadd.f32 %v3238_v55, %v11328_v18  ;;  %v3240_v31 = vpop.f32.mrb[177].mxu0 }
 0x607   : > { %v9405_v41 = vadd.f32 %v3240_v31, %v11329_v11  ;;  %v3242_v45 = vpop.f32.mrb[178].mxu0  ;;  %3592 = vmax.xlane.f32.xlu0 %v3591_v0  ;;  %v3595_v31 = vsel %vm1620_vm6, %v9399_v35, -inf }
 0x608   : > { %11373 = vst [vmem:[#allocation118_spill] sm:$0xff] %v9402_v1  ;;  %v9412_v25 = vadd.f32 %v3242_v45, %v11328_v18  ;;  %v3244_v56 = vpop.f32.mrb[179].mxu0 }
 0x609   : > { %11374 = vst [vmem:[#allocation119_spill] sm:$0xff] %v9405_v41  ;;  %v3594_v21 = vmax.f32 %v9402_v1, %v9405_v41  ;;  %v9417_v55 = vadd.f32 %v3244_v56, %v11329_v11 }
 0x60a   : > { %11376 = vst [vmem:[#allocation121_spill] sm:$0xff] %v9412_v25 }
 0x60b   : > { %11377 = vst [vmem:[#allocation122_spill] sm:$0xff] %v9417_v55  ;;  %v3599_v0 = vmax.f32 %v9412_v25, %v9417_v55  ;;  %v3596_v30 = vmax.f32 %v3594_v21, %v3595_v31  ;;  %v9437_v21 = vadd.f32 %v9287_v23, %v11330_v44 }
 0x60d   : > { %3597 = vmax.xlane.f32.xlu1 %v3596_v30  ;;  %v3248_v45 = vpop.f32.mrb[180].mxu0  ;;  %v3601_v12 = vmax.f32 %v3599_v0, %v3600_v62  ;;  %11381 = vst [vmem:[#allocation126_spill] sm:$0xff] %v9437_v21  ;;  %v3610_v23 = vsel %vm1620_vm6, %v9437_v21, -inf }
 0x60e   : > { %v9430_v56 = vadd.f32 %v3248_v45, %v11328_v18  ;;  %v3250_v1 = vpop.f32.mrb[181].mxu0 }
 0x60f   : > { %v9433_v35 = vadd.f32 %v3250_v1, %v11329_v11  ;;  %3602 = vmax.xlane.f32.xlu0 %v3601_v12  ;;  %v3252_v55 = vpop.f32.mrb[182].mxu0  ;;  %v3605_v1 = vsel %vm1620_vm6, %v9427_v43, -inf  ;;  %v6995_v43 = vld [vmem:[#allocation2 + $0x80] sm:$0xff] }
 0x610   : > { %11379 = vst [vmem:[#allocation124_spill] sm:$0xff] %v9430_v56  ;;  %v9440_v31 = vadd.f32 %v3252_v55, %v11328_v18  ;;  %v3254_v0 = vpop.f32.mrb[183].mxu0 }
 0x611   : > { %11380 = vst [vmem:[#allocation125_spill] sm:$0xff] %v9433_v35  ;;  %v3604_v42 = vmax.f32 %v9430_v56, %v9433_v35  ;;  %v9445_v30 = vadd.f32 %v3254_v0, %v11329_v11 }
 0x612   : > { %11382 = vst [vmem:[#allocation127_spill] sm:$0xff] %v9440_v31 }
 0x613   : > { %11383 = vst [vmem:[#allocation128_spill] sm:$0xff] %v9445_v30  ;;  %v3609_v12 = vmax.f32 %v9440_v31, %v9445_v30  ;;  %v3606_v62 = vmax.f32 %v3604_v42, %v3605_v1  ;;  %v6996_v31 = vld [vmem:[#allocation2 + $0x88] sm:$0xff] }
 0x615   : > { %v3258_v45 = vpop.f32.mrb[184].mxu0  ;;  %3607 = vmax.xlane.f32.xlu1 %v3606_v62  ;;  %v3611_v55 = vmax.f32 %v3609_v12, %v3610_v23 }
 0x616   : > { %v3260_v6 = vpop.f32.mrb[185].mxu0 }
 0x617   : > { %v3262_v25 = vpop.f32.mrb[186].mxu0  ;;  %3612 = vmax.xlane.f32.xlu0 %v3611_v55  ;;  %v9465_v33 = vadd.f32 %v3260_v6, %v11329_v11 }
 0x618   : > { %v3264_v56 = vpop.f32.mrb[187].mxu0  ;;  %v9470_v20 = vadd.f32 %v3262_v25, %v11328_v18  ;;  %v9489_v25 = vadd.f32 %v9285_v4, %v11330_v44  ;;  %v9507_v4 = vadd.f32 %v9317_v28, %v11330_v44 }
 0x619   : > { %11385 = vst [vmem:[#allocation130_spill] sm:$0xff] %v9465_v33  ;;  %v9473_v10 = vadd.f32 %v3264_v56, %v11329_v11 }
 0x61a   : > { %11386 = vst [vmem:[#allocation131_spill] sm:$0xff] %v9470_v20  ;;  %v3620_v28 = vsel %vm1620_vm6, %v9489_v25, -inf }
 0x61b   : > { %11387 = vst [vmem:[#allocation132_spill] sm:$0xff] %v9473_v10 }
 0x61d   : > { %v3268_v35 = vpop.f32.mrb[188].mxu0 }
 0x61e   : > { %v3270_v0 = vpop.f32.mrb[189].mxu0 }
 0x61f   : > { %v3272_v41 = vpop.f32.mrb[190].mxu0  ;;  %v9485_v6 = vadd.f32 %v3270_v0, %v11329_v11  ;;  %v3615_v0 = vsel %vm1620_vm6, %v9477_v27, -inf }
 0x620   : > { %v3274_v47 = vpop.f32.mrb[191].mxu0  ;;  %v9492_v56 = vadd.f32 %v3272_v41, %v11328_v18  ;;  %v9511_v41 = vadd.f32 %v9323_v50, %v11330_v44 }
 0x621   : > { %11389 = vst [vmem:[#allocation134_spill] sm:$0xff] %v9485_v6  ;;  %v9495_v63 = vadd.f32 %v3274_v47, %v11329_v11 }
 0x622   : > { %11390 = vst [vmem:[#allocation135_spill] sm:$0xff] %v9492_v56  ;;  %11392 = vst [vmem:[#allocation137_spill] sm:$0xff] %v9511_v41 }
 0x623   : > { %11391 = vst [vmem:[#allocation136_spill] sm:$0xff] %v9495_v63  ;;  %v3629_v50 = vmax.f32 %v9492_v56, %v9495_v63  ;;  %v11491_v56 = vld [vmem:[#allocation61_spill] sm:$0xff] }
 0x625   : > { %v3278_v7 = vpop.f32.mrb[192].mxu0 }
 0x626   : > { %4274 = vrot.lane.b32.xlu1 %v6995_v43, %s7011_s22  ;;  %v3280_v30 = vpop.f32.mrb[193].mxu0  ;;  %v9462_v43 = vadd.f32 %v3258_v45, %v11328_v18  ;;  %v9482_v45 = vadd.f32 %v3268_v35, %v11328_v18 }
 0x627   : > { %v3282_v42 = vpop.f32.mrb[194].mxu0 }
 0x628   : > { %v3284_v1 = vpop.f32.mrb[195].mxu0  ;;  %11384 = vst [vmem:[#allocation129_spill] sm:$0xff] %v9462_v43  ;;  %v3614_v14 = vmax.f32 %v9462_v43, %v9465_v33  ;;  %v3619_v33 = vmax.f32 %v9470_v20, %v9473_v10  ;;  %v3624_v43 = vmax.f32 %v9482_v45, %v9485_v6  ;;  %v9518_v10 = vadd.f32 %v3278_v7, %v11328_v18 }
 0x629   : > { %v9521_v20 = vadd.f32 %v3280_v30, %v11329_v11  ;;  %v9530_v5 = vadd.f32 %v3282_v42, %v11328_v18  ;;  %v9533_v6 = vadd.f32 %v3284_v1, %v11329_v11  ;;  %v9537_v30 = vadd.f32 %v9313_v19, %v11330_v44 }
 0x62a   : > { %11393 = vst [vmem:[#allocation138_spill] sm:$0xff] %v9518_v10  ;;  %v3616_v13 = vmax.f32 %v3614_v14, %v3615_v0  ;;  %v3621_v7 = vmax.f32 %v3619_v33, %v3620_v28  ;;  %v3625_v14 = vsel %vm1620_vm6, %v9507_v4, -inf  ;;  %v3630_v0 = vsel %vm1620_vm6, %v9511_v41, -inf }
 0x62b   : > { %11394 = vst [vmem:[#allocation139_spill] sm:$0xff] %v9521_v20  ;;  %11395 = vst [vmem:[#allocation140_spill] sm:$0xff] %v9530_v5  ;;  %v3634_v63 = vmax.f32 %v9518_v10, %v9521_v20  ;;  %v9553_v33 = vadd.f32 %v9321_v39, %v11330_v44  ;;  %v3639_v19 = vmax.f32 %v9530_v5, %v9533_v6  ;;  %v3635_v39 = vsel %vm1620_vm6, %v9537_v30, -inf  ;;  %v11490_v10 = vld [vmem:[#allocation118_spill] sm:$0xff] }
 0x62c   : > { %11396 = vst [vmem:[#allocation141_spill] sm:$0xff] %v9533_v6  ;;  %11397 = vst [vmem:[#allocation142_spill] sm:$0xff] %v9537_v30  ;;  %v3631_v28 = vmax.f32 %v3629_v50, %v3630_v0  ;;  %v11488_v6 = vld [vmem:[#allocation60_spill] sm:$0xff] }
 0x62d   : > { %4276 = vrot.lane.b32.xlu0 %v6996_v31, %s7011_s22  ;;  %v3288_v62 = vpop.f32.mrb[196].mxu0  ;;  %11400 = vst [vmem:[#allocation145_spill] sm:$0xff] %v9553_v33  ;;  %v3640_v50 = vsel %vm1620_vm6, %v9553_v33, -inf }
 0x62e   : > { %v3290_v12 = vpop.f32.mrb[197].mxu0  ;;  %v9546_v42 = vadd.f32 %v3288_v62, %v11328_v18 }
 0x62f   : > { %v3292_v23 = vpop.f32.mrb[198].mxu0  ;;  %v9549_v1 = vadd.f32 %v3290_v12, %v11329_v11 }
 0x630   : > { %v3294_v21 = vpop.f32.mrb[199].mxu0  ;;  %11398 = vst [vmem:[#allocation143_spill] sm:$0xff] %v9546_v42  ;;  %v9558_v41 = vadd.f32 %v3292_v23, %v11328_v18 }
 0x631   : > { %11399 = vst [vmem:[#allocation144_spill] sm:$0xff] %v9549_v1  ;;  %v9561_v20 = vadd.f32 %v3294_v21, %v11329_v11  ;;  %v3644_v23 = vmax.f32 %v9546_v42, %v9549_v1 }
 0x632   : > { %11401 = vst [vmem:[#allocation146_spill] sm:$0xff] %v9558_v41 }
 0x633   : > { %11402 = vst [vmem:[#allocation147_spill] sm:$0xff] %v9561_v20 }
 0x635   : > { %v3298_v55 = vpop.f32.mrb[200].mxu0 }
 0x636   : > { %v3300_v53 = vpop.f32.mrb[201].mxu0  ;;  %v9564_v62 = vadd.f32 %v3298_v55, %v11328_v18 }
 0x637   : > { %v3302_v54 = vpop.f32.mrb[202].mxu0  ;;  %v9567_v12 = vadd.f32 %v3300_v53, %v11329_v11  ;;  %v3636_v53 = vmax.f32 %v3634_v63, %v3635_v39  ;;  %v3649_v63 = vmax.f32 %v9558_v41, %v9561_v20  ;;  %v11478_v20 = vld [vmem:[#allocation55_spill] sm:$0xff] }
 0x638   : > { %v3304_v58 = vpop.f32.mrb[203].mxu0  ;;  %11403 = vst [vmem:[#allocation148_spill] sm:$0xff] %v9564_v62  ;;  %v9578_v21 = vadd.f32 %v3302_v54, %v11328_v18  ;;  %v9595_v54 = vadd.f32 %v9359_v22, %v11330_v44 }
 0x639   : > { %11404 = vst [vmem:[#allocation149_spill] sm:$0xff] %v9567_v12  ;;  %v9581_v55 = vadd.f32 %v3304_v58, %v11329_v11  ;;  %v9599_v58 = vadd.f32 %v9389_v37, %v11330_v44 }
 0x63a   : > { %11406 = vst [vmem:[#allocation151_spill] sm:$0xff] %v9578_v21  ;;  %11410 = vst [vmem:[#allocation155_spill] sm:$0xff] %v9595_v54  ;;  %v3650_v39 = vsel %vm1620_vm6, %v9595_v54, -inf }
 0x63b   : > { %11407 = vst [vmem:[#allocation152_spill] sm:$0xff] %v9581_v55  ;;  %11411 = vst [vmem:[#allocation156_spill] sm:$0xff] %v9599_v58  ;;  %v3659_v37 = vmax.f32 %v9578_v21, %v9581_v55 }
 0x63d   : > { %v9455_v51 = vpop.f32.mrb[204].mxu0 }
 0x63e   : > { %v9457_v52 = vpop.f32.mrb[205].mxu0  ;;  %v9609_v0 = vadd.f32 %v9455_v51, %v11328_v18 }
 0x63f   : > { %v9459_v61 = vpop.f32.mrb[206].mxu0  ;;  %v9613_v22 = vadd.f32 %v9457_v52, %v11329_v11 }
 0x640   : > { %v9467_v31 = vpop.f32.mrb[207].mxu0  ;;  %11412 = vst [vmem:[#allocation157_spill] sm:$0xff] %v9609_v0 }
 0x641   : > { %11413 = vst [vmem:[#allocation158_spill] sm:$0xff] %v9613_v22 }
 0x645   : > { %v9497_v16 = vpop.f32.mrb[208].mxu0 }
 0x646   : > { %v9501_v35 = vpop.f32.mrb[209].mxu0 }
 0x647   : > { %v9513_v47 = vpop.f32.mrb[210].mxu0 }
 0x648   : > { %v9523_v27 = vpop.f32.mrb[211].mxu0 }
 0x64a   : > { %3617 = vmax.xlane.f32.xlu1 %v3616_v13  ;;  %v3626_v13 = vmax.f32 %v3624_v43, %v3625_v14  ;;  %v9573_v43 = vadd.f32 %v9353_v60, %v11330_v44  ;;  %v9591_v60 = vadd.f32 %v9357_v26, %v11330_v44  ;;  %v3654_v14 = vmax.f32 %v9564_v62, %v9567_v12 }
 0x64c   : > { %3622 = vmax.xlane.f32.xlu0 %v3621_v7  ;;  %11405 = vst [vmem:[#allocation150_spill] sm:$0xff] %v9573_v43  ;;  %v9587_v7 = vadd.f32 %v9349_v34, %v11330_v44  ;;  %11409 = vst [vmem:[#allocation154_spill] sm:$0xff] %v9591_v60  ;;  %v3641_v34 = vmax.f32 %v3639_v19, %v3640_v50  ;;  %v3645_v26 = vsel %vm1620_vm6, %v9573_v43, -inf  ;;  %v3660_v52 = vsel %vm1620_vm6, %v9591_v60, -inf }
 0x64d   : > { %v9623_v19 = vadd.f32 %v9467_v31, %v11329_v11  ;;  %v9639_v31 = vadd.f32 %v9395_v9, %v11330_v44  ;;  %v3651_v50 = vmax.f32 %v3649_v63, %v3650_v39  ;;  %v9650_v9 = vadd.f32 %v9497_v16, %v11328_v18 }
 0x64e   : > { %3627 = vmax.xlane.f32.xlu1 %v3626_v13  ;;  %11408 = vst [vmem:[#allocation153_spill] sm:$0xff] %v9587_v7  ;;  %v9619_v13 = vadd.f32 %v9459_v61, %v11328_v18  ;;  %v3655_v51 = vsel %vm1620_vm6, %v9587_v7, -inf  ;;  %v3665_v61 = vsel %vm1620_vm6, %v9599_v58, -inf  ;;  %v9654_v63 = vadd.f32 %v9501_v35, %v11329_v11 }
 0x64f   : > { %11415 = vst [vmem:[#allocation160_spill] sm:$0xff] %v9623_v19  ;;  %11417 = vst [vmem:[#allocation162_spill] sm:$0xff] %v9639_v31  ;;  %v9663_v16 = vadd.f32 %v9523_v27, %v11329_v11 }
 0x650   : > { %3632 = vmax.xlane.f32.xlu0 %v3631_v28  ;;  %11414 = vst [vmem:[#allocation159_spill] sm:$0xff] %v9619_v13  ;;  %v3646_v28 = vmax.f32 %v3644_v23, %v3645_v26  ;;  %v3664_v26 = vmax.f32 %v9609_v0, %v9613_v22  ;;  %v3669_v58 = vmax.f32 %v9619_v13, %v9623_v19  ;;  %11418 = vst [vmem:[#allocation163_spill] sm:$0xff] %v9650_v9 }
 0x651   : > { %11419 = vst [vmem:[#allocation164_spill] sm:$0xff] %v9654_v63  ;;  %11421 = vst [vmem:[#allocation166_spill] sm:$0xff] %v9663_v16 }
 0x652   : > { %3637 = vmax.xlane.f32.xlu1 %v3636_v53  ;;  %v9633_v53 = vadd.f32 %v9385_v46, %v11330_v44 }
 0x654   : > { %3642 = vmax.xlane.f32.xlu0 %v3641_v34  ;;  %11416 = vst [vmem:[#allocation161_spill] sm:$0xff] %v9633_v53  ;;  %v3508_v23 = vpop.xlane.xlu0 %3507  ;;  %v3656_v34 = vmax.f32 %v3654_v14, %v3655_v51 }
 0x655   : > { %v3684_v60 = vsub.f32 %v9116_v48, %v3508_v23  ;;  %v3685_v55 = vsub.f32 %v9119_v38, %v3508_v23  ;;  %v3686_v46 = vsub.f32 %v9128_v3, %v3508_v23  ;;  %v9659_v3 = vadd.f32 %v9513_v47, %v11328_v18 }
 0x656   : > { %3647 = vmax.xlane.f32.xlu1 %v3646_v28  ;;  %v3513_v14 = vpop.xlane.xlu1 %3512  ;;  %v3661_v28 = vmax.f32 %v3659_v37, %v3660_v52  ;;  %v3674_v18 = vmax.f32 %v9650_v9, %v9654_v63 }
 0x657   : > { %v3792_v51 = vmul.f32 1.442695, %v3684_v60  ;;  %v3794_v48 = vmul.f32 1.442695, %v3685_v55  ;;  %v3796_v39 = vmul.f32 1.442695, %v3686_v46  ;;  %v3687_v38 = vsub.f32 %v9122_v17, %v3513_v14 }
 0x658   : > { %3652 = vmax.xlane.f32.xlu0 %v3651_v50  ;;  %11420 = vst [vmem:[#allocation165_spill] sm:$0xff] %v9659_v3  ;;  %v3688_v23 = vsub.f32 %v9125_v49, %v3513_v14  ;;  %v3689_v35 = vsub.f32 %v9141_v24, %v3513_v14  ;;  %v3666_v60 = vmax.f32 %v3664_v26, %v3665_v61  ;;  %v3670_v24 = vsel %vm1620_vm6, %v9639_v31, -inf  ;;  %v11455_v31 = vld [vmem:[#allocation104_spill] sm:$0xff] }
 0x659   : > { %6617 = vpow2.f32 %v3792_v51  ;;  %v3798_v55 = vmul.f32 1.442695, %v3687_v38  ;;  %v9677_v49 = vadd.f32 %v9393_v40, %v11330_v44  ;;  %v3679_v37 = vmax.f32 %v9659_v3, %v9663_v16 }
 0x65a   : > { %3657 = vmax.xlane.f32.xlu1 %v3656_v34  ;;  %v9667_v50 = vpop.xlane.xlu0 %3517  ;;  %6619 = vpow2.f32 %v3794_v48  ;;  %v3800_v47 = vmul.f32 1.442695, %v3688_v23  ;;  %v3802_v11 = vmul.f32 1.442695, %v3689_v35  ;;  %v3671_v61 = vmax.f32 %v3669_v58, %v3670_v24 }
 0x65b   : > { %v3691_v17 = vsub.f32 %v9146_v32, %v9667_v50  ;;  %11422 = vst [vmem:[#allocation167_spill] sm:$0xff] %v9677_v49  ;;  %6621 = vpow2.f32 %v3796_v39  ;;  %v3675_v40 = vsel %vm1620_vm6, %v9633_v53, -inf  ;;  %v3690_v34 = vsub.f32 %v9138_v29, %v9667_v50 }
 0x65c   : > { %v9673_v27 = vpop.xlane.xlu1 %3522  ;;  %3662 = vmax.xlane.f32.xlu0 %v3661_v28  ;;  %6623 = vpow2.f32 %v3798_v55  ;;  %v3680_v46 = vsel %vm1620_vm6, %v9677_v49, -inf }
 0x65d   : > { %v3693_v32 = vsub.f32 %v9154_v2, %v9673_v27  ;;  %v3694_v52 = vsub.f32 %v9159_v36, %v9673_v27  ;;  %6625 = vpow2.f32 %v3800_v47  ;;  %v3806_v44 = vmul.f32 1.442695, %v3691_v17 }
 0x65e   : > { %3667 = vmax.xlane.f32.xlu1 %v3666_v60  ;;  %6627 = vpow2.f32 %v3802_v11  ;;  %v3676_v2 = vmax.f32 %v3674_v18, %v3675_v40  ;;  %v3681_v58 = vmax.f32 %v3679_v37, %v3680_v46  ;;  %v3804_v51 = vmul.f32 1.442695, %v3690_v34  ;;  %v11423_v60 = vld [vmem:[#allocation23_spill] sm:$0xff] }
 0x65f   : > { %v3810_v26 = vmul.f32 1.442695, %v3693_v32  ;;  %v3812_v14 = vmul.f32 1.442695, %v3694_v52  ;;  %6629 = vpow2.f32 %v3806_v44  ;;  %v11424_v11 = vld [vmem:[#allocation39_spill] sm:$0xff] }
 0x660   : > { %3672 = vmax.xlane.f32.xlu0 %v3671_v61 }
 0x661   : > { %6631 = vpow2.f32 %v3810_v26  ;;  %v11426_v26 = vld [vmem:[#allocation21_spill] sm:$0xff] }
 0x662   : > { %3677 = vmax.xlane.f32.xlu1 %v3676_v2  ;;  %v9693_v36 = vpop.xlane.xlu0 %3527  ;;  %6633 = vpow2.f32 %v3812_v14 }
 0x663   : > { %v3697_v28 = vsub.f32 %v9174_v8, %v9693_v36  ;;  %v6618_v29 = vpop.eup %6617  ;;  %6635 = vpow2.f32 %v3804_v51  ;;  %v3696_v18 = vsub.f32 %v11423_v60, %v9693_v36 }
 0x664   : > { %v9697_v48 = vpop.xlane.xlu1 %3532  ;;  %3682 = vmax.xlane.f32.xlu0 %v3681_v58  ;;  %v6620_v38 = vpop.eup %6619  ;;  %v11427_v58 = vld [vmem:[#allocation24_spill] sm:$0xff] }
 0x665   : > { %v3818_v39 = vmul.f32 1.442695, %v3697_v28  ;;  %v3699_v23 = vsub.f32 %v9180_v57, %v9697_v48  ;;  %v3700_v35 = vsub.f32 %v9185_v15, %v9697_v48  ;;  %v6622_v55 = vpop.eup %6621  ;;  %v4008_v17 = vadd.f32 %v6620_v38, %v6618_v29  ;;  %v11425_v15 = vld [vmem:[#allocation17_spill] sm:$0xff] }
 0x666   : > { %2207 = vadd.xlane.f32.xlu1 %v8681_v59  ;;  %v6624_v8 = vpop.eup %6623  ;;  %v4009_v57 = vsel %vm1620_vm6, %v6622_v55, 0.0  ;;  %v3816_v46 = vmul.f32 1.442695, %v3696_v18 }
 0x667   : > { %v3824_v47 = vmul.f32 1.442695, %v3700_v35  ;;  %v6626_v24 = vpop.eup %6625  ;;  %6637 = vpow2.f32 %v3818_v39  ;;  %v4188_v32 = vpack.c.bf16 %v6624_v8, %v6618_v29  ;;  %v3822_v52 = vmul.f32 1.442695, %v3699_v23  ;;  %v11428_v29 = vld [vmem:[#allocation12_spill] sm:$0xff]  ;;  %v11429_v35 = vld [vmem:[#allocation14_spill] sm:$0xff] }
 0x668   : > { %2212 = vadd.xlane.f32.xlu0 %v11424_v11  ;;  %v6628_v37 = vpop.eup %6627  ;;  %v4189_v59 = vpack.c.bf16 %v6626_v24, %v6620_v38  ;;  %v9711_v40 = vadd.f32 %v4009_v57, %v4008_v17  ;;  %v4013_v44 = vadd.f32 %v6626_v24, %v6624_v8  ;;  %v11430_v17 = vld [vmem:[#allocation40_spill] sm:$0xff] }
 0x669   : > { %6639 = vpow2.f32 %v3824_v47  ;;  %v4190_v34 = vpack.c.bf16 %v6628_v37, %v6622_v55  ;;  %v4014_v28 = vsel %vm1620_vm6, %v6628_v37, 0.0  ;;  %v9719_v51 = vpop.eup %6629  ;;  %v11431_v47 = vld [vmem:[#allocation27_spill] sm:$0xff] }
 0x66a   : > { %2127 = vadd.xlane.f32.xlu1 %v11425_v15  ;;  %v9709_v61 = vpop.xlane.xlu0 %3537  ;;  %4382 = vmatprep.mubr.bf16.mxu1 %v4189_v59  ;;  %6641 = vpow2.f32 %v3822_v52  ;;  %v9727_v8 = vadd.f32 %v4014_v28, %v4013_v44  ;;  %v11433_v15 = vld [vmem:[#allocation32_spill] sm:$0xff] }
 0x66b   : > { %v3703_v2 = vsub.f32 %v11426_v26, %v9709_v61  ;;  %6210 = vmatprep.mubr.msk.bf16.mxu0 %vm1620_vm6, %v4190_v34  ;;  %4383 = vmatmul.mubr.bf16.vlgmr.msra.gmra.mrb[184].mxu1 %v4188_v32  ;;  %v6632_v38 = vpop.eup %6631  ;;  %6643 = vpow2.f32 %v3816_v46  ;;  %v3702_v11 = vsub.f32 %v11431_v47, %v9709_v61  ;;  %v11432_v32 = vld [vmem:[#allocation41_spill] sm:$0xff]  ;;  %v11435_v28 = vld [vmem:[#allocation28_spill] sm:$0xff] }
 0x66c   : > { %v9715_v14 = vpop.xlane.xlu1 %3542  ;;  %2132 = vadd.xlane.f32.xlu0 %v11427_v58  ;;  %v6634_v60 = vpop.eup %6633  ;;  %v11434_v34 = vld [vmem:[#allocation89_spill] sm:$0xff] }
 0x66d   : > { %v3706_v39 = vsub.f32 %v11428_v29, %v9715_v14  ;;  %v3830_v23 = vmul.f32 1.442695, %v3703_v2  ;;  %v3705_v55 = vsub.f32 %v11429_v35, %v9715_v14  ;;  %v4192_v24 = vpack.c.bf16 %v6634_v60, %v9719_v51  ;;  %v9735_v37 = vpop.eup %6635 }
 0x66e   : > { %2217 = vadd.xlane.f32.xlu1 %v11430_v17  ;;  %v9733_v57 = vadd.f32 %v6634_v60, %v6632_v38  ;;  %v4191_v2 = vpack.c.bf16 %v6632_v38, %v9735_v37  ;;  %v3828_v46 = vmul.f32 1.442695, %v3702_v11  ;;  %v11438_v60 = vld [vmem:[#allocation42_spill] sm:$0xff] }
 0x66f   : > { %v3836_v18 = vmul.f32 1.442695, %v3706_v39  ;;  %6645 = vpow2.f32 %v3830_v23  ;;  %v3834_v52 = vmul.f32 1.442695, %v3705_v55  ;;  %4390 = vmatprep.mubr.bf16.mxu1 %v4192_v24  ;;  %v11436_v39 = vld [vmem:[#allocation91_spill] sm:$0xff]  ;;  %v11437_v55 = vld [vmem:[#allocation92_spill] sm:$0xff] }
 0x670   : > { %2222 = vadd.xlane.f32.xlu0 %v11432_v32  ;;  %v11440_v32 = vld [vmem:[#allocation43_spill] sm:$0xff] }
 0x671   : > { %v9740_v44 = vpop.eup %6637  ;;  %6647 = vpow2.f32 %v3836_v18  ;;  %v11439_v18 = vld [vmem:[#allocation88_spill] sm:$0xff] }
 0x672   : > { %2137 = vadd.xlane.f32.xlu1 %v11433_v15  ;;  %v9738_v59 = vpop.xlane.xlu0 %3547  ;;  %6649 = vpow2.f32 %v3834_v52 }
 0x673   : > { %v3709_v26 = vsub.f32 %v11434_v34, %v9738_v59  ;;  %v9748_v29 = vpop.eup %6639  ;;  %4391 = vmatmul.mubr.bf16.gmra.mrb[188].mxu1 %v4191_v2  ;;  %v3708_v47 = vsub.f32 %v11439_v18, %v9738_v59  ;;  %6651 = vpow2.f32 %v3828_v46  ;;  %v11441_v34 = vld [vmem:[#allocation26_spill] sm:$0xff] }
 0x674   : > { %v9745_v58 = vpop.xlane.xlu1 %3552  ;;  %2142 = vadd.xlane.f32.xlu0 %v11435_v28  ;;  %v4195_v38 = vpack.c.bf16 %v9748_v29, %v9740_v44  ;;  %v9759_v11 = vpop.eup %6641  ;;  %v11442_v28 = vld [vmem:[#allocation95_spill] sm:$0xff] }
 0x675   : > { %v3711_v23 = vsub.f32 %v11436_v39, %v9745_v58  ;;  %v3842_v35 = vmul.f32 1.442695, %v3709_v26  ;;  %v3712_v17 = vsub.f32 %v11437_v55, %v9745_v58  ;;  %v9762_v15 = vpop.eup %6643  ;;  %v3840_v2 = vmul.f32 1.442695, %v3708_v47  ;;  %v11445_v47 = vld [vmem:[#allocation96_spill] sm:$0xff] }
 0x676   : > { %2227 = vadd.xlane.f32.xlu1 %v11438_v60  ;;  %4398 = vmatprep.mubr.bf16.mxu1 %v4195_v38  ;;  %v4194_v46 = vpack.c.bf16 %v9759_v11, %v9762_v15 }
 0x677   : > { %v3848_v24 = vmul.f32 1.442695, %v3712_v17  ;;  %v3846_v52 = vmul.f32 1.442695, %v3711_v23  ;;  %6653 = vpow2.f32 %v3842_v35  ;;  %v11443_v17 = vld [vmem:[#allocation34_spill] sm:$0xff]  ;;  %v11444_v35 = vld [vmem:[#allocation44_spill] sm:$0xff] }
 0x678   : > { %2232 = vadd.xlane.f32.xlu0 %v11440_v32  ;;  %v11446_v32 = vld [vmem:[#allocation97_spill] sm:$0xff] }
 0x679   : > { %6655 = vpow2.f32 %v3848_v24  ;;  %v9771_v55 = vpop.eup %6645 }
 0x67a   : > { %2147 = vadd.xlane.f32.xlu1 %v11441_v34  ;;  %v9765_v26 = vpop.xlane.xlu0 %3557  ;;  %6657 = vpow2.f32 %v3846_v52  ;;  %v11447_v52 = vld [vmem:[#allocation94_spill] sm:$0xff] }
 0x67b   : > { %v3715_v39 = vsub.f32 %v11442_v28, %v9765_v26  ;;  %v9774_v23 = vpop.eup %6647  ;;  %4399 = vmatmul.mubr.bf16.gmra.mrb[192].mxu1 %v4194_v46  ;;  %6659 = vpow2.f32 %v3840_v2  ;;  %v3714_v46 = vsub.f32 %v11447_v52, %v9765_v26 }
 0x67c   : > { %2152 = vadd.xlane.f32.xlu0 %v11443_v17  ;;  %v4198_v60 = vpack.c.bf16 %v9774_v23, %v9771_v55  ;;  %v9785_v28 = vpop.eup %6649  ;;  %v11448_v17 = vld [vmem:[#allocation45_spill] sm:$0xff] }
 0x67d   : > { %v3854_v18 = vmul.f32 1.442695, %v3715_v39  ;;  %v9792_v39 = vpop.eup %6651 }
 0x67e   : > { %2237 = vadd.xlane.f32.xlu1 %v11444_v35  ;;  %v9779_v38 = vpop.xlane.xlu0 %3562  ;;  %4406 = vmatprep.mubr.bf16.mxu1 %v4198_v60  ;;  %v11449_v35 = vld [vmem:[#allocation15_spill] sm:$0xff]  ;;  %v4197_v60 = vpack.c.bf16 %v9785_v28, %v9792_v39 }
 0x67f   : > { %v3717_v24 = vsub.f32 %v11445_v47, %v9779_v38  ;;  %v3718_v34 = vsub.f32 %v11446_v32, %v9779_v38  ;;  %v3692_v49 = vsub.f32 %v11449_v35, %v9667_v50  ;;  %v11450_v47 = vld [vmem:[#allocation47_spill] sm:$0xff]  ;;  %6661 = vpow2.f32 %v3854_v18  ;;  %v11451_v32 = vld [vmem:[#allocation101_spill] sm:$0xff]  ;;  %v11452_v50 = vld [vmem:[#allocation100_spill] sm:$0xff] }
 0x680   : > { %2242 = vadd.xlane.f32.xlu0 %v11448_v17  ;;  %v3852_v17 = vmul.f32 1.442695, %v3714_v46 }
 0x681   : > { %v3858_v16 = vmul.f32 1.442695, %v3717_v24  ;;  %v3860_v2 = vmul.f32 1.442695, %v3718_v34  ;;  %v9801_v52 = vpop.eup %6653  ;;  %v11453_v34 = vld [vmem:[#allocation4_spill] sm:$0xff] }
 0x682   : > { %v9794_v3 = vpop.xlane.xlu1 %3567  ;;  %2157 = vadd.xlane.f32.xlu1 %v11450_v47  ;;  %v3808_v18 = vmul.f32 1.442695, %v3692_v49 }
 0x683   : > { %v3721_v53 = vsub.f32 %v11451_v32, %v9794_v3  ;;  %6663 = vpow2.f32 %v3860_v2  ;;  %v3720_v24 = vsub.f32 %v11452_v50, %v9794_v3  ;;  %v9808_v63 = vpop.eup %6655  ;;  %4407 = vmatmul.mubr.bf16.gmra.mrb[196].mxu1 %v4197_v60  ;;  %v11454_v32 = vld [vmem:[#allocation103_spill] sm:$0xff]  ;;  %v11456_v2 = vld [vmem:[#allocation46_spill] sm:$0xff] }
 0x684   : > { %2162 = vadd.xlane.f32.xlu0 %v11453_v34  ;;  %v9806_v35 = vpop.xlane.xlu0 %3572  ;;  %6665 = vpow2.f32 %v3858_v16  ;;  %v4201_v50 = vpack.c.bf16 %v9808_v63, %v9801_v52  ;;  %v9817_v34 = vpop.eup %6657  ;;  %v11457_v16 = vld [vmem:[#allocation48_spill] sm:$0xff] }
 0x685   : > { %v3866_v47 = vmul.f32 1.442695, %v3721_v53  ;;  %v3723_v9 = vsub.f32 %v11454_v32, %v9806_v35  ;;  %v3724_v46 = vsub.f32 %v11455_v31, %v9806_v35  ;;  %6667 = vpow2.f32 %v3852_v17  ;;  %v9820_v53 = vpop.eup %6659  ;;  %v11458_v31 = vld [vmem:[#allocation49_spill] sm:$0xff]  ;;  %v11460_v17 = vld [vmem:[#allocation107_spill] sm:$0xff] }
 0x686   : > { %2247 = vadd.xlane.f32.xlu1 %v11456_v2  ;;  %v3864_v19 = vmul.f32 1.442695, %v3720_v24  ;;  %4414 = vmatprep.mubr.bf16.mxu1 %v4201_v50  ;;  %6669 = vpow2.f32 %v3808_v18  ;;  %v4200_v32 = vpack.c.bf16 %v9817_v34, %v9820_v53  ;;  %v11459_v2 = vld [vmem:[#allocation106_spill] sm:$0xff] }
 0x687   : > { %v3872_v13 = vmul.f32 1.442695, %v3724_v46  ;;  %6671 = vpow2.f32 %v3866_v47  ;;  %v3870_v49 = vmul.f32 1.442695, %v3723_v9  ;;  %v11461_v46 = vld [vmem:[#allocation105_spill] sm:$0xff]  ;;  %v11463_v18 = vld [vmem:[#allocation30_spill] sm:$0xff] }
 0x688   : > { %2252 = vadd.xlane.f32.xlu0 %v11457_v16  ;;  %v11462_v16 = vld [vmem:[#allocation22_spill] sm:$0xff] }
 0x689   : > { %6673 = vpow2.f32 %v3872_v13  ;;  %v3695_v0 = vsub.f32 %v11462_v16, %v9673_v27  ;;  %v9831_v47 = vpop.eup %6661  ;;  %v11464_v13 = vld [vmem:[#allocation109_spill] sm:$0xff]  ;;  %v11467_v27 = vld [vmem:[#allocation50_spill] sm:$0xff] }
 0x68a   : > { %v3578_v60 = vpop.xlane.xlu1 %3577  ;;  %2167 = vadd.xlane.f32.xlu1 %v11458_v31  ;;  %6675 = vpow2.f32 %v3864_v19 }
 0x68b   : > { %v3726_v22 = vsub.f32 %v11459_v2, %v3578_v60  ;;  %v3727_v24 = vsub.f32 %v11460_v17, %v3578_v60  ;;  %v3728_v50 = vsub.f32 %v11461_v46, %v3578_v60  ;;  %4415 = vmatmul.mubr.bf16.gmra.mrb[200].mxu1 %v4200_v32  ;;  %6677 = vpow2.f32 %v3870_v49  ;;  %v11465_v17 = vld [vmem:[#allocation110_spill] sm:$0xff]  ;;  %v11466_v46 = vld [vmem:[#allocation108_spill] sm:$0xff]  ;;  %v11468_v32 = vld [vmem:[#allocation25_spill] sm:$0xff] }
 0x68c   : > { %2172 = vadd.xlane.f32.xlu0 %v11463_v18  ;;  %v3583_v9 = vpop.xlane.xlu0 %3582  ;;  %v11469_v49 = vld [vmem:[#allocation51_spill] sm:$0xff] }
 0x68d   : > { %v3876_v31 = vmul.f32 1.442695, %v3726_v22  ;;  %v3878_v21 = vmul.f32 1.442695, %v3727_v24  ;;  %v3880_v7 = vmul.f32 1.442695, %v3728_v50  ;;  %v3729_v12 = vsub.f32 %v11464_v13, %v3583_v9  ;;  %v9834_v2 = vpop.eup %6663 }
 0x68e   : > { %v3730_v60 = vsub.f32 %v11465_v17, %v3583_v9  ;;  %v3731_v62 = vsub.f32 %v11466_v46, %v3583_v9  ;;  %2257 = vadd.xlane.f32.xlu1 %v11467_v27  ;;  %v9839_v19 = vpop.eup %6665  ;;  %v4204_v22 = vpack.c.bf16 %v9834_v2, %v9831_v47  ;;  %v3698_v24 = vsub.f32 %v11468_v32, %v9693_v36  ;;  %v11470_v9 = vld [vmem:[#allocation33_spill] sm:$0xff]  ;;  %v11474_v32 = vld [vmem:[#allocation35_spill] sm:$0xff] }
 0x68f   : > { %6679 = vpow2.f32 %v3876_v31  ;;  %v3882_v16 = vmul.f32 1.442695, %v3729_v12  ;;  %v3814_v13 = vmul.f32 1.442695, %v3695_v0  ;;  %v3701_v17 = vsub.f32 %v11470_v9, %v9697_v48  ;;  %v9848_v46 = vpop.eup %6667  ;;  %v11471_v31 = vld [vmem:[#allocation52_spill] sm:$0xff]  ;;  %v11473_v48 = vld [vmem:[#allocation53_spill] sm:$0xff] }
 0x690   : > { %6681 = vpow2.f32 %v3878_v21  ;;  %v3884_v50 = vmul.f32 1.442695, %v3730_v60  ;;  %v3886_v18 = vmul.f32 1.442695, %v3731_v62  ;;  %2262 = vadd.xlane.f32.xlu0 %v11469_v49  ;;  %4422 = vmatprep.mubr.bf16.mxu1 %v4204_v22  ;;  %v9853_v27 = vpop.eup %6669  ;;  %v11472_v62 = vld [vmem:[#allocation113_spill] sm:$0xff]  ;;  %v4203_v0 = vpack.c.bf16 %v9839_v19, %v9848_v46 }
 0x691   : > { %6683 = vpow2.f32 %v3880_v7  ;;  %v9859_v36 = vpop.eup %6671  ;;  %v3820_v7 = vmul.f32 1.442695, %v3698_v24  ;;  %v3826_v22 = vmul.f32 1.442695, %v3701_v17  ;;  %v11475_v49 = vld [vmem:[#allocation13_spill] sm:$0xff]  ;;  %v11476_v24 = vld [vmem:[#allocation115_spill] sm:$0xff] }
 0x692   : > { %6685 = vpow2.f32 %v3882_v16  ;;  %v9850_v12 = vpop.xlane.xlu1 %3587  ;;  %2177 = vadd.xlane.f32.xlu1 %v11471_v31  ;;  %v3707_v9 = vsub.f32 %v11475_v49, %v9715_v14 }
 0x693   : > { %6687 = vpow2.f32 %v3884_v50  ;;  %v3733_v21 = vsub.f32 %v11472_v62, %v9850_v12  ;;  %v9864_v16 = vpop.eup %6673  ;;  %v3704_v50 = vsub.f32 %v11474_v32, %v9709_v61  ;;  %4423 = vmatmul.mubr.bf16.gmra.mrb[204].mxu1 %v4203_v0  ;;  %v11479_v61 = vld [vmem:[#allocation112_spill] sm:$0xff] }
 0x694   : > { %6689 = vpow2.f32 %v3886_v18  ;;  %2182 = vadd.xlane.f32.xlu0 %v11473_v48  ;;  %v9862_v60 = vpop.xlane.xlu0 %3592  ;;  %v9870_v31 = vpop.eup %6675  ;;  %v11477_v48 = vld [vmem:[#allocation116_spill] sm:$0xff]  ;;  %v3732_v14 = vsub.f32 %v11479_v61, %v9850_v12  ;;  %v3838_v41 = vmul.f32 1.442695, %v3707_v9 }
 0x695   : > { %6691 = vpow2.f32 %v3814_v13  ;;  %v3890_v62 = vmul.f32 1.442695, %v3733_v21  ;;  %v3735_v18 = vsub.f32 %v11476_v24, %v9862_v60  ;;  %v3736_v54 = vsub.f32 %v11477_v48, %v9862_v60  ;;  %v9879_v17 = vpop.eup %6677  ;;  %v11480_v21 = vld [vmem:[#allocation54_spill] sm:$0xff]  ;;  %v11481_v24 = vld [vmem:[#allocation87_spill] sm:$0xff] }
 0x696   : > { %2267 = vadd.xlane.f32.xlu1 %v11478_v20  ;;  %v4207_v13 = vpack.c.bf16 %v9864_v16, %v9859_v36  ;;  %6693 = vpow2.f32 %v3820_v7  ;;  %v3832_v49 = vmul.f32 1.442695, %v3704_v50  ;;  %v3710_v20 = vsub.f32 %v11481_v24, %v9738_v59  ;;  %v11482_v7 = vld [vmem:[#allocation56_spill] sm:$0xff] }
 0x697   : > { %v3896_v0 = vmul.f32 1.442695, %v3736_v54  ;;  %6695 = vpow2.f32 %v3826_v22  ;;  %v3894_v43 = vmul.f32 1.442695, %v3735_v18  ;;  %v11483_v54 = vld [vmem:[#allocation90_spill] sm:$0xff]  ;;  %v11484_v22 = vld [vmem:[#allocation119_spill] sm:$0xff]  ;;  %v4206_v59 = vpack.c.bf16 %v9879_v17, %v9870_v31 }
 0x698   : > { %4430 = vmatprep.mubr.bf16.mxu1 %v4207_v13  ;;  %2272 = vadd.xlane.f32.xlu0 %v11480_v21  ;;  %6697 = vpow2.f32 %v3890_v62  ;;  %v3713_v13 = vsub.f32 %v11483_v54, %v9745_v58  ;;  %v3888_v9 = vmul.f32 1.442695, %v3732_v14  ;;  %v11485_v62 = vld [vmem:[#allocation57_spill] sm:$0xff]  ;;  %v4018_v24 = vadd.f32 %v9735_v37, %v9719_v51  ;;  %v11487_v51 = vld [vmem:[#allocation122_spill] sm:$0xff] }
 0x699   : > { %v9884_v32 = vpop.eup %6679  ;;  %6699 = vpow2.f32 %v3896_v0  ;;  %v3844_v54 = vmul.f32 1.442695, %v3710_v20  ;;  %v4019_v14 = vsel %vm1620_vm6, %v9853_v27, 0.0  ;;  %v11489_v20 = vld [vmem:[#allocation93_spill] sm:$0xff] }
 0x69a   : > { %v6682_v48 = vpop.eup %6681  ;;  %v9888_v1 = vpop.xlane.xlu1 %3597  ;;  %2187 = vadd.xlane.f32.xlu1 %v11482_v7  ;;  %6701 = vpow2.f32 %v3832_v49  ;;  %v3850_v49 = vmul.f32 1.442695, %v3713_v13 }
 0x69b   : > { %v9891_v61 = vpop.eup %6683  ;;  %v3739_v50 = vsub.f32 %v11484_v22, %v9888_v1  ;;  %v4078_v7 = vadd.f32 %v6682_v48, %v9884_v32  ;;  %4431 = vmatmul.mubr.bf16.gmra.mrb[208].mxu1 %v4206_v59  ;;  %v11486_v22 = vld [vmem:[#allocation121_spill] sm:$0xff]  ;;  %6703 = vpow2.f32 %v3894_v43  ;;  %v3716_v59 = vsub.f32 %v11489_v20, %v9765_v26  ;;  %v11496_v20 = vld [vmem:[#allocation59_spill] sm:$0xff] }
 0x69c   : > { %v6686_v21 = vpop.eup %6685  ;;  %2192 = vadd.xlane.f32.xlu0 %v11485_v62  ;;  %v9900_v18 = vpop.xlane.xlu0 %3602  ;;  %v4079_v58 = vsel %vm1620_vm6, %v9891_v61, 0.0  ;;  %6705 = vpow2.f32 %v3838_v41  ;;  %v3738_v43 = vsub.f32 %v11490_v10, %v9888_v1  ;;  %v4020_v10 = vadd.f32 %v4019_v14, %v4018_v24 }
 0x69d   : > { %v6688_v0 = vpop.eup %6687  ;;  %v3741_v42 = vsub.f32 %v11486_v22, %v9900_v18  ;;  %v3902_v33 = vmul.f32 1.442695, %v3739_v50  ;;  %v3742_v37 = vsub.f32 %v11487_v51, %v9900_v18  ;;  %v9920_v22 = vadd.f32 %v4079_v58, %v4078_v7  ;;  %v11493_v7 = vld [vmem:[#allocation58_spill] sm:$0xff] }
 0x69e   : > { %v9911_v62 = vpop.eup %6689  ;;  %2277 = vadd.xlane.f32.xlu1 %v11488_v6  ;;  %v4210_v5 = vpack.c.bf16 %v6688_v0, %v6682_v48  ;;  %6707 = vpow2.f32 %v3888_v9  ;;  %v4083_v51 = vadd.f32 %v6688_v0, %v6686_v21  ;;  %v11492_v6 = vld [vmem:[#allocation98_spill] sm:$0xff]  ;;  %v3900_v14 = vmul.f32 1.442695, %v3738_v43 }
 0x69f   : > { %v9916_v30 = vpop.eup %6691  ;;  %v3908_v50 = vmul.f32 1.442695, %v3742_v37  ;;  %6709 = vpow2.f32 %v3844_v54  ;;  %v3719_v48 = vsub.f32 %v11492_v6, %v9779_v38  ;;  %v3906_v41 = vmul.f32 1.442695, %v3741_v42  ;;  %v11494_v42 = vld [vmem:[#allocation125_spill] sm:$0xff]  ;;  %v11495_v37 = vld [vmem:[#allocation99_spill] sm:$0xff] }
 0x6a0   : > { %4438 = vmatprep.mubr.bf16.mxu1 %v4210_v5  ;;  %2282 = vadd.xlane.f32.xlu0 %v11491_v56  ;;  %v4084_v13 = vsel %vm1620_vm6, %v9911_v62, 0.0  ;;  %v9929_v26 = vpop.eup %6693  ;;  %6711 = vpow2.f32 %v3902_v33  ;;  %v4024_v5 = vsel %vm1620_vm6, %v9916_v30, 0.0  ;;  %v3856_v38 = vmul.f32 1.442695, %v3716_v59 }
 0x6a1   : > { %v9936_v56 = vadd.f32 %v4084_v13, %v4083_v51  ;;  %v9938_v58 = vpop.eup %6695  ;;  %6713 = vpow2.f32 %v3908_v50  ;;  %v4209_v54 = vpack.c.bf16 %v6686_v21, %v9884_v32  ;;  %v3722_v24 = vsub.f32 %v11495_v37, %v9794_v3  ;;  %v11497_v13 = vld [vmem:[#allocation102_spill] sm:$0xff] }
 0x6a2   : > { %v9931_v9 = vpop.xlane.xlu1 %3607  ;;  %2197 = vadd.xlane.f32.xlu1 %v11493_v7  ;;  %v9943_v33 = vpop.eup %6697  ;;  %6715 = vpow2.f32 %v3850_v49  ;;  %v4028_v59 = vadd.f32 %v9762_v15, %v9740_v44  ;;  %v3862_v6 = vmul.f32 1.442695, %v3719_v48  ;;  %v3725_v32 = vsub.f32 %v11497_v13, %v9806_v35  ;;  %v11498_v49 = vld [vmem:[#allocation127_spill] sm:$0xff]  ;;  %v11499_v7 = vld [vmem:[#allocation128_spill] sm:$0xff] }
 0x6a3   : > { %v3745_v0 = vsub.f32 %v11494_v42, %v9931_v9  ;;  %v9952_v50 = vpop.eup %6699  ;;  %6717 = vpow2.f32 %v3906_v41  ;;  %4439 = vmatmul.mubr.bf16.gmra.mrb[212].mxu1 %v4209_v54  ;;  %v4033_v21 = vadd.f32 %v9759_v11, %v9748_v29  ;;  %v11500_v35 = vld [vmem:[#allocation111_spill] sm:$0xff]  ;;  %v4029_v29 = vsel %vm1620_vm6, %v9929_v26, 0.0 }
 0x6a4   : > { %2202 = vadd.xlane.f32.xlu0 %v11496_v20  ;;  %v9948_v51 = vpop.xlane.xlu0 %3612  ;;  %v4213_v44 = vpack.c.bf16 %v9952_v50, %v9943_v33  ;;  %v9965_v15 = vpop.eup %6701  ;;  %6719 = vpow2.f32 %v3856_v38  ;;  %v3734_v48 = vsub.f32 %v11500_v35, %v9850_v12  ;;  %v4034_v11 = vsel %vm1620_vm6, %v9938_v58, 0.0 }
 0x6a5   : > { %v3914_v3 = vmul.f32 1.442695, %v3745_v0  ;;  %v3747_v43 = vsub.f32 %v11498_v49, %v9948_v51  ;;  %v3748_v42 = vsub.f32 %v11499_v7, %v9948_v51  ;;  %v9973_v41 = vpop.eup %6703  ;;  %v3868_v0 = vmul.f32 1.442695, %v3722_v24 }
 0x6a6   : > { %v4275_v37 = vpop.permute.xlu1 %4274  ;;  %4011 = vadd.xlane.f32.xlu1 %v9711_v40  ;;  %6721 = vpow2.f32 %v3900_v14  ;;  %v11501_v40 = vld [vmem:[#allocation124_spill] sm:$0xff]  ;;  %4446 = vmatprep.mubr.bf16.mxu1 %v4213_v44  ;;  %v9977_v13 = vpop.eup %6705  ;;  %v3874_v12 = vmul.f32 1.442695, %v3725_v32  ;;  %v4025_v49 = vadd.f32 %v4024_v5, %v9733_v57  ;;  %v4193_v24 = vpack.c.bf16 %v9916_v30, %v9853_v27  ;;  %v11503_v30 = vld [vmem:[#allocation117_spill] sm:$0xff] }
 0x6a7   : > { %6206 = vmatprep.subr.bf16.mxu0 %v4275_v37  ;;  %v3744_v54 = vsub.f32 %v11501_v40, %v9931_v9  ;;  %v3920_v20 = vmul.f32 1.442695, %v3748_v42  ;;  %6723 = vpow2.f32 %v3862_v6  ;;  %v3918_v7 = vmul.f32 1.442695, %v3747_v43  ;;  %v11502_v6 = vld [vmem:[#allocation114_spill] sm:$0xff] }
 0x6a8   : > { %6207 = vmatpush3.bf16.msra.mxu0 %v4275_v37  ;;  %v4277_v38 = vpop.permute.xlu0 %4276  ;;  %4016 = vadd.xlane.f32.xlu0 %v9727_v8  ;;  %v9983_v14 = vpop.eup %6707  ;;  %6725 = vpow2.f32 %v3914_v3  ;;  %v4030_v42 = vadd.f32 %v4029_v29, %v4028_v59  ;;  %v4035_v37 = vadd.f32 %v4034_v11, %v4033_v21  ;;  %v3892_v35 = vmul.f32 1.442695, %v3734_v48  ;;  %v11505_v11 = vld [vmem:[#allocation123_spill] sm:$0xff] }
 0x6a9   : > { %6208 = vmatprep.subr.bf16.mxu0 %v4277_v38  ;;  %v9985_v44 = vpop.eup %6709  ;;  %v3737_v32 = vsub.f32 %v11502_v6, %v9862_v60  ;;  %6727 = vpow2.f32 %v3920_v20  ;;  %v4212_v8 = vpack.c.bf16 %v9973_v41, %v9983_v14  ;;  %v3740_v27 = vsub.f32 %v11503_v30, %v9888_v1 }
 0x6aa   : > { %4021 = vadd.xlane.f32.xlu1 %v4020_v10  ;;  %v9991_v57 = vpop.eup %6711  ;;  %6729 = vpow2.f32 %v3868_v0  ;;  %v3912_v5 = vmul.f32 1.442695, %v3744_v54  ;;  %v4038_v10 = vadd.f32 %v9792_v39, %v9771_v55  ;;  %v4196_v60 = vpack.c.bf16 %v9938_v58, %v9929_v26  ;;  %v11504_v58 = vld [vmem:[#allocation120_spill] sm:$0xff] }
 0x6ab   : > { %v9997_v59 = vpop.eup %6713  ;;  %6731 = vpow2.f32 %v3874_v12  ;;  %4447 = vmatmul.mubr.bf16.gmra.mrb[216].mxu1 %v4212_v8  ;;  %v4039_v21 = vsel %vm1620_vm6, %v9965_v15, 0.0  ;;  %v4043_v3 = vadd.f32 %v9785_v28, %v9774_v23  ;;  %v4044_v39 = vsel %vm1620_vm6, %v9977_v13, 0.0 }
 0x6ac   : > { %6209 = vmatpush3.bf16.msra.mxu0 %v4277_v38  ;;  %4026 = vadd.xlane.f32.xlu0 %v4025_v49  ;;  %v6716_v1 = vpop.eup %6715  ;;  %6733 = vpow2.f32 %v3918_v7  ;;  %v4216_v55 = vpack.c.bf16 %v9997_v59, %v9991_v57  ;;  %v4048_v43 = vadd.f32 %v9820_v53, %v9801_v52  ;;  %v3898_v26 = vmul.f32 1.442695, %v3737_v32 }
 0x6ad   : > { %v10011_v48 = vpop.eup %6717  ;;  %6735 = vpow2.f32 %v3892_v35  ;;  %v3743_v29 = vsub.f32 %v11504_v58, %v9900_v18  ;;  %v4049_v23 = vsel %vm1620_vm6, %v9985_v44, 0.0  ;;  %v3904_v28 = vmul.f32 1.442695, %v3740_v27 }
 0x6ae   : > { %4031 = vadd.xlane.f32.xlu1 %v4030_v42  ;;  %v3746_v0 = vsub.f32 %v11505_v11, %v9931_v9  ;;  %6737 = vpow2.f32 %v3912_v5  ;;  %4454 = vmatprep.mubr.bf16.mxu1 %v4216_v55  ;;  %v4040_v52 = vadd.f32 %v4039_v21, %v4038_v10  ;;  %v6720_v53 = vpop.eup %6719  ;;  %v4045_v18 = vadd.f32 %v4044_v39, %v4043_v3  ;;  %v11506_v9 = vld [vmem:[#allocation126_spill] sm:$0xff] }
 0x6af   : > { %6211 = vmatmul.mubr.msk.bf16.vlgmr.msra.gmra.mrb[212].mxu0 %vm1620_vm6, %v4193_v24  ;;  %v4050_v54 = vadd.f32 %v4049_v23, %v4048_v43  ;;  %v4053_v20 = vadd.f32 %v9817_v34, %v9808_v63  ;;  %6739 = vpow2.f32 %v3898_v26  ;;  %v3910_v12 = vmul.f32 1.442695, %v3743_v29 }
 0x6b0   : > { %6214 = vmatprep.mubr.msk.bf16.mxu0 %vm1620_vm6, %v4196_v60  ;;  %4036 = vadd.xlane.f32.xlu0 %v4035_v37  ;;  %v10021_v40 = vpop.eup %6721  ;;  %v3749_v49 = vsub.f32 %v11506_v9, %v9948_v51  ;;  %6741 = vpow2.f32 %v3904_v28  ;;  %v3916_v42 = vmul.f32 1.442695, %v3746_v0  ;;  %v4054_v37 = vsel %vm1620_vm6, %v6716_v1, 0.0 }
 0x6b1   : > { %v6724_v38 = vpop.eup %6723  ;;  %v4215_v24 = vpack.c.bf16 %v10011_v48, %v10021_v40  ;;  %v4058_v35 = vadd.f32 %v9848_v46, %v9831_v47  ;;  %v4199_v63 = vpack.c.bf16 %v9977_v13, %v9965_v15  ;;  %v4059_v34 = vsel %vm1620_vm6, %v6720_v53, 0.0 }
 0x6b2   : > { %4041 = vadd.xlane.f32.xlu1 %v4040_v52  ;;  %v10029_v7 = vpop.eup %6725  ;;  %v4202_v8 = vpack.c.bf16 %v6716_v1, %v9985_v44  ;;  %6743 = vpow2.f32 %v3910_v12  ;;  %v3922_v27 = vmul.f32 1.442695, %v3749_v49  ;;  %v4055_v47 = vadd.f32 %v4054_v37, %v4053_v20  ;;  %v11507_v49 = vld [vmem:[#allocation129_spill] sm:$0xff] }
 0x6b3   : > { %v10034_v6 = vpop.eup %6727  ;;  %4455 = vmatmul.mubr.bf16.gmra.mrb[220].mxu1 %v4215_v24  ;;  %v4063_v46 = vadd.f32 %v9839_v19, %v9834_v2  ;;  %6745 = vpow2.f32 %v3916_v42  ;;  %v4060_v15 = vadd.f32 %v4059_v34, %v4058_v35  ;;  %v4064_v13 = vsel %vm1620_vm6, %v6724_v38, 0.0  ;;  %v11509_v37 = vld [vmem:[#allocation133_spill] sm:$0xff] }
 0x6b4   : > { %4046 = vadd.xlane.f32.xlu0 %v4045_v18  ;;  %v6730_v51 = vpop.eup %6729  ;;  %v4219_v32 = vpack.c.bf16 %v10034_v6, %v10029_v7  ;;  %v4068_v44 = vadd.f32 %v9870_v31, %v9859_v36  ;;  %6747 = vpow2.f32 %v3922_v27  ;;  %v4073_v19 = vadd.f32 %v9879_v17, %v9864_v16 }
 0x6b5   : > { %v6732_v30 = vpop.eup %6731  ;;  %v4069_v60 = vsel %vm1620_vm6, %v6730_v51, 0.0  ;;  %v4065_v2 = vadd.f32 %v4064_v13, %v4063_v46  ;;  %v4088_v39 = vadd.f32 %v9983_v14, %v9943_v33  ;;  %v4205_v36 = vpack.c.bf16 %v6724_v38, %v6720_v53  ;;  %v11512_v13 = vld [vmem:[#allocation134_spill] sm:$0xff] }
 0x6b6   : > { %4051 = vadd.xlane.f32.xlu1 %v4050_v54  ;;  %v6734_v5 = vpop.eup %6733  ;;  %4462 = vmatprep.mubr.bf16.mxu1 %v4219_v32  ;;  %v4070_v1 = vadd.f32 %v4069_v60, %v4068_v44  ;;  %v4074_v55 = vsel %vm1620_vm6, %v6732_v30, 0.0  ;;  %v4208_v58 = vpack.c.bf16 %v6732_v30, %v6730_v51  ;;  %v4093_v16 = vadd.f32 %v9973_v41, %v9952_v50  ;;  %v11510_v32 = vld [vmem:[#allocation131_spill] sm:$0xff]  ;;  %v11511_v30 = vld [vmem:[#allocation132_spill] sm:$0xff] }
 0x6b7   : > { %6215 = vmatmul.mubr.msk.bf16.gmra.mrb[216].mxu0 %vm1620_vm6, %v4199_v63  ;;  %v6736_v10 = vpop.eup %6735  ;;  %v4075_v29 = vadd.f32 %v4074_v55, %v4073_v19  ;;  %v4098_v14 = vadd.f32 %v10021_v40, %v9991_v57  ;;  %v4103_v52 = vadd.f32 %v10011_v48, %v9997_v59  ;;  %v4211_v57 = vpack.c.bf16 %v9911_v62, %v9891_v61  ;;  %v11513_v19 = vld [vmem:[#allocation135_spill] sm:$0xff] }
 0x6b8   : > { %6218 = vmatprep.mubr.msk.bf16.mxu0 %vm1620_vm6, %v4202_v8  ;;  %4056 = vadd.xlane.f32.xlu0 %v4055_v47  ;;  %v6738_v21 = vpop.eup %6737  ;;  %v4089_v31 = vsel %vm1620_vm6, %v6736_v10, 0.0  ;;  %v4113_v38 = vadd.f32 %v6734_v5, %v10034_v6 }
 0x6b9   : > { %v4218_v3 = vpack.c.bf16 %v6734_v5, %v6738_v21  ;;  %v6740_v43 = vpop.eup %6739  ;;  %v4090_v17 = vadd.f32 %v4089_v31, %v4088_v39  ;;  %v4108_v41 = vadd.f32 %v6738_v21, %v10029_v7  ;;  %v11508_v7 = vld [vmem:[#allocation130_spill] sm:$0xff] }
 0x6ba   : > { %4061 = vadd.xlane.f32.xlu1 %v4060_v15  ;;  %v6742_v26 = vpop.eup %6741  ;;  %v4094_v33 = vsel %vm1620_vm6, %v6740_v43, 0.0  ;;  %v4214_v54 = vpack.c.bf16 %v6740_v43, %v6736_v10  ;;  %v11515_v43 = vld [vmem:[#allocation137_spill] sm:$0xff] }
 0x6bb   : > { %4463 = vmatmul.mubr.bf16.gmra.mrb[224].mxu1 %v4218_v3  ;;  %v4099_v28 = vsel %vm1620_vm6, %v6742_v26, 0.0  ;;  %v4095_v0 = vadd.f32 %v4094_v33, %v4093_v16 }
 0x6bc   : > { %4066 = vadd.xlane.f32.xlu0 %v4065_v2  ;;  %v6744_v23 = vpop.eup %6743  ;;  %v4100_v53 = vadd.f32 %v4099_v28, %v4098_v14  ;;  %v11519_v28 = vld [vmem:[#allocation140_spill] sm:$0xff] }
 0x6bd   : > { %v6746_v11 = vpop.eup %6745  ;;  %v4104_v50 = vsel %vm1620_vm6, %v6744_v23, 0.0  ;;  %v4217_v9 = vpack.c.bf16 %v6744_v23, %v6742_v26  ;;  %v11516_v26 = vld [vmem:[#allocation138_spill] sm:$0xff] }
 0x6be   : > { %4071 = vadd.xlane.f32.xlu1 %v4070_v1  ;;  %v6748_v18 = vpop.eup %6747  ;;  %v4109_v40 = vsel %vm1620_vm6, %v6746_v11, 0.0  ;;  %v4105_v20 = vadd.f32 %v4104_v50, %v4103_v52  ;;  %v11520_v52 = vld [vmem:[#allocation141_spill] sm:$0xff] }
 0x6bf   : > { %6219 = vmatmul.mubr.msk.bf16.gmra.mrb[220].mxu0 %vm1620_vm6, %v4205_v36  ;;  %v4110_v59 = vadd.f32 %v4109_v40, %v4108_v41  ;;  %v4114_v48 = vsel %vm1620_vm6, %v6748_v18, 0.0  ;;  %v4220_v61 = vpack.c.bf16 %v6748_v18, %v6746_v11  ;;  %v11521_v50 = vld [vmem:[#allocation145_spill] sm:$0xff] }
 0x6c0   : > { %6222 = vmatprep.mubr.msk.bf16.mxu0 %vm1620_vm6, %v4208_v58  ;;  %4076 = vadd.xlane.f32.xlu0 %v4075_v29  ;;  %v4115_v12 = vadd.f32 %v4114_v48, %v4113_v38  ;;  %v11517_v29 = vld [vmem:[#allocation139_spill] sm:$0xff] }
 0x6c2   : > { %4091 = vadd.xlane.f32.xlu1 %v4090_v17  ;;  %v11518_v17 = vld [vmem:[#allocation142_spill] sm:$0xff] }
 0x6c4   : > { %4096 = vadd.xlane.f32.xlu0 %v4095_v0 }
 0x6c6   : > { %4101 = vadd.xlane.f32.xlu1 %v4100_v53 }
 0x6c7   : > { %6223 = vmatmul.mubr.msk.bf16.gmra.mrb[224].mxu0 %vm1620_vm6, %v4211_v57 }
 0x6c8   : > { %6226 = vmatprep.mubr.msk.bf16.mxu0 %vm1620_vm6, %v4214_v54  ;;  %4106 = vadd.xlane.f32.xlu0 %v4105_v20  ;;  %v11522_v54 = vld [vmem:[#allocation143_spill] sm:$0xff] }
 0x6ca   : > { %4111 = vadd.xlane.f32.xlu1 %v4110_v59  ;;  %v11523_v59 = vld [vmem:[#allocation144_spill] sm:$0xff] }
 0x6cc   : > { %4116 = vadd.xlane.f32.xlu0 %v4115_v12  ;;  %v11524_v12 = vld [vmem:[#allocation150_spill] sm:$0xff] }
 0x6cf   : > { %6227 = vmatmul.mubr.msk.bf16.gmra.mrb[228].mxu0 %vm1620_vm6, %v4217_v9 }
 0x6d0   : > { %6230 = vmatprep.mubr.msk.bf16.mxu0 %vm1620_vm6, %v4220_v61 }
 0x6d7   : > { %v3618_v62 = vpop.xlane.xlu1 %3617 }
 0x6d8   : > { %v3750_v24 = vsub.f32 %v11507_v49, %v3618_v62  ;;  %v3751_v42 = vsub.f32 %v11508_v7, %v3618_v62  ;;  %v3752_v35 = vsub.f32 %v11509_v37, %v3618_v62  ;;  %v11525_v7 = vld [vmem:[#allocation146_spill] sm:$0xff] }
 0x6d9   : > { %v3623_v6 = vpop.xlane.xlu0 %3622 }
 0x6da   : > { %v3924_v63 = vmul.f32 1.442695, %v3750_v24  ;;  %v3926_v34 = vmul.f32 1.442695, %v3751_v42  ;;  %v3928_v51 = vmul.f32 1.442695, %v3752_v35  ;;  %v3753_v8 = vsub.f32 %v11510_v32, %v3623_v6 }
 0x6db   : > { %v3754_v27 = vsub.f32 %v11511_v30, %v3623_v6  ;;  %v3755_v47 = vsub.f32 %v9489_v25, %v3623_v6  ;;  %v3628_v46 = vpop.xlane.xlu1 %3627  ;;  %v11514_v25 = vld [vmem:[#allocation136_spill] sm:$0xff]  ;;  %v11526_v6 = vld [vmem:[#allocation147_spill] sm:$0xff] }
 0x6dc   : > { %6749 = vpow2.f32 %v3924_v63  ;;  %v3930_v5 = vmul.f32 1.442695, %v3753_v8  ;;  %v3756_v15 = vsub.f32 %v9482_v45, %v3628_v46  ;;  %v3757_v44 = vsub.f32 %v11512_v13, %v3628_v46 }
 0x6dd   : > { %6751 = vpow2.f32 %v3926_v34  ;;  %v3932_v10 = vmul.f32 1.442695, %v3754_v27  ;;  %v3934_v60 = vmul.f32 1.442695, %v3755_v47  ;;  %v3758_v21 = vsub.f32 %v9507_v4, %v3628_v46  ;;  %v3633_v3 = vpop.xlane.xlu0 %3632  ;;  %v11527_v34 = vld [vmem:[#allocation155_spill] sm:$0xff]  ;;  %v11528_v27 = vld [vmem:[#allocation148_spill] sm:$0xff] }
 0x6de   : > { %6753 = vpow2.f32 %v3928_v51  ;;  %v3936_v2 = vmul.f32 1.442695, %v3756_v15  ;;  %v3759_v1 = vsub.f32 %v11513_v19, %v3633_v3  ;;  %v3938_v55 = vmul.f32 1.442695, %v3757_v44  ;;  %v11529_v46 = vld [vmem:[#allocation149_spill] sm:$0xff] }
 0x6df   : > { %6755 = vpow2.f32 %v3930_v5  ;;  %v3760_v39 = vsub.f32 %v11514_v25, %v3633_v3  ;;  %v3761_v36 = vsub.f32 %v11515_v43, %v3633_v3  ;;  %v3638_v31 = vpop.xlane.xlu1 %3637  ;;  %v3940_v45 = vmul.f32 1.442695, %v3758_v21  ;;  %v11532_v43 = vld [vmem:[#allocation152_spill] sm:$0xff] }
 0x6e0   : > { %6757 = vpow2.f32 %v3932_v10  ;;  %v3762_v58 = vsub.f32 %v11516_v26, %v3638_v31  ;;  %v3763_v16 = vsub.f32 %v11517_v29, %v3638_v31  ;;  %v3942_v4 = vmul.f32 1.442695, %v3759_v1  ;;  %v11530_v10 = vld [vmem:[#allocation153_spill] sm:$0xff]  ;;  %v11531_v1 = vld [vmem:[#allocation151_spill] sm:$0xff] }
 0x6e1   : > { %6759 = vpow2.f32 %v3934_v60  ;;  %v3764_v33 = vsub.f32 %v11518_v17, %v3638_v31  ;;  %v3643_v14 = vpop.xlane.xlu0 %3642  ;;  %v3944_v23 = vmul.f32 1.442695, %v3760_v39  ;;  %v3946_v0 = vmul.f32 1.442695, %v3761_v36  ;;  %v11533_v31 = vld [vmem:[#allocation154_spill] sm:$0xff] }
 0x6e2   : > { %6761 = vpow2.f32 %v3936_v2  ;;  %v3765_v11 = vsub.f32 %v11519_v28, %v3643_v14  ;;  %v3766_v53 = vsub.f32 %v11520_v52, %v3643_v14  ;;  %v3767_v41 = vsub.f32 %v11521_v50, %v3643_v14  ;;  %v11534_v14 = vld [vmem:[#allocation157_spill] sm:$0xff]  ;;  %v11535_v28 = vld [vmem:[#allocation158_spill] sm:$0xff] }
 0x6e3   : > { %6763 = vpow2.f32 %v3938_v55  ;;  %v3648_v18 = vpop.xlane.xlu1 %3647  ;;  %v3948_v57 = vmul.f32 1.442695, %v3762_v58  ;;  %v3950_v40 = vmul.f32 1.442695, %v3763_v16  ;;  %v3952_v38 = vmul.f32 1.442695, %v3764_v33 }
 0x6e4   : > { %6765 = vpow2.f32 %v3940_v45  ;;  %v3768_v20 = vsub.f32 %v11522_v54, %v3648_v18  ;;  %v3769_v48 = vsub.f32 %v11523_v59, %v3648_v18  ;;  %v3770_v9 = vsub.f32 %v11524_v12, %v3648_v18 }
 0x6e5   : > { %6767 = vpow2.f32 %v3942_v4  ;;  %v3653_v61 = vpop.xlane.xlu0 %3652  ;;  %v3954_v49 = vmul.f32 1.442695, %v3765_v11  ;;  %v3956_v24 = vmul.f32 1.442695, %v3766_v53  ;;  %v3958_v35 = vmul.f32 1.442695, %v3767_v41 }
 0x6e6   : > { %v10098_v62 = vpop.eup %6749  ;;  %6769 = vpow2.f32 %v3944_v23  ;;  %v3771_v42 = vsub.f32 %v11525_v7, %v3653_v61  ;;  %v3772_v63 = vsub.f32 %v11526_v6, %v3653_v61  ;;  %v3773_v51 = vsub.f32 %v11527_v34, %v3653_v61  ;;  %v11537_v7 = vld [vmem:[#allocation159_spill] sm:$0xff] }
 0x6e7   : > { %v6752_v37 = vpop.eup %6751  ;;  %6771 = vpow2.f32 %v3946_v0  ;;  %v3658_v32 = vpop.xlane.xlu1 %3657  ;;  %v3960_v30 = vmul.f32 1.442695, %v3768_v20  ;;  %v3962_v13 = vmul.f32 1.442695, %v3769_v48  ;;  %v3964_v44 = vmul.f32 1.442695, %v3770_v9 }
 0x6e8   : > { %v6754_v8 = vpop.eup %6753  ;;  %6773 = vpow2.f32 %v3948_v57  ;;  %v3774_v47 = vsub.f32 %v11528_v27, %v3658_v32  ;;  %v3775_v5 = vsub.f32 %v11529_v46, %v3658_v32  ;;  %v3776_v60 = vsub.f32 %v11530_v10, %v3658_v32  ;;  %v11536_v57 = vld [vmem:[#allocation156_spill] sm:$0xff] }
 0x6e9   : > { %v6756_v15 = vpop.eup %6755  ;;  %6775 = vpow2.f32 %v3950_v40  ;;  %v3663_v21 = vpop.xlane.xlu0 %3662  ;;  %v3966_v2 = vmul.f32 1.442695, %v3771_v42  ;;  %v3968_v19 = vmul.f32 1.442695, %v3772_v63  ;;  %v3970_v39 = vmul.f32 1.442695, %v3773_v51 }
 0x6ea   : > { %v6758_v3 = vpop.eup %6757  ;;  %6777 = vpow2.f32 %v3952_v38  ;;  %v3777_v55 = vsub.f32 %v11531_v1, %v3663_v21  ;;  %v3778_v36 = vsub.f32 %v11532_v43, %v3663_v21  ;;  %v3779_v45 = vsub.f32 %v11533_v31, %v3663_v21  ;;  %v11538_v63 = vld [vmem:[#allocation160_spill] sm:$0xff] }
 0x6eb   : > { %v6760_v25 = vpop.eup %6759  ;;  %6779 = vpow2.f32 %v3954_v49  ;;  %v3668_v26 = vpop.xlane.xlu1 %3667  ;;  %v3972_v29 = vmul.f32 1.442695, %v3774_v47  ;;  %v3974_v16 = vmul.f32 1.442695, %v3775_v5  ;;  %v3976_v4 = vmul.f32 1.442695, %v3776_v60 }
 0x6ec   : > { %v10109_v58 = vpop.eup %6761  ;;  %6781 = vpow2.f32 %v3956_v24  ;;  %v3978_v33 = vmul.f32 1.442695, %v3777_v55  ;;  %v3780_v23 = vsub.f32 %v11534_v14, %v3668_v26  ;;  %v3781_v11 = vsub.f32 %v11535_v28, %v3668_v26 }
 0x6ed   : > { %v10111_v17 = vpop.eup %6763  ;;  %6783 = vpow2.f32 %v3958_v35  ;;  %v3673_v0 = vpop.xlane.xlu0 %3672  ;;  %v3980_v53 = vmul.f32 1.442695, %v3778_v36  ;;  %v10117_v50 = vmul.f32 1.442695, %v3779_v45  ;;  %v4118_v41 = vadd.f32 %v6752_v37, %v10098_v62 }
 0x6ee   : > { %v10115_v52 = vpop.eup %6765  ;;  %6785 = vpow2.f32 %v3960_v30  ;;  %v3782_v40 = vsub.f32 %v11536_v57, %v3668_v26  ;;  %v4119_v54 = vsel %vm1620_vm6, %v6754_v8, 0.0  ;;  %v4222_v20 = vpack.c.bf16 %v6758_v3, %v6752_v37  ;;  %v11544_v57 = vld [vmem:[#allocation166_spill] sm:$0xff] }
 0x6ef   : > { %v10120_v18 = vpop.eup %6767  ;;  %6787 = vpow2.f32 %v3962_v13  ;;  %v3678_v38 = vpop.xlane.xlu1 %3677  ;;  %v4120_v48 = vadd.f32 %v4119_v54, %v4118_v41  ;;  %v4223_v12 = vpack.c.bf16 %v6760_v25, %v6754_v8  ;;  %v4221_v9 = vpack.c.bf16 %v6756_v15, %v10098_v62  ;;  %v11539_v62 = vld [vmem:[#allocation162_spill] sm:$0xff] }
 0x6f0   : > { %v6770_v59 = vpop.eup %6769  ;;  %6789 = vpow2.f32 %v3964_v44  ;;  %4470 = vmatprep.mubr.bf16.mxu1 %v4222_v20  ;;  %v4123_v49 = vadd.f32 %v6758_v3, %v6756_v15  ;;  %v4124_v24 = vsel %vm1620_vm6, %v6760_v25, 0.0  ;;  %v3783_v42 = vsub.f32 %v11537_v7, %v3673_v0  ;;  %v11540_v15 = vld [vmem:[#allocation163_spill] sm:$0xff]  ;;  %v11541_v44 = vld [vmem:[#allocation164_spill] sm:$0xff]  ;;  %v11542_v3 = vld [vmem:[#allocation161_spill] sm:$0xff] }
 0x6f1   : > { %v6772_v61 = vpop.eup %6771  ;;  %6791 = vpow2.f32 %v3966_v2  ;;  %v10127_v35 = vpop.xlane.xlu0 %3682  ;;  %v3984_v37 = vmul.f32 1.442695, %v3780_v23  ;;  %4121 = vadd.xlane.f32.xlu1 %v4120_v48  ;;  %6231 = vmatmul.mubr.msk.bf16.gmra.mrb[232].mxu0 %vm1620_vm6, %v4223_v12  ;;  %v3784_v34 = vsub.f32 %v11538_v63, %v3673_v0  ;;  %v3785_v51 = vsub.f32 %v11539_v62, %v3673_v0  ;;  %v11545_v20 = vld [vmem:[#allocation167_spill] sm:$0xff] }
 0x6f2   : > { %v10129_v6 = vpop.eup %6773  ;;  %6793 = vpow2.f32 %v3968_v19  ;;  %v3986_v8 = vmul.f32 1.442695, %v3781_v11  ;;  %v3988_v30 = vmul.f32 1.442695, %v3782_v40  ;;  %4471 = vmatmul.mubr.bf16.gmra.mrb[228].mxu1 %v4221_v9  ;;  %v4125_v27 = vadd.f32 %v4124_v24, %v4123_v49 }
 0x6f3   : > { %v10134_v32 = vpop.eup %6775  ;;  %6795 = vpow2.f32 %v3970_v39  ;;  %v10136_v47 = vpop.xlane.xlu1 %2207  ;;  %v3990_v5 = vmul.f32 1.442695, %v3783_v42  ;;  %v3786_v13 = vsub.f32 %v11540_v15, %v3678_v38  ;;  %v3787_v10 = vsub.f32 %v11541_v44, %v3678_v38 }
 0x6f4   : > { %v6778_v46 = vpop.eup %6777  ;;  %6797 = vpow2.f32 %v3972_v29  ;;  %4126 = vadd.xlane.f32.xlu0 %v4125_v27  ;;  %v3992_v21 = vmul.f32 1.442695, %v3784_v34  ;;  %v3788_v2 = vsub.f32 %v11542_v3, %v3678_v38  ;;  %v4128_v19 = vadd.f32 %v10111_v17, %v10109_v58 }
 0x6f5   : > { %v10140_v60 = vpop.eup %6779  ;;  %6799 = vpow2.f32 %v3974_v16  ;;  %v10145_v1 = vpop.xlane.xlu0 %2212  ;;  %v3994_v25 = vmul.f32 1.442695, %v3785_v51  ;;  %v4129_v39 = vsel %vm1620_vm6, %v10115_v52, 0.0  ;;  %v4225_v43 = vpack.c.bf16 %v6770_v59, %v10111_v17 }
 0x6f6   : > { %v6782_v55 = vpop.eup %6781  ;;  %6801 = vpow2.f32 %v3976_v4  ;;  %v4130_v31 = vadd.f32 %v4129_v39, %v4128_v19  ;;  %v4226_v45 = vpack.c.bf16 %v6772_v61, %v10115_v52  ;;  %v4133_v26 = vadd.f32 %v6770_v59, %v10120_v18 }
 0x6f7   : > { %v6784_v36 = vpop.eup %6783  ;;  %6803 = vpow2.f32 %v3978_v33  ;;  %v10152_v29 = vpop.xlane.xlu1 %2127  ;;  %v3996_v14 = vmul.f32 1.442695, %v3786_v13  ;;  %v3998_v4 = vmul.f32 1.442695, %v3787_v10  ;;  %4478 = vmatprep.mubr.bf16.mxu1 %v4225_v43  ;;  %v4134_v23 = vsel %vm1620_vm6, %v6772_v61, 0.0 }
 0x6f8   : > { %v10154_v16 = vpop.eup %6785  ;;  %6805 = vpow2.f32 %v3980_v53  ;;  %v4000_v17 = vmul.f32 1.442695, %v3788_v2  ;;  %4131 = vadd.xlane.f32.xlu1 %v4130_v31  ;;  %6234 = vmatprep.mubr.msk.bf16.mxu0 %vm1620_vm6, %v4226_v45  ;;  %v4135_v33 = vadd.f32 %v4134_v23, %v4133_v26  ;;  %v4138_v11 = vadd.f32 %v10134_v32, %v10129_v6  ;;  %v11543_v53 = vld [vmem:[#allocation165_spill] sm:$0xff] }
 0x6f9   : > { %v10157_v28 = vpop.eup %6787  ;;  %6807 = vpow2.f32 %v10117_v50  ;;  %v10163_v0 = vpop.xlane.xlu0 %2132  ;;  %v3789_v41 = vsub.f32 %v11543_v53, %v10127_v35  ;;  %v3790_v40 = vsub.f32 %v11544_v57, %v10127_v35  ;;  %v4139_v50 = vsel %vm1620_vm6, %v6778_v46, 0.0 }
 0x6fa   : > { %v6790_v52 = vpop.eup %6789  ;;  %6809 = vpow2.f32 %v3984_v37  ;;  %4136 = vadd.xlane.f32.xlu0 %v4135_v33  ;;  %v3791_v38 = vsub.f32 %v11545_v20, %v10127_v35  ;;  %v4140_v59 = vadd.f32 %v4139_v50, %v4138_v11  ;;  %v4229_v48 = vpack.c.bf16 %v6784_v36, %v6778_v46 }
 0x6fb   : > { %v10170_v54 = vpop.eup %6791  ;;  %6811 = vpow2.f32 %v3986_v8  ;;  %v10174_v12 = vpop.xlane.xlu1 %2217  ;;  %v4224_v61 = vpack.c.bf16 %v10120_v18, %v10109_v58  ;;  %v4228_v49 = vpack.c.bf16 %v6782_v55, %v10134_v32  ;;  %v4143_v24 = vadd.f32 %v6782_v55, %v10140_v60 }
 0x6fc   : > { %v10176_v9 = vpop.eup %6793  ;;  %6813 = vpow2.f32 %v3988_v30  ;;  %4141 = vadd.xlane.f32.xlu1 %v4140_v59  ;;  %6235 = vmatmul.mubr.msk.bf16.gmra.mrb[236].mxu0 %vm1620_vm6, %v4229_v48  ;;  %v4144_v42 = vsel %vm1620_vm6, %v6784_v36, 0.0  ;;  %v4148_v35 = vadd.f32 %v10157_v28, %v10154_v16  ;;  %v4149_v37 = vsel %vm1620_vm6, %v6790_v52, 0.0  ;;  %v11547_v48 = vld [vmem:[#allocation64_spill] sm:$0xff] }
 0x6fd   : > { %v6796_v7 = vpop.eup %6795  ;;  %6815 = vpow2.f32 %v3990_v5  ;;  %v10187_v63 = vpop.xlane.xlu0 %2222  ;;  %4479 = vmatmul.mubr.bf16.gmra.mrb[232].mxu1 %v4224_v61  ;;  %v4145_v58 = vadd.f32 %v4144_v42, %v4143_v24  ;;  %v4153_v62 = vadd.f32 %v10176_v9, %v10170_v54  ;;  %v4002_v32 = vmul.f32 1.442695, %v3789_v41 }
 0x6fe   : > { %v10189_v34 = vpop.eup %6797  ;;  %6817 = vpow2.f32 %v3992_v21  ;;  %v4232_v18 = vpack.c.bf16 %v6796_v7, %v6790_v52  ;;  %4486 = vmatprep.mubr.bf16.mxu1 %v4228_v49  ;;  %v4150_v8 = vadd.f32 %v4149_v37, %v4148_v35  ;;  %v4154_v30 = vsel %vm1620_vm6, %v6796_v7, 0.0  ;;  %v11549_v49 = vld [vmem:[#allocation86_spill] sm:$0xff]  ;;  %v11550_v37 = vld [vmem:[#allocation83_spill] sm:$0xff] }
 0x6ff   : > { %v10193_v51 = vpop.eup %6799  ;;  %6819 = vpow2.f32 %v3994_v25  ;;  %v2138_v27 = vpop.xlane.xlu1 %2137  ;;  %v4004_v5 = vmul.f32 1.442695, %v3790_v40  ;;  %4146 = vadd.xlane.f32.xlu0 %v4145_v58  ;;  %v4155_v15 = vadd.f32 %v4154_v30, %v4153_v62  ;;  %v4006_v10 = vmul.f32 1.442695, %v3791_v38 }
 0x700   : > { %v6802_v46 = vpop.eup %6801  ;;  %6821 = vpow2.f32 %v3996_v14  ;;  %6238 = vmatprep.mubr.msk.bf16.mxu0 %vm1620_vm6, %v4232_v18  ;;  %v4158_v13 = vadd.f32 %v10193_v51, %v10189_v34  ;;  %4151 = vadd.xlane.f32.xlu1 %v4150_v8  ;;  %v4227_v31 = vpack.c.bf16 %v10140_v60, %v10129_v6  ;;  %v4231_v14 = vpack.c.bf16 %v10176_v9, %v10157_v28  ;;  %v11548_v9 = vld [vmem:[#allocation67_spill] sm:$0xff] }
 0x701   : > { %v10199_v44 = vpop.eup %6803  ;;  %6823 = vpow2.f32 %v3998_v4  ;;  %v4159_v21 = vsel %vm1620_vm6, %v6802_v46, 0.0  ;;  %v2143_v3 = vpop.xlane.xlu0 %2142 }
 0x702   : > { %v6806_v2 = vpop.eup %6805  ;;  %6825 = vpow2.f32 %v4000_v17  ;;  %v4160_v19 = vadd.f32 %v4159_v21, %v4158_v13 }
 0x703   : > { %v6808_v55 = vpop.eup %6807  ;;  %6827 = vpow2.f32 %v4002_v32  ;;  %v4163_v25 = vadd.f32 %v6806_v2, %v10199_v44  ;;  %v2228_v39 = vpop.xlane.xlu1 %2227  ;;  %4156 = vadd.xlane.f32.xlu0 %v4155_v15  ;;  %v4234_v57 = vpack.c.bf16 %v6806_v2, %v10193_v51  ;;  %v11551_v32 = vld [vmem:[#allocation66_spill] sm:$0xff]  ;;  %v11553_v15 = vld [vmem:[#allocation68_spill] sm:$0xff]  ;;  %v11554_v2 = vld [vmem:[#allocation81_spill] sm:$0xff] }
 0x704   : > { %v10203_v43 = vpop.eup %6809  ;;  %6829 = vpow2.f32 %v4004_v5  ;;  %v4235_v36 = vpack.c.bf16 %v6808_v55, %v6802_v46  ;;  %v4164_v45 = vsel %vm1620_vm6, %v6808_v55, 0.0  ;;  %4161 = vadd.xlane.f32.xlu1 %v4160_v19  ;;  %v4233_v46 = vpack.c.bf16 %v10199_v44, %v10189_v34  ;;  %v11555_v44 = vld [vmem:[#allocation82_spill] sm:$0xff] }
 0x705   : > { %v10208_v26 = vpop.eup %6811  ;;  %6831 = vpow2.f32 %v4006_v10  ;;  %v4165_v4 = vadd.f32 %v4164_v45, %v4163_v25  ;;  %v2233_v23 = vpop.xlane.xlu0 %2232  ;;  %4487 = vmatmul.mubr.bf16.gmra.mrb[236].mxu1 %v4227_v31 }
 0x706   : > { %v6814_v17 = vpop.eup %6813  ;;  %6833 = vrcp.f32 %v10136_v47  ;;  %6239 = vmatmul.mubr.msk.bf16.gmra.mrb[240].mxu0 %vm1620_vm6, %v4235_v36  ;;  %4494 = vmatprep.mubr.bf16.mxu1 %v4231_v14  ;;  %v4168_v20 = vadd.f32 %v10208_v26, %v10203_v43  ;;  %v11556_v14 = vld [vmem:[#allocation65_spill] sm:$0xff] }
 0x707   : > { %v10214_v33 = vpop.eup %6815  ;;  %6835 = vrcp.f32 %v10145_v1  ;;  %v2148_v6 = vpop.xlane.xlu1 %2147  ;;  %4166 = vadd.xlane.f32.xlu0 %v4165_v4 }
 0x708   : > { %v10217_v60 = vpop.eup %6817  ;;  %6837 = vrcp.f32 %v10152_v29  ;;  %4081 = vadd.xlane.f32.xlu1 %v9920_v22  ;;  %v4230_v22 = vpack.c.bf16 %v10170_v54, %v10154_v16 }
 0x709   : > { %v6820_v28 = vpop.eup %6819  ;;  %6839 = vrcp.f32 %v10163_v0  ;;  %v2153_v47 = vpop.xlane.xlu0 %2152  ;;  %v11546_v0 = vld [vmem:[#allocation62_spill] sm:$0xff]  ;;  %v4173_v35 = vadd.f32 %v10217_v60, %v10214_v33  ;;  %v4237_v21 = vpack.c.bf16 %v10217_v60, %v10208_v26 }
 0x70a   : > { %v10222_v11 = vpop.eup %6821  ;;  %6841 = vrcp.f32 %v10174_v12  ;;  %v4238_v52 = vpack.c.bf16 %v6820_v28, %v6814_v17  ;;  %v4174_v18 = vsel %vm1620_vm6, %v6820_v28, 0.0 }
 0x70b   : > { %v10225_v53 = vpop.eup %6823  ;;  %6843 = vrcp.f32 %v10187_v63  ;;  %v2238_v1 = vpop.xlane.xlu1 %2237  ;;  %4086 = vadd.xlane.f32.xlu0 %v9936_v56  ;;  %v4169_v56 = vsel %vm1620_vm6, %v6814_v17, 0.0  ;;  %v4175_v25 = vadd.f32 %v4174_v18, %v4173_v35  ;;  %v11557_v17 = vld [vmem:[#allocation70_spill] sm:$0xff] }
 0x70c   : > { %v6826_v41 = vpop.eup %6825  ;;  %6845 = vrcp.f32 %v2138_v27  ;;  %6242 = vmatprep.mubr.msk.bf16.mxu0 %vm1620_vm6, %v4238_v52  ;;  %2287 = vadd.xlane.f32.xlu1 %v11546_v0  ;;  %v4170_v42 = vadd.f32 %v4169_v56, %v4168_v20  ;;  %v4178_v62 = vadd.f32 %v10225_v53, %v10222_v11  ;;  %v11552_v27 = vld [vmem:[#allocation63_spill] sm:$0xff]  ;;  %v11562_v20 = vld [vmem:[#allocation73_spill] sm:$0xff] }
 0x70d   : > { %v10232_v29 = vpop.eup %6827  ;;  %6847 = vrcp.f32 %v2143_v3  ;;  %v2243_v40 = vpop.xlane.xlu0 %2242  ;;  %4495 = vmatmul.mubr.bf16.gmra.mrb[240].mxu1 %v4230_v22  ;;  %v4179_v5 = vsel %vm1620_vm6, %v6826_v41, 0.0  ;;  %v11560_v22 = vld [vmem:[#allocation6_spill] sm:$0xff] }
 0x70e   : > { %v10236_v50 = vpop.eup %6829  ;;  %6849 = vrcp.f32 %v2228_v39  ;;  %4502 = vmatprep.mubr.bf16.mxu1 %v4234_v57  ;;  %v4180_v31 = vadd.f32 %v4179_v5, %v4178_v62  ;;  %v11569_v62 = vld [vmem:[#allocation71_spill] sm:$0xff] }
 0x70f   : > { %v6832_v38 = vpop.eup %6831  ;;  %6851 = vrcp.f32 %v2233_v23  ;;  %v2158_v16 = vpop.xlane.xlu1 %2157  ;;  %2292 = vadd.xlane.f32.xlu0 %v11547_v48  ;;  %v4183_v34 = vadd.f32 %v10236_v50, %v10232_v29 }
 0x710   : > { %v6834_v54 = vpop.eup %6833  ;;  %v4241_v59 = vpack.c.bf16 %v6832_v38, %v6826_v41  ;;  %6853 = vrcp.f32 %v2148_v6  ;;  %2297 = vadd.xlane.f32.xlu1 %v11548_v9  ;;  %v4184_v45 = vsel %vm1620_vm6, %v6832_v38, 0.0 }
 0x711   : > { %v6836_v12 = vpop.eup %6835  ;;  %6855 = vrcp.f32 %v2153_v47  ;;  %v2163_v61 = vpop.xlane.xlu0 %2162  ;;  %v10244_v24 = vmul.f32 %v6834_v54, %v11549_v49  ;;  %v11558_v47 = vld [vmem:[#allocation85_spill] sm:$0xff]  ;;  %v4185_v41 = vadd.f32 %v4184_v45, %v4183_v34  ;;  %v11563_v54 = vld [vmem:[#allocation72_spill] sm:$0xff] }
 0x712   : > { %v6838_v7 = vpop.eup %6837  ;;  %6243 = vmatmul.mubr.msk.bf16.gmra.mrb[244].mxu0 %vm1620_vm6, %v4241_v59  ;;  %6857 = vrcp.f32 %v2238_v1  ;;  %v10250_v63 = vmul.f32 %v6836_v12, %v11550_v37  ;;  %v4240_v12 = vpack.c.bf16 %v10236_v50, %v10225_v53 }
 0x713   : > { %v6840_v58 = vpop.eup %6839  ;;  %6859 = vrcp.f32 %v2243_v40  ;;  %v2248_v51 = vpop.xlane.xlu1 %2247  ;;  %v10256_v8 = vmul.f32 %v6838_v7, %v11551_v32  ;;  %2302 = vadd.xlane.f32.xlu0 %v11552_v27  ;;  %v11570_v32 = vld [vmem:[#allocation29_spill] sm:$0xff] }
 0x714   : > { %v6842_v30 = vpop.eup %6841  ;;  %6861 = vrcp.f32 %v2158_v16  ;;  %v10263_v13 = vmul.f32 %v6840_v58, %v11553_v15  ;;  %4171 = vadd.xlane.f32.xlu1 %v4170_v42  ;;  %v4236_v16 = vpack.c.bf16 %v10214_v33, %v10203_v43  ;;  %v11566_v42 = vld [vmem:[#allocation31_spill] sm:$0xff]  ;;  %v11568_v33 = vld [vmem:[#allocation69_spill] sm:$0xff] }
 0x715   : > { %v6844_v10 = vpop.eup %6843  ;;  %6863 = vrcp.f32 %v2163_v61  ;;  %v2253_v3 = vpop.xlane.xlu0 %2252  ;;  %v10268_v19 = vmul.f32 %v6842_v30, %v11554_v2  ;;  %4503 = vmatmul.mubr.bf16.gmra.mrb[244].mxu1 %v4233_v46  ;;  %v11564_v61 = vld [vmem:[#allocation7_spill] sm:$0xff]  ;;  %v11572_v46 = vld [vmem:[#allocation5_spill] sm:$0xff]  ;;  %v4239_v2 = vpack.c.bf16 %v10232_v29, %v10222_v11  ;;  %v11580_v29 = vld [vmem:[#allocation76_spill] sm:$0xff] }
 0x716   : > { %v6846_v55 = vpop.eup %6845  ;;  %6865 = vrcp.f32 %v2248_v51  ;;  %v10273_v39 = vmul.f32 %v6844_v10, %v11555_v44  ;;  %4510 = vmatprep.mubr.bf16.mxu1 %v4237_v21  ;;  %v11574_v10 = vld [vmem:[#allocation75_spill] sm:$0xff] }
 0x717   : > { %v6848_v36 = vpop.eup %6847  ;;  %6867 = vrcp.f32 %v2253_v3  ;;  %v2168_v26 = vpop.xlane.xlu1 %2167  ;;  %v10277_v4 = vmul.f32 %v6846_v55, %v11556_v14  ;;  %4176 = vadd.xlane.f32.xlu0 %v4175_v25  ;;  %v11575_v25 = vld [vmem:[#allocation74_spill] sm:$0xff] }
 0x718   : > { %v6850_v23 = vpop.eup %6849  ;;  %6869 = vrcp.f32 %v2168_v26  ;;  %v10280_v6 = vmul.f32 %v6848_v36, %v11557_v17  ;;  %4181 = vadd.xlane.f32.xlu1 %v4180_v31  ;;  %v11576_v31 = vld [vmem:[#allocation37_spill] sm:$0xff] }
 0x719   : > { %v6852_v60 = vpop.eup %6851  ;;  %v2173_v28 = vpop.xlane.xlu0 %2172  ;;  %v10283_v52 = vmul.f32 %v6850_v23, %v11558_v47  ;;  %v11578_v23 = vld [vmem:[#allocation38_spill] sm:$0xff] }
 0x71a   : > { %v6854_v1 = vpop.eup %6853  ;;  %6871 = vrcp.f32 %v2173_v28  ;;  %v10286_v0 = vmul.f32 %v6852_v60, %v11560_v22 }
 0x71b   : > { %11559 = vst [vmem:[#allocation23_spill] sm:$0xff] %v10283_v52  ;;  %v6856_v57 = vpop.eup %6855  ;;  %v2258_v40 = vpop.xlane.xlu1 %2257  ;;  %v10289_v38 = vmul.f32 %v6854_v1, %v11562_v20  ;;  %4186 = vadd.xlane.f32.xlu0 %v4185_v41  ;;  %v11581_v41 = vld [vmem:[#allocation79_spill] sm:$0xff]  ;;  %v11582_v20 = vld [vmem:[#allocation9_spill] sm:$0xff] }
 0x71c   : > { %11561 = vst [vmem:[#allocation39_spill] sm:$0xff] %v10286_v0  ;;  %v6858_v56 = vpop.eup %6857  ;;  %6873 = vrcp.f32 %v2258_v40  ;;  %v10294_v59 = vmul.f32 %v6856_v57, %v11563_v54 }
 0x71d   : > { %v6860_v48 = vpop.eup %6859  ;;  %v2263_v9 = vpop.xlane.xlu0 %2262  ;;  %v10299_v49 = vmul.f32 %v6858_v56, %v11564_v61  ;;  %4511 = vmatmul.mubr.bf16.gmra.mrb[248].mxu1 %v4236_v16  ;;  %v11586_v61 = vld [vmem:[#allocation77_spill] sm:$0xff] }
 0x71e   : > { %v6862_v7 = vpop.eup %6861  ;;  %6875 = vrcp.f32 %v2263_v9  ;;  %v10302_v35 = vmul.f32 %v6860_v48, %v11566_v42  ;;  %4518 = vmatprep.mubr.bf16.mxu1 %v4240_v12  ;;  %v11584_v48 = vld [vmem:[#allocation8_spill] sm:$0xff] }
 0x71f   : > { %11565 = vst [vmem:[#allocation17_spill] sm:$0xff] %v10299_v49  ;;  %v6864_v37 = vpop.eup %6863  ;;  %v2178_v43 = vpop.xlane.xlu1 %2177  ;;  %v10305_v58 = vmul.f32 %v6862_v7, %v11568_v33 }
 0x720   : > { %11567 = vst [vmem:[#allocation21_spill] sm:$0xff] %v10302_v35  ;;  %v6866_v18 = vpop.eup %6865  ;;  %6877 = vrcp.f32 %v2178_v43  ;;  %v10308_v53 = vmul.f32 %v6864_v37, %v11569_v62  ;;  %v11587_v37 = vld [vmem:[#allocation78_spill] sm:$0xff] }
 0x721   : > { %v6868_v50 = vpop.eup %6867  ;;  %v2183_v51 = vpop.xlane.xlu0 %2182  ;;  %v10311_v30 = vmul.f32 %v6866_v18, %v11570_v32  ;;  %v11588_v18 = vld [vmem:[#allocation10_spill] sm:$0xff] }
 0x722   : > { %v6870_v27 = vpop.eup %6869  ;;  %6879 = vrcp.f32 %v2183_v51  ;;  %v10314_v5 = vmul.f32 %v6868_v50, %v11572_v46  ;;  %v11590_v51 = vld [vmem:[#allocation36_spill] sm:$0xff] }
 0x723   : > { %11571 = vst [vmem:[#allocation24_spill] sm:$0xff] %v10311_v30  ;;  %v2268_v15 = vpop.xlane.xlu1 %2267  ;;  %v10317_v21 = vmul.f32 %v6870_v27, %v11574_v10  ;;  %v11592_v46 = vld [vmem:[#allocation80_spill] sm:$0xff] }
 0x724   : > { %11573 = vst [vmem:[#allocation12_spill] sm:$0xff] %v10314_v5  ;;  %v6872_v3 = vpop.eup %6871  ;;  %6881 = vrcp.f32 %v2268_v15 }
 0x725   : > { %v2273_v55 = vpop.xlane.xlu0 %2272  ;;  %v10322_v34 = vmul.f32 %v6872_v3, %v11575_v25  ;;  %4519 = vmatmul.mubr.bf16.gmra.mrb[252].mxu1 %v4239_v2  ;;  %v11593_v3 = vld [vmem:[#allocation84_spill] sm:$0xff] }
 0x726   : > { %v6874_v44 = vpop.eup %6873  ;;  %6883 = vrcp.f32 %v2273_v55 }
 0x727   : > { %v2188_v36 = vpop.xlane.xlu1 %2187  ;;  %v10325_v45 = vmul.f32 %v6874_v44, %v11576_v31 }
 0x728   : > { %v6876_v26 = vpop.eup %6875  ;;  %6885 = vrcp.f32 %v2188_v36 }
 0x729   : > { %11577 = vst [vmem:[#allocation14_spill] sm:$0xff] %v10325_v45  ;;  %v2193_v14 = vpop.xlane.xlu0 %2192  ;;  %v10328_v17 = vmul.f32 %v6876_v26, %v11578_v23 }
 0x72a   : > { %v6878_v60 = vpop.eup %6877  ;;  %6887 = vrcp.f32 %v2193_v14 }
 0x72b   : > { %11579 = vst [vmem:[#allocation40_spill] sm:$0xff] %v10328_v17  ;;  %v2278_v11 = vpop.xlane.xlu1 %2277  ;;  %v10331_v28 = vmul.f32 %v6878_v60, %v11580_v29 }
 0x72c   : > { %v6880_v47 = vpop.eup %6879  ;;  %6889 = vrcp.f32 %v2278_v11 }
 0x72d   : > { %v2283_v1 = vpop.xlane.xlu0 %2282  ;;  %v10334_v22 = vmul.f32 %v6880_v47, %v11581_v41 }
 0x72e   : > { %v6882_v57 = vpop.eup %6881  ;;  %6891 = vrcp.f32 %v2283_v1 }
 0x72f   : > { %v2198_v40 = vpop.xlane.xlu1 %2197  ;;  %v10337_v56 = vmul.f32 %v6882_v57, %v11582_v20 }
 0x730   : > { %v6884_v16 = vpop.eup %6883  ;;  %6893 = vrcp.f32 %v2198_v40 }
 0x731   : > { %11583 = vst [vmem:[#allocation27_spill] sm:$0xff] %v10337_v56  ;;  %v2203_v54 = vpop.xlane.xlu0 %2202  ;;  %v10340_v12 = vmul.f32 %v6884_v16, %v11584_v48 }
 0x732   : > { %v6886_v9 = vpop.eup %6885  ;;  %6895 = vrcp.f32 %v2203_v54 }
 0x733   : > { %11585 = vst [vmem:[#allocation41_spill] sm:$0xff] %v10340_v12  ;;  %v10343_v7 = vmul.f32 %v6886_v9, %v11586_v61  ;;  %v4012_v31 = vpop.xlane.xlu1 %4011 }
 0x734   : > { %v6888_v42 = vpop.eup %6887 }
 0x735   : > { %v10346_v43 = vmul.f32 %v6888_v42, %v11587_v37  ;;  %v4017_v26 = vpop.xlane.xlu0 %4016 }
 0x736   : > { %v6890_v33 = vpop.eup %6889 }
 0x737   : > { %v10349_v62 = vmul.f32 %v6890_v33, %v11588_v18  ;;  %v4022_v29 = vpop.xlane.xlu1 %4021 }
 0x738   : > { %v6892_v50 = vpop.eup %6891  ;;  %6897 = vrcp.f32 %v4022_v29 }
 0x739   : > { %11589 = vst [vmem:[#allocation32_spill] sm:$0xff] %v10349_v62  ;;  %v10352_v32 = vmul.f32 %v6892_v50, %v11590_v51  ;;  %v4027_v47 = vpop.xlane.xlu0 %4026  ;;  %6899 = vrcp.f32 %v4012_v31 }
 0x73a   : > { %v6894_v27 = vpop.eup %6893  ;;  %6901 = vrcp.f32 %v4027_v47 }
 0x73b   : > { %11591 = vst [vmem:[#allocation89_spill] sm:$0xff] %v10352_v32  ;;  %v10355_v15 = vmul.f32 %v6894_v27, %v11592_v46  ;;  %v4032_v57 = vpop.xlane.xlu1 %4031  ;;  %6903 = vrcp.f32 %v4017_v26  ;;  %v10425_v26 = vld [vmem:[%s10847_s5] ss:$0 sm:$0xff] }
 0x73c   : > { %v6896_v10 = vpop.eup %6895 }
 0x73d   : > { %v10358_v2 = vmul.f32 %v6896_v10, %v11593_v3  ;;  %v4037_v16 = vpop.xlane.xlu0 %4036 }
 0x73e   : > { %v10360_v55 = vpop.f32.mrb[184].mxu1 }
 0x73f   : > { %v4386_v25 = vpop.f32.mrb[185].mxu1  ;;  %v4042_v54 = vpop.xlane.xlu1 %4041 }
 0x740   : > { %v10362_v44 = vpop.f32.mrb[186].mxu1  ;;  %6905 = vrcp.f32 %v4042_v54 }
 0x741   : > { %v4389_v36 = vpop.f32.mrb[187].mxu1  ;;  %v4047_v61 = vpop.xlane.xlu0 %4046  ;;  %6907 = vrcp.f32 %v4032_v57 }
 0x742   : > { %v6898_v49 = vpop.eup %6897  ;;  %6909 = vrcp.f32 %v4047_v61 }
 0x743   : > { %v10374_v33 = vpop.xlane.xlu1 %4051  ;;  %v6900_v54 = vpop.eup %6899  ;;  %6911 = vrcp.f32 %v4037_v16 }
 0x745   : > { %v10376_v18 = vpop.xlane.xlu0 %4056 }
 0x746   : > { %v4392_v14 = vpop.f32.mrb[188].mxu1 }
 0x747   : > { %v4394_v23 = vpop.f32.mrb[189].mxu1  ;;  %v10382_v10 = vpop.xlane.xlu1 %4061 }
 0x748   : > { %v10364_v60 = vpop.f32.mrb[190].mxu1  ;;  %6913 = vrcp.f32 %v10382_v10 }
 0x749   : > { %v4397_v11 = vpop.f32.mrb[191].mxu1  ;;  %v10384_v3 = vpop.xlane.xlu0 %4066  ;;  %6915 = vrcp.f32 %v10374_v33 }
 0x74a   : > { %6917 = vrcp.f32 %v10384_v3 }
 0x74b   : > { %v10388_v23 = vpop.xlane.xlu1 %4071  ;;  %6919 = vrcp.f32 %v10376_v18  ;;  %v2905_v18 = vadd.f32 %v10425_v26, %v10308_v53 }
 0x74c   : > { %6921 = vrcp.f32 %v10388_v23 }
 0x74e   : > { %v10366_v1 = vpop.f32.mrb[192].mxu1 }
 0x74f   : > { %v4402_v41 = vpop.f32.mrb[193].mxu1 }
 0x750   : > { %v10368_v40 = vpop.f32.mrb[194].mxu1 }
 0x751   : > { %v4405_v20 = vpop.f32.mrb[195].mxu1 }
 0x752   : > { %v10392_v20 = vpop.xlane.xlu0 %4076 }
 0x753   : > { %6923 = vrcp.f32 %v10392_v20  ;;  %v2906_v20 = vadd.f32 %v10425_v26, %v10317_v21 }
 0x756   : > { %v10370_v48 = vpop.f32.mrb[196].mxu1 }
 0x757   : > { %v4410_v9 = vpop.f32.mrb[197].mxu1 }
 0x758   : > { %v10372_v42 = vpop.f32.mrb[198].mxu1  ;;  %v10394_v9 = vpop.xlane.xlu1 %4091 }
 0x759   : > { %v4413_v37 = vpop.f32.mrb[199].mxu1 }
 0x75c   : > { %v10402_v12 = vpop.xlane.xlu1 %4101 }
 0x75e   : > { %v10378_v50 = vpop.f32.mrb[200].mxu1 }
 0x75f   : > { %v4418_v51 = vpop.f32.mrb[201].mxu1 }
 0x760   : > { %v10380_v27 = vpop.f32.mrb[202].mxu1  ;;  %v10410_v5 = vpop.xlane.xlu1 %4111 }
 0x761   : > { %v4421_v46 = vpop.f32.mrb[203].mxu1  ;;  %11594 = vst [vmem:[#allocation28_spill] sm:$0xff] %v10410_v5 }
 0x762   : > { %v10398_v46 = vpop.xlane.xlu0 %4096 }
 0x766   : > { %v10386_v25 = vpop.f32.mrb[204].mxu1 }
 0x767   : > { %v4426_v36 = vpop.f32.mrb[205].mxu1 }
 0x768   : > { %v10390_v11 = vpop.f32.mrb[206].mxu1  ;;  %v10404_v36 = vpop.xlane.xlu0 %4106 }
 0x769   : > { %v4429_v41 = vpop.f32.mrb[207].mxu1 }
 0x76e   : > { %v10396_v37 = vpop.f32.mrb[208].mxu1 }
 0x76f   : > { %v4434_v51 = vpop.f32.mrb[209].mxu1 }
 0x770   : > { %v10400_v32 = vpop.f32.mrb[210].mxu1  ;;  %v10412_v51 = vpop.xlane.xlu0 %4116 }
 0x771   : > { %v4437_v62 = vpop.f32.mrb[211].mxu1  ;;  %11595 = vst [vmem:[#allocation91_spill] sm:$0xff] %v10412_v51  ;;  %v2898_v51 = vadd.f32 %v10425_v26, %v10256_v8  ;;  %v2899_v8 = vadd.f32 %v10425_v26, %v10263_v13 }
 0x776   : > { %v10406_v56 = vpop.f32.mrb[212].mxu1 }
 0x777   : > { %v4442_v17 = vpop.f32.mrb[213].mxu1 }
 0x778   : > { %v10408_v41 = vpop.f32.mrb[214].mxu1 }
 0x779   : > { %v4445_v45 = vpop.f32.mrb[215].mxu1 }
 0x77e   : > { %v10414_v30 = vpop.xlane.xlu1 %4121  ;;  %v10416_v62 = vpop.f32.mrb[216].mxu1 }
 0x77f   : > { %11596 = vst [vmem:[#allocation92_spill] sm:$0xff] %v10414_v30  ;;  %v4450_v0 = vpop.f32.mrb[217].mxu1 }
 0x780   : > { %v10420_v52 = vpop.f32.mrb[218].mxu1 }
 0x781   : > { %v10418_v35 = vpop.xlane.xlu0 %4126  ;;  %v4453_v17 = vpop.f32.mrb[219].mxu1 }
 0x782   : > { %11597 = vst [vmem:[#allocation42_spill] sm:$0xff] %v10418_v35  ;;  %v6212_v29 = vpop.f32.mrb[212].mxu0  ;;  %v6371_v35 = vld [vmem:[%s10849_s7 + $0x4] ss:$12 sps:$4 sm:$0xff]  }
 0x783   : > { %v4570_v45 = vadd.f32 %v6212_v29, %v4392_v14  ;;  %v4561_v31 = vpop.f32.mrb[213].mxu0  ;;  %v2900_v14 = vadd.f32 %v10425_v26, %v10277_v4  ;;  %5038 = vmatprep.mubr.bf16.mxu0 %v6371_v35 }
 0x784   : > { %v4562_v47 = vadd.f32 %v4561_v31, %v10360_v55  ;;  %v6213_v0 = vpop.f32.mrb[214].mxu0  ;;  %v6372_v55 = vld [vmem:[%s10849_s7 + $0x8] ss:$12 sps:$4 sm:$0xff]   ;;  %v6902_v31 = vpop.eup %6901 }
 0x785   : > { %v10431_v17 = vpop.xlane.xlu1 %4131  ;;  %v4742_v57 = vmul.f32 %v6898_v49, %v4570_v45  ;;  %v4573_v61 = vadd.f32 %v6213_v0, %v10364_v60  ;;  %v4564_v29 = vpop.f32.mrb[215].mxu0  ;;  %v2901_v49 = vadd.f32 %v10425_v26, %v10280_v6  ;;  %6250 = vmatprep.mubr.msk.bf16.mxu1 %vm1620_vm6, %v6372_v55 }
 0x786   : > { %11598 = vst [vmem:[#allocation88_spill] sm:$0xff] %v10431_v17  ;;  %v4740_v30 = vmul.f32 %v6900_v54, %v4562_v47  ;;  %v4565_v16 = vadd.f32 %v4564_v29, %v10362_v44  ;;  %v6904_v17 = vpop.eup %6903  ;;  %v10448_v45 = vpop.f32.mrb[220].mxu1 }
 0x787   : > { %v10442_v5 = vpop.xlane.xlu0 %4136  ;;  %v10444_v4 = vadd.f32 %v4742_v57, %v2900_v14  ;;  %v4743_v60 = vmul.f32 %v6902_v31, %v4573_v61  ;;  %v4458_v35 = vpop.f32.mrb[221].mxu1 }
 0x788   : > { %v10451_v0 = vadd.f32 %v4740_v30, %v2898_v51  ;;  %v4741_v44 = vmul.f32 %v6904_v17, %v4565_v16  ;;  %v10459_v14 = vpop.f32.mrb[222].mxu1  ;;  %v6906_v17 = vpop.eup %6905 }
 0x789   : > { %v10455_v47 = vpop.xlane.xlu1 %4141  ;;  %v10457_v54 = vadd.f32 %v4743_v60, %v2901_v49  ;;  %v4461_v57 = vpop.f32.mrb[223].mxu1 }
 0x78a   : > { %v10462_v6 = vadd.f32 %v4741_v44, %v2899_v8  ;;  %v6216_v61 = vpop.f32.mrb[216].mxu0  ;;  %v6908_v16 = vpop.eup %6907  ;;  %v2902_v44 = vadd.f32 %v10425_v26, %v10289_v38 }
 0x78b   : > { %v4586_v13 = vadd.f32 %v6216_v61, %v10370_v48  ;;  %v4577_v51 = vpop.f32.mrb[217].mxu0  ;;  %v2904_v48 = vadd.f32 %v10425_v26, %v10305_v58  ;;  %v6910_v8 = vpop.eup %6909 }
 0x78c   : > { %v10469_v29 = vpop.xlane.xlu0 %4146  ;;  %v4812_v10 = vpack.c.bf16 %v10462_v6, %v10451_v0  ;;  %v4578_v55 = vadd.f32 %v4577_v51, %v10366_v1  ;;  %v6217_v31 = vpop.f32.mrb[218].mxu0 }
 0x78d   : > { %v10475_v33 = vpop.xlane.xlu1 %4151  ;;  %v4746_v49 = vmul.f32 %v6906_v17, %v4586_v13  ;;  %v4589_v60 = vadd.f32 %v6217_v31, %v10372_v42  ;;  %v4580_v3 = vpop.f32.mrb[219].mxu0  ;;  %v2903_v13 = vadd.f32 %v10425_v26, %v10294_v59 }
 0x78e   : > { %v4744_v35 = vmul.f32 %v6908_v16, %v4578_v55  ;;  %v4581_v1 = vadd.f32 %v4580_v3, %v10368_v40  ;;  %v6912_v57 = vpop.eup %6911  ;;  %v10487_v30 = vpop.f32.mrb[224].mxu1 }
 0x78f   : > { %v10483_v61 = vadd.f32 %v4746_v49, %v2904_v48  ;;  %v4747_v51 = vmul.f32 %v6910_v8, %v4589_v60  ;;  %v4466_v17 = vpop.f32.mrb[225].mxu1  ;;  %v6914_v3 = vpop.eup %6913 }
 0x790   : > { %v10489_v58 = vpop.xlane.xlu0 %4156  ;;  %v10491_v42 = vadd.f32 %v4744_v35, %v2902_v44  ;;  %v4745_v38 = vmul.f32 %v6912_v57, %v4581_v1  ;;  %v10499_v31 = vpop.f32.mrb[226].mxu1 }
 0x791   : > { %v10495_v55 = vpop.xlane.xlu1 %4161  ;;  %v10497_v40 = vadd.f32 %v4747_v51, %v2905_v18  ;;  %v4469_v16 = vpop.f32.mrb[227].mxu1  ;;  %v2908_v18 = vadd.f32 %v10425_v26, %v10331_v28 }
 0x792   : > { %v10502_v53 = vadd.f32 %v4745_v38, %v2903_v13  ;;  %v6220_v48 = vpop.f32.mrb[220].mxu0  ;;  %v6916_v1 = vpop.eup %6915 }
 0x793   : > { %v4602_v60 = vadd.f32 %v6220_v48, %v10386_v25  ;;  %v4593_v59 = vpop.f32.mrb[221].mxu0  ;;  %v6918_v38 = vpop.eup %6917 }
 0x794   : > { %v10508_v8 = vpop.xlane.xlu0 %4166  ;;  %v4814_v44 = vpack.c.bf16 %v10502_v53, %v10491_v42  ;;  %v4594_v23 = vadd.f32 %v4593_v59, %v10378_v50  ;;  %v6221_v35 = vpop.f32.mrb[222].mxu0  ;;  %v2909_v59 = vadd.f32 %v10425_v26, %v10334_v22  ;;  %v11611_v42 = vpack.c.bf16 %v10497_v40, %v10483_v61 }
 0x795   : > { %v4082_v57 = vpop.xlane.xlu1 %4081  ;;  %v4750_v51 = vmul.f32 %v6914_v3, %v4602_v60  ;;  %v4605_v25 = vadd.f32 %v6221_v35, %v10390_v11  ;;  %v4596_v13 = vpop.f32.mrb[223].mxu0  ;;  %v2907_v60 = vadd.f32 %v10425_v26, %v10322_v34 }
 0x796   : > { %6925 = vrcp.f32 %v4082_v57  ;;  %v4748_v17 = vmul.f32 %v6916_v1, %v4594_v23  ;;  %v4597_v16 = vadd.f32 %v4596_v13, %v10380_v27  ;;  %v6920_v48 = vpop.eup %6919 }
 0x797   : > { %v10519_v50 = vadd.f32 %v4750_v51, %v2908_v18  ;;  %v4751_v49 = vmul.f32 %v6918_v38, %v4605_v25  ;;  %6927 = vrcp.f32 %v10402_v12  ;;  %v6922_v57 = vpop.eup %6921 }
 0x798   : > { %v4087_v28 = vpop.xlane.xlu0 %4086  ;;  %v10524_v11 = vadd.f32 %v4748_v17, %v2906_v20  ;;  %v4749_v3 = vmul.f32 %v6920_v48, %v4597_v16  ;;  %v6924_v25 = vpop.eup %6923  ;;  %v2912_v20 = vadd.f32 %v10425_v26, %v10355_v15 }
 0x799   : > { %6929 = vrcp.f32 %v4087_v28  ;;  %v10528_v21 = vadd.f32 %v4751_v49, %v2909_v59 }
 0x79a   : > { %v6224_v27 = vpop.f32.mrb[224].mxu0  ;;  %6931 = vrcp.f32 %v10394_v9  ;;  %v10531_v23 = vadd.f32 %v4749_v3, %v2907_v60 }
 0x79b   : > { %v4618_v22 = vadd.f32 %v6224_v27, %v10406_v56  ;;  %v4609_v35 = vpop.f32.mrb[225].mxu0  ;;  %6933 = vrcp.f32 %v10404_v36  ;;  %v4817_v12 = vpack.c.bf16 %v10528_v21, %v10519_v50  ;;  %v2910_v56 = vadd.f32 %v10425_v26, %v10343_v7 }
 0x79c   : > { %v4610_v1 = vadd.f32 %v4609_v35, %v10396_v37  ;;  %v6225_v34 = vpop.f32.mrb[226].mxu0  ;;  %6935 = vrcp.f32 %v10398_v46  ;;  %v4816_v49 = vpack.c.bf16 %v10531_v23, %v10524_v11  ;;  %v2911_v37 = vadd.f32 %v10425_v26, %v10346_v43  ;;  %v2293_v53 = vpop.xlane.xlu0 %2292  ;;  %v11614_v23 = vld [vmem:[#allocation27_spill] sm:$0xff] }
 0x79d   : > { %v4621_v9 = vadd.f32 %v6225_v34, %v10408_v41  ;;  %v4612_v18 = vpop.f32.mrb[227].mxu0  ;;  %v2916_v43 = vadd.f32 %v10425_v26, %v10268_v19 }
 0x79e   : > { %v4752_v51 = vmul.f32 %v6922_v57, %v4610_v1  ;;  %v4613_v36 = vadd.f32 %v4612_v18, %v10400_v32  ;;  %v2914_v18 = vadd.f32 %v10425_v26, %v10244_v24 }
 0x7a0   : > { %v10545_v13 = vadd.f32 %v4752_v51, %v2910_v56  ;;  %v4753_v38 = vmul.f32 %v6924_v25, %v4613_v36  ;;  %v6926_v46 = vpop.eup %6925  ;;  %v2917_v25 = vadd.f32 %v10425_v26, %v10273_v39  ;;  %v11599_v39 = vpack.c.bf16 %v10457_v54, %v10444_v4  ;;  %v11604_v4 = vld [vmem:[#allocation88_spill] sm:$0xff]  ;;  %v11605_v54 = vld [vmem:[#allocation17_spill] sm:$0xff] }
 0x7a1   : > { %v4754_v17 = vmul.f32 %v6926_v46, %v4618_v22  ;;  %v6928_v48 = vpop.eup %6927  ;;  %v2913_v22 = vadd.f32 %v10425_v26, %v10358_v2 }
 0x7a2   : > { %v10551_v41 = vadd.f32 %v4753_v38, %v2911_v37  ;;  %v6228_v16 = vpop.f32.mrb[228].mxu0 }
 0x7a3   : > { %v4634_v7 = vadd.f32 %v6228_v16, %v10448_v45  ;;  %v4625_v59 = vpop.f32.mrb[229].mxu0  ;;  %v6930_v32 = vpop.eup %6929  ;;  %v10554_v28 = vadd.f32 %v4754_v17, %v2912_v20  ;;  %v11600_v17 = vld [vmem:[#allocation28_spill] sm:$0xff]  ;;  %v11602_v16 = vld [vmem:[#allocation91_spill] sm:$0xff] }
 0x7a4   : > { %v4818_v60 = vpack.c.bf16 %v10551_v41, %v10545_v13  ;;  %v4626_v3 = vadd.f32 %v4625_v59, %v10416_v62  ;;  %v6229_v15 = vpop.f32.mrb[230].mxu0  ;;  %v6932_v27 = vpop.eup %6931  ;;  %v4755_v35 = vmul.f32 %v6930_v32, %v4621_v9  ;;  %6937 = vrcp.f32 %v11600_v17 }
 0x7a5   : > { %v4758_v1 = vmul.f32 %v6928_v48, %v4634_v7  ;;  %v4637_v45 = vadd.f32 %v6229_v15, %v10459_v14  ;;  %v4628_v34 = vpop.f32.mrb[231].mxu0  ;;  %v6934_v57 = vpop.eup %6933  ;;  %v2915_v14 = vadd.f32 %v10425_v26, %v10250_v63  ;;  %v11601_v63 = vld [vmem:[#allocation92_spill] sm:$0xff]  ;;  %v11603_v48 = vld [vmem:[#allocation42_spill] sm:$0xff] }
 0x7a6   : > { %v4756_v56 = vmul.f32 %v6932_v27, %v4626_v3  ;;  %v4629_v51 = vadd.f32 %v4628_v34, %v10420_v52  ;;  %v6936_v19 = vpop.eup %6935  ;;  %v10567_v36 = vadd.f32 %v4755_v35, %v2913_v22  ;;  %6939 = vrcp.f32 %v11601_v63  ;;  %v11606_v22 = vld [vmem:[#allocation23_spill] sm:$0xff] }
 0x7a7   : > { %v4794_v62 = vadd.f32 %v4758_v1, %v2916_v43  ;;  %v4759_v2 = vmul.f32 %v6934_v57, %v4637_v45  ;;  %6941 = vrcp.f32 %v11602_v16  ;;  %v2920_v27 = vadd.f32 %v10425_v26, %v11605_v54  ;;  %v11610_v54 = vld [vmem:[#allocation12_spill] sm:$0xff] }
 0x7a8   : > { %v4792_v9 = vadd.f32 %v4756_v56, %v2914_v18  ;;  %v4757_v37 = vmul.f32 %v6936_v19, %v4629_v51  ;;  %v4819_v38 = vpack.c.bf16 %v10567_v36, %v10554_v28  ;;  %6943 = vrcp.f32 %v11603_v48  ;;  %v11621_v28 = vld [vmem:[#allocation16_spill] sm:$0xff] }
 0x7a9   : > { %v4795_v24 = vadd.f32 %v4759_v2, %v2917_v25  ;;  %6945 = vrcp.f32 %v11604_v4  ;;  %v2918_v35 = vadd.f32 %v10425_v26, %v11606_v22  ;;  %v11608_v2 = vld [vmem:[#allocation39_spill] sm:$0xff] }
 0x7aa   : > { %v4793_v46 = vadd.f32 %v4757_v37, %v2915_v14  ;;  %6947 = vrcp.f32 %v10442_v5 }
 0x7ab   : > { %v4821_v20 = vpack.c.bf16 %v4795_v24, %v4794_v62  ;;  %v11607_v62 = vld [vmem:[#allocation21_spill] sm:$0xff]  ;;  %6949 = vrcp.f32 %v10455_v47 }
 0x7ac   : > { %v4820_v52 = vpack.c.bf16 %v4793_v46, %v4792_v9  ;;  %v2921_v25 = vadd.f32 %v10425_v26, %v11607_v62  ;;  %v2919_v9 = vadd.f32 %v10425_v26, %v11608_v2  ;;  %6951 = vrcp.f32 %v10469_v29  ;;  %v2288_v29 = vpop.xlane.xlu1 %2287 }
 0x7ad   : > { %6953 = vrcp.f32 %v10475_v33 }
 0x7ae   : > { %5919 = vmatprep.subr.bf16.mxu0 %v4820_v52  ;;  %v6938_v43 = vpop.eup %6937  ;;  %6955 = vrcp.f32 %v10489_v58 }
 0x7af   : > { %5920 = vmatpush3.bf16.msra.mxu0 %v4812_v10  ;;  %6957 = vrcp.f32 %v10495_v55 }
 0x7b0   : > { %5921 = vmatprep.subr.bf16.mxu0 %v4821_v20  ;;  %v6940_v15 = vpop.eup %6939  ;;  %6959 = vrcp.f32 %v10508_v8 }
 0x7b1   : > { %v6942_v34 = vpop.eup %6941  ;;  %6961 = vrcp.f32 %v2288_v29 }
 0x7b2   : > { %v6944_v19 = vpop.eup %6943  ;;  %6963 = vrcp.f32 %v2293_v53 }
 0x7b3   : > { %5922 = vmatpush3.bf16.msra.mxu0 %v11599_v39  ;;  %v6946_v5 = vpop.eup %6945 }
 0x7c4   : > { %v6232_v7 = vpop.f32.mrb[232].mxu0 }
 0x7c5   : > { %v4472_v59 = vpop.f32.mrb[228].mxu1  ;;  %v4641_v32 = vpop.f32.mrb[233].mxu0 }
 0x7c6   : > { %v4650_v3 = vadd.f32 %v6232_v7, %v4472_v59  ;;  %v4642_v0 = vadd.f32 %v4641_v32, %v10487_v30  ;;  %v4474_v6 = vpop.f32.mrb[229].mxu1  ;;  %v6233_v10 = vpop.f32.mrb[234].mxu0 }
 0x7c7   : > { %v4475_v1 = vpop.f32.mrb[230].mxu1  ;;  %v4644_v45 = vpop.f32.mrb[235].mxu0 }
 0x7c8   : > { %v4762_v57 = vmul.f32 %v6940_v15, %v4650_v3  ;;  %v4760_v18 = vmul.f32 %v6938_v43, %v4642_v0  ;;  %v4653_v56 = vadd.f32 %v6233_v10, %v4475_v1  ;;  %v4645_v51 = vadd.f32 %v4644_v45, %v10499_v31  ;;  %v4477_v30 = vpop.f32.mrb[231].mxu1  ;;  %v6948_v3 = vpop.eup %6947  ;;  %v11609_v0 = vld [vmem:[#allocation24_spill] sm:$0xff] }
 0x7c9   : > { %v2922_v47 = vadd.f32 %v10425_v26, %v11609_v0 }
 0x7ca   : > { %v4798_v14 = vadd.f32 %v4762_v57, %v2920_v27  ;;  %v4796_v37 = vadd.f32 %v4760_v18, %v2918_v35  ;;  %v4763_v24 = vmul.f32 %v6944_v19, %v4653_v56  ;;  %v4761_v46 = vmul.f32 %v6942_v34, %v4645_v51  ;;  %v6950_v56 = vpop.eup %6949  ;;  %v11612_v19 = vld [vmem:[#allocation14_spill] sm:$0xff] }
 0x7cb   : > { %v2923_v27 = vadd.f32 %v10425_v26, %v11610_v54  ;;  %v2924_v61 = vadd.f32 %v10425_v26, %v11612_v19  ;;  %v6952_v33 = vpop.eup %6951 }
 0x7cc   : > { %v4799_v20 = vadd.f32 %v4763_v24, %v2921_v25  ;;  %v4797_v52 = vadd.f32 %v4761_v46, %v2919_v9  ;;  %v2298_v24 = vpop.xlane.xlu1 %2297 }
 0x7ce   : > { %v4822_v39 = vpack.c.bf16 %v4797_v52, %v4796_v37  ;;  %v4823_v17 = vpack.c.bf16 %v4799_v20, %v4798_v14  ;;  %v11613_v14 = vld [vmem:[#allocation40_spill] sm:$0xff]  ;;  %v2303_v52 = vpop.xlane.xlu0 %2302 }
 0x7cf   : > { %v6236_v63 = vpop.f32.mrb[236].mxu0  ;;  %v2925_v37 = vadd.f32 %v10425_v26, %v11613_v14 }
 0x7d0   : > { %v4480_v31 = vpop.f32.mrb[232].mxu1  ;;  %v4657_v16 = vpop.f32.mrb[237].mxu0  ;;  %5923 = vmatprep.subr.bf16.mxu0 %v4822_v39 }
 0x7d1   : > { %v4658_v48 = vadd.f32 %v4657_v16, %v4480_v31  ;;  %v4482_v7 = vpop.f32.mrb[233].mxu1  ;;  %v6237_v59 = vpop.f32.mrb[238].mxu0  ;;  %5924 = vmatpush3.bf16.msra.mxu0 %v4814_v44 }
 0x7d2   : > { %v4483_v32 = vpop.f32.mrb[234].mxu1  ;;  %v4660_v43 = vpop.f32.mrb[239].mxu0  ;;  %5925 = vmatprep.subr.bf16.mxu0 %v4823_v17 }
 0x7d3   : > { %v4764_v6 = vmul.f32 %v6946_v5, %v4658_v48  ;;  %v4661_v10 = vadd.f32 %v4660_v43, %v4483_v32  ;;  %v4485_v15 = vpop.f32.mrb[235].mxu1  ;;  %v6954_v31 = vpop.eup %6953  ;;  %v11615_v43 = vld [vmem:[#allocation41_spill] sm:$0xff] }
 0x7d4   : > { %v6956_v7 = vpop.eup %6955  ;;  %v4172_v8 = vpop.xlane.xlu1 %4171 }
 0x7d5   : > { %v4800_v4 = vadd.f32 %v4764_v6, %v2922_v47  ;;  %v4765_v22 = vmul.f32 %v6948_v3, %v4661_v10  ;;  %5926 = vmatpush3.bf16.msra.mxu0 %v11611_v42  ;;  %v2927_v3 = vadd.f32 %v10425_v26, %v11615_v43  ;;  %v4177_v6 = vpop.xlane.xlu0 %4176  ;;  %6965 = vrcp.f32 %v4172_v8  ;;  %v6958_v50 = vpop.eup %6957  ;;  %v11616_v42 = vld [vmem:[#allocation32_spill] sm:$0xff] }
 0x7d6   : > { %6967 = vrcp.f32 %v2298_v24  ;;  %v2928_v29 = vadd.f32 %v10425_v26, %v11616_v42  ;;  %v6382_v42 = vld [vmem:[%s10849_s7 + $0x48] ss:$12 sps:$4 sm:$0xff]  }
 0x7d7   : > { %v4801_v44 = vadd.f32 %v4765_v22, %v2923_v27  ;;  %6969 = vrcp.f32 %v4177_v6  ;;  %v6376_v6 = vld [vmem:[%s10849_s7 + $0x18] ss:$12 sps:$4 sm:$0xff]  }
 0x7d8   : > { %v4488_v1 = vpop.f32.mrb[236].mxu1  ;;  %6971 = vrcp.f32 %v2303_v52 }
 0x7d9   : > { %v6240_v35 = vpop.f32.mrb[240].mxu0  ;;  %v4666_v45 = vadd.f32 %v6236_v63, %v4488_v1  ;;  %v4490_v57 = vpop.f32.mrb[237].mxu1  ;;  %v4824_v18 = vpack.c.bf16 %v4801_v44, %v4800_v4 }
 0x7da   : > { %v4673_v34 = vpop.f32.mrb[241].mxu0  ;;  %v4491_v30 = vpop.f32.mrb[238].mxu1  ;;  %v11617_v57 = vld [vmem:[#allocation89_spill] sm:$0xff] }
 0x7db   : > { %v6241_v51 = vpop.f32.mrb[242].mxu0  ;;  %v4766_v40 = vmul.f32 %v6950_v56, %v4666_v45  ;;  %v4669_v62 = vadd.f32 %v6237_v59, %v4491_v30  ;;  %v4493_v2 = vpop.f32.mrb[239].mxu1  ;;  %5927 = vmatprep.subr.bf16.mxu0 %v4824_v18  ;;  %v2929_v18 = vadd.f32 %v10425_v26, %v11617_v57  ;;  %v6397_v57 = vld [vmem:[%s10849_s7 + $0xb0] ss:$12 sps:$4 sm:$0xff]  }
 0x7dc   : > { %v4676_v25 = vpop.f32.mrb[243].mxu0  ;;  %5928 = vmatpush3.bf16.msra.mxu0 %v4816_v49  ;;  %v2926_v49 = vadd.f32 %v10425_v26, %v11614_v23  ;;  %v4187_v19 = vpop.xlane.xlu0 %4186 }
 0x7dd   : > { %v4802_v9 = vadd.f32 %v4766_v40, %v2924_v61  ;;  %v4767_v58 = vmul.f32 %v6952_v33, %v4669_v62  ;;  %v11618_v40 = vld [vmem:[#allocation18_spill] sm:$0xff]  ;;  %v11619_v33 = vld [vmem:[#allocation19_spill] sm:$0xff] }
 0x7df   : > { %v4803_v46 = vadd.f32 %v4767_v58, %v2925_v37 }
 0x7e0   : > { %v4496_v20 = vpop.f32.mrb[240].mxu1 }
 0x7e1   : > { %v4674_v39 = vadd.f32 %v4673_v34, %v4496_v20  ;;  %v4498_v17 = vpop.f32.mrb[241].mxu1  ;;  %v4825_v63 = vpack.c.bf16 %v4803_v46, %v4802_v9  ;;  %v6369_v20 = vld [vmem:[%s10849_s7] ss:$12 sps:$4 sm:$0xff]  }
 0x7e2   : > { %v4499_v11 = vpop.f32.mrb[242].mxu1 }
 0x7e3   : > { %v4768_v16 = vmul.f32 %v6954_v31, %v4674_v39  ;;  %v4677_v5 = vadd.f32 %v4676_v25, %v4499_v11  ;;  %v4501_v48 = vpop.f32.mrb[243].mxu1  ;;  %5929 = vmatprep.subr.bf16.mxu0 %v4825_v63  ;;  %v6374_v39 = vld [vmem:[%s10849_s7 + $0x1c] ss:$12 sps:$4 sm:$0xff]  }
 0x7e4   : > { %5930 = vmatpush3.bf16.msra.mxu0 %v4817_v12  ;;  %v6960_v12 = vpop.eup %6959 }
 0x7e5   : > { %v10622_v55 = vpop.f32.mrb[244].mxu0  ;;  %v4804_v59 = vadd.f32 %v4768_v16, %v2926_v49  ;;  %v4769_v0 = vmul.f32 %v6956_v7, %v4677_v5  ;;  %v6962_v45 = vpop.eup %6961  ;;  %v11620_v49 = vld [vmem:[#allocation20_spill] sm:$0xff] }
 0x7e6   : > { %v4689_v32 = vpop.f32.mrb[245].mxu0  ;;  %v6964_v30 = vpop.eup %6963  ;;  %v2888_v62 = vmul.f32 %v6962_v45, %v11618_v40  ;;  %v6392_v45 = vld [vmem:[%s10849_s7 + $0x7c] ss:$12 sps:$4 sm:$0xff]  }
 0x7e7   : > { %v10629_v47 = vpop.f32.mrb[246].mxu0  ;;  %v4805_v10 = vadd.f32 %v4769_v0, %v2927_v3  ;;  %v2889_v9 = vmul.f32 %v6964_v30, %v11619_v33  ;;  %v6966_v13 = vpop.eup %6965  ;;  %v6400_v30 = vld [vmem:[%s10849_s7 + $0xac] ss:$12 sps:$4 sm:$0xff]  }
 0x7e8   : > { %v4692_v15 = vpop.f32.mrb[247].mxu0  ;;  %v4504_v4 = vpop.f32.mrb[244].mxu1  ;;  %v2930_v37 = vadd.f32 %v10425_v26, %v2888_v62  ;;  %v11622_v33 = vld [vmem:[#allocation11_spill] sm:$0xff] }
 0x7e9   : > { %v4682_v54 = vadd.f32 %v6240_v35, %v4504_v4  ;;  %v4506_v27 = vpop.f32.mrb[245].mxu1  ;;  %v4826_v22 = vpack.c.bf16 %v4805_v10, %v4804_v59  ;;  %v4182_v35 = vpop.xlane.xlu1 %4181  ;;  %v2931_v63 = vadd.f32 %v10425_v26, %v2889_v9  ;;  %v5202_v9 = vadd.s32 8, %v11622_v33 }
 0x7ea   : > { %v4507_v21 = vpop.f32.mrb[246].mxu1  ;;  %6973 = vrcp.f32 %v4182_v35  ;;  %v6396_v35 = vld [vmem:[%s10849_s7 + $0x98] ss:$12 sps:$4 sm:$0xff]  }
 0x7eb   : > { %v4770_v53 = vmul.f32 %v6958_v50, %v4682_v54  ;;  %v4685_v44 = vadd.f32 %v6241_v51, %v4507_v21  ;;  %v4509_v1 = vpop.f32.mrb[247].mxu1  ;;  %5931 = vmatprep.subr.bf16.mxu0 %v4826_v22  ;;  %6975 = vrcp.f32 %v4187_v19  ;;  %v6373_v22 = vld [vmem:[%s10849_s7 + $0x20] ss:$12 sps:$4 sm:$0xff]   ;;  %v6377_v50 = vld [vmem:[%s10849_s7 + $0x30] ss:$12 sps:$4 sm:$0xff]  }
 0x7ec   : > { %5932 = vmatpush3.bf16.msra.mxu0 %v4818_v60  ;;  %v6968_v60 = vpop.eup %6967  ;;  %v6380_v21 = vld [vmem:[%s10849_s7 + $0x38] ss:$12 sps:$4 sm:$0xff]   ;;  %v6389_v1 = vld [vmem:[%s10849_s7 + $0x80] ss:$12 sps:$4 sm:$0xff]   ;;  %v6398_v19 = vld [vmem:[%s10849_s7 + $0xa8] ss:$12 sps:$4 sm:$0xff]  }
 0x7ed   : > { %v4806_v34 = vadd.f32 %v4770_v53, %v2928_v29  ;;  %v4771_v56 = vmul.f32 %v6960_v12, %v4685_v44  ;;  %v6970_v52 = vpop.eup %6969  ;;  %v2890_v16 = vmul.f32 %v6968_v60, %v11620_v49  ;;  %v6381_v12 = vld [vmem:[%s10849_s7 + $0x50] ss:$12 sps:$4 sm:$0xff]   ;;  %v6388_v53 = vld [vmem:[%s10849_s7 + $0x68] ss:$12 sps:$4 sm:$0xff]   ;;  %v6385_v44 = vld [vmem:[%s10849_s7 + $0x60] ss:$12 sps:$4 sm:$0xff]  }
 0x7ee   : > { %v6972_v11 = vpop.eup %6971  ;;  %v6387_v29 = vld [vmem:[%s10849_s7 + $0x64] ss:$12 sps:$4 sm:$0xff]  }
 0x7ef   : > { %v4807_v61 = vadd.f32 %v4771_v56, %v2929_v18  ;;  %v2891_v36 = vmul.f32 %v6972_v11, %v11621_v28  ;;  %v6395_v18 = vld [vmem:[%s10849_s7 + $0x94] ss:$12 sps:$4 sm:$0xff]   ;;  %v6393_v56 = vld [vmem:[%s10849_s7 + $0x90] ss:$12 sps:$4 sm:$0xff]   ;;  %v5205_v11 = vadd.s32 32, %v11622_v33 }
 0x7f0   : > { %v4512_v51 = vpop.f32.mrb[248].mxu1 }
 0x7f1   : > { %v4690_v25 = vadd.f32 %v4689_v32, %v4512_v51  ;;  %v4514_v2 = vpop.f32.mrb[249].mxu1  ;;  %v4827_v14 = vpack.c.bf16 %v4807_v61, %v4806_v34  ;;  %v2932_v32 = vadd.f32 %v10425_v26, %v2890_v16  ;;  %v2933_v4 = vadd.f32 %v10425_v26, %v2891_v36  ;;  %v6384_v26 = vld [vmem:[%s10849_s7 + $0x4c] ss:$12 sps:$4 sm:$0xff]  }
 0x7f2   : > { %v4515_v41 = vpop.f32.mrb[250].mxu1  ;;  %v6390_v34 = vld [vmem:[%s10849_s7 + $0x78] ss:$12 sps:$4 sm:$0xff]   ;;  %v7012_v36 = vmov 0.0  }
 0x7f3   : > { %v4772_v58 = vmul.f32 %v6966_v13, %v4690_v25  ;;  %v4693_v24 = vadd.f32 %v4692_v15, %v4515_v41  ;;  %v4517_v46 = vpop.f32.mrb[251].mxu1  ;;  %5933 = vmatprep.subr.bf16.mxu0 %v4827_v14  ;;  %v5204_v13 = vadd.s32 24, %v11622_v33  ;;  %v5203_v41 = vadd.s32 16, %v11622_v33 }
 0x7f4   : > { %5934 = vmatpush3.bf16.msra.mxu0 %v4819_v38  ;;  %v6974_v8 = vpop.eup %6973 }
 0x7f5   : > { %v4808_v17 = vadd.f32 %v4772_v58, %v2930_v37  ;;  %v4773_v31 = vmul.f32 %v6970_v52, %v4693_v24  ;;  %v6976_v10 = vpop.eup %6975  ;;  %v11623_v37 = vlaneseq  ;;  %v5219_v24 = vand.u32 15, %v11622_v33 }
 0x7f6   : > { %v5220_v52 = vand.u32 15, %v5202_v9 }
 0x7f7   : > { %v4809_v23 = vadd.f32 %v4773_v31, %v2931_v63  ;;  %5039 = vmatmul.mubr.bf16.vlgmr.msra.gmra.mrb[248].mxu0 %v6369_v20  ;;  %v10728_v58 = vand.u32 127, %v11623_v37  ;;  %v5222_v63 = vand.u32 15, %v5204_v13  ;;  %v5221_v31 = vand.u32 15, %v5203_v41 }
 0x7f8   : > { %v4520_v5 = vpop.f32.mrb[252].mxu1  ;;  %5046 = vmatprep.mubr.bf16.mxu0 %v6374_v39 }
 0x7f9   : > { %v4698_v48 = vadd.f32 %v10622_v55, %v4520_v5  ;;  %v4522_v7 = vpop.f32.mrb[253].mxu1  ;;  %v4828_v38 = vpack.c.bf16 %v4809_v23, %v4808_v17  ;;  %v6379_v55 = vld [vmem:[%s10849_s7 + $0x34] ss:$12 sps:$4 sm:$0xff]   ;;  %vm5235_vm7 = vcmp.eq.s32.totalorder %v5219_v24, %v10728_v58  ;;  %vm5236_vm8 = vcmp.eq.s32.totalorder %v5220_v52, %v10728_v58 }
 0x7fa   : > { %v4523_v59 = vpop.f32.mrb[254].mxu1  ;;  %v5206_v23 = vadd.s32 40, %v11622_v33  ;;  %vm10736_vm9 = vcmp.eq.s32.totalorder %v5222_v63, %v10728_v58  ;;  %vm10741_vm10 = vcmp.eq.s32.totalorder %v5221_v31, %v10728_v58  ;;  %v5207_v7 = vadd.s32 48, %v11622_v33 }
 0x7fb   : > { %v4774_v43 = vmul.f32 %v6974_v8, %v4698_v48  ;;  %v4701_v3 = vadd.f32 %v10629_v47, %v4523_v59  ;;  %v4525_v0 = vpop.f32.mrb[255].mxu1  ;;  %6246 = vmatprep.subr.bf16.mxu1 %v4828_v38 }
 0x7fc   : > { %6247 = vmatpush3.bf16.msra.mxu1 %v4828_v38  ;;  %v5676_v38 = vsel %vm5235_vm7, 1.0, %v7012_v36  ;;  %v5677_v0 = vsel %vm5236_vm8, 1.0, %v7012_v36  ;;  %vm7014_vm8 = vmmov 0  }
 0x7fd   : > { %v4810_v15 = vadd.f32 %v4774_v43, %v2932_v32  ;;  %v4775_v54 = vmul.f32 %v6976_v10, %v4701_v3  ;;  %v5223_v32 = vand.u32 15, %v5205_v11 }
 0x7ff   : > { %v4811_v27 = vadd.f32 %v4775_v54, %v2933_v4  ;;  %5047 = vmatmul.mubr.bf16.gmra.mrb[252].mxu0 %v6376_v6  ;;  %vm5239_vm11 = vcmp.eq.s32.totalorder %v5223_v32, %v10728_v58 }
 0x800   : > { %5054 = vmatprep.mubr.bf16.mxu0 %v6379_v55  ;;  %v5208_v55 = vadd.s32 56, %v11622_v33 }
 0x801   : > { %v4829_v47 = vpack.c.bf16 %v4811_v27, %v4810_v15  ;;  %v5679_v27 = vsel %vm10736_vm9, 1.0, %v7012_v36  ;;  %vm5423_vm9 = vcmask 7168  }
 0x803   : > { %6248 = vmatprep.subr.bf16.mxu1 %v4829_v47 }
 0x804   : > { %6249 = vmatpush3.bf16.msra.mxu1 %v4829_v47  ;;  %v5678_v47 = vsel %vm10741_vm10, 1.0, %v7012_v36  ;;  %vm5436_vm10 = vcmp.eq.s32.totalorder %v11622_v33, 0 }
 0x807   : > { %6251 = vmatmul.mubr.msk.bf16.vlgmr.msra.gmra.mrb[0].mxu1 %vm1620_vm6, %v6373_v22  ;;  %5055 = vmatmul.mubr.bf16.gmra.mrb[0].mxu0 %v6377_v50  ;;  %v5224_v22 = vand.u32 15, %v5206_v23 }
 0x808   : > { %6254 = vmatprep.mubr.msk.bf16.mxu1 %vm1620_vm6, %v6380_v21  ;;  %5062 = vmatprep.mubr.bf16.mxu0 %v6384_v26 }
 0x809   : > { %vm10760_vm12 = vcmp.eq.s32.totalorder %v5224_v22, %v10728_v58 }
 0x80a   : > { %v5681_v41 = vsel %vm10760_vm12, 1.0, %v7012_v36 }
 0x80f   : > { %6255 = vmatmul.mubr.msk.bf16.gmra.mrb[4].mxu1 %vm1620_vm6, %v6381_v12  ;;  %5063 = vmatmul.mubr.bf16.gmra.mrb[4].mxu0 %v6382_v42  ;;  %v5225_v12 = vand.u32 15, %v5207_v7 }
 0x810   : > { %5070 = vmatprep.mubr.bf16.mxu0 %v6387_v29  ;;  %6258 = vmatprep.mubr.msk.bf16.mxu1 %vm1620_vm6, %v6388_v53 }
 0x811   : > { %vm10765_vm13 = vcmp.eq.s32.totalorder %v5225_v12, %v10728_v58 }
 0x812   : > { %v5682_v24 = vsel %vm10765_vm13, 1.0, %v7012_v36 }
 0x817   : > { %5071 = vmatmul.mubr.bf16.gmra.mrb[8].mxu0 %v6385_v44  ;;  %6259 = vmatmul.mubr.msk.bf16.gmra.mrb[8].mxu1 %vm1620_vm6, %v6389_v1  ;;  %v5226_v44 = vand.u32 15, %v5208_v55 }
 0x818   : > { %5078 = vmatprep.mubr.bf16.mxu0 %v6392_v45  ;;  %6262 = vmatprep.mubr.msk.bf16.mxu1 %vm1620_vm6, %v6396_v35  ;;  %v5209_v45 = vadd.s32 64, %v11622_v33 }
 0x819   : > { %vm5242_vm14 = vcmp.eq.s32.totalorder %v5226_v44, %v10728_v58  ;;  %v7013_v44 = vmov 0.0|0.0  }
 0x81a   : > { %v5227_v37 = vand.u32 15, %v5209_v45  ;;  %6301 = vmatprep.subr.bf16.mxu1 %v7013_v44 }
 0x81c   : > { %vm5243_vm15 = vcmp.eq.s32.totalorder %v5227_v37, %v10728_v58  ;;  %v5215_v37 = vadd.s32 112, %v11622_v33 }
 0x81f   : > { %5079 = vmatmul.mubr.bf16.gmra.mrb[12].mxu0 %v6390_v34  ;;  %6263 = vmatmul.mubr.msk.bf16.gmra.mrb[12].mxu1 %vm1620_vm6, %v6397_v57 }
 0x820   : > { %5086 = vmatprep.mubr.bf16.mxu0 %v6395_v18  ;;  %6298 = vmatprep.mubr.msk.f32.mxu1 %vm7014_vm8, %v7012_v36 }
 0x827   : > { %5087 = vmatmul.mubr.bf16.gmra.mrb[16].mxu0 %v6393_v56  ;;  %v5214_v56 = vadd.s32 104, %v11622_v33 }
 0x828   : > { %5094 = vmatprep.mubr.bf16.mxu0 %v6400_v30 }
 0x82f   : > { %5095 = vmatmul.mubr.bf16.gmra.mrb[20].mxu0 %v6398_v19  ;;  %v5680_v19 = vsel %vm5239_vm11, 1.0, %v7012_v36  ;;  %vm5441_vm11 = vcmask 0  }
 0x8ca   : > { %v5935_v61 = vpop.f32.mrb[248].mxu0 }
 0x8cb   : > { %v5936_v40 = vpop.f32.mrb[249].mxu0 }
 0x8cc   : > { %v5937_v62 = vadd.f32 %v5936_v40, %v5935_v61  ;;  %v5938_v51 = vpop.f32.mrb[250].mxu0  ;;  %v5210_v40 = vadd.s32 72, %v11622_v33 }
 0x8cd   : > { %v5939_v25 = vpop.f32.mrb[251].mxu0 }
 0x8ce   : > { %v5940_v2 = vadd.f32 %v5939_v25, %v5938_v51  ;;  %v5228_v63 = vand.u32 15, %v5210_v40 }
 0x8d0   : > { %vm5244_vm0 = vcmp.eq.s32.totalorder %v5228_v63, %v10728_v58 }
 0x8d2   : > { %v5941_v14 = vpop.f32.mrb[252].mxu0 }
 0x8d3   : > { %v5942_v60 = vpop.f32.mrb[253].mxu0 }
 0x8d4   : > { %v5943_v46 = vadd.f32 %v5942_v60, %v5941_v14  ;;  %v5944_v20 = vpop.f32.mrb[254].mxu0 }
 0x8d5   : > { %v5945_v39 = vpop.f32.mrb[255].mxu0 }
 0x8d6   : > { %v5946_v17 = vadd.f32 %v5945_v39, %v5944_v20 }
 0x8da   : > { %v6252_v49 = vpop.f32.mrb[0].mxu1  ;;  %v5947_v16 = vpop.f32.mrb[0].mxu0 }
 0x8db   : > { %v5137_v28 = vpop.f32.mrb[1].mxu1  ;;  %v5146_v8 = vadd.f32 %v6252_v49, %v5943_v46  ;;  %v5948_v59 = vpop.f32.mrb[1].mxu0 }
 0x8dc   : > { %v5138_v43 = vadd.f32 %v5937_v62, %v5137_v28  ;;  %v6253_v3 = vpop.f32.mrb[2].mxu1  ;;  %v5949_v6 = vadd.f32 %v5948_v59, %v5947_v16  ;;  %v5950_v10 = vpop.f32.mrb[2].mxu0  ;;  %v5211_v28 = vadd.s32 80, %v11622_v33 }
 0x8dd   : > { %v5140_v15 = vpop.f32.mrb[3].mxu1  ;;  %v5149_v4 = vadd.f32 %v6253_v3, %v5946_v17  ;;  %v5951_v54 = vpop.f32.mrb[3].mxu0  ;;  %v5285_v53 = vmul.f32 %v5678_v47, %v5146_v8  ;;  %v5683_v17 = vsel %vm5242_vm14, 1.0, %v7012_v36  ;;  %v5685_v47 = vsel %vm5244_vm0, 1.0, %v7012_v36 }
 0x8de   : > { %v5283_v50 = vmul.f32 %v5676_v38, %v5138_v43  ;;  %v5141_v21 = vadd.f32 %v5940_v2, %v5140_v15  ;;  %v5952_v26 = vadd.f32 %v5951_v54, %v5950_v10  ;;  %v5684_v10 = vsel %vm5243_vm15, 1.0, %v7012_v36 }
 0x8df   : > { %v5286_v1 = vmul.f32 %v5679_v27, %v5149_v4  ;;  %v5305_v51 = vsel %vm758_vm3, %v5285_v53, 0.0  ;;  %v5229_v27 = vand.u32 15, %v5211_v28  ;;  %v5213_v53 = vadd.s32 96, %v11622_v33 }
 0x8e0   : > { %v5284_v42 = vmul.f32 %v5677_v0, %v5141_v21  ;;  %v5299_v29 = vsel %vm758_vm3, %v5283_v50, 0.0  ;;  %v5212_v0 = vadd.s32 88, %v11622_v33 }
 0x8e1   : > { %5300 = vadd.xlane.f32.xlu1 %v5299_v29  ;;  %v5308_v14 = vsel %vm758_vm3, %v5286_v1, 0.0  ;;  %vm5245_vm1 = vcmp.eq.s32.totalorder %v5229_v27, %v10728_v58 }
 0x8e2   : > { %v5302_v35 = vsel %vm758_vm3, %v5284_v42, 0.0  ;;  %v6256_v34 = vpop.f32.mrb[4].mxu1  ;;  %v5953_v18 = vpop.f32.mrb[4].mxu0  ;;  %v5230_v21 = vand.u32 15, %v5212_v0 }
 0x8e3   : > { %5303 = vadd.xlane.f32.xlu0 %v5302_v35  ;;  %v5153_v30 = vpop.f32.mrb[5].mxu1  ;;  %v5954_v61 = vpop.f32.mrb[5].mxu0 }
 0x8e4   : > { %v5154_v62 = vadd.f32 %v5949_v6, %v5153_v30  ;;  %v6257_v25 = vpop.f32.mrb[6].mxu1  ;;  %v5955_v2 = vadd.f32 %v5954_v61, %v5953_v18  ;;  %v5956_v9 = vpop.f32.mrb[6].mxu0  ;;  %vm5246_vm2 = vcmp.eq.s32.totalorder %v5230_v21, %v10728_v58 }
 0x8e5   : > { %5306 = vadd.xlane.f32.xlu1 %v5305_v51  ;;  %v5156_v13 = vpop.f32.mrb[7].mxu1  ;;  %v5957_v60 = vpop.f32.mrb[7].mxu0  ;;  %v5231_v51 = vand.u32 15, %v5213_v53 }
 0x8e6   : > { %v5287_v46 = vmul.f32 %v5680_v19, %v5154_v62  ;;  %v5157_v20 = vadd.f32 %v5952_v26, %v5156_v13  ;;  %v5162_v52 = vadd.f32 %v6256_v34, %v5955_v2  ;;  %v5958_v39 = vadd.f32 %v5957_v60, %v5956_v9 }
 0x8e7   : > { %5309 = vadd.xlane.f32.xlu0 %v5308_v14  ;;  %v5686_v19 = vsel %vm5245_vm1, 1.0, %v7012_v36  ;;  %v5232_v14 = vand.u32 15, %v5214_v56  ;;  %vm5247_vm4 = vcmp.eq.s32.totalorder %v5231_v51, %v10728_v58 }
 0x8e8   : > { %v5288_v31 = vmul.f32 %v5681_v41, %v5157_v20  ;;  %v5165_v11 = vadd.f32 %v6257_v25, %v5958_v39  ;;  %v5311_v23 = vsel %vm758_vm3, %v5287_v46, 0.0  ;;  %v5289_v49 = vmul.f32 %v5682_v24, %v5162_v52 }
 0x8e9   : > { %5312 = vadd.xlane.f32.xlu1 %v5311_v23  ;;  %v5687_v25 = vsel %vm5246_vm2, 1.0, %v7012_v36  ;;  %vm5248_vm5 = vcmp.eq.s32.totalorder %v5232_v14, %v10728_v58  ;;  %v5216_v39 = vadd.s32 120, %v11622_v33  ;;  %v5688_v63 = vsel %vm5247_vm4, 1.0, %v7012_v36 }
 0x8ea   : > { %v5314_v16 = vsel %vm758_vm3, %v5288_v31, 0.0  ;;  %v5959_v5 = vpop.f32.mrb[8].mxu0  ;;  %v6260_v48 = vpop.f32.mrb[8].mxu1  ;;  %v5290_v7 = vmul.f32 %v5683_v17, %v5165_v11  ;;  %v5317_v43 = vsel %vm758_vm3, %v5289_v49, 0.0  ;;  %v5233_v23 = vand.u32 15, %v5215_v37 }
 0x8eb   : > { %5315 = vadd.xlane.f32.xlu0 %v5314_v16  ;;  %v5960_v38 = vpop.f32.mrb[9].mxu0  ;;  %v5169_v8 = vpop.f32.mrb[9].mxu1  ;;  %v5689_v49 = vsel %vm5248_vm5, 1.0, %v7012_v36 }
 0x8ec   : > { %v5961_v59 = vadd.f32 %v5960_v38, %v5959_v5  ;;  %v5962_v32 = vpop.f32.mrb[10].mxu0  ;;  %v6261_v3 = vpop.f32.mrb[10].mxu1  ;;  %v5320_v54 = vsel %vm758_vm3, %v5290_v7, 0.0  ;;  %vm5249_vm6 = vcmp.eq.s32.totalorder %v5233_v23, %v10728_v58 }
 0x8ed   : > { %v5963_v6 = vpop.f32.mrb[11].mxu0  ;;  %5318 = vadd.xlane.f32.xlu1 %v5317_v43  ;;  %v5172_v55 = vpop.f32.mrb[11].mxu1  ;;  %v5690_v0 = vsel %vm5249_vm6, 1.0, %v7012_v36 }
 0x8ee   : > { %v5964_v15 = vadd.f32 %v5963_v6, %v5962_v32  ;;  %v5170_v4 = vadd.f32 %v5961_v59, %v5169_v8 }
 0x8ef   : > { %5321 = vadd.xlane.f32.xlu0 %v5320_v54 }
 0x8f0   : > { %v5291_v22 = vmul.f32 %v5684_v10, %v5170_v4  ;;  %v5173_v50 = vadd.f32 %v5964_v15, %v5172_v55 }
 0x8f2   : > { %v5292_v26 = vmul.f32 %v5685_v47, %v5173_v50  ;;  %v5965_v12 = vpop.f32.mrb[12].mxu0  ;;  %v5323_v42 = vsel %vm758_vm3, %v5291_v22, 0.0  ;;  %v6264_v29 = vpop.f32.mrb[12].mxu1 }
 0x8f3   : > { %v5966_v1 = vpop.f32.mrb[13].mxu0  ;;  %5324 = vadd.xlane.f32.xlu1 %v5323_v42  ;;  %v5185_v45 = vpop.f32.mrb[13].mxu1 }
 0x8f4   : > { %v5967_v35 = vadd.f32 %v5966_v1, %v5965_v12  ;;  %v5968_v34 = vpop.f32.mrb[14].mxu0  ;;  %v5326_v57 = vsel %vm758_vm3, %v5292_v26, 0.0  ;;  %v6265_v18 = vpop.f32.mrb[14].mxu1 }
 0x8f5   : > { %v5969_v30 = vpop.f32.mrb[15].mxu0  ;;  %5327 = vadd.xlane.f32.xlu0 %v5326_v57  ;;  %v5188_v61 = vpop.f32.mrb[15].mxu1 }
 0x8f6   : > { %v5178_v40 = vadd.f32 %v6260_v48, %v5967_v35  ;;  %v5970_v62 = vadd.f32 %v5969_v30, %v5968_v34  ;;  %v5234_v48 = vand.u32 15, %v5216_v39 }
 0x8f8   : > { %v5181_v2 = vadd.f32 %v6261_v3, %v5970_v62  ;;  %v5293_v9 = vmul.f32 %v5686_v19, %v5178_v40  ;;  %vm5250_vm7 = vcmp.eq.s32.totalorder %v5234_v48, %v10728_v58 }
 0x8f9   : > { %v5691_v55 = vsel %vm5250_vm7, 1.0, %v7012_v36 }
 0x8fa   : > { %v5971_v13 = vpop.f32.mrb[16].mxu0  ;;  %v5294_v41 = vmul.f32 %v5687_v25, %v5181_v2  ;;  %v5329_v60 = vsel %vm758_vm3, %v5293_v9, 0.0  ;;  %v5347_v25 = vshra.s32 %v10728_v58, 4  ;;  %v1030_v58 = vld [vmem:[%s10851_s9] sm:$0xff] }
 0x8fb   : > { %v5972_v24 = vpop.f32.mrb[17].mxu0  ;;  %5330 = vadd.xlane.f32.xlu1 %v5329_v60 }
 0x8fc   : > { %v5973_v46 = vadd.f32 %v5972_v24, %v5971_v13  ;;  %v5974_v20 = vpop.f32.mrb[18].mxu0  ;;  %v5332_v52 = vsel %vm758_vm3, %v5294_v41, 0.0  ;;  %v7015_v13 = vmov 1.0   ;;  %v1029_v41 = vld [vmem:[%s10850_s8] sm:$0xff] }
 0x8fd   : > { %v5975_v17 = vpop.f32.mrb[19].mxu0  ;;  %5333 = vadd.xlane.f32.xlu0 %v5332_v52 }
 0x8fe   : > { %v5976_v31 = vadd.f32 %v5975_v17, %v5974_v20  ;;  %v5186_v11 = vadd.f32 %v5973_v46, %v5185_v45 }
 0x900   : > { %v5295_v16 = vmul.f32 %v5688_v63, %v5186_v11  ;;  %v5189_v5 = vadd.f32 %v5976_v31, %v5188_v61 }
 0x902   : > { %v5977_v7 = vpop.f32.mrb[20].mxu0  ;;  %v5296_v28 = vmul.f32 %v5689_v49, %v5189_v5  ;;  %v5335_v38 = vsel %vm758_vm3, %v5295_v16, 0.0  ;;  %v1031_v49 = vld [vmem:[#allocation3] sm:$0x1]  ;;  %v5694_v5 = vsel %vm5436_vm10, 1.0, %v7012_v36 }
 0x903   : > { %v5978_v8 = vpop.f32.mrb[21].mxu0  ;;  %5336 = vadd.xlane.f32.xlu1 %v5335_v38 }
 0x904   : > { %v5979_v59 = vadd.f32 %v5978_v8, %v5977_v7  ;;  %v5980_v32 = vpop.f32.mrb[22].mxu0  ;;  %v5338_v43 = vsel %vm758_vm3, %v5296_v28, 0.0 }
 0x905   : > { %v5981_v3 = vpop.f32.mrb[23].mxu0  ;;  %5339 = vadd.xlane.f32.xlu0 %v5338_v43 }
 0x906   : > { %v5194_v6 = vadd.f32 %v6264_v29, %v5979_v59  ;;  %v5982_v10 = vadd.f32 %v5981_v3, %v5980_v32 }
 0x908   : > { %v5197_v15 = vadd.f32 %v6265_v18, %v5982_v10  ;;  %v5297_v4 = vmul.f32 %v5690_v0, %v5194_v6 }
 0x90a   : > { %v5298_v54 = vmul.f32 %v5691_v55, %v5197_v15  ;;  %v5341_v27 = vsel %vm758_vm3, %v5297_v4, 0.0 }
 0x90b   : > { %5342 = vadd.xlane.f32.xlu1 %v5341_v27 }
 0x90c   : > { %v5344_v47 = vsel %vm758_vm3, %v5298_v54, 0.0  ;;  %vm5348_vm3 = vcmp.eq.s32.totalorder %v11622_v33, %v5347_v25 }
 0x90d   : > { %5345 = vadd.xlane.f32.xlu0 %v5344_v47 }
 0x96e   : > { %v5301_v22 = vpop.xlane.xlu1 %5300 }
 0x970   : > { %v5304_v50 = vpop.xlane.xlu0 %5303 }
 0x971   : > { %v6302_v21 = vpack.c.bf16 %v5304_v50, %v5301_v22 }
 0x972   : > { %v5307_v26 = vpop.xlane.xlu1 %5306 }
 0x973   : > { %6303 = vmatpush3.bf16.msra.mxu1 %v6302_v21 }
 0x974   : > { %v5310_v12 = vpop.xlane.xlu0 %5309  ;;  %6304 = vmatprep.subr.bf16.mxu1 %v7013_v44 }
 0x975   : > { %v6305_v42 = vpack.c.bf16 %v5310_v12, %v5307_v26 }
 0x976   : > { %v5313_v29 = vpop.xlane.xlu1 %5312 }
 0x977   : > { %6306 = vmatpush3.bf16.msra.mxu1 %v6305_v42 }
 0x978   : > { %v5316_v53 = vpop.xlane.xlu0 %5315  ;;  %6307 = vmatprep.subr.bf16.mxu1 %v7013_v44 }
 0x979   : > { %v6308_v1 = vpack.c.bf16 %v5316_v53, %v5313_v29 }
 0x97a   : > { %v5319_v35 = vpop.xlane.xlu1 %5318 }
 0x97b   : > { %6309 = vmatpush3.bf16.msra.mxu1 %v6308_v1 }
 0x97c   : > { %v5322_v45 = vpop.xlane.xlu0 %5321  ;;  %6310 = vmatprep.subr.bf16.mxu1 %v7013_v44 }
 0x97d   : > { %v6311_v34 = vpack.c.bf16 %v5322_v45, %v5319_v35 }
 0x97f   : > { %6312 = vmatpush3.bf16.msra.mxu1 %v6311_v34 }
 0x980   : > { %6313 = vmatprep.subr.bf16.mxu1 %v7013_v44  ;;  %v5325_v18 = vpop.xlane.xlu1 %5324 }
 0x982   : > { %v5328_v57 = vpop.xlane.xlu0 %5327 }
 0x983   : > { %v6314_v56 = vpack.c.bf16 %v5328_v57, %v5325_v18 }
 0x985   : > { %6315 = vmatpush3.bf16.msra.mxu1 %v6314_v56 }
 0x986   : > { %6316 = vmatprep.subr.bf16.mxu1 %v7013_v44 }
 0x988   : > { %v5331_v19 = vpop.xlane.xlu1 %5330 }
 0x98a   : > { %v5334_v30 = vpop.xlane.xlu0 %5333 }
 0x98b   : > { %v6317_v61 = vpack.c.bf16 %v5334_v30, %v5331_v19 }
 0x98d   : > { %6318 = vmatpush3.bf16.msra.mxu1 %v6317_v61 }
 0x98e   : > { %6319 = vmatprep.subr.bf16.mxu1 %v7013_v44 }
 0x990   : > { %v5337_v62 = vpop.xlane.xlu1 %5336 }
 0x992   : > { %v5340_v40 = vpop.xlane.xlu0 %5339 }
 0x993   : > { %v6320_v51 = vpack.c.bf16 %v5340_v40, %v5337_v62 }
 0x995   : > { %6321 = vmatpush3.bf16.msra.mxu1 %v6320_v51 }
 0x996   : > { %6322 = vmatprep.subr.bf16.mxu1 %v7013_v44 }
 0x998   : > { %v5343_v9 = vpop.xlane.xlu1 %5342 }
 0x99a   : > { %v5346_v2 = vpop.xlane.xlu0 %5345 }
 0x99b   : > { %v6323_v14 = vpack.c.bf16 %v5346_v2, %v5343_v9 }
 0x99d   : > { %6324 = vmatpush3.bf16.msra.mxu1 %v6323_v14 }
 0x9a0   : > { %6299 = vmatmul.mubr.msk.f32.vlgmr.msra.gmra.mrb[16].mxu1 %vm5348_vm3, %v7015_v13 }
 0xa73   : > { %v5417_v60 = vpop.f32.mrb[16].mxu1 }
 0xa74   : > { %v5418_v37 = vadd.f32 %v5417_v60, %v1029_v41  ;;  %v6300_v24 = vpop.f32.mrb[17].mxu1 }
 0xa76   : > { %v5421_v44 = vmax.f32 %v5418_v37, 0.0 }
 0xa78   : > { %v5422_v46 = vmul.f32 %v5421_v44, %v1030_v58 }
 0xa7a   : > { %v5424_v20 = vsel %vm5423_vm9, %v5422_v46, 0.0 }
 0xa7b   : > { %5425 = vadd.xlane.f32.xlu1 %v5424_v20 }
 0xb08   : > { %v5426_v52 = vpop.xlane.xlu1 %5425 }
 0xb09   : > { %v5427_v39 = vrot.slane %v5426_v52, 4 }
 0xb0b   : > { %v5428_v17 = vadd.f32 %v5427_v39, %v5426_v52 }
 0xb0d   : > { %v5429_v63 = vrot.slane %v5428_v17, 2 }
 0xb0f   : > { %v5430_v31 = vadd.f32 %v5429_v63, %v5428_v17 }
 0xb11   : > { %v5431_v11 = vrot.slane %v5430_v31, 1 }
 0xb13   : > { %v5432_v23 = vadd.f32 %v5431_v11, %v5430_v31 }
 0xb15   : > { %6347 = vpush %v5432_v23 }
 0xb46   : > { %s6348_s10 = spop %6347 }
 0xb47   : > { %v5434_v16 = vstv %s6348_s10 }
 0xb48   : > { %v5435_v48 = vadd.f32 %v5434_v16, %v1031_v49 }
 0xb4a   : > { %v5439_v7 = vmul.f32 %v5694_v5, %v5435_v48 }
 0xb4c   : > { %5442 = vst.msk [vmem:[%s386_s25] sm:$0x1] %vm5441_vm11, %v5439_v7 }
 0xb4d PF: > { %s23_s19 = sadd.s32 1, %s7003_s19  }
 0xb4e   : > { %p20_p5 = scmp.ge.s32.totalorder %s23_s19, 4  }
 0xb50   :  { %22 = sbr.rel (!%p20_p5) target bundleno = 3 (0x3), region = 94 }

</bundles_post_ra>
